<compile_context>
chip_gen: v7x
topology: tpu7x:2x2x1
jax: 0.10.0
libtpu: 0.0.40
codegen_flags: <defaults>
</compile_context>

<pallas_src>
import functools

import jax
import jax.numpy as jnp
from jax import lax
from jax.experimental import pallas as pl
from jax.experimental.pallas import tpu as pltpu


def _convt_parity_kernel(x_ref, w_ref, scale_ref, shift_ref, o_ref, *, act):
    # x_ref:     (4, 4*Cin, tm)   bf16 -- per-parity K-concatenated, transposed input
    # w_ref:     (4, Cout, 4*Cin) bf16 -- per-parity packed, transposed weights
    # scale_ref: (Cout, 1)        f32  -- folded BatchNorm(eval) scale
    # shift_ref: (Cout, 1)        f32  -- folded conv bias + BatchNorm shift
    # o_ref:     (2, 2, Cout, tm)      -- the 4 output parities (r, s), channel-major
    for p in range(4):
        # Single bf16 MXU dot per parity, f32 accumulation.
        z = jnp.dot(w_ref[p], x_ref[p], preferred_element_type=jnp.float32)  # (Cout, tm)
        z = z * scale_ref[...] + shift_ref[...]
        if act == "relu":
            z = jnp.maximum(z, 0.0)
        else:  # "tanh"
            z = jnp.tanh(z)
        o_ref[p // 2, p % 2] = z.astype(o_ref.dtype)


def _pick_tile(M):
    """Tile of the flattened N*H*W axis (the output lane axis)."""
    if M >= 2048:
        for cand in (1024, 512, 256, 128):
            if M % cand == 0:
                return cand
    if M >= 512 and M % 2 == 0 and (M // 2) % 128 == 0:
        return M // 2           # keep >= 2 grid steps for v7x megacore
    # TODO(synk): fallback puts the whole axis in one block; fine at these shapes,
    # would need revisiting for much larger N/H/W on v7x's 64 MiB VMEM.
    return M


def convt2x_layer(x_nchw, w_par, scale, shift, act, out_dtype):
    """One ConvTranspose2d(k=4,s=2,p=1) + folded BN/bias + activation. NCHW in/out."""
    N, Cin, H, W = x_nchw.shape
    Cout = w_par.shape[1]
    K4 = 4 * Cin
    M = N * H * W

    # Glue: zero-pad once, build the 4 per-parity K-concatenated transposed slabs.
    x_pad = jnp.pad(x_nchw, ((0, 0), (0, 0), (1, 1), (1, 1)))       # (N, Cin, H+2, W+2)
    xT = jnp.transpose(x_pad, (1, 0, 2, 3))                         # (Cin, N, H+2, W+2)

    def slab(oi, oj):
        return xT[:, :, oi:oi + H, oj:oj + W].reshape(Cin, M)       # (Cin, M)

    parities = []
    for r in (0, 1):
        for s in (0, 1):
            parities.append(jnp.concatenate(
                [slab(r + di, s + dj) for di in (0, 1) for dj in (0, 1)], axis=0))
    xp = jnp.stack(parities, axis=0)                                # (4, 4*Cin, M) bf16

    tm = _pick_tile(M)
    grid = M // tm

    kernel = functools.partial(_convt_parity_kernel, act=act)
    y_flat = pl.pallas_call(
        kernel,
        out_shape=jax.ShapeDtypeStruct((2, 2, Cout, M), out_dtype),
        grid_spec=pltpu.PrefetchScalarGridSpec(
            num_scalar_prefetch=0,
            grid=(grid,),
            in_specs=[
                pl.BlockSpec((4, K4, tm), lambda i: (0, 0, i)),
                pl.BlockSpec((4, Cout, K4), lambda i: (0, 0, 0)),
                pl.BlockSpec((Cout, 1), lambda i: (0, 0)),
                pl.BlockSpec((Cout, 1), lambda i: (0, 0)),
            ],
            out_specs=pl.BlockSpec((2, 2, Cout, tm), lambda i: (0, 0, 0, i)),
        ),
        compiler_params=pltpu.CompilerParams(
            dimension_semantics=("parallel",),
            vmem_limit_bytes=48 * 1024 * 1024,
        ),
    )(xp, w_par, scale.reshape(Cout, 1), shift.reshape(Cout, 1))

    # Reassemble parities directly into NCHW: y[n, c, 2i+r, 2j+s] = y_flat[r, s, c, m]
    y = y_flat.reshape(2, 2, Cout, N, H, W)
    y = jnp.transpose(y, (3, 2, 4, 0, 5, 1)).reshape(N, Cout, 2 * H, 2 * W)
    return y


def init_decoder_params(key, dim=32, attribut=2):
    chans = [dim + 2 * attribut, 512 + 2 * attribut, 256 + 2 * attribut,
             128 + 2 * attribut, 64 + 2 * attribut, 32 + 2 * attribut,
             16 + 2 * attribut, 3]
    eps = 1e-5
    params = []
    for i in range(7):
        cin, cout = chans[i], chans[i + 1]
        key, kw, kb, kg, kbe, km, kv = jax.random.split(key, 7)
        # PyTorch ConvTranspose2d weight layout: (Cin, Cout, kh, kw)
        w = jax.random.normal(kw, (cin, cout, 4, 4), jnp.float32) * jnp.sqrt(2.0 / (cin * 16.0))
        b = 0.01 * jax.random.normal(kb, (cout,), jnp.float32)
        if i < 6:
            gamma = 1.0 + 0.1 * jax.random.normal(kg, (cout,), jnp.float32)
            beta = 0.01 * jax.random.normal(kbe, (cout,), jnp.float32)
            rmean = 0.01 * jax.random.normal(km, (cout,), jnp.float32)
            rvar = 1.0 + 0.1 * jax.random.uniform(kv, (cout,), jnp.float32)
            scale = gamma / jnp.sqrt(rvar + eps)
            shift = beta + scale * (b - rmean)
            act = "relu"
        else:
            scale = jnp.ones((cout,), jnp.float32)
            shift = b
            act = "tanh"
        # Per-parity packed + transposed weights: (4, Cout, 4*Cin), bf16.
        w4 = jnp.transpose(w, (2, 3, 0, 1))            # (kh, kw, Cin, Cout)
        pblocks = []
        for r in (0, 1):
            for s in (0, 1):
                blocks = [w4[3 - 2 * di - r, 3 - 2 * dj - s]
                          for di in (0, 1) for dj in (0, 1)]          # each (Cin, Cout)
                pblocks.append(jnp.concatenate(blocks, axis=0).T)     # (Cout, 4*Cin)
        w_par = jnp.stack(pblocks, axis=0).astype(jnp.bfloat16)       # (4, Cout, 4*Cin)
        params.append(dict(w=w, w_par=w_par, scale=scale, shift=shift, act=act))
    return params


def decoder_forward(params, latent_code, attributes):
    """latent_code: (N, dim, h, w) NCHW; attributes: (N, attribut). Returns NCHW f32."""
    N, _, h, w = latent_code.shape
    onehot = jnp.concatenate([attributes, 1.0 - attributes], axis=1)          # (N, 2a)
    onehot = jnp.broadcast_to(onehot[:, :, None, None], (N, onehot.shape[1], h, w))
    x = jnp.concatenate([latent_code, onehot], axis=1).astype(jnp.bfloat16)   # NCHW bf16
    n_layers = len(params)
    for i, p in enumerate(params):
        out_dtype = jnp.float32 if i == n_layers - 1 else jnp.bfloat16
        x = convt2x_layer(x, p["w_par"], p["scale"], p["shift"], p["act"], out_dtype)
    return x                                                                   # NCHW f32


def decoder_reference(params, latent_code, attributes):
    """Pure-JAX reference (ConvTranspose as lhs-dilated conv with flipped kernel).

    Mirrors the kernel's precision model: activations/weights rounded to bf16 before
    each conv, exact f32 accumulation, f32 scale/shift/activation.
    """
    N, _, h, w = latent_code.shape
    onehot = jnp.concatenate([attributes, 1.0 - attributes], axis=1)
    onehot = jnp.broadcast_to(onehot[:, :, None, None], (N, onehot.shape[1], h, w))
    x = jnp.concatenate([latent_code, onehot], axis=1)
    x = jnp.transpose(x, (0, 2, 3, 1))                                        # NHWC
    for p in params:
        xb = x.astype(jnp.bfloat16).astype(jnp.float32)
        wt = p["w"].astype(jnp.bfloat16).astype(jnp.float32)                  # (Cin,Cout,4,4)
        w_flip = jnp.transpose(wt[:, :, ::-1, ::-1], (2, 3, 0, 1))            # HWIO
        y = lax.conv_general_dilated(
            xb, w_flip, window_strides=(1, 1), padding=((2, 2), (2, 2)),
            lhs_dilation=(2, 2), dimension_numbers=("NHWC", "HWIO", "NHWC"),
            precision=lax.Precision.HIGHEST)
        y = y * p["scale"][None, None, None, :] + p["shift"][None, None, None, :]
        x = jnp.maximum(y, 0.0) if p["act"] == "relu" else jnp.tanh(y)
    return jnp.transpose(x, (0, 3, 1, 2))                                     # NCHW


if __name__ == "__main__":
    key = jax.random.PRNGKey(0)
    dim, attribut = 32, 2
    N, h, w = 2, 1, 1  # latent 1x1 -> 7 doublings -> 128x128 RGB output

    kp, kl, ka = jax.random.split(key, 3)
    params = init_decoder_params(kp, dim=dim, attribut=attribut)
    latent = jax.random.normal(kl, (N, dim, h, w), jnp.float32)
    attrs = jax.random.bernoulli(ka, 0.5, (N, attribut)).astype(jnp.float32)

    out = decoder_forward(params, latent, attrs)
    out = jax.block_until_ready(out)
    assert out.shape == (N, 3, h * 128, w * 128), out.shape

    ref = jax.block_until_ready(decoder_reference(params, latent, attrs))
    max_err = float(jnp.max(jnp.abs(out - ref)))
    # bf16 inputs with f32 accumulation in both paths -> only accumulation-order noise.
    assert max_err < 5e-3, f"max abs err {max_err}"

    print("KERNEL_OK")
</pallas_src>

<mosaic_0001>
module attributes {stable_mosaic.version = 11 : i64} {
  func.func @_convt_parity_kernel(%arg0: i32, %arg1: memref<4x144x2xbf16, #tpu.memory_space<vmem>>, %arg2: memref<4x516x144xbf16, #tpu.memory_space<vmem>>, %arg3: memref<516x1xf32, #tpu.memory_space<vmem>>, %arg4: memref<516x1xf32, #tpu.memory_space<vmem>>, %arg5: memref<2x2x516x2xbf16, #tpu.memory_space<vmem>>) attributes {dimension_semantics = [#tpu.dimension_semantics<parallel>], iteration_bounds = array<i64: 1>, scalar_prefetch = 0 : i64, scratch_operands = 0 : i64, tpu.core_type = #tpu.core_type<tc>, window_params = [{transform_indices = @transform_0, window_bounds = array<i64: 4, 144, 2>}, {pipeline_mode = #tpu.pipeline_mode<synchronous>, transform_indices = @transform_1, window_bounds = array<i64: 4, 516, 144>}, {pipeline_mode = #tpu.pipeline_mode<synchronous>, transform_indices = @transform_2, window_bounds = array<i64: 516, 1>}, {pipeline_mode = #tpu.pipeline_mode<synchronous>, transform_indices = @transform_3, window_bounds = array<i64: 516, 1>}, {transform_indices = @transform_4, window_bounds = array<i64: 2, 2, 516, 2>}]} {
    %c0 = arith.constant 0 : index
    %c0_0 = arith.constant 0 : index
    %c0_1 = arith.constant 0 : index
    %0 = vector.load %arg2[%c0, %c0_0, %c0_1] : memref<4x516x144xbf16, #tpu.memory_space<vmem>>, vector<1x516x144xbf16>
    %1 = vector.shape_cast %0 : vector<1x516x144xbf16> to vector<516x144xbf16>
    %c0_2 = arith.constant 0 : index
    %c0_3 = arith.constant 0 : index
    %c0_4 = arith.constant 0 : index
    %2 = vector.load %arg1[%c0_2, %c0_3, %c0_4] : memref<4x144x2xbf16, #tpu.memory_space<vmem>>, vector<1x144x2xbf16>
    %3 = vector.shape_cast %2 : vector<1x144x2xbf16> to vector<144x2xbf16>
    %cst = arith.constant dense<0.000000e+00> : vector<516x2xf32>
    %4 = tpu.matmul %1, %3, %cst {dimension_numbers = #tpu.dot_dimension_numbers<[1], [0], [0], [1], [0, 0, 1, 1], [], []>} : vector<516x144xbf16>, vector<144x2xbf16>, vector<516x2xf32> -> vector<516x2xf32>
    %c0_5 = arith.constant 0 : index
    %c0_6 = arith.constant 0 : index
    %5 = vector.load %arg3[%c0_5, %c0_6] : memref<516x1xf32, #tpu.memory_space<vmem>>, vector<516x1xf32>
    %6 = vector.broadcast %5 : vector<516x1xf32> to vector<516x2xf32>
    %7 = arith.mulf %4, %6 : vector<516x2xf32>
    %c0_7 = arith.constant 0 : index
    %c0_8 = arith.constant 0 : index
    %8 = vector.load %arg4[%c0_7, %c0_8] : memref<516x1xf32, #tpu.memory_space<vmem>>, vector<516x1xf32>
    %9 = vector.broadcast %8 : vector<516x1xf32> to vector<516x2xf32>
    %10 = arith.addf %7, %9 : vector<516x2xf32>
    %cst_9 = arith.constant 0.000000e+00 : f32
    %11 = vector.broadcast %cst_9 : f32 to vector<516x2xf32>
    %12 = arith.maximumf %10, %11 : vector<516x2xf32>
    %13 = arith.truncf %12 : vector<516x2xf32> to vector<516x2xbf16>
    %c0_10 = arith.constant 0 : index
    %c0_11 = arith.constant 0 : index
    %c0_12 = arith.constant 0 : index
    %c0_13 = arith.constant 0 : index
    %14 = vector.load %arg5[%c0_10, %c0_11, %c0_12, %c0_13] : memref<2x2x516x2xbf16, #tpu.memory_space<vmem>>, vector<1x1x516x2xbf16>
    %15 = vector.shape_cast %14 : vector<1x1x516x2xbf16> to vector<516x2xbf16>
    %16 = vector.shape_cast %13 : vector<516x2xbf16> to vector<1x1x516x2xbf16>
    tpu.vector_store %arg5[%c0_10, %c0_11, %c0_12, %c0_13], %16 {strides = array<i32>} : memref<2x2x516x2xbf16, #tpu.memory_space<vmem>>, vector<1x1x516x2xbf16>,
    %c1 = arith.constant 1 : index
    %c0_14 = arith.constant 0 : index
    %c0_15 = arith.constant 0 : index
    %17 = vector.load %arg2[%c1, %c0_14, %c0_15] : memref<4x516x144xbf16, #tpu.memory_space<vmem>>, vector<1x516x144xbf16>
    %18 = vector.shape_cast %17 : vector<1x516x144xbf16> to vector<516x144xbf16>
    %c1_16 = arith.constant 1 : index
    %c0_17 = arith.constant 0 : index
    %c0_18 = arith.constant 0 : index
    %19 = vector.load %arg1[%c1_16, %c0_17, %c0_18] : memref<4x144x2xbf16, #tpu.memory_space<vmem>>, vector<1x144x2xbf16>
    %20 = vector.shape_cast %19 : vector<1x144x2xbf16> to vector<144x2xbf16>
    %cst_19 = arith.constant dense<0.000000e+00> : vector<516x2xf32>
    %21 = tpu.matmul %18, %20, %cst_19 {dimension_numbers = #tpu.dot_dimension_numbers<[1], [0], [0], [1], [0, 0, 1, 1], [], []>} : vector<516x144xbf16>, vector<144x2xbf16>, vector<516x2xf32> -> vector<516x2xf32>
    %c0_20 = arith.constant 0 : index
    %c0_21 = arith.constant 0 : index
    %22 = vector.load %arg3[%c0_20, %c0_21] : memref<516x1xf32, #tpu.memory_space<vmem>>, vector<516x1xf32>
    %23 = vector.broadcast %22 : vector<516x1xf32> to vector<516x2xf32>
    %24 = arith.mulf %21, %23 : vector<516x2xf32>
    %c0_22 = arith.constant 0 : index
    %c0_23 = arith.constant 0 : index
    %25 = vector.load %arg4[%c0_22, %c0_23] : memref<516x1xf32, #tpu.memory_space<vmem>>, vector<516x1xf32>
    %26 = vector.broadcast %25 : vector<516x1xf32> to vector<516x2xf32>
    %27 = arith.addf %24, %26 : vector<516x2xf32>
    %cst_24 = arith.constant 0.000000e+00 : f32
    %28 = vector.broadcast %cst_24 : f32 to vector<516x2xf32>
    %29 = arith.maximumf %27, %28 : vector<516x2xf32>
    %30 = arith.truncf %29 : vector<516x2xf32> to vector<516x2xbf16>
    %c0_25 = arith.constant 0 : index
    %c1_26 = arith.constant 1 : index
    %c0_27 = arith.constant 0 : index
    %c0_28 = arith.constant 0 : index
    %31 = vector.load %arg5[%c0_25, %c1_26, %c0_27, %c0_28] : memref<2x2x516x2xbf16, #tpu.memory_space<vmem>>, vector<1x1x516x2xbf16>
    %32 = vector.shape_cast %31 : vector<1x1x516x2xbf16> to vector<516x2xbf16>
    %33 = vector.shape_cast %30 : vector<516x2xbf16> to vector<1x1x516x2xbf16>
    tpu.vector_store %arg5[%c0_25, %c1_26, %c0_27, %c0_28], %33 {strides = array<i32>} : memref<2x2x516x2xbf16, #tpu.memory_space<vmem>>, vector<1x1x516x2xbf16>,
    %c2 = arith.constant 2 : index
    %c0_29 = arith.constant 0 : index
    %c0_30 = arith.constant 0 : index
    %34 = vector.load %arg2[%c2, %c0_29, %c0_30] : memref<4x516x144xbf16, #tpu.memory_space<vmem>>, vector<1x516x144xbf16>
    %35 = vector.shape_cast %34 : vector<1x516x144xbf16> to vector<516x144xbf16>
    %c2_31 = arith.constant 2 : index
    %c0_32 = arith.constant 0 : index
    %c0_33 = arith.constant 0 : index
    %36 = vector.load %arg1[%c2_31, %c0_32, %c0_33] : memref<4x144x2xbf16, #tpu.memory_space<vmem>>, vector<1x144x2xbf16>
    %37 = vector.shape_cast %36 : vector<1x144x2xbf16> to vector<144x2xbf16>
    %cst_34 = arith.constant dense<0.000000e+00> : vector<516x2xf32>
    %38 = tpu.matmul %35, %37, %cst_34 {dimension_numbers = #tpu.dot_dimension_numbers<[1], [0], [0], [1], [0, 0, 1, 1], [], []>} : vector<516x144xbf16>, vector<144x2xbf16>, vector<516x2xf32> -> vector<516x2xf32>
    %c0_35 = arith.constant 0 : index
    %c0_36 = arith.constant 0 : index
    %39 = vector.load %arg3[%c0_35, %c0_36] : memref<516x1xf32, #tpu.memory_space<vmem>>, vector<516x1xf32>
    %40 = vector.broadcast %39 : vector<516x1xf32> to vector<516x2xf32>
    %41 = arith.mulf %38, %40 : vector<516x2xf32>
    %c0_37 = arith.constant 0 : index
    %c0_38 = arith.constant 0 : index
    %42 = vector.load %arg4[%c0_37, %c0_38] : memref<516x1xf32, #tpu.memory_space<vmem>>, vector<516x1xf32>
    %43 = vector.broadcast %42 : vector<516x1xf32> to vector<516x2xf32>
    %44 = arith.addf %41, %43 : vector<516x2xf32>
    %cst_39 = arith.constant 0.000000e+00 : f32
    %45 = vector.broadcast %cst_39 : f32 to vector<516x2xf32>
    %46 = arith.maximumf %44, %45 : vector<516x2xf32>
    %47 = arith.truncf %46 : vector<516x2xf32> to vector<516x2xbf16>
    %c1_40 = arith.constant 1 : index
    %c0_41 = arith.constant 0 : index
    %c0_42 = arith.constant 0 : index
    %c0_43 = arith.constant 0 : index
    %48 = vector.load %arg5[%c1_40, %c0_41, %c0_42, %c0_43] : memref<2x2x516x2xbf16, #tpu.memory_space<vmem>>, vector<1x1x516x2xbf16>
    %49 = vector.shape_cast %48 : vector<1x1x516x2xbf16> to vector<516x2xbf16>
    %50 = vector.shape_cast %47 : vector<516x2xbf16> to vector<1x1x516x2xbf16>
    tpu.vector_store %arg5[%c1_40, %c0_41, %c0_42, %c0_43], %50 {strides = array<i32>} : memref<2x2x516x2xbf16, #tpu.memory_space<vmem>>, vector<1x1x516x2xbf16>,
    %c3 = arith.constant 3 : index
    %c0_44 = arith.constant 0 : index
    %c0_45 = arith.constant 0 : index
    %51 = vector.load %arg2[%c3, %c0_44, %c0_45] : memref<4x516x144xbf16, #tpu.memory_space<vmem>>, vector<1x516x144xbf16>
    %52 = vector.shape_cast %51 : vector<1x516x144xbf16> to vector<516x144xbf16>
    %c3_46 = arith.constant 3 : index
    %c0_47 = arith.constant 0 : index
    %c0_48 = arith.constant 0 : index
    %53 = vector.load %arg1[%c3_46, %c0_47, %c0_48] : memref<4x144x2xbf16, #tpu.memory_space<vmem>>, vector<1x144x2xbf16>
    %54 = vector.shape_cast %53 : vector<1x144x2xbf16> to vector<144x2xbf16>
    %cst_49 = arith.constant dense<0.000000e+00> : vector<516x2xf32>
    %55 = tpu.matmul %52, %54, %cst_49 {dimension_numbers = #tpu.dot_dimension_numbers<[1], [0], [0], [1], [0, 0, 1, 1], [], []>} : vector<516x144xbf16>, vector<144x2xbf16>, vector<516x2xf32> -> vector<516x2xf32>
    %c0_50 = arith.constant 0 : index
    %c0_51 = arith.constant 0 : index
    %56 = vector.load %arg3[%c0_50, %c0_51] : memref<516x1xf32, #tpu.memory_space<vmem>>, vector<516x1xf32>
    %57 = vector.broadcast %56 : vector<516x1xf32> to vector<516x2xf32>
    %58 = arith.mulf %55, %57 : vector<516x2xf32>
    %c0_52 = arith.constant 0 : index
    %c0_53 = arith.constant 0 : index
    %59 = vector.load %arg4[%c0_52, %c0_53] : memref<516x1xf32, #tpu.memory_space<vmem>>, vector<516x1xf32>
    %60 = vector.broadcast %59 : vector<516x1xf32> to vector<516x2xf32>
    %61 = arith.addf %58, %60 : vector<516x2xf32>
    %cst_54 = arith.constant 0.000000e+00 : f32
    %62 = vector.broadcast %cst_54 : f32 to vector<516x2xf32>
    %63 = arith.maximumf %61, %62 : vector<516x2xf32>
    %64 = arith.truncf %63 : vector<516x2xf32> to vector<516x2xbf16>
    %c1_55 = arith.constant 1 : index
    %c1_56 = arith.constant 1 : index
    %c0_57 = arith.constant 0 : index
    %c0_58 = arith.constant 0 : index
    %65 = vector.load %arg5[%c1_55, %c1_56, %c0_57, %c0_58] : memref<2x2x516x2xbf16, #tpu.memory_space<vmem>>, vector<1x1x516x2xbf16>
    %66 = vector.shape_cast %65 : vector<1x1x516x2xbf16> to vector<516x2xbf16>
    %67 = vector.shape_cast %64 : vector<516x2xbf16> to vector<1x1x516x2xbf16>
    tpu.vector_store %arg5[%c1_55, %c1_56, %c0_57, %c0_58], %67 {strides = array<i32>} : memref<2x2x516x2xbf16, #tpu.memory_space<vmem>>, vector<1x1x516x2xbf16>,
    return
  }
  func.func @transform_0(%arg0: i32) -> (i32, i32, i32) {
    %c0_i32 = arith.constant 0 : i32
    %c0_i32_0 = arith.constant 0 : i32
    %c0_i32_1 = arith.constant 0 : i32
    return %c0_i32, %c0_i32_0, %arg0 : i32, i32, i32
  }
  func.func @transform_1(%arg0: i32) -> (i32, i32, i32) {
    %c0_i32 = arith.constant 0 : i32
    %c0_i32_0 = arith.constant 0 : i32
    %c0_i32_1 = arith.constant 0 : i32
    %c0_i32_2 = arith.constant 0 : i32
    return %c0_i32, %c0_i32_0, %c0_i32_1 : i32, i32, i32
  }
  func.func @transform_2(%arg0: i32) -> (i32, i32) {
    %c0_i32 = arith.constant 0 : i32
    %c0_i32_0 = arith.constant 0 : i32
    %c0_i32_1 = arith.constant 0 : i32
    return %c0_i32, %c0_i32_0 : i32, i32
  }
  func.func @transform_3(%arg0: i32) -> (i32, i32) {
    %c0_i32 = arith.constant 0 : i32
    %c0_i32_0 = arith.constant 0 : i32
    %c0_i32_1 = arith.constant 0 : i32
    return %c0_i32, %c0_i32_0 : i32, i32
  }
  func.func @transform_4(%arg0: i32) -> (i32, i32, i32, i32) {
    %c0_i32 = arith.constant 0 : i32
    %c0_i32_0 = arith.constant 0 : i32
    %c0_i32_1 = arith.constant 0 : i32
    %c0_i32_2 = arith.constant 0 : i32
    return %c0_i32, %c0_i32_0, %c0_i32_1, %arg0 : i32, i32, i32, i32
  }
}

</mosaic_0001>

<bundles_post_ra>
// kernel: tpu_custom_call.1
= control target key start
LH: loop header
LB: loop body
LE: loop exit
PB: predicated region body
PF: predicated region fallthrough
CT: control target
= control target key end

     0   :  { %v15615_v0 = vmov 0   ;;  %vm449_vm0 = vcmask 130048   ;;  %vm2081_vm1 = vcmask 11264   ;;  %vm2146_vm2 = vcmask 9216   ;;  %s15610_s2 = inlined_call_operand.vmem [shape: f32[516,1], index: 2, kind: input, shape index: {}]   ;;  %s15611_s0 = inlined_call_operand.vmem [shape: bf16[4,144,2], index: 0, kind: input, shape index: {}]   ;;  %s15612_s1 = inlined_call_operand.vmem [shape: bf16[4,516,144], index: 1, kind: input, shape index: {}]   ;;  %s15613_s3 = inlined_call_operand.vmem [shape: f32[516,1], index: 3, kind: input, shape index: {}]   ;;  %s15614_s4 = inlined_call_operand.vmem [shape: bf16[2,2,516,2], index: 4, kind: output, shape index: {}]  }
   0x1   :  { %9940 = vset.pattern.permute.xlu1 %v15615_v0  ;;  %9939 = vset.pattern.permute.xlu0 %v15615_v0  ;;  %v847_v1 = vld [vmem:[%s15610_s2 + $0x10] sm:$0xff]  ;;  %v845_v2 = vld [vmem:[%s15610_s2] sm:$0xff]  ;;  %v848_v4 = vld [vmem:[%s15610_s2 + $0x18] sm:$0xff] }
   0x2   :  { %922 = vperm.xlu1 %9940, %v847_v1   ;;  %912 = vperm.xlu0 %9939, %v845_v2   ;;  %v9941_v3 = vld [vmem:[%s15611_s0] sm:$0xff]   ;;  %v846_v5 = vld [vmem:[%s15610_s2 + $0x8] sm:$0xff]  ;;  %v9943_v10 = vld [vmem:[%s15611_s0 + $0x10] sm:$0xff]  }
   0x3   :  { %549 = vmatprep.subr.bf16.mxu0 %v15615_v0  ;;  %2680 = vmatprep.subr.bf16.mxu1 %v15615_v0  ;;  %v9942_v6 = vld [vmem:[%s15611_s0 + $0x8] sm:$0xff]   ;;  %v849_v8 = vld [vmem:[%s15610_s2 + $0x20] sm:$0xff]  ;;  %v9946_v11 = vld [vmem:[%s15611_s0 + $0x50] sm:$0xff]  }
   0x4   :  { %550 = vmatpush1.bf16.msra.mxu0 %v9941_v3  ;;  %v850_v7 = vld [vmem:[%s15610_s2 + $0x28] sm:$0xff]  ;;  %v852_v12 = vld [vmem:[%s15610_s2 + $0x38] sm:$0xff]  ;;  %v851_v13 = vld [vmem:[%s15610_s2 + $0x30] sm:$0xff] }
   0x5   :  { %551 = vmatprep.subr.bf16.mxu0 %v15615_v0  ;;  %v9944_v9 = vld [vmem:[%s15611_s0 + $0x48] sm:$0xff]   ;;  %v9945_v14 = vld [vmem:[%s15611_s0 + $0x18] sm:$0xff]   ;;  %v853_v17 = vld [vmem:[%s15610_s2 + $0x40] sm:$0xff] }
   0x6   :  { %927 = vperm.xlu1 %9940, %v848_v4   ;;  %917 = vperm.xlu0 %9939, %v846_v5   ;;  %v9948_v15 = vld [vmem:[%s15611_s0 + $0x58] sm:$0xff]   ;;  %v854_v16 = vld [vmem:[%s15610_s2 + $0x48] sm:$0xff]  ;;  %v9947_v18 = vld [vmem:[%s15611_s0 + $0x20] sm:$0xff]  }
   0x7   :  { %2681 = vmatpush1.bf16.msra.mxu1 %v9944_v9  ;;  %v9950_v19 = vld [vmem:[%s15611_s0 + $0x60] sm:$0xff]   ;;  %v856_v20 = vld [vmem:[%s15610_s2 + $0x58] sm:$0xff]  ;;  %v855_v21 = vld [vmem:[%s15610_s2 + $0x50] sm:$0xff] }
   0x8   :  { %552 = vmatpush1.bf16.msra.mxu0 %v9942_v6  ;;  %2682 = vmatprep.subr.bf16.mxu1 %v15615_v0  ;;  %v9949_v22 = vld [vmem:[%s15611_s0 + $0x28] sm:$0xff]   ;;  %v857_v25 = vld [vmem:[%s15610_s2 + $0x60] sm:$0xff]  ;;  %v9951_v27 = vld [vmem:[%s15611_s0 + $0x30] sm:$0xff]  }
   0x9   :  { %553 = vmatprep.subr.bf16.mxu0 %v15615_v0  ;;  %v9952_v23 = vld [vmem:[%s15611_s0 + $0x68] sm:$0xff]   ;;  %v9954_v28 = vld [vmem:[%s15611_s0 + $0x70] sm:$0xff]   ;;  %v860_v29 = vld [vmem:[%s15610_s2 + $0x78] sm:$0xff] }
   0xa   :  { %937 = vperm.xlu1 %9940, %v850_v7   ;;  %932 = vperm.xlu0 %9939, %v849_v8   ;;  %v858_v24 = vld [vmem:[%s15610_s2 + $0x68] sm:$0xff]  ;;  %v859_v30 = vld [vmem:[%s15610_s2 + $0x70] sm:$0xff]  ;;  %v9953_v31 = vld [vmem:[%s15611_s0 + $0x38] sm:$0xff]  }
   0xb   :  { %2683 = vmatpush1.bf16.msra.mxu1 %v9946_v11  ;;  %v9958_v26 = vld [vmem:[%s15612_s1 + $0x4] ss:$8 sps:$4 sm:$0xff]   ;;  %v9959_v32 = vld [vmem:[%s15611_s0 + $0x78] sm:$0xff]   ;;  %v863_v39 = vld [vmem:[%s15610_s2 + $0x90] sm:$0xff] }
   0xc   :  { %554 = vmatpush1.bf16.msra.mxu0 %v9943_v10  ;;  %2684 = vmatprep.subr.bf16.mxu1 %v15615_v0  ;;  %v9967_v33 = vld [vmem:[%s15612_s1 + $0x20c] ss:$8 sps:$4 sm:$0xff]   ;;  %v861_v35 = vld [vmem:[%s15610_s2 + $0x80] sm:$0xff]  ;;  %v864_v38 = vld [vmem:[%s15610_s2 + $0x98] sm:$0xff] }
   0xd   :  { %555 = vmatprep.subr.bf16.mxu0 %v15615_v0  ;;  %8617 = vmatprep.mubr.msk.bf16.mxu0 %vm449_vm0, %v9958_v26  ;;  %v862_v34 = vld [vmem:[%s15610_s2 + $0x88] sm:$0xff]  ;;  %v9955_v36 = vld [vmem:[%s15611_s0 + $0x40] sm:$0xff]   ;;  %v9961_v41 = vld [vmem:[%s15612_s1 + $0x14] ss:$8 sps:$4 sm:$0xff]  }
   0xe   :  { %947 = vperm.xlu1 %9940, %v852_v12   ;;  %942 = vperm.xlu0 %9939, %v851_v13   ;;  %v9960_v37 = vld [vmem:[%s15611_s0 + $0x80] sm:$0xff]   ;;  %v9964_v42 = vld [vmem:[%s15611_s0 + $0x88] sm:$0xff]   ;;  %v868_v47 = vld [vmem:[%s15610_s2 + $0xb8] sm:$0xff] }
   0xf   :  { %2685 = vmatpush1.bf16.msra.mxu1 %v9948_v15  ;;  %8873 = vmatprep.mubr.msk.bf16.mxu1 %vm449_vm0, %v9967_v33  ;;  %v9956_v40 = vld [vmem:[%s15612_s1] ss:$8 sps:$4 sm:$0xff]   ;;  %v9971_v46 = vld [vmem:[%s15612_s1 + $0x21c] ss:$8 sps:$4 sm:$0xff]   ;;  %v867_v48 = vld [vmem:[%s15610_s2 + $0xb0] sm:$0xff] }
  0x10   :  { %556 = vmatpush1.bf16.msra.mxu0 %v9945_v14  ;;  %2686 = vmatprep.subr.bf16.mxu1 %v15615_v0  ;;  %v866_v43 = vld [vmem:[%s15610_s2 + $0xa8] sm:$0xff]  ;;  %v865_v44 = vld [vmem:[%s15610_s2 + $0xa0] sm:$0xff]  ;;  %v9963_v49 = vld [vmem:[%s15612_s1 + $0x10] ss:$8 sps:$4 sm:$0xff]  }
  0x11   :  { %557 = vmatprep.subr.bf16.mxu0 %v15615_v0  ;;  %v9965_v45 = vld [vmem:[%s15612_s1 + $0x208] ss:$8 sps:$4 sm:$0xff]   ;;  %v9968_v50 = vld [vmem:[%s15612_s1 + $0x24] ss:$8 sps:$4 sm:$0xff]   ;;  %v9973_v53 = vld [vmem:[%s15612_s1 + $0x218] ss:$8 sps:$4 sm:$0xff]  }
  0x12   :  { %957 = vperm.xlu1 %9940, %v854_v16   ;;  %952 = vperm.xlu0 %9939, %v853_v17   ;;  %v870_v51 = vld [vmem:[%s15610_s2 + $0xc8] sm:$0xff]  ;;  %v869_v52 = vld [vmem:[%s15610_s2 + $0xc0] sm:$0xff]  ;;  %v872_v55 = vld [vmem:[%s15610_s2 + $0xd8] sm:$0xff] }
  0x13   :  { %2687 = vmatpush1.bf16.msra.mxu1 %v9950_v19  ;;  %v9977_v54 = vld [vmem:[%s15612_s1 + $0x22c] ss:$8 sps:$4 sm:$0xff]   ;;  %v9970_v57 = vld [vmem:[%s15612_s1 + $0x20] ss:$8 sps:$4 sm:$0xff]   ;;  %v9983_v62 = vld [vmem:[%s15612_s1 + $0x23c] ss:$8 sps:$4 sm:$0xff]  }
  0x14   :  { %558 = vmatpush1.bf16.msra.mxu0 %v9947_v18  ;;  %2688 = vmatprep.subr.bf16.mxu1 %v15615_v0  ;;  %v871_v56 = vld [vmem:[%s15610_s2 + $0xd0] sm:$0xff]  ;;  %v874_v59 = vld [vmem:[%s15610_s2 + $0xe8] sm:$0xff]  ;;  %v873_v60 = vld [vmem:[%s15610_s2 + $0xe0] sm:$0xff] }
  0x15   :  { %559 = vmatprep.subr.bf16.mxu0 %v15615_v0  ;;  %v9974_v58 = vld [vmem:[%s15612_s1 + $0x34] ss:$8 sps:$4 sm:$0xff]   ;;  %v9979_v61 = vld [vmem:[%s15612_s1 + $0x228] ss:$8 sps:$4 sm:$0xff]   ;;  %v9980_v3 = vld [vmem:[%s15612_s1 + $0x44] ss:$8 sps:$4 sm:$0xff]  }
  0x16   :  { %967 = vperm.xlu1 %9940, %v856_v20   ;;  %962 = vperm.xlu0 %9939, %v855_v21   ;;  %v876_v63 = vld [vmem:[%s15610_s2 + $0xf8] sm:$0xff]  ;;  %v875_v1 = vld [vmem:[%s15610_s2 + $0xf0] sm:$0xff]  ;;  %v878_v4 = vld [vmem:[%s15610_s2 + $0x108] sm:$0xff] }
  0x17   :  { %2689 = vmatpush1.bf16.msra.mxu1 %v9952_v23  ;;  %v9976_v2 = vld [vmem:[%s15612_s1 + $0x30] ss:$8 sps:$4 sm:$0xff]   ;;  %v877_v5 = vld [vmem:[%s15610_s2 + $0x100] sm:$0xff]  ;;  %v9989_v7 = vld [vmem:[%s15612_s1 + $0x24c] ss:$8 sps:$4 sm:$0xff]  }
  0x18   :  { %560 = vmatpush1.bf16.msra.mxu0 %v9949_v22  ;;  %2690 = vmatprep.subr.bf16.mxu1 %v15615_v0  ;;  %v9985_v6 = vld [vmem:[%s15612_s1 + $0x238] ss:$8 sps:$4 sm:$0xff]   ;;  %v879_v9 = vld [vmem:[%s15610_s2 + $0x110] sm:$0xff]  ;;  %v882_v12 = vld [vmem:[%s15610_s2 + $0x128] sm:$0xff] }
  0x19   :  { %561 = vmatprep.subr.bf16.mxu0 %v15615_v0  ;;  %v880_v8 = vld [vmem:[%s15610_s2 + $0x118] sm:$0xff]  ;;  %v9982_v10 = vld [vmem:[%s15612_s1 + $0x40] ss:$8 sps:$4 sm:$0xff]   ;;  %v883_v17 = vld [vmem:[%s15610_s2 + $0x130] sm:$0xff] }
  0x1a   :  { %977 = vperm.xlu1 %9940, %v858_v24   ;;  %972 = vperm.xlu0 %9939, %v857_v25   ;;  %v9986_v11 = vld [vmem:[%s15612_s1 + $0x54] ss:$8 sps:$4 sm:$0xff]   ;;  %v881_v13 = vld [vmem:[%s15610_s2 + $0x120] sm:$0xff]  ;;  %v9991_v14 = vld [vmem:[%s15612_s1 + $0x248] ss:$8 sps:$4 sm:$0xff]  }
  0x1b   :  { %2691 = vmatpush1.bf16.msra.mxu1 %v9954_v28  ;;  %v9995_v15 = vld [vmem:[%s15612_s1 + $0x25c] ss:$8 sps:$4 sm:$0xff]   ;;  %v9988_v18 = vld [vmem:[%s15612_s1 + $0x50] ss:$8 sps:$4 sm:$0xff]   ;;  %v886_v20 = vld [vmem:[%s15610_s2 + $0x148] sm:$0xff] }
  0x1c   :  { %562 = vmatpush1.bf16.msra.mxu0 %v9951_v27  ;;  %2692 = vmatprep.subr.bf16.mxu1 %v15615_v0  ;;  %v884_v16 = vld [vmem:[%s15610_s2 + $0x138] sm:$0xff]  ;;  %v9992_v19 = vld [vmem:[%s15612_s1 + $0x64] ss:$8 sps:$4 sm:$0xff]   ;;  %v887_v25 = vld [vmem:[%s15610_s2 + $0x150] sm:$0xff] }
  0x1d   :  { %563 = vmatprep.subr.bf16.mxu0 %v15615_v0  ;;  %v885_v21 = vld [vmem:[%s15610_s2 + $0x140] sm:$0xff]  ;;  %v10001_v23 = vld [vmem:[%s15612_s1 + $0x26c] ss:$8 sps:$4 sm:$0xff]   ;;  %v888_v24 = vld [vmem:[%s15610_s2 + $0x158] sm:$0xff] }
  0x1e   :  { %987 = vperm.xlu1 %9940, %v860_v29   ;;  %982 = vperm.xlu0 %9939, %v859_v30   ;;  %v9997_v22 = vld [vmem:[%s15612_s1 + $0x258] ss:$8 sps:$4 sm:$0xff]   ;;  %v9998_v27 = vld [vmem:[%s15612_s1 + $0x74] ss:$8 sps:$4 sm:$0xff]   ;;  %v890_v28 = vld [vmem:[%s15610_s2 + $0x168] sm:$0xff] }
  0x1f   :  { %2693 = vmatpush1.bf16.msra.mxu1 %v9959_v32  ;;  %v9994_v26 = vld [vmem:[%s15612_s1 + $0x60] ss:$8 sps:$4 sm:$0xff]   ;;  %v892_v32 = vld [vmem:[%s15610_s2 + $0x178] sm:$0xff]  ;;  %v891_v33 = vld [vmem:[%s15610_s2 + $0x170] sm:$0xff] }
  0x20   :  { %564 = vmatpush1.bf16.msra.mxu0 %v9953_v31  ;;  %2694 = vmatprep.subr.bf16.mxu1 %v15615_v0  ;;  %v889_v29 = vld [vmem:[%s15610_s2 + $0x160] sm:$0xff]  ;;  %v10003_v30 = vld [vmem:[%s15612_s1 + $0x268] ss:$8 sps:$4 sm:$0xff]  }
  0x21   :  { %565 = vmatprep.subr.bf16.mxu0 %v15615_v0  ;;  %v10007_v31 = vld [vmem:[%s15612_s1 + $0x27c] ss:$8 sps:$4 sm:$0xff]  }
  0x22   :  { %997 = vperm.xlu1 %9940, %v862_v34   ;;  %992 = vperm.xlu0 %9939, %v861_v35   ;;  %v10000_v34 = vld [vmem:[%s15612_s1 + $0x70] ss:$8 sps:$4 sm:$0xff]   ;;  %v10004_v35 = vld [vmem:[%s15612_s1 + $0x84] ss:$8 sps:$4 sm:$0xff]  }
  0x23   :  { %2695 = vmatpush1.bf16.msra.mxu1 %v9960_v37  ;;  %v893_v37 = vld [vmem:[%s15610_s2 + $0x180] sm:$0xff] }
  0x24   :  { %566 = vmatpush1.bf16.msra.mxu0 %v9955_v36  ;;  %2696 = vmatprep.subr.bf16.mxu1 %v15615_v0  ;;  %v894_v36 = vld [vmem:[%s15610_s2 + $0x188] sm:$0xff] }
  0x25   :  { %4810 = vmatprep.subr.bf16.mxu0 %v15615_v0 }
  0x26   :  { %1007 = vperm.xlu1 %9940, %v864_v38   ;;  %1002 = vperm.xlu0 %9939, %v863_v39   ;;  %v10009_v38 = vld [vmem:[%s15612_s1 + $0x278] ss:$8 sps:$4 sm:$0xff]   ;;  %v10013_v39 = vld [vmem:[%s15612_s1 + $0x28c] ss:$8 sps:$4 sm:$0xff]  }
  0x27   :  { %582 = vmatmul.mubr.bf16.vlgmr.msra.gmra.mrb[0].mxu0 %v9956_v40  ;;  %2697 = vmatpush1.bf16.msra.mxu1 %v9964_v42  ;;  %v896_v40 = vld [vmem:[%s15610_s2 + $0x198] sm:$0xff]  ;;  %v10006_v42 = vld [vmem:[%s15612_s1 + $0x80] ss:$8 sps:$4 sm:$0xff]  }
  0x28   :  { %8618 = vmatprep.mubr.msk.bf16.mxu0 %vm449_vm0, %v9961_v41  ;;  %6940 = vmatprep.subr.bf16.mxu1 %v15615_v0  ;;  %v895_v41 = vld [vmem:[%s15610_s2 + $0x190] sm:$0xff] }
  0x2a   :  { %1017 = vperm.xlu1 %9940, %v866_v43   ;;  %1012 = vperm.xlu0 %9939, %v865_v44   ;;  %v10010_v43 = vld [vmem:[%s15612_s1 + $0x94] ss:$8 sps:$4 sm:$0xff]   ;;  %v898_v44 = vld [vmem:[%s15610_s2 + $0x1a8] sm:$0xff] }
  0x2b   :  { %2713 = vmatmul.mubr.bf16.vlgmr.msra.gmra.mrb[0].mxu1 %v9965_v45  ;;  %v897_v45 = vld [vmem:[%s15610_s2 + $0x1a0] sm:$0xff] }
  0x2c   :  { %8874 = vmatprep.mubr.msk.bf16.mxu1 %vm449_vm0, %v9971_v46  ;;  %v10015_v46 = vld [vmem:[%s15612_s1 + $0x288] ss:$8 sps:$4 sm:$0xff]  }
  0x2e   :  { %1027 = vperm.xlu1 %9940, %v868_v47   ;;  %1022 = vperm.xlu0 %9939, %v867_v48   ;;  %v10019_v47 = vld [vmem:[%s15612_s1 + $0x29c] ss:$8 sps:$4 sm:$0xff]  }
  0x2f   :  { %590 = vmatmul.mubr.bf16.gmra.mrb[4].mxu0 %v9963_v49  ;;  %v900_v48 = vld [vmem:[%s15610_s2 + $0x1b8] sm:$0xff]  ;;  %v899_v49 = vld [vmem:[%s15610_s2 + $0x1b0] sm:$0xff] }
  0x30   :  { %8619 = vmatprep.mubr.msk.bf16.mxu0 %vm449_vm0, %v9968_v50  ;;  %v10012_v50 = vld [vmem:[%s15612_s1 + $0x90] ss:$8 sps:$4 sm:$0xff]  }
  0x32   :  { %1037 = vperm.xlu1 %9940, %v870_v51   ;;  %1032 = vperm.xlu0 %9939, %v869_v52   ;;  %v10016_v51 = vld [vmem:[%s15612_s1 + $0xa4] ss:$8 sps:$4 sm:$0xff]  }
  0x33   :  { %2721 = vmatmul.mubr.bf16.gmra.mrb[4].mxu1 %v9973_v53  ;;  %v902_v52 = vld [vmem:[%s15610_s2 + $0x1c8] sm:$0xff]  ;;  %v901_v53 = vld [vmem:[%s15610_s2 + $0x1c0] sm:$0xff] }
  0x34   :  { %8875 = vmatprep.mubr.msk.bf16.mxu1 %vm449_vm0, %v9977_v54  ;;  %v10021_v54 = vld [vmem:[%s15612_s1 + $0x298] ss:$8 sps:$4 sm:$0xff]  }
  0x36   :  { %1047 = vperm.xlu1 %9940, %v872_v55   ;;  %1042 = vperm.xlu0 %9939, %v871_v56   ;;  %v10025_v55 = vld [vmem:[%s15612_s1 + $0x2ac] ss:$8 sps:$4 sm:$0xff]   ;;  %v904_v56 = vld [vmem:[%s15610_s2 + $0x1d8] sm:$0xff] }
  0x37   :  { %598 = vmatmul.mubr.bf16.gmra.mrb[8].mxu0 %v9970_v57  ;;  %v903_v57 = vld [vmem:[%s15610_s2 + $0x1d0] sm:$0xff] }
  0x38   :  { %8620 = vmatprep.mubr.msk.bf16.mxu0 %vm449_vm0, %v9974_v58  ;;  %v10018_v58 = vld [vmem:[%s15612_s1 + $0xa0] ss:$8 sps:$4 sm:$0xff]  }
  0x3a   :  { %1057 = vperm.xlu1 %9940, %v874_v59   ;;  %1052 = vperm.xlu0 %9939, %v873_v60   ;;  %v10022_v59 = vld [vmem:[%s15612_s1 + $0xb4] ss:$8 sps:$4 sm:$0xff]   ;;  %v906_v60 = vld [vmem:[%s15610_s2 + $0x1e8] sm:$0xff] }
  0x3b   :  { %2729 = vmatmul.mubr.bf16.gmra.mrb[8].mxu1 %v9979_v61  ;;  %v905_v61 = vld [vmem:[%s15610_s2 + $0x1e0] sm:$0xff] }
  0x3c   :  { %8876 = vmatprep.mubr.msk.bf16.mxu1 %vm449_vm0, %v9983_v62  ;;  %v10027_v62 = vld [vmem:[%s15612_s1 + $0x2a8] ss:$8 sps:$4 sm:$0xff]  }
  0x3e   :  { %1067 = vperm.xlu1 %9940, %v876_v63   ;;  %1062 = vperm.xlu0 %9939, %v875_v1   ;;  %v10031_v63 = vld [vmem:[%s15612_s1 + $0x2bc] ss:$8 sps:$4 sm:$0xff]  }
  0x3f   :  { %606 = vmatmul.mubr.bf16.gmra.mrb[12].mxu0 %v9976_v2  ;;  %v908_v1 = vld [vmem:[%s15610_s2 + $0x1f8] sm:$0xff]  ;;  %v907_v2 = vld [vmem:[%s15610_s2 + $0x1f0] sm:$0xff] }
  0x40   :  { %8621 = vmatprep.mubr.msk.bf16.mxu0 %vm449_vm0, %v9980_v3  ;;  %v10024_v3 = vld [vmem:[%s15612_s1 + $0xb0] ss:$8 sps:$4 sm:$0xff]  }
  0x42   :  { %1077 = vperm.xlu1 %9940, %v878_v4   ;;  %1072 = vperm.xlu0 %9939, %v877_v5   ;;  %v10028_v4 = vld [vmem:[%s15612_s1 + $0xc4] ss:$8 sps:$4 sm:$0xff]  }
  0x43   :  { %2737 = vmatmul.mubr.bf16.gmra.mrb[12].mxu1 %v9985_v6  ;;  %v1300_v5 = vld [vmem:[%s15613_s3] sm:$0xff] }
  0x44   :  { %8877 = vmatprep.mubr.msk.bf16.mxu1 %vm449_vm0, %v9989_v7  ;;  %v909_v6 = vld [vmem:[%s15610_s2 + $0x200] sm:$0xf] }
  0x45   :  { %v10033_v7 = vld [vmem:[%s15612_s1 + $0x2b8] ss:$8 sps:$4 sm:$0xff]  }
  0x46   :  { %1087 = vperm.xlu1 %9940, %v880_v8   ;;  %1082 = vperm.xlu0 %9939, %v879_v9  }
  0x47   :  { %614 = vmatmul.mubr.bf16.gmra.mrb[16].mxu0 %v9982_v10  ;;  %v10037_v10 = vld [vmem:[%s15612_s1 + $0x2cc] ss:$8 sps:$4 sm:$0xff]  }
  0x48   :  { %8622 = vmatprep.mubr.msk.bf16.mxu0 %vm449_vm0, %v9986_v11  ;;  %v1302_v11 = vld [vmem:[%s15613_s3 + $0x10] sm:$0xff] }
  0x4a   :  { %1097 = vperm.xlu1 %9940, %v882_v12   ;;  %1092 = vperm.xlu0 %9939, %v881_v13   ;;  %v1301_v12 = vld [vmem:[%s15613_s3 + $0x8] sm:$0xff] }
  0x4b   :  { %2745 = vmatmul.mubr.bf16.gmra.mrb[16].mxu1 %v9991_v14  ;;  %v10030_v13 = vld [vmem:[%s15612_s1 + $0xc0] ss:$8 sps:$4 sm:$0xff]   ;;  %v10034_v14 = vld [vmem:[%s15612_s1 + $0xd4] ss:$8 sps:$4 sm:$0xff]  }
  0x4c   :  { %8878 = vmatprep.mubr.msk.bf16.mxu1 %vm449_vm0, %v9995_v15 }
  0x4e   :  { %1107 = vperm.xlu1 %9940, %v884_v16   ;;  %1102 = vperm.xlu0 %9939, %v883_v17   ;;  %v1304_v17 = vld [vmem:[%s15613_s3 + $0x20] sm:$0xff] }
  0x4f   :  { %622 = vmatmul.mubr.bf16.gmra.mrb[20].mxu0 %v9988_v18  ;;  %v1303_v18 = vld [vmem:[%s15613_s3 + $0x18] sm:$0xff] }
  0x50   :  { %8623 = vmatprep.mubr.msk.bf16.mxu0 %vm449_vm0, %v9992_v19  ;;  %v10039_v19 = vld [vmem:[%s15612_s1 + $0x2c8] ss:$8 sps:$4 sm:$0xff]  }
  0x52   :  { %1117 = vperm.xlu1 %9940, %v886_v20   ;;  %1112 = vperm.xlu0 %9939, %v885_v21  }
  0x53   :  { %2753 = vmatmul.mubr.bf16.gmra.mrb[20].mxu1 %v9997_v22  ;;  %v10043_v22 = vld [vmem:[%s15612_s1 + $0x2dc] ss:$8 sps:$4 sm:$0xff]  }
  0x54   :  { %8879 = vmatprep.mubr.msk.bf16.mxu1 %vm449_vm0, %v10001_v23  ;;  %v1306_v23 = vld [vmem:[%s15613_s3 + $0x30] sm:$0xff] }
  0x56   :  { %1127 = vperm.xlu1 %9940, %v888_v24   ;;  %1122 = vperm.xlu0 %9939, %v887_v25   ;;  %v1305_v24 = vld [vmem:[%s15613_s3 + $0x28] sm:$0xff]  ;;  %v10036_v25 = vld [vmem:[%s15612_s1 + $0xd0] ss:$8 sps:$4 sm:$0xff]  }
  0x57   :  { %630 = vmatmul.mubr.bf16.gmra.mrb[24].mxu0 %v9994_v26  ;;  %v10040_v26 = vld [vmem:[%s15612_s1 + $0xe4] ss:$8 sps:$4 sm:$0xff]  }
  0x58   :  { %8624 = vmatprep.mubr.msk.bf16.mxu0 %vm449_vm0, %v9998_v27 }
  0x5a   :  { %1137 = vperm.xlu1 %9940, %v890_v28   ;;  %1132 = vperm.xlu0 %9939, %v889_v29   ;;  %v1308_v29 = vld [vmem:[%s15613_s3 + $0x40] sm:$0xff] }
  0x5b   :  { %2761 = vmatmul.mubr.bf16.gmra.mrb[24].mxu1 %v10003_v30  ;;  %v1307_v30 = vld [vmem:[%s15613_s3 + $0x38] sm:$0xff] }
  0x5c   :  { %8880 = vmatprep.mubr.msk.bf16.mxu1 %vm449_vm0, %v10007_v31  ;;  %v10045_v31 = vld [vmem:[%s15612_s1 + $0x2d8] ss:$8 sps:$4 sm:$0xff]  }
  0x5e   :  { %1147 = vperm.xlu1 %9940, %v892_v32   ;;  %1142 = vperm.xlu0 %9939, %v891_v33   ;;  %v10049_v32 = vld [vmem:[%s15612_s1 + $0x2ec] ss:$8 sps:$4 sm:$0xff]  }
  0x5f   :  { %638 = vmatmul.mubr.bf16.gmra.mrb[28].mxu0 %v10000_v34 }
  0x60   :  { %8625 = vmatprep.mubr.msk.bf16.mxu0 %vm449_vm0, %v10004_v35  ;;  %v1310_v35 = vld [vmem:[%s15613_s3 + $0x50] sm:$0xff] }
  0x62   :  { %1157 = vperm.xlu1 %9940, %v894_v36   ;;  %1152 = vperm.xlu0 %9939, %v893_v37   ;;  %v1309_v36 = vld [vmem:[%s15613_s3 + $0x48] sm:$0xff] }
  0x63   :  { %2769 = vmatmul.mubr.bf16.gmra.mrb[28].mxu1 %v10009_v38  ;;  %v10042_v37 = vld [vmem:[%s15612_s1 + $0xe0] ss:$8 sps:$4 sm:$0xff]   ;;  %v10134_v38 = vld [vmem:[%s15611_s0 + $0x90] sm:$0xff]  }
  0x64   :  { %8881 = vmatprep.mubr.msk.bf16.mxu1 %vm449_vm0, %v10013_v39  ;;  %v10046_v39 = vld [vmem:[%s15612_s1 + $0xf4] ss:$8 sps:$4 sm:$0xff]   ;;  %4811 = vmatpush1.bf16.msra.mxu0 %v10134_v38 }
  0x65   :  { %4812 = vmatprep.subr.bf16.mxu0 %v15615_v0  ;;  %v1326_v38 = vld [vmem:[%s15613_s3 + $0xd0] sm:$0xff] }
  0x66   :  { %1167 = vperm.xlu1 %9940, %v896_v40   ;;  %1162 = vperm.xlu0 %9939, %v895_v41  }
  0x67   :  { %646 = vmatmul.mubr.bf16.gmra.mrb[32].mxu0 %v10006_v42  ;;  %v1312_v42 = vld [vmem:[%s15613_s3 + $0x60] sm:$0xff] }
  0x68   :  { %8626 = vmatprep.mubr.msk.bf16.mxu0 %vm449_vm0, %v10010_v43  ;;  %v1311_v43 = vld [vmem:[%s15613_s3 + $0x58] sm:$0xff] }
  0x6a   :  { %1177 = vperm.xlu1 %9940, %v898_v44   ;;  %1172 = vperm.xlu0 %9939, %v897_v45   ;;  %v10138_v44 = vld [vmem:[%s15611_s0 + $0x98] sm:$0xff]   ;;  %v10051_v45 = vld [vmem:[%s15612_s1 + $0x2e8] ss:$8 sps:$4 sm:$0xff]  }
  0x6b   :  { %2777 = vmatmul.mubr.bf16.gmra.mrb[32].mxu1 %v10015_v46  ;;  %v10055_v46 = vld [vmem:[%s15612_s1 + $0x2fc] ss:$8 sps:$4 sm:$0xff]   ;;  %4813 = vmatpush1.bf16.msra.mxu0 %v10138_v44 }
  0x6c   :  { %8882 = vmatprep.mubr.msk.bf16.mxu1 %vm449_vm0, %v10019_v47  ;;  %4814 = vmatprep.subr.bf16.mxu0 %v15615_v0  ;;  %v10070_v44 = vld [vmem:[%s15612_s1 + $0x134] ss:$8 sps:$4 sm:$0xff]  }
  0x6e   :  { %1187 = vperm.xlu1 %9940, %v900_v48   ;;  %1182 = vperm.xlu0 %9939, %v899_v49   ;;  %v1314_v49 = vld [vmem:[%s15613_s3 + $0x70] sm:$0xff] }
  0x6f   :  { %654 = vmatmul.mubr.bf16.gmra.mrb[36].mxu0 %v10012_v50  ;;  %v1313_v50 = vld [vmem:[%s15613_s3 + $0x68] sm:$0xff] }
  0x70   :  { %8627 = vmatprep.mubr.msk.bf16.mxu0 %vm449_vm0, %v10016_v51  ;;  %v10048_v51 = vld [vmem:[%s15612_s1 + $0xf0] ss:$8 sps:$4 sm:$0xff]  }
  0x72   :  { %1197 = vperm.xlu1 %9940, %v902_v52   ;;  %1192 = vperm.xlu0 %9939, %v901_v53   ;;  %v10141_v52 = vld [vmem:[%s15611_s0 + $0xa0] sm:$0xff]  }
  0x73   :  { %2785 = vmatmul.mubr.bf16.gmra.mrb[36].mxu1 %v10021_v54  ;;  %v10052_v53 = vld [vmem:[%s15612_s1 + $0x104] ss:$8 sps:$4 sm:$0xff]   ;;  %4815 = vmatpush1.bf16.msra.mxu0 %v10141_v52 }
  0x74   :  { %8883 = vmatprep.mubr.msk.bf16.mxu1 %vm449_vm0, %v10025_v55  ;;  %4816 = vmatprep.subr.bf16.mxu0 %v15615_v0  ;;  %v10079_v52 = vld [vmem:[%s15612_s1 + $0x33c] ss:$8 sps:$4 sm:$0xff]  }
  0x76   :  { %1207 = vperm.xlu1 %9940, %v904_v56   ;;  %1202 = vperm.xlu0 %9939, %v903_v57   ;;  %v1316_v56 = vld [vmem:[%s15613_s3 + $0x80] sm:$0xff]  ;;  %v1315_v57 = vld [vmem:[%s15613_s3 + $0x78] sm:$0xff] }
  0x77   :  { %662 = vmatmul.mubr.bf16.gmra.mrb[40].mxu0 %v10018_v58  ;;  %v10145_v58 = vld [vmem:[%s15611_s0 + $0xa8] sm:$0xff]  }
  0x78   :  { %8628 = vmatprep.mubr.msk.bf16.mxu0 %vm449_vm0, %v10022_v59  ;;  %v10057_v59 = vld [vmem:[%s15612_s1 + $0x2f8] ss:$8 sps:$4 sm:$0xff]   ;;  %4817 = vmatpush1.bf16.msra.mxu0 %v10145_v58  ;;  %v1329_v58 = vld [vmem:[%s15613_s3 + $0xe8] sm:$0xff] }
  0x79   :  { %4818 = vmatprep.subr.bf16.mxu0 %v15615_v0 }
  0x7a   :  { %1217 = vperm.xlu1 %9940, %v906_v60   ;;  %1212 = vperm.xlu0 %9939, %v905_v61   ;;  %v10061_v60 = vld [vmem:[%s15612_s1 + $0x30c] ss:$8 sps:$4 sm:$0xff]  }
  0x7b   :  { %2793 = vmatmul.mubr.bf16.gmra.mrb[40].mxu1 %v10027_v62 }
  0x7c   :  { %8884 = vmatprep.mubr.msk.bf16.mxu1 %vm449_vm0, %v10031_v63  ;;  %v1318_v63 = vld [vmem:[%s15613_s3 + $0x90] sm:$0xff] }
  0x7e   :  { %1227 = vperm.xlu1 %9940, %v908_v1   ;;  %1222 = vperm.xlu0 %9939, %v907_v2   ;;  %v1317_v1 = vld [vmem:[%s15613_s3 + $0x88] sm:$0xff] }
  0x7f   :  { %670 = vmatmul.mubr.bf16.gmra.mrb[44].mxu0 %v10024_v3  ;;  %v10054_v2 = vld [vmem:[%s15612_s1 + $0x100] ss:$8 sps:$4 sm:$0xff]   ;;  %v10148_v3 = vld [vmem:[%s15611_s0 + $0xb0] sm:$0xff]  }
  0x80   :  { %8629 = vmatprep.mubr.msk.bf16.mxu0 %vm449_vm0, %v10028_v4  ;;  %v10058_v4 = vld [vmem:[%s15612_s1 + $0x114] ss:$8 sps:$4 sm:$0xff]   ;;  %4819 = vmatpush1.bf16.msra.mxu0 %v10148_v3 }
  0x81   :  { %v10835_v8 = vpop.permute.xlu1 %922  ;;  %v10837_v9 = vpop.permute.xlu0 %912  ;;  %4820 = vmatprep.subr.bf16.mxu0 %v15615_v0  ;;  %v1331_v3 = vld [vmem:[%s15613_s3 + $0xf8] sm:$0xff] }
  0x82   :  { %1367 = vperm.xlu1 %9940, %v1300_v5   ;;  %1232 = vperm.xlu0 %9939, %v909_v6  }
  0x83   :  { %2801 = vmatmul.mubr.bf16.gmra.mrb[44].mxu1 %v10033_v7  ;;  %v1320_v7 = vld [vmem:[%s15613_s3 + $0xa0] sm:$0xff] }
  0x84   :  { %8885 = vmatprep.mubr.msk.bf16.mxu1 %vm449_vm0, %v10037_v10  ;;  %v1319_v10 = vld [vmem:[%s15613_s3 + $0x98] sm:$0xff] }
  0x85   :  { %v10854_v15 = vpop.permute.xlu1 %927  ;;  %v10856_v16 = vpop.permute.xlu0 %917 }
  0x86   :  { %1377 = vperm.xlu1 %9940, %v1302_v11   ;;  %1372 = vperm.xlu0 %9939, %v1301_v12   ;;  %v10151_v11 = vld [vmem:[%s15611_s0 + $0xb8] sm:$0xff]   ;;  %v10063_v12 = vld [vmem:[%s15612_s1 + $0x308] ss:$8 sps:$4 sm:$0xff]  }
  0x87   :  { %678 = vmatmul.mubr.bf16.gmra.mrb[48].mxu0 %v10030_v13  ;;  %v10067_v13 = vld [vmem:[%s15612_s1 + $0x31c] ss:$8 sps:$4 sm:$0xff]  }
  0x88   :  { %8630 = vmatprep.mubr.msk.bf16.mxu0 %vm449_vm0, %v10034_v14  ;;  %4821 = vmatpush1.bf16.msra.mxu0 %v10151_v11 }
  0x89   :  { %v10869_v20 = vpop.permute.xlu1 %937  ;;  %v10871_v21 = vpop.permute.xlu0 %932  ;;  %4822 = vmatprep.subr.bf16.mxu0 %v15615_v0 }
  0x8a   :  { %1387 = vperm.xlu1 %9940, %v1304_v17   ;;  %1382 = vperm.xlu0 %9939, %v1303_v18   ;;  %v1322_v18 = vld [vmem:[%s15613_s3 + $0xb0] sm:$0xff] }
  0x8b   :  { %2809 = vmatmul.mubr.bf16.gmra.mrb[48].mxu1 %v10039_v19  ;;  %v1321_v19 = vld [vmem:[%s15613_s3 + $0xa8] sm:$0xff] }
  0x8c   :  { %8886 = vmatprep.mubr.msk.bf16.mxu1 %vm449_vm0, %v10043_v22  ;;  %v10060_v22 = vld [vmem:[%s15612_s1 + $0x110] ss:$8 sps:$4 sm:$0xff]  }
  0x8d   :  { %v10888_v27 = vpop.permute.xlu1 %947  ;;  %v10890_v28 = vpop.permute.xlu0 %942 }
  0x8e   :  { %1397 = vperm.xlu1 %9940, %v1306_v23   ;;  %1392 = vperm.xlu0 %9939, %v1305_v24   ;;  %v10064_v23 = vld [vmem:[%s15612_s1 + $0x124] ss:$8 sps:$4 sm:$0xff]  }
  0x8f   :  { %686 = vmatmul.mubr.bf16.gmra.mrb[52].mxu0 %v10036_v25  ;;  %v10154_v24 = vld [vmem:[%s15611_s0 + $0xc0] sm:$0xff]  }
  0x90   :  { %8631 = vmatprep.mubr.msk.bf16.mxu0 %vm449_vm0, %v10040_v26  ;;  %4823 = vmatpush1.bf16.msra.mxu0 %v10154_v24  ;;  %v1336_v24 = vld [vmem:[%s15613_s3 + $0x120] sm:$0xff] }
  0x91   :  { %v10906_v33 = vpop.permute.xlu1 %957  ;;  %v10908_v34 = vpop.permute.xlu0 %952  ;;  %4824 = vmatprep.subr.bf16.mxu0 %v15615_v0 }
  0x92   :  { %1407 = vperm.xlu1 %9940, %v1308_v29   ;;  %1402 = vperm.xlu0 %9939, %v1307_v30   ;;  %v1324_v29 = vld [vmem:[%s15613_s3 + $0xc0] sm:$0xff]  ;;  %v1323_v30 = vld [vmem:[%s15613_s3 + $0xb8] sm:$0xff] }
  0x93   :  { %2817 = vmatmul.mubr.bf16.gmra.mrb[52].mxu1 %v10045_v31  ;;  %v10069_v31 = vld [vmem:[%s15612_s1 + $0x318] ss:$8 sps:$4 sm:$0xff]  }
  0x94   :  { %8887 = vmatprep.mubr.msk.bf16.mxu1 %vm449_vm0, %v10049_v32  ;;  %v10155_v32 = vld [vmem:[%s15611_s0 + $0xc8] sm:$0xff]  }
  0x95   :  { %v10925_v40 = vpop.permute.xlu1 %967  ;;  %v10927_v41 = vpop.permute.xlu0 %962  ;;  %4825 = vmatpush1.bf16.msra.mxu0 %v10155_v32 }
  0x96   :  { %1417 = vperm.xlu1 %9940, %v1310_v35   ;;  %1412 = vperm.xlu0 %9939, %v1309_v36   ;;  %v10073_v35 = vld [vmem:[%s15612_s1 + $0x32c] ss:$8 sps:$4 sm:$0xff]  }
  0x97   :  { %694 = vmatmul.mubr.bf16.gmra.mrb[56].mxu0 %v10042_v37  ;;  %4826 = vmatprep.subr.bf16.mxu0 %v15615_v0  ;;  %v10117_v0 = vld [vmem:[%s15612_s1 + $0x398] ss:$8 sps:$4 sm:$0xff]  }
  0x98   :  { %8632 = vmatprep.mubr.msk.bf16.mxu0 %vm449_vm0, %v10046_v39  ;;  %v1325_v39 = vld [vmem:[%s15613_s3 + $0xc8] sm:$0xff] }
  0x99   :  { %v10947_v47 = vpop.permute.xlu1 %977  ;;  %v10949_v48 = vpop.permute.xlu0 %972 }
  0x9a   :  { %1427 = vperm.xlu1 %9940, %v1312_v42   ;;  %1422 = vperm.xlu0 %9939, %v1311_v43   ;;  %v10066_v42 = vld [vmem:[%s15612_s1 + $0x120] ss:$8 sps:$4 sm:$0xff]   ;;  %v10157_v43 = vld [vmem:[%s15611_s0 + $0xd0] sm:$0xff]  }
  0x9b   :  { %2825 = vmatmul.mubr.bf16.gmra.mrb[56].mxu1 %v10051_v45  ;;  %4827 = vmatpush1.bf16.msra.mxu0 %v10157_v43  ;;  %v10088_v43 = vld [vmem:[%s15612_s1 + $0x164] ss:$8 sps:$4 sm:$0xff]  }
  0x9c   :  { %8888 = vmatprep.mubr.msk.bf16.mxu1 %vm449_vm0, %v10055_v46 }
  0x9d   :  { %v10967_v54 = vpop.permute.xlu1 %987  ;;  %v10969_v55 = vpop.permute.xlu0 %982 }
  0x9e   :  { %1437 = vperm.xlu1 %9940, %v1314_v49   ;;  %1432 = vperm.xlu0 %9939, %v1313_v50   ;;  %v1328_v49 = vld [vmem:[%s15613_s3 + $0xe0] sm:$0xff]  ;;  %v1327_v50 = vld [vmem:[%s15613_s3 + $0xd8] sm:$0xff] }
  0x9f   :  { %702 = vmatmul.mubr.bf16.gmra.mrb[60].mxu0 %v10048_v51  ;;  %v10075_v51 = vld [vmem:[%s15612_s1 + $0x328] ss:$8 sps:$4 sm:$0xff]  }
  0xa0   :  { %8633 = vmatprep.mubr.msk.bf16.mxu0 %vm449_vm0, %v10052_v53 }
  0xa1   :  { %v10989_v61 = vpop.permute.xlu1 %997  ;;  %v10991_v62 = vpop.permute.xlu0 %992 }
  0xa2   :  { %1447 = vperm.xlu1 %9940, %v1316_v56   ;;  %1442 = vperm.xlu0 %9939, %v1315_v57   ;;  %v1330_v57 = vld [vmem:[%s15613_s3 + $0xf0] sm:$0xff] }
  0xa3   :  { %2833 = vmatmul.mubr.bf16.gmra.mrb[60].mxu1 %v10057_v59  ;;  %v10072_v59 = vld [vmem:[%s15612_s1 + $0x130] ss:$8 sps:$4 sm:$0xff]  }
  0xa4   :  { %8889 = vmatprep.mubr.msk.bf16.mxu1 %vm449_vm0, %v10061_v60  ;;  %v10076_v60 = vld [vmem:[%s15612_s1 + $0x144] ss:$8 sps:$4 sm:$0xff]  }
  0xa5   :  { %v11009_v5 = vpop.permute.xlu1 %1007  ;;  %v11011_v6 = vpop.permute.xlu0 %1002 }
  0xa6   :  { %1457 = vperm.xlu1 %9940, %v1318_v63   ;;  %1452 = vperm.xlu0 %9939, %v1317_v1  }
  0xa7   :  { %710 = vmatmul.mubr.bf16.gmra.mrb[64].mxu0 %v10054_v2  ;;  %v1332_v2 = vld [vmem:[%s15613_s3 + $0x100] sm:$0xff] }
  0xa8   :  { %8634 = vmatprep.mubr.msk.bf16.mxu0 %vm449_vm0, %v10058_v4  ;;  %v10081_v4 = vld [vmem:[%s15612_s1 + $0x338] ss:$8 sps:$4 sm:$0xff]  }
  0xa9   :  { %v11031_v14 = vpop.permute.xlu1 %1017  ;;  %v11033_v17 = vpop.permute.xlu0 %1012 }
  0xaa   :  { %1467 = vperm.xlu1 %9940, %v1320_v7   ;;  %1462 = vperm.xlu0 %9939, %v1319_v10   ;;  %v10085_v7 = vld [vmem:[%s15612_s1 + $0x34c] ss:$8 sps:$4 sm:$0xff]  }
  0xab   :  { %2841 = vmatmul.mubr.bf16.gmra.mrb[64].mxu1 %v10063_v12  ;;  %v1334_v12 = vld [vmem:[%s15613_s3 + $0x110] sm:$0xff] }
  0xac   :  { %8890 = vmatprep.mubr.msk.bf16.mxu1 %vm449_vm0, %v10067_v13  ;;  %v1333_v13 = vld [vmem:[%s15613_s3 + $0x108] sm:$0xff] }
  0xad   :  { %v11051_v25 = vpop.permute.xlu1 %1027  ;;  %v11053_v26 = vpop.permute.xlu0 %1022 }
  0xae   :  { %1477 = vperm.xlu1 %9940, %v1322_v18   ;;  %1472 = vperm.xlu0 %9939, %v1321_v19   ;;  %v10078_v18 = vld [vmem:[%s15612_s1 + $0x140] ss:$8 sps:$4 sm:$0xff]   ;;  %v10082_v19 = vld [vmem:[%s15612_s1 + $0x154] ss:$8 sps:$4 sm:$0xff]  }
  0xaf   :  { %718 = vmatmul.mubr.bf16.gmra.mrb[68].mxu0 %v10060_v22 }
  0xb0   :  { %8635 = vmatprep.mubr.msk.bf16.mxu0 %vm449_vm0, %v10064_v23 }
  0xb1   :  { %v11073_v36 = vpop.permute.xlu1 %1037  ;;  %v11075_v37 = vpop.permute.xlu0 %1032 }
  0xb2   :  { %1487 = vperm.xlu1 %9940, %v1324_v29   ;;  %1482 = vperm.xlu0 %9939, %v1323_v30   ;;  %v1335_v29 = vld [vmem:[%s15613_s3 + $0x118] sm:$0xff]  ;;  %v10087_v30 = vld [vmem:[%s15612_s1 + $0x348] ss:$8 sps:$4 sm:$0xff]  }
  0xb3   :  { %2849 = vmatmul.mubr.bf16.gmra.mrb[68].mxu1 %v10069_v31  ;;  %v10091_v31 = vld [vmem:[%s15612_s1 + $0x35c] ss:$8 sps:$4 sm:$0xff]  }
  0xb4   :  { %8891 = vmatprep.mubr.msk.bf16.mxu1 %vm449_vm0, %v10073_v35 }
  0xb5   :  { %v11093_v45 = vpop.permute.xlu1 %1047  ;;  %v11095_v46 = vpop.permute.xlu0 %1042 }
  0xb6   :  { %1497 = vperm.xlu1 %9940, %v1326_v38   ;;  %1492 = vperm.xlu0 %9939, %v1325_v39   ;;  %v1338_v38 = vld [vmem:[%s15613_s3 + $0x130] sm:$0xff]  ;;  %v1337_v39 = vld [vmem:[%s15613_s3 + $0x128] sm:$0xff] }
  0xb7   :  { %726 = vmatmul.mubr.bf16.gmra.mrb[72].mxu0 %v10066_v42  ;;  %v10084_v42 = vld [vmem:[%s15612_s1 + $0x150] ss:$8 sps:$4 sm:$0xff]  }
  0xb8   :  { %8636 = vmatprep.mubr.msk.bf16.mxu0 %vm449_vm0, %v10070_v44 }
  0xb9   :  { %v11111_v53 = vpop.permute.xlu1 %1057  ;;  %v11113_v56 = vpop.permute.xlu0 %1052 }
  0xba   :  { %1507 = vperm.xlu1 %9940, %v1328_v49   ;;  %1502 = vperm.xlu0 %9939, %v1327_v50   ;;  %v1340_v50 = vld [vmem:[%s15613_s3 + $0x140] sm:$0xff] }
  0xbb   :  { %2857 = vmatmul.mubr.bf16.gmra.mrb[72].mxu1 %v10075_v51  ;;  %v1339_v51 = vld [vmem:[%s15613_s3 + $0x138] sm:$0xff] }
  0xbc   :  { %8892 = vmatprep.mubr.msk.bf16.mxu1 %vm449_vm0, %v10079_v52  ;;  %v10093_v52 = vld [vmem:[%s15612_s1 + $0x358] ss:$8 sps:$4 sm:$0xff]  }
  0xbd   :  { %v11127_v63 = vpop.permute.xlu1 %1067  ;;  %v11129_v1 = vpop.permute.xlu0 %1062 }
  0xbe   :  { %1517 = vperm.xlu1 %9940, %v1330_v57   ;;  %1512 = vperm.xlu0 %9939, %v1329_v58   ;;  %v10097_v57 = vld [vmem:[%s15612_s1 + $0x36c] ss:$8 sps:$4 sm:$0xff]  }
  0xbf   :  { %734 = vmatmul.mubr.bf16.gmra.mrb[76].mxu0 %v10072_v59 }
  0xc0   :  { %8637 = vmatprep.mubr.msk.bf16.mxu0 %vm449_vm0, %v10076_v60  ;;  %v1342_v60 = vld [vmem:[%s15613_s3 + $0x150] sm:$0xff] }
  0xc1   :  { %v11145_v10 = vpop.permute.xlu1 %1077  ;;  %v11147_v11 = vpop.permute.xlu0 %1072 }
  0xc2   :  { %1527 = vperm.xlu1 %9940, %v1332_v2   ;;  %1522 = vperm.xlu0 %9939, %v1331_v3   ;;  %v1341_v2 = vld [vmem:[%s15613_s3 + $0x148] sm:$0xff] }
  0xc3   :  { %2865 = vmatmul.mubr.bf16.gmra.mrb[76].mxu1 %v10081_v4  ;;  %v10090_v3 = vld [vmem:[%s15612_s1 + $0x160] ss:$8 sps:$4 sm:$0xff]   ;;  %v10094_v4 = vld [vmem:[%s15612_s1 + $0x174] ss:$8 sps:$4 sm:$0xff]  }
  0xc4   :  { %8893 = vmatprep.mubr.msk.bf16.mxu1 %vm449_vm0, %v10085_v7 }
  0xc5   :  { %v11161_v22 = vpop.permute.xlu1 %1087  ;;  %v11163_v23 = vpop.permute.xlu0 %1082 }
  0xc6   :  { %1537 = vperm.xlu1 %9940, %v1334_v12   ;;  %1532 = vperm.xlu0 %9939, %v1333_v13   ;;  %v1344_v13 = vld [vmem:[%s15613_s3 + $0x160] sm:$0xff] }
  0xc7   :  { %742 = vmatmul.mubr.bf16.gmra.mrb[80].mxu0 %v10078_v18  ;;  %v1343_v18 = vld [vmem:[%s15613_s3 + $0x158] sm:$0xff] }
  0xc8   :  { %8638 = vmatprep.mubr.msk.bf16.mxu0 %vm449_vm0, %v10082_v19  ;;  %v10099_v19 = vld [vmem:[%s15612_s1 + $0x368] ss:$8 sps:$4 sm:$0xff]  }
  0xc9   :  { %v11179_v32 = vpop.permute.xlu1 %1097  ;;  %v11181_v35 = vpop.permute.xlu0 %1092 }
  0xca   :  { %1547 = vperm.xlu1 %9940, %v1336_v24   ;;  %1542 = vperm.xlu0 %9939, %v1335_v29   ;;  %v10103_v24 = vld [vmem:[%s15612_s1 + $0x37c] ss:$8 sps:$4 sm:$0xff]  }
  0xcb   :  { %2873 = vmatmul.mubr.bf16.gmra.mrb[80].mxu1 %v10087_v30 }
  0xcc   :  { %8894 = vmatprep.mubr.msk.bf16.mxu1 %vm449_vm0, %v10091_v31  ;;  %v1346_v31 = vld [vmem:[%s15613_s3 + $0x170] sm:$0xff] }
  0xcd   :  { %v11195_v44 = vpop.permute.xlu1 %1107  ;;  %v11197_v49 = vpop.permute.xlu0 %1102 }
  0xce   :  { %1557 = vperm.xlu1 %9940, %v1338_v38   ;;  %1552 = vperm.xlu0 %9939, %v1337_v39   ;;  %v1345_v38 = vld [vmem:[%s15613_s3 + $0x168] sm:$0xff]  ;;  %v10096_v39 = vld [vmem:[%s15612_s1 + $0x170] ss:$8 sps:$4 sm:$0xff]  }
  0xcf   :  { %750 = vmatmul.mubr.bf16.gmra.mrb[84].mxu0 %v10084_v42  ;;  %v10100_v42 = vld [vmem:[%s15612_s1 + $0x184] ss:$8 sps:$4 sm:$0xff]  }
  0xd0   :  { %8639 = vmatprep.mubr.msk.bf16.mxu0 %vm449_vm0, %v10088_v43 }
  0xd1   :  { %v11213_v58 = vpop.permute.xlu1 %1117  ;;  %v11215_v59 = vpop.permute.xlu0 %1112 }
  0xd2   :  { %1567 = vperm.xlu1 %9940, %v1340_v50   ;;  %1562 = vperm.xlu0 %9939, %v1339_v51   ;;  %v1348_v51 = vld [vmem:[%s15613_s3 + $0x180] sm:$0xff] }
  0xd3   :  { %2881 = vmatmul.mubr.bf16.gmra.mrb[84].mxu1 %v10093_v52  ;;  %v1347_v52 = vld [vmem:[%s15613_s3 + $0x178] sm:$0xff] }
  0xd4   :  { %8895 = vmatprep.mubr.msk.bf16.mxu1 %vm449_vm0, %v10097_v57  ;;  %v10105_v57 = vld [vmem:[%s15612_s1 + $0x378] ss:$8 sps:$4 sm:$0xff]  }
  0xd5   :  { %v11229_v7 = vpop.permute.xlu1 %1127  ;;  %v11231_v12 = vpop.permute.xlu0 %1122 }
  0xd6   :  { %1577 = vperm.xlu1 %9940, %v1342_v60   ;;  %1572 = vperm.xlu0 %9939, %v1341_v2  }
  0xd7   :  { %758 = vmatmul.mubr.bf16.gmra.mrb[88].mxu0 %v10090_v3  ;;  %v10109_v3 = vld [vmem:[%s15612_s1 + $0x38c] ss:$8 sps:$4 sm:$0xff]  }
  0xd8   :  { %8640 = vmatprep.mubr.msk.bf16.mxu0 %vm449_vm0, %v10094_v4  ;;  %v1350_v4 = vld [vmem:[%s15613_s3 + $0x190] sm:$0xff] }
  0xd9   :  { %v11247_v29 = vpop.permute.xlu1 %1137  ;;  %v11249_v30 = vpop.permute.xlu0 %1132 }
  0xda   :  { %1587 = vperm.xlu1 %9940, %v1344_v13   ;;  %1582 = vperm.xlu0 %9939, %v1343_v18   ;;  %v1349_v13 = vld [vmem:[%s15613_s3 + $0x188] sm:$0xff] }
  0xdb   :  { %2889 = vmatmul.mubr.bf16.gmra.mrb[88].mxu1 %v10099_v19  ;;  %v10102_v18 = vld [vmem:[%s15612_s1 + $0x180] ss:$8 sps:$4 sm:$0xff]   ;;  %v10106_v19 = vld [vmem:[%s15612_s1 + $0x194] ss:$8 sps:$4 sm:$0xff]  }
  0xdc   :  { %8896 = vmatprep.mubr.msk.bf16.mxu1 %vm449_vm0, %v10103_v24 }
  0xdd   :  { %v11263_v43 = vpop.permute.xlu1 %1147  ;;  %v11265_v50 = vpop.permute.xlu0 %1142 }
  0xde   :  { %15617 = vst [vmem:[#allocation2_spill] sm:$0xff] %v11263_v43  ;;  %15618 = vst [vmem:[#allocation3_spill] sm:$0xff] %v11265_v50  ;;  %1597 = vperm.xlu1 %9940, %v1346_v31   ;;  %1592 = vperm.xlu0 %9939, %v1345_v38   ;;  %v1352_v38 = vld [vmem:[%s15613_s3 + $0x1a0] sm:$0xff]  ;;  %v2978_v43 = vld [vmem:[%s15610_s2 + $0x10] sm:$0xff] }
  0xdf   :  { %766 = vmatmul.mubr.bf16.gmra.mrb[92].mxu0 %v10096_v39  ;;  %v1351_v39 = vld [vmem:[%s15613_s3 + $0x198] sm:$0xff] }
  0xe0   :  { %8641 = vmatprep.mubr.msk.bf16.mxu0 %vm449_vm0, %v10100_v42  ;;  %v10111_v42 = vld [vmem:[%s15612_s1 + $0x388] ss:$8 sps:$4 sm:$0xff]  }
  0xe1   :  { %v11278_v60 = vpop.permute.xlu1 %1157  ;;  %v11280_v2 = vpop.permute.xlu0 %1152 }
  0xe2   :  { %15619 = vst [vmem:[#allocation4_spill] sm:$0xff] %v11278_v60  ;;  %15620 = vst [vmem:[#allocation5_spill] sm:$0xff] %v11280_v2  ;;  %1607 = vperm.xlu1 %9940, %v1348_v51   ;;  %1602 = vperm.xlu0 %9939, %v1347_v52  }
  0xe3   :  { %2897 = vmatmul.mubr.bf16.gmra.mrb[92].mxu1 %v10105_v57  ;;  %v10115_v57 = vld [vmem:[%s15612_s1 + $0x39c] ss:$8 sps:$4 sm:$0xff]  }
  0xe4   :  { %8897 = vmatprep.mubr.msk.bf16.mxu1 %vm449_vm0, %v10109_v3  ;;  %v1354_v3 = vld [vmem:[%s15613_s3 + $0x1b0] sm:$0xff] }
  0xe5   :  { %v11297_v24 = vpop.permute.xlu1 %1167  ;;  %v11299_v31 = vpop.permute.xlu0 %1162 }
  0xe6   :  { %15621 = vst [vmem:[#allocation6_spill] sm:$0xff] %v11297_v24  ;;  %15622 = vst [vmem:[#allocation7_spill] sm:$0xff] %v11299_v31  ;;  %1617 = vperm.xlu1 %9940, %v1350_v4   ;;  %1612 = vperm.xlu0 %9939, %v1349_v13   ;;  %v1353_v4 = vld [vmem:[%s15613_s3 + $0x1a8] sm:$0xff]  ;;  %v10108_v13 = vld [vmem:[%s15612_s1 + $0x190] ss:$8 sps:$4 sm:$0xff]  }
  0xe7   :  { %774 = vmatmul.mubr.bf16.gmra.mrb[96].mxu0 %v10102_v18  ;;  %v10112_v18 = vld [vmem:[%s15612_s1 + $0x1a4] ss:$8 sps:$4 sm:$0xff]  }
  0xe8   :  { %8642 = vmatprep.mubr.msk.bf16.mxu0 %vm449_vm0, %v10106_v19 }
  0xe9   :  { %v11312_v51 = vpop.permute.xlu1 %1177  ;;  %v11314_v52 = vpop.permute.xlu0 %1172 }
  0xea   :  { %15623 = vst [vmem:[#allocation8_spill] sm:$0xff] %v11312_v51  ;;  %15624 = vst [vmem:[#allocation9_spill] sm:$0xff] %v11314_v52  ;;  %1627 = vperm.xlu1 %9940, %v1352_v38   ;;  %1622 = vperm.xlu0 %9939, %v1351_v39   ;;  %v1356_v39 = vld [vmem:[%s15613_s3 + $0x1c0] sm:$0xff]  ;;  %v8769_v51 = vld [vmem:[%s15612_s1 + $0x3b8] sm:$0xff] }
  0xeb   :  { %2905 = vmatmul.mubr.bf16.gmra.mrb[96].mxu1 %v10111_v42  ;;  %v1355_v42 = vld [vmem:[%s15613_s3 + $0x1b8] sm:$0xff]  ;;  %v8770_v52 = vld [vmem:[%s15612_s1 + $0x3c0] sm:$0xff] }
  0xec   :  { %8898 = vmatprep.mubr.msk.bf16.mxu1 %vm449_vm0, %v10115_v57  ;;  %v8852_v31 = vcombine.low %v8769_v51, %v8770_v52  ;;  %v10126_v51 = vld [vmem:[%s15612_s1 + $0x1c0] ss:$8 sps:$4 sm:$0xff]  }
  0xed   :  { %v11331_v19 = vpop.permute.xlu1 %1187  ;;  %v11333_v38 = vpop.permute.xlu0 %1182 }
  0xee   :  { %15625 = vst [vmem:[#allocation10_spill] sm:$0xff] %v11331_v19  ;;  %15626 = vst [vmem:[#allocation11_spill] sm:$0xff] %v11333_v38  ;;  %1637 = vperm.xlu1 %9940, %v1354_v3   ;;  %1632 = vperm.xlu0 %9939, %v1353_v4   ;;  %v10121_v3 = vld [vmem:[%s15612_s1 + $0x3ac] ss:$8 sps:$4 sm:$0xff]  }
  0xef   :  { %782 = vmatmul.mubr.bf16.gmra.mrb[100].mxu0 %v10108_v13  ;;  %v1358_v4 = vld [vmem:[%s15613_s3 + $0x1d0] sm:$0xff]  ;;  %v1357_v13 = vld [vmem:[%s15613_s3 + $0x1c8] sm:$0xff] }
  0xf0   :  { %8643 = vmatprep.mubr.msk.bf16.mxu0 %vm449_vm0, %v10112_v18  ;;  %v10114_v18 = vld [vmem:[%s15612_s1 + $0x1a0] ss:$8 sps:$4 sm:$0xff]  }
  0xf1   :  { %v11346_v19 = vpop.permute.xlu1 %1197  ;;  %v11348_v57 = vpop.permute.xlu0 %1192  ;;  %v1361_v38 = vld [vmem:[%s15613_s3 + $0x1e8] sm:$0xff] }
  0xf2   :  { %15627 = vst [vmem:[#allocation12_spill] sm:$0xff] %v11346_v19  ;;  %15628 = vst [vmem:[#allocation13_spill] sm:$0xff] %v11348_v57  ;;  %1647 = vperm.xlu1 %9940, %v1356_v39   ;;  %1642 = vperm.xlu0 %9939, %v1355_v42   ;;  %v10118_v19 = vld [vmem:[%s15612_s1 + $0x1b4] ss:$8 sps:$4 sm:$0xff]   ;;  %v1360_v42 = vld [vmem:[%s15613_s3 + $0x1e0] sm:$0xff] }
  0xf3   :  { %2913 = vmatmul.mubr.bf16.gmra.mrb[100].mxu1 %v10117_v0  ;;  %v1359_v0 = vld [vmem:[%s15613_s3 + $0x1d8] sm:$0xff] }
  0xf4   :  { %8899 = vmatprep.mubr.msk.bf16.mxu1 %vm449_vm0, %v10121_v3 }
  0xf5   :  { %v11365_v57 = vpop.permute.xlu1 %1207  ;;  %v11367_v39 = vpop.permute.xlu0 %1202 }
  0xf6   :  { %15629 = vst [vmem:[#allocation14_spill] sm:$0xff] %v11365_v57  ;;  %15630 = vst [vmem:[#allocation15_spill] sm:$0xff] %v11367_v39  ;;  %1657 = vperm.xlu1 %9940, %v1358_v4   ;;  %1652 = vperm.xlu0 %9939, %v1357_v13   ;;  %v10123_v57 = vld [vmem:[%s15612_s1 + $0x3a8] ss:$8 sps:$4 sm:$0xff]   ;;  %v10127_v4 = vld [vmem:[%s15612_s1 + $0x3bc] ss:$8 sps:$4 sm:$0xff]  }
  0xf7   :  { %790 = vmatmul.mubr.bf16.gmra.mrb[104].mxu0 %v10114_v18 }
  0xf8   :  { %8644 = vmatprep.mubr.msk.bf16.mxu0 %vm449_vm0, %v10118_v19  ;;  %v1362_v19 = vld [vmem:[%s15613_s3 + $0x1f0] sm:$0xff] }
  0xf9   :  { %v11380_v39 = vpop.permute.xlu1 %1217  ;;  %v11382_v3 = vpop.permute.xlu0 %1212 }
  0xfa   :  { %15631 = vst [vmem:[#allocation16_spill] sm:$0xff] %v11380_v39  ;;  %15632 = vst [vmem:[#allocation17_spill] sm:$0xff] %v11382_v3  ;;  %1667 = vperm.xlu1 %9940, %v1360_v42   ;;  %1662 = vperm.xlu0 %9939, %v1359_v0   ;;  %v583_v13 = vpop.f32.mrb[0].mxu0  ;;  %v10120_v39 = vld [vmem:[%s15612_s1 + $0x1b0] ss:$8 sps:$4 sm:$0xff]  }
  0xfb   :  { %v585_v18 = vpop.f32.mrb[1].mxu0  ;;  %2921 = vmatmul.mubr.bf16.gmra.mrb[104].mxu1 %v10123_v57  ;;  %v10124_v42 = vld [vmem:[%s15612_s1 + $0x1c4] ss:$8 sps:$4 sm:$0xff]   ;;  %v1235_v24 = vmul.f32 %v10837_v9, %v583_v13 }
  0xfc   :  { %v586_v3 = vpop.f32.mrb[2].mxu0  ;;  %8900 = vmatprep.mubr.msk.bf16.mxu1 %vm449_vm0, %v10127_v4  ;;  %v2976_v9 = vld [vmem:[%s15610_s2] sm:$0xff] }
  0xfd   :  { %v11399_v0 = vpop.permute.xlu1 %1227  ;;  %v11401_v18 = vpop.permute.xlu0 %1222  ;;  %v1236_v52 = vmul.f32 %v10856_v16, %v586_v3  ;;  %v8772_v16 = vld [vmem:[%s15612_s1 + $0x3d0] sm:$0xff] }
  0xfe   :  { %15633 = vst [vmem:[#allocation18_spill] sm:$0xff] %v11399_v0  ;;  %15634 = vst [vmem:[#allocation19_spill] sm:$0xff] %v11401_v18  ;;  %1677 = vperm.xlu1 %9940, %v1362_v19   ;;  %1672 = vperm.xlu0 %9939, %v1361_v38   ;;  %v588_v57 = vpop.f32.mrb[3].mxu0  ;;  %v1364_v0 = vld [vmem:[%s15613_s3 + $0x200] sm:$0xf]  ;;  %v1363_v18 = vld [vmem:[%s15613_s3 + $0x1f8] sm:$0xff] }
  0xff   :  { %798 = vmatmul.mubr.bf16.gmra.mrb[108].mxu0 %v10120_v39  ;;  %v10132_v38 = vld [vmem:[%s15612_s1 + $0x3cc] ss:$8 sps:$4 sm:$0xff]  }
 0x100   :  { %8645 = vmatprep.mubr.msk.bf16.mxu0 %vm449_vm0, %v10124_v42  ;;  %v2977_v57 = vld [vmem:[%s15610_s2 + $0x8] sm:$0xff]  ;;  %v10129_v42 = vld [vmem:[%s15612_s1 + $0x1d4] ss:$8 sps:$4 sm:$0xff]  }
 0x101   :  { %v1368_v60 = vpop.permute.xlu1 %1367  ;;  %v11418_v2 = vpop.permute.xlu0 %1232 }
 0x102   :  { %15635 = vst [vmem:[#allocation20_spill] sm:$0xff] %v11418_v2  ;;  %v1690_v39 = vadd.f32 %v1368_v60, %v1235_v24  ;;  %1687 = vperm.xlu1 %9940, %v1364_v0   ;;  %1682 = vperm.xlu0 %9939, %v1363_v18   ;;  %v591_v4 = vpop.f32.mrb[4].mxu0  ;;  %v11437_v0 = vpop.f32.mrb[0].mxu1  ;;  %v8771_v2 = vld [vmem:[%s15612_s1 + $0x3c8] sm:$0xff] }
 0x103   :  { %v593_v19 = vpop.f32.mrb[5].mxu0  ;;  %v1237_v60 = vmul.f32 %v10835_v8, %v591_v4  ;;  %2929 = vmatmul.mubr.bf16.gmra.mrb[108].mxu1 %v8852_v31  ;;  %15636 = vst [vmem:[#allocation21_spill] sm:$0xff] %v11437_v0  ;;  %v2716_v4 = vpop.f32.mrb[1].mxu1  ;;  %v2979_v0 = vld [vmem:[%s15610_s2 + $0x18] sm:$0xff] }
 0x104   :  { %v1755_v13 = vmax.f32 %v1690_v39, 0.0  ;;  %v594_v24 = vpop.f32.mrb[6].mxu0  ;;  %8901 = vmatprep.mubr.msk.bf16.mxu1 %vm449_vm0, %v10132_v38  ;;  %v11452_v50 = vpop.f32.mrb[2].mxu1 }
 0x105   :  { %v1378_v18 = vpop.permute.xlu1 %1377  ;;  %v1373_v19 = vpop.permute.xlu0 %1372  ;;  %15637 = vst [vmem:[#allocation22_spill] sm:$0xff] %v11452_v50  ;;  %v1238_v38 = vmul.f32 %v10854_v15, %v594_v24 }
 0x106   :  { %v9678_v8 = vpack.c.bf16 %v1755_v13, %v1755_v13  ;;  %v1692_v31 = vadd.f32 %v1378_v18, %v1237_v60  ;;  %v1691_v3 = vadd.f32 %v1373_v19, %v1236_v52  ;;  %3048 = vperm.xlu1 %9940, %v2977_v57   ;;  %3043 = vperm.xlu0 %9939, %v2976_v9   ;;  %v596_v39 = vpop.f32.mrb[7].mxu0  ;;  %v2719_v52 = vpop.f32.mrb[3].mxu1  ;;  %v10139_v18 = vld [vmem:[%s15612_s1 + $0x3dc] ss:$8 sps:$4 sm:$0xff]  }
 0x107   :  { %806 = vmatmul.mubr.bf16.gmra.mrb[112].mxu0 %v10126_v51  ;;  %v8854_v51 = vcombine.low %v8771_v2, %v8772_v16  ;;  %v11463_v50 = vpop.f32.mrb[4].mxu1  ;;  %v2981_v2 = vld [vmem:[%s15610_s2 + $0x28] sm:$0xff]  ;;  %v10131_v16 = vld [vmem:[%s15612_s1 + $0x1d0] ss:$8 sps:$4 sm:$0xff]  }
 0x108   :  { %2082 = vst.msk [vmem:[%s15614_s4] sm:$0xf] %vm2081_vm1, %v9678_v8  ;;  %v1757_v57 = vmax.f32 %v1692_v31, 0.0  ;;  %v1756_v9 = vmax.f32 %v1691_v3, 0.0  ;;  %8646 = vmatprep.mubr.msk.bf16.mxu0 %vm449_vm0, %v10129_v42  ;;  %v2980_v42 = vld [vmem:[%s15610_s2 + $0x20] sm:$0xff] }
 0x109   :  { %v1388_v13 = vpop.permute.xlu1 %1387  ;;  %v1383_v60 = vpop.permute.xlu0 %1382  ;;  %v10135_v31 = vld [vmem:[%s15612_s1 + $0x1e4] ss:$8 sps:$4 sm:$0xff]  }
 0x10a   :  { %v9680_v19 = vpack.c.bf16 %v1757_v57, %v1757_v57  ;;  %v9679_v39 = vpack.c.bf16 %v1756_v9, %v1756_v9  ;;  %v1693_v4 = vadd.f32 %v1383_v60, %v1238_v38  ;;  %3058 = vperm.xlu1 %9940, %v2979_v0   ;;  %3053 = vperm.xlu0 %9939, %v2978_v43   ;;  %v599_v8 = vpop.f32.mrb[8].mxu0  ;;  %v2724_v0 = vpop.f32.mrb[5].mxu1  ;;  %v8773_v60 = vld [vmem:[%s15612_s1 + $0x3d8] sm:$0xff] }
 0x10b   :  { %v1239_v15 = vmul.f32 %v10871_v21, %v599_v8  ;;  %v601_v24 = vpop.f32.mrb[9].mxu0  ;;  %2937 = vmatmul.mubr.bf16.gmra.mrb[112].mxu1 %v8854_v51  ;;  %v11486_v3 = vpop.f32.mrb[6].mxu1 }
 0x10c   :  { %2084 = vst.msk [vmem:[%s15614_s4 + $0x8] sm:$0xf] %vm2081_vm1, %v9680_v19  ;;  %2083 = vst.msk [vmem:[%s15614_s4 + $0x4] sm:$0xf] %vm2081_vm1, %v9679_v39  ;;  %v1758_v21 = vmax.f32 %v1693_v4, 0.0  ;;  %v602_v43 = vpop.f32.mrb[10].mxu0  ;;  %8902 = vmatprep.mubr.msk.bf16.mxu1 %vm449_vm0, %v10139_v18 }
 0x10d   :  { %v1694_v38 = vadd.f32 %v1388_v13, %v1239_v15  ;;  %v1240_v57 = vmul.f32 %v10869_v20, %v602_v43  ;;  %v1398_v9 = vpop.permute.xlu1 %1397  ;;  %v1393_v52 = vpop.permute.xlu0 %1392  ;;  %v8774_v19 = vld [vmem:[%s15612_s1 + $0x3e0] sm:$0xff]  ;;  %v2983_v20 = vld [vmem:[%s15610_s2 + $0x38] sm:$0xff]  ;;  %v2982_v15 = vld [vmem:[%s15610_s2 + $0x30] sm:$0xff] }
 0x10e   :  { %v9681_v51 = vpack.c.bf16 %v1758_v21, %v1758_v21  ;;  %3068 = vperm.xlu1 %9940, %v2981_v2   ;;  %3063 = vperm.xlu0 %9939, %v2980_v42   ;;  %v604_v39 = vpop.f32.mrb[11].mxu0  ;;  %v2727_v4 = vpop.f32.mrb[7].mxu1  ;;  %v8856_v18 = vcombine.low %v8773_v60, %v8774_v19  ;;  %v10146_v43 = vld [vmem:[%s15612_s1 + $0x3ec] ss:$8 sps:$4 sm:$0xff]  }
 0x10f   :  { %v1759_v13 = vmax.f32 %v1694_v38, 0.0  ;;  %v1695_v8 = vadd.f32 %v1393_v52, %v1240_v57  ;;  %814 = vmatmul.mubr.bf16.gmra.mrb[116].mxu0 %v10131_v16  ;;  %v11502_v24 = vpop.f32.mrb[8].mxu1  ;;  %v2985_v19 = vld [vmem:[%s15610_s2 + $0x48] sm:$0xff] }
 0x110   :  { %2085 = vst.msk [vmem:[%s15614_s4 + $0xc] sm:$0xf] %vm2081_vm1, %v9681_v51  ;;  %8647 = vmatprep.mubr.msk.bf16.mxu0 %vm449_vm0, %v10135_v31  ;;  %v2732_v2 = vpop.f32.mrb[9].mxu1  ;;  %v2984_v51 = vld [vmem:[%s15610_s2 + $0x40] sm:$0xff] }
 0x111   :  { %v9682_v42 = vpack.c.bf16 %v1759_v13, %v1759_v13  ;;  %v1760_v16 = vmax.f32 %v1695_v8, 0.0  ;;  %v1408_v0 = vpop.permute.xlu1 %1407  ;;  %v1403_v21 = vpop.permute.xlu0 %1402  ;;  %v10137_v39 = vld [vmem:[%s15612_s1 + $0x1e0] ss:$8 sps:$4 sm:$0xff]  }
 0x112   :  { %3078 = vperm.xlu1 %9940, %v2983_v20   ;;  %3073 = vperm.xlu0 %9939, %v2982_v15   ;;  %v607_v38 = vpop.f32.mrb[12].mxu0  ;;  %v11512_v57 = vpop.f32.mrb[10].mxu1 }
 0x113   :  { %2086 = vst.msk [vmem:[%s15614_s4 + $0x10] sm:$0xf] %vm2081_vm1, %v9682_v42  ;;  %v9683_v31 = vpack.c.bf16 %v1760_v16, %v1760_v16  ;;  %v1241_v52 = vmul.f32 %v10890_v28, %v607_v38  ;;  %v609_v60 = vpop.f32.mrb[13].mxu0  ;;  %v2735_v4 = vpop.f32.mrb[11].mxu1  ;;  %2945 = vmatmul.mubr.bf16.gmra.mrb[116].mxu1 %v8856_v18  ;;  %v10142_v28 = vld [vmem:[%s15612_s1 + $0x1f4] ss:$8 sps:$4 sm:$0xff]  }
 0x114   :  { %v610_v13 = vpop.f32.mrb[14].mxu0  ;;  %v8775_v42 = vld [vmem:[%s15612_s1 + $0x3e8] sm:$0xff]  ;;  %v8776_v18 = vld [vmem:[%s15612_s1 + $0x3f0] sm:$0xff]  ;;  %8903 = vmatprep.mubr.msk.bf16.mxu1 %vm449_vm0, %v10146_v43 }
 0x115   :  { %2087 = vst.msk [vmem:[%s15614_s4 + $0x14] sm:$0xf] %vm2081_vm1, %v9683_v31  ;;  %v1696_v8 = vadd.f32 %v1398_v9, %v1241_v52  ;;  %v1242_v20 = vmul.f32 %v10888_v27, %v610_v13  ;;  %v11536_v15 = vpop.permute.xlu1 %1417  ;;  %v1413_v2 = vpop.permute.xlu0 %1412  ;;  %v2987_v27 = vld [vmem:[%s15610_s2 + $0x58] sm:$0xff]  ;;  %v2986_v31 = vld [vmem:[%s15610_s2 + $0x50] sm:$0xff]  ;;  %v8858_v60 = vcombine.low %v8775_v42, %v8776_v18 }
 0x116   :  { %3088 = vperm.xlu1 %9940, %v2985_v19   ;;  %3083 = vperm.xlu0 %9939, %v2984_v51   ;;  %v612_v16 = vpop.f32.mrb[15].mxu0  ;;  %v11551_v52 = vpop.f32.mrb[12].mxu1  ;;  %v10152_v13 = vld [vmem:[%s15612_s1 + $0x3fc] ss:$8 sps:$4 sm:$0xff]  }
 0x117   :  { %v1761_v38 = vmax.f32 %v1696_v8, 0.0  ;;  %v1697_v9 = vadd.f32 %v1403_v21, %v1242_v20  ;;  %822 = vmatmul.mubr.bf16.gmra.mrb[120].mxu0 %v10137_v39  ;;  %15638 = vst [vmem:[#allocation23_spill] sm:$0xff] %v11551_v52  ;;  %v2740_v43 = vpop.f32.mrb[13].mxu1  ;;  %v11561_v39 = vld [vmem:[%s15612_s1 + $0x200] sm:$0x33]  ;;  %v2989_v16 = vld [vmem:[%s15610_s2 + $0x68] sm:$0xff] }
 0x118   :  { %8648 = vmatprep.mubr.msk.bf16.mxu0 %vm449_vm0, %v10142_v28  ;;  %v11566_v8 = vpop.f32.mrb[14].mxu1  ;;  %v8607_v43 = vcombine.high %v11561_v39, %v11561_v39 }
 0x119   :  { %v9684_v19 = vpack.c.bf16 %v1761_v38, %v1761_v38  ;;  %v1762_v51 = vmax.f32 %v1697_v9, 0.0  ;;  %v11554_v4 = vpop.permute.xlu1 %1427  ;;  %v11556_v21 = vpop.permute.xlu0 %1422  ;;  %15639 = vst [vmem:[#allocation24_spill] sm:$0xff] %v11566_v8  ;;  %v2988_v38 = vld [vmem:[%s15610_s2 + $0x60] sm:$0xff]  ;;  %v10144_v9 = vld [vmem:[%s15612_s1 + $0x1f0] ss:$8 sps:$4 sm:$0xff]  }
 0x11a   :  { %3098 = vperm.xlu1 %9940, %v2987_v27   ;;  %3093 = vperm.xlu0 %9939, %v2986_v31   ;;  %v615_v28 = vpop.f32.mrb[16].mxu0  ;;  %v2743_v27 = vpop.f32.mrb[15].mxu1 }
 0x11b   :  { %2088 = vst.msk [vmem:[%s15614_s4 + $0x18] sm:$0xf] %vm2081_vm1, %v9684_v19  ;;  %v9685_v20 = vpack.c.bf16 %v1762_v51, %v1762_v51  ;;  %v1243_v42 = vmul.f32 %v10908_v34, %v615_v28  ;;  %v617_v18 = vpop.f32.mrb[17].mxu0  ;;  %2953 = vmatmul.mubr.bf16.gmra.mrb[120].mxu1 %v8858_v60  ;;  %v8778_v60 = vld [vmem:[%s15612_s1 + $0x400] sm:$0xff]  ;;  %v2991_v27 = vld [vmem:[%s15610_s2 + $0x78] sm:$0xff] }
 0x11c   :  { %v618_v31 = vpop.f32.mrb[18].mxu0  ;;  %v8777_v18 = vld [vmem:[%s15612_s1 + $0x3f8] sm:$0xff]  ;;  %8904 = vmatprep.mubr.msk.bf16.mxu1 %vm449_vm0, %v10152_v13 }
 0x11d   :  { %2089 = vst.msk [vmem:[%s15614_s4 + $0x1c] sm:$0xf] %vm2081_vm1, %v9685_v20  ;;  %v1698_v34 = vadd.f32 %v1408_v0, %v1243_v42  ;;  %v1244_v19 = vmul.f32 %v10906_v33, %v618_v31  ;;  %v11589_v51 = vpop.permute.xlu1 %1437  ;;  %v11591_v28 = vpop.permute.xlu0 %1432  ;;  %v11603_v33 = vld [vmem:[%s15612_s1 + $0x408] sm:$0x33]  ;;  %v2990_v31 = vld [vmem:[%s15610_s2 + $0x70] sm:$0xff] }
 0x11e   :  { %3108 = vperm.xlu1 %9940, %v2989_v16   ;;  %3103 = vperm.xlu0 %9939, %v2988_v38   ;;  %v620_v20 = vpop.f32.mrb[19].mxu0  ;;  %v11611_v13 = vpop.f32.mrb[16].mxu1  ;;  %v8860_v16 = vcombine.low %v8777_v18, %v8778_v60 }
 0x11f   :  { %v1763_v0 = vmax.f32 %v1698_v34, 0.0  ;;  %v1699_v42 = vadd.f32 %v1413_v2, %v1244_v19  ;;  %830 = vmatmul.mubr.bf16.gmra.mrb[124].mxu0 %v10144_v9  ;;  %v2748_v38 = vpop.f32.mrb[17].mxu1  ;;  %v8863_v9 = vcombine.high %v11603_v33, %v11603_v33 }
 0x120   :  { %8649 = vmatprep.mubr.msk.bf16.mxu0 %vm449_vm0, %v8607_v43  ;;  %v11620_v19 = vpop.f32.mrb[18].mxu1 }
 0x121   :  { %v9686_v20 = vpack.c.bf16 %v1763_v0, %v1763_v0  ;;  %v1764_v8 = vmax.f32 %v1699_v42, 0.0  ;;  %v11614_v52 = vpop.permute.xlu1 %1447  ;;  %v11616_v2 = vpop.permute.xlu0 %1442  ;;  %15640 = vst [vmem:[#allocation25_spill] sm:$0xff] %v11620_v19  ;;  %v2993_v0 = vld [vmem:[%s15610_s2 + $0x88] sm:$0xff]  ;;  %v2992_v42 = vld [vmem:[%s15610_s2 + $0x80] sm:$0xff]  ;;  %v3035_v19 = vld [vmem:[%s15610_s2 + $0x1d8] sm:$0xff] }
 0x122   :  { %3118 = vperm.xlu1 %9940, %v2991_v27   ;;  %3113 = vperm.xlu0 %9939, %v2990_v31   ;;  %v623_v34 = vpop.f32.mrb[20].mxu0  ;;  %v8606_v27 = vcombine.low %v11561_v39, %v11561_v39  ;;  %v2751_v31 = vpop.f32.mrb[19].mxu1 }
 0x123   :  { %2090 = vst.msk [vmem:[%s15614_s4 + $0x20] sm:$0xf] %vm2081_vm1, %v9686_v20  ;;  %v9687_v43 = vpack.c.bf16 %v1764_v8, %v1764_v8  ;;  %v1245_v18 = vmul.f32 %v10927_v41, %v623_v34  ;;  %v625_v60 = vpop.f32.mrb[21].mxu0  ;;  %2961 = vmatmul.mubr.bf16.gmra.mrb[124].mxu1 %v8860_v16  ;;  %v10160_v8 = vld [vmem:[%s15612_s1 + $0x414] ss:$8 sps:$4 sm:$0xff]  }
 0x124   :  { %v626_v38 = vpop.f32.mrb[22].mxu0  ;;  %8905 = vmatprep.mubr.msk.bf16.mxu1 %vm449_vm0, %v8863_v9  ;;  %v8862_v9 = vcombine.low %v11603_v33, %v11603_v33 }
 0x125   :  { %2091 = vst.msk [vmem:[%s15614_s4 + $0x24] sm:$0xf] %vm2081_vm1, %v9687_v43  ;;  %v1700_v41 = vadd.f32 %v11536_v15, %v1245_v18  ;;  %v1246_v20 = vmul.f32 %v10925_v40, %v626_v38  ;;  %v11644_v34 = vpop.permute.xlu1 %1457  ;;  %v11646_v60 = vpop.permute.xlu0 %1452  ;;  %v2995_v43 = vld [vmem:[%s15610_s2 + $0x98] sm:$0xff]  ;;  %v2994_v40 = vld [vmem:[%s15610_s2 + $0x90] sm:$0xff] }
 0x126   :  { %3128 = vperm.xlu1 %9940, %v2993_v0   ;;  %3123 = vperm.xlu0 %9939, %v2992_v42   ;;  %v628_v39 = vpop.f32.mrb[23].mxu0  ;;  %v11656_v15 = vpop.f32.mrb[20].mxu1 }
 0x127   :  { %v1765_v16 = vmax.f32 %v1700_v41, 0.0  ;;  %v1701_v31 = vadd.f32 %v11556_v21, %v1246_v20  ;;  %838 = vmatmul.mubr.bf16.gmra.mrb[128].mxu0 %v8606_v27  ;;  %15641 = vst [vmem:[#allocation26_spill] sm:$0xff] %v11656_v15  ;;  %v2756_v18 = vpop.f32.mrb[21].mxu1  ;;  %v2997_v39 = vld [vmem:[%s15610_s2 + $0xa8] sm:$0xff]  ;;  %v3007_v15 = vld [vmem:[%s15610_s2 + $0xf8] sm:$0xff] }
 0x128   :  { %9194 = vmatprep.mubr.msk.bf16.mxu0 %vm449_vm0, %v10160_v8  ;;  %v11665_v41 = vpop.f32.mrb[22].mxu1 }
 0x129   :  { %v9688_v0 = vpack.c.bf16 %v1765_v16, %v1765_v16  ;;  %v1766_v42 = vmax.f32 %v1701_v31, 0.0  ;;  %v11661_v21 = vpop.permute.xlu1 %1467  ;;  %v11663_v27 = vpop.permute.xlu0 %1462  ;;  %15642 = vst [vmem:[#allocation27_spill] sm:$0xff] %v11665_v41  ;;  %v2996_v16 = vld [vmem:[%s15610_s2 + $0xa0] sm:$0xff]  ;;  %v10158_v31 = vld [vmem:[%s15612_s1 + $0x410] ss:$8 sps:$4 sm:$0xff]  }
 0x12a   :  { %3138 = vperm.xlu1 %9940, %v2995_v43   ;;  %3133 = vperm.xlu0 %9939, %v2994_v40   ;;  %v631_v38 = vpop.f32.mrb[24].mxu0  ;;  %v2759_v43 = vpop.f32.mrb[23].mxu1  ;;  %v2999_v41 = vld [vmem:[%s15610_s2 + $0xb8] sm:$0xff] }
 0x12b   :  { %2092 = vst.msk [vmem:[%s15614_s4 + $0x28] sm:$0xf] %vm2081_vm1, %v9688_v0  ;;  %v9689_v33 = vpack.c.bf16 %v1766_v42, %v1766_v42  ;;  %v1247_v8 = vmul.f32 %v10949_v48, %v631_v38  ;;  %v633_v20 = vpop.f32.mrb[25].mxu0  ;;  %2969 = vmatmul.mubr.bf16.gmra.mrb[128].mxu1 %v8862_v9  ;;  %v10161_v48 = vld [vmem:[%s15612_s1 + $0x424] ss:$8 sps:$4 sm:$0xff]  }
 0x12c   :  { %v634_v40 = vpop.f32.mrb[26].mxu0 }
 0x12d   :  { %2093 = vst.msk [vmem:[%s15614_s4 + $0x2c] sm:$0xf] %vm2081_vm1, %v9689_v33  ;;  %v1702_v18 = vadd.f32 %v11554_v4, %v1247_v8  ;;  %v1248_v0 = vmul.f32 %v10947_v47, %v634_v40  ;;  %v11690_v42 = vpop.permute.xlu1 %1477  ;;  %v11692_v38 = vpop.permute.xlu0 %1472  ;;  %v2998_v4 = vld [vmem:[%s15610_s2 + $0xb0] sm:$0xff] }
 0x12e   :  { %3148 = vperm.xlu1 %9940, %v2997_v39   ;;  %3143 = vperm.xlu0 %9939, %v2996_v16   ;;  %v636_v9 = vpop.f32.mrb[27].mxu0  ;;  %v11701_v47 = vpop.f32.mrb[24].mxu1 }
 0x12f   :  { %v1767_v20 = vmax.f32 %v1702_v18, 0.0  ;;  %v1703_v43 = vadd.f32 %v11591_v28, %v1248_v0  ;;  %4843 = vmatmul.mubr.bf16.vlgmr.msra.gmra.mrb[132].mxu0 %v10158_v31  ;;  %15643 = vst [vmem:[#allocation28_spill] sm:$0xff] %v11701_v47  ;;  %v2764_v33 = vpop.f32.mrb[25].mxu1  ;;  %v3001_v9 = vld [vmem:[%s15610_s2 + $0xc8] sm:$0xff] }
 0x130   :  { %9195 = vmatprep.mubr.msk.bf16.mxu0 %vm449_vm0, %v10161_v48  ;;  %v11708_v18 = vpop.f32.mrb[26].mxu1  ;;  %v10164_v33 = vld [vmem:[%s15612_s1 + $0x434] ss:$8 sps:$4 sm:$0xff]  }
 0x131   :  { %v9690_v8 = vpack.c.bf16 %v1767_v20, %v1767_v20  ;;  %v1768_v39 = vmax.f32 %v1703_v43, 0.0  ;;  %v11704_v16 = vpop.permute.xlu1 %1487  ;;  %v11706_v40 = vpop.permute.xlu0 %1482  ;;  %15644 = vst [vmem:[#allocation29_spill] sm:$0xff] %v11708_v18  ;;  %v10163_v20 = vld [vmem:[%s15612_s1 + $0x420] ss:$8 sps:$4 sm:$0xff]  }
 0x132   :  { %3158 = vperm.xlu1 %9940, %v2999_v41   ;;  %3153 = vperm.xlu0 %9939, %v2998_v4   ;;  %v639_v28 = vpop.f32.mrb[28].mxu0  ;;  %v3000_v41 = vld [vmem:[%s15610_s2 + $0xc0] sm:$0xff]  ;;  %v2767_v43 = vpop.f32.mrb[27].mxu1 }
 0x133   :  { %2094 = vst.msk [vmem:[%s15614_s4 + $0x30] sm:$0xf] %vm2081_vm1, %v9690_v8  ;;  %v9691_v31 = vpack.c.bf16 %v1768_v39, %v1768_v39  ;;  %v1249_v48 = vmul.f32 %v10969_v55, %v639_v28  ;;  %v641_v0 = vpop.f32.mrb[29].mxu0 }
 0x134   :  { %v642_v4 = vpop.f32.mrb[30].mxu0  ;;  %v10206_v0 = vld [vmem:[%s15611_s0 + $0xd8] sm:$0xff]  }
 0x135   :  { %2095 = vst.msk [vmem:[%s15614_s4 + $0x34] sm:$0xf] %vm2081_vm1, %v9691_v31  ;;  %v1704_v55 = vadd.f32 %v11589_v51, %v1249_v48  ;;  %v1250_v8 = vmul.f32 %v10967_v54, %v642_v4  ;;  %v11733_v39 = vpop.permute.xlu1 %1497  ;;  %v11735_v28 = vpop.permute.xlu0 %1492  ;;  %v3003_v51 = vld [vmem:[%s15610_s2 + $0xd8] sm:$0xff]  ;;  %v3002_v54 = vld [vmem:[%s15610_s2 + $0xd0] sm:$0xff]  ;;  %6941 = vmatpush1.bf16.msra.mxu1 %v10206_v0 }
 0x136   :  { %3168 = vperm.xlu1 %9940, %v3001_v9   ;;  %3163 = vperm.xlu0 %9939, %v3000_v41   ;;  %v644_v43 = vpop.f32.mrb[31].mxu0  ;;  %v11747_v31 = vpop.f32.mrb[28].mxu1  ;;  %v15646_v9 = vmov 0  }
 0x137   :  { %v1769_v18 = vmax.f32 %v1704_v55, 0.0  ;;  %v1705_v47 = vadd.f32 %v11616_v2, %v1250_v8  ;;  %4851 = vmatmul.mubr.bf16.gmra.mrb[136].mxu0 %v10163_v20  ;;  %15645 = vst [vmem:[#allocation30_spill] sm:$0xff] %v11747_v31  ;;  %v2772_v48 = vpop.f32.mrb[29].mxu1  ;;  %6942 = vmatprep.subr.bf16.mxu1 %v15646_v9 }
 0x138   :  { %9196 = vmatprep.mubr.msk.bf16.mxu0 %vm449_vm0, %v10164_v33  ;;  %v11755_v43 = vpop.f32.mrb[30].mxu1 }
 0x139   :  { %v9692_v41 = vpack.c.bf16 %v1769_v18, %v1769_v18  ;;  %v1770_v4 = vmax.f32 %v1705_v47, 0.0  ;;  %v11751_v2 = vpop.permute.xlu1 %1507  ;;  %v11753_v55 = vpop.permute.xlu0 %1502  ;;  %15647 = vst [vmem:[#allocation31_spill] sm:$0xff] %v11755_v43  ;;  %v3005_v47 = vld [vmem:[%s15610_s2 + $0xe8] sm:$0xff]  ;;  %v3004_v18 = vld [vmem:[%s15610_s2 + $0xe0] sm:$0xff] }
 0x13a   :  { %3178 = vperm.xlu1 %9940, %v3003_v51   ;;  %3173 = vperm.xlu0 %9939, %v3002_v54   ;;  %v647_v8 = vpop.f32.mrb[32].mxu0  ;;  %v10166_v51 = vld [vmem:[%s15612_s1 + $0x430] ss:$8 sps:$4 sm:$0xff]   ;;  %v2775_v54 = vpop.f32.mrb[31].mxu1 }
 0x13b   :  { %2096 = vst.msk [vmem:[%s15614_s4 + $0x38] sm:$0xf] %vm2081_vm1, %v9692_v41  ;;  %v9693_v20 = vpack.c.bf16 %v1770_v4, %v1770_v4  ;;  %v1251_v33 = vmul.f32 %v10991_v62, %v647_v8  ;;  %v649_v0 = vpop.f32.mrb[33].mxu0  ;;  %v10167_v41 = vld [vmem:[%s15612_s1 + $0x444] ss:$8 sps:$4 sm:$0xff]  }
 0x13c   :  { %v650_v48 = vpop.f32.mrb[34].mxu0 }
 0x13d   :  { %2097 = vst.msk [vmem:[%s15614_s4 + $0x3c] sm:$0xf] %vm2081_vm1, %v9693_v20  ;;  %v1706_v62 = vadd.f32 %v11614_v52, %v1251_v33  ;;  %v1252_v4 = vmul.f32 %v10989_v61, %v650_v48  ;;  %v11780_v8 = vpop.permute.xlu1 %1517  ;;  %v11782_v0 = vpop.permute.xlu0 %1512  ;;  %v3006_v52 = vld [vmem:[%s15610_s2 + $0xf0] sm:$0xff] }
 0x13e   :  { %3188 = vperm.xlu1 %9940, %v3005_v47   ;;  %3183 = vperm.xlu0 %9939, %v3004_v18   ;;  %v652_v54 = vpop.f32.mrb[35].mxu0  ;;  %v11791_v61 = vpop.f32.mrb[32].mxu1 }
 0x13f   :  { %v1771_v43 = vmax.f32 %v1706_v62, 0.0  ;;  %v1707_v31 = vadd.f32 %v11646_v60, %v1252_v4  ;;  %4859 = vmatmul.mubr.bf16.gmra.mrb[140].mxu0 %v10166_v51  ;;  %15648 = vst [vmem:[#allocation32_spill] sm:$0xff] %v11791_v61  ;;  %v2780_v20 = vpop.f32.mrb[33].mxu1  ;;  %v3011_v61 = vld [vmem:[%s15610_s2 + $0x118] sm:$0xff] }
 0x140   :  { %9197 = vmatprep.mubr.msk.bf16.mxu0 %vm449_vm0, %v10167_v41  ;;  %v11798_v62 = vpop.f32.mrb[34].mxu1  ;;  %v10170_v20 = vld [vmem:[%s15612_s1 + $0x454] ss:$8 sps:$4 sm:$0xff]  }
 0x141   :  { %v9694_v33 = vpack.c.bf16 %v1771_v43, %v1771_v43  ;;  %v1772_v47 = vmax.f32 %v1707_v31, 0.0  ;;  %v11794_v18 = vpop.permute.xlu1 %1527  ;;  %v11796_v48 = vpop.permute.xlu0 %1522  ;;  %15649 = vst [vmem:[#allocation33_spill] sm:$0xff] %v11798_v62  ;;  %v3009_v31 = vld [vmem:[%s15610_s2 + $0x108] sm:$0xff] }
 0x142   :  { %3198 = vperm.xlu1 %9940, %v3007_v15   ;;  %3193 = vperm.xlu0 %9939, %v3006_v52   ;;  %v655_v60 = vpop.f32.mrb[36].mxu0  ;;  %v3008_v15 = vld [vmem:[%s15610_s2 + $0x100] sm:$0xff]  ;;  %v2783_v54 = vpop.f32.mrb[35].mxu1 }
 0x143   :  { %2098 = vst.msk [vmem:[%s15614_s4 + $0x40] sm:$0xf] %vm2081_vm1, %v9694_v33  ;;  %v9695_v51 = vpack.c.bf16 %v1772_v47, %v1772_v47  ;;  %v1253_v41 = vmul.f32 %v11011_v6, %v655_v60  ;;  %v657_v4 = vpop.f32.mrb[37].mxu0  ;;  %v10169_v43 = vld [vmem:[%s15612_s1 + $0x440] ss:$8 sps:$4 sm:$0xff]  }
 0x144   :  { %v658_v52 = vpop.f32.mrb[38].mxu0 }
 0x145   :  { %2099 = vst.msk [vmem:[%s15614_s4 + $0x44] sm:$0xf] %vm2081_vm1, %v9695_v51  ;;  %v1708_v6 = vadd.f32 %v11644_v34, %v1253_v41  ;;  %v1254_v33 = vmul.f32 %v11009_v5, %v658_v52  ;;  %v11823_v47 = vpop.permute.xlu1 %1537  ;;  %v11825_v60 = vpop.permute.xlu0 %1532  ;;  %v3010_v34 = vld [vmem:[%s15610_s2 + $0x110] sm:$0xff] }
 0x146   :  { %3208 = vperm.xlu1 %9940, %v3009_v31   ;;  %3203 = vperm.xlu0 %9939, %v3008_v15   ;;  %v660_v4 = vpop.f32.mrb[39].mxu0  ;;  %v11834_v5 = vpop.f32.mrb[36].mxu1 }
 0x147   :  { %v1773_v54 = vmax.f32 %v1708_v6, 0.0  ;;  %v1709_v62 = vadd.f32 %v11663_v27, %v1254_v33  ;;  %4867 = vmatmul.mubr.bf16.gmra.mrb[144].mxu0 %v10169_v43  ;;  %15650 = vst [vmem:[#allocation34_spill] sm:$0xff] %v11834_v5  ;;  %v2788_v51 = vpop.f32.mrb[37].mxu1  ;;  %v10172_v4 = vld [vmem:[%s15612_s1 + $0x450] ss:$8 sps:$4 sm:$0xff]  }
 0x148   :  { %9198 = vmatprep.mubr.msk.bf16.mxu0 %vm449_vm0, %v10170_v20  ;;  %v11841_v6 = vpop.f32.mrb[38].mxu1  ;;  %v10173_v51 = vld [vmem:[%s15612_s1 + $0x464] ss:$8 sps:$4 sm:$0xff]   ;;  %v3015_v5 = vld [vmem:[%s15610_s2 + $0x138] sm:$0xff] }
 0x149   :  { %v9696_v41 = vpack.c.bf16 %v1773_v54, %v1773_v54  ;;  %v1774_v31 = vmax.f32 %v1709_v62, 0.0  ;;  %v11837_v15 = vpop.permute.xlu1 %1547  ;;  %v11839_v52 = vpop.permute.xlu0 %1542  ;;  %15651 = vst [vmem:[#allocation35_spill] sm:$0xff] %v11841_v6  ;;  %v3013_v62 = vld [vmem:[%s15610_s2 + $0x128] sm:$0xff] }
 0x14a   :  { %3218 = vperm.xlu1 %9940, %v3011_v61   ;;  %3213 = vperm.xlu0 %9939, %v3010_v34   ;;  %v663_v27 = vpop.f32.mrb[40].mxu0  ;;  %v3012_v61 = vld [vmem:[%s15610_s2 + $0x120] sm:$0xff]  ;;  %v2791_v54 = vpop.f32.mrb[39].mxu1 }
 0x14b   :  { %2100 = vst.msk [vmem:[%s15614_s4 + $0x48] sm:$0xf] %vm2081_vm1, %v9696_v41  ;;  %v9697_v43 = vpack.c.bf16 %v1774_v31, %v1774_v31  ;;  %v1255_v20 = vmul.f32 %v11033_v17, %v663_v27  ;;  %v665_v33 = vpop.f32.mrb[41].mxu0 }
 0x14c   :  { %v666_v34 = vpop.f32.mrb[42].mxu0 }
 0x14d   :  { %2101 = vst.msk [vmem:[%s15614_s4 + $0x4c] sm:$0xf] %vm2081_vm1, %v9697_v43  ;;  %v1710_v17 = vadd.f32 %v11661_v21, %v1255_v20  ;;  %v1256_v41 = vmul.f32 %v11031_v14, %v666_v34  ;;  %v11866_v31 = vpop.permute.xlu1 %1557  ;;  %v11868_v27 = vpop.permute.xlu0 %1552  ;;  %v3014_v21 = vld [vmem:[%s15610_s2 + $0x130] sm:$0xff] }
 0x14e   :  { %3228 = vperm.xlu1 %9940, %v3013_v62   ;;  %3223 = vperm.xlu0 %9939, %v3012_v61   ;;  %v668_v33 = vpop.f32.mrb[43].mxu0  ;;  %v11877_v14 = vpop.f32.mrb[40].mxu1 }
 0x14f   :  { %v1775_v54 = vmax.f32 %v1710_v17, 0.0  ;;  %v1711_v6 = vadd.f32 %v11692_v38, %v1256_v41  ;;  %4875 = vmatmul.mubr.bf16.gmra.mrb[148].mxu0 %v10172_v4  ;;  %15652 = vst [vmem:[#allocation36_spill] sm:$0xff] %v11877_v14  ;;  %v2796_v43 = vpop.f32.mrb[41].mxu1  ;;  %v10175_v33 = vld [vmem:[%s15612_s1 + $0x460] ss:$8 sps:$4 sm:$0xff]  }
 0x150   :  { %9199 = vmatprep.mubr.msk.bf16.mxu0 %vm449_vm0, %v10173_v51  ;;  %v11884_v17 = vpop.f32.mrb[42].mxu1  ;;  %v10176_v43 = vld [vmem:[%s15612_s1 + $0x474] ss:$8 sps:$4 sm:$0xff]  }
 0x151   :  { %v9698_v20 = vpack.c.bf16 %v1775_v54, %v1775_v54  ;;  %v1776_v62 = vmax.f32 %v1711_v6, 0.0  ;;  %v11880_v61 = vpop.permute.xlu1 %1567  ;;  %v11882_v34 = vpop.permute.xlu0 %1562  ;;  %15653 = vst [vmem:[#allocation37_spill] sm:$0xff] %v11884_v17  ;;  %v3017_v6 = vld [vmem:[%s15610_s2 + $0x148] sm:$0xff] }
 0x152   :  { %3238 = vperm.xlu1 %9940, %v3015_v5   ;;  %3233 = vperm.xlu0 %9939, %v3014_v21   ;;  %v671_v38 = vpop.f32.mrb[44].mxu0  ;;  %v3016_v5 = vld [vmem:[%s15610_s2 + $0x140] sm:$0xff]  ;;  %v2799_v54 = vpop.f32.mrb[43].mxu1 }
 0x153   :  { %2102 = vst.msk [vmem:[%s15614_s4 + $0x50] sm:$0xf] %vm2081_vm1, %v9698_v20  ;;  %v9699_v4 = vpack.c.bf16 %v1776_v62, %v1776_v62  ;;  %v1257_v51 = vmul.f32 %v11053_v26, %v671_v38  ;;  %v673_v41 = vpop.f32.mrb[45].mxu0 }
 0x154   :  { %v674_v21 = vpop.f32.mrb[46].mxu0  ;;  %v10219_v41 = vld [vmem:[%s15611_s0 + $0xe0] sm:$0xff]  }
 0x155   :  { %2103 = vst.msk [vmem:[%s15614_s4 + $0x54] sm:$0xf] %vm2081_vm1, %v9699_v4  ;;  %v1712_v26 = vadd.f32 %v11690_v42, %v1257_v51  ;;  %v1258_v20 = vmul.f32 %v11051_v25, %v674_v21  ;;  %v11909_v62 = vpop.permute.xlu1 %1577  ;;  %v11911_v38 = vpop.permute.xlu0 %1572  ;;  %v3019_v42 = vld [vmem:[%s15610_s2 + $0x158] sm:$0xff]  ;;  %v3018_v25 = vld [vmem:[%s15610_s2 + $0x150] sm:$0xff]  ;;  %6943 = vmatpush1.bf16.msra.mxu1 %v10219_v41 }
 0x156   :  { %3248 = vperm.xlu1 %9940, %v3017_v6   ;;  %3243 = vperm.xlu0 %9939, %v3016_v5   ;;  %v676_v54 = vpop.f32.mrb[47].mxu0  ;;  %v11923_v4 = vpop.f32.mrb[44].mxu1 }
 0x157   :  { %v1777_v17 = vmax.f32 %v1712_v26, 0.0  ;;  %v1713_v14 = vadd.f32 %v11706_v40, %v1258_v20  ;;  %4883 = vmatmul.mubr.bf16.gmra.mrb[152].mxu0 %v10175_v33  ;;  %15654 = vst [vmem:[#allocation38_spill] sm:$0xff] %v11923_v4  ;;  %v2804_v51 = vpop.f32.mrb[45].mxu1  ;;  %6944 = vmatprep.subr.bf16.mxu1 %v15646_v9  ;;  %v10178_v54 = vld [vmem:[%s15612_s1 + $0x470] ss:$8 sps:$4 sm:$0xff]  }
 0x158   :  { %9200 = vmatprep.mubr.msk.bf16.mxu0 %vm449_vm0, %v10176_v43  ;;  %v11931_v20 = vpop.f32.mrb[46].mxu1  ;;  %v10179_v51 = vld [vmem:[%s15612_s1 + $0x484] ss:$8 sps:$4 sm:$0xff]   ;;  %v3023_v4 = vld [vmem:[%s15610_s2 + $0x178] sm:$0xff] }
 0x159   :  { %v9700_v6 = vpack.c.bf16 %v1777_v17, %v1777_v17  ;;  %v1778_v5 = vmax.f32 %v1713_v14, 0.0  ;;  %v11927_v40 = vpop.permute.xlu1 %1587  ;;  %v11929_v21 = vpop.permute.xlu0 %1582  ;;  %15655 = vst [vmem:[#allocation39_spill] sm:$0xff] %v11931_v20  ;;  %v3021_v14 = vld [vmem:[%s15610_s2 + $0x168] sm:$0xff]  ;;  %v3020_v17 = vld [vmem:[%s15610_s2 + $0x160] sm:$0xff] }
 0x15a   :  { %3258 = vperm.xlu1 %9940, %v3019_v42   ;;  %3253 = vperm.xlu0 %9939, %v3018_v25   ;;  %v679_v26 = vpop.f32.mrb[48].mxu0  ;;  %v2807_v42 = vpop.f32.mrb[47].mxu1 }
 0x15b   :  { %2104 = vst.msk [vmem:[%s15614_s4 + $0x58] sm:$0xf] %vm2081_vm1, %v9700_v6  ;;  %v9701_v33 = vpack.c.bf16 %v1778_v5, %v1778_v5  ;;  %v1259_v43 = vmul.f32 %v11075_v37, %v679_v26  ;;  %v681_v41 = vpop.f32.mrb[49].mxu0 }
 0x15c   :  { %v682_v25 = vpop.f32.mrb[50].mxu0 }
 0x15d   :  { %2105 = vst.msk [vmem:[%s15614_s4 + $0x5c] sm:$0xf] %vm2081_vm1, %v9701_v33  ;;  %v1714_v37 = vadd.f32 %v11704_v16, %v1259_v43  ;;  %v1260_v6 = vmul.f32 %v11073_v36, %v682_v25  ;;  %v11956_v5 = vpop.permute.xlu1 %1597  ;;  %v11958_v26 = vpop.permute.xlu0 %1592  ;;  %v3022_v16 = vld [vmem:[%s15610_s2 + $0x170] sm:$0xff] }
 0x15e   :  { %3268 = vperm.xlu1 %9940, %v3021_v14   ;;  %3263 = vperm.xlu0 %9939, %v3020_v17   ;;  %v684_v41 = vpop.f32.mrb[51].mxu0  ;;  %v11967_v36 = vpop.f32.mrb[48].mxu1 }
 0x15f   :  { %v1779_v42 = vmax.f32 %v1714_v37, 0.0  ;;  %v1715_v20 = vadd.f32 %v11735_v28, %v1260_v6  ;;  %4891 = vmatmul.mubr.bf16.gmra.mrb[156].mxu0 %v10178_v54  ;;  %15656 = vst [vmem:[#allocation40_spill] sm:$0xff] %v11967_v36  ;;  %v2812_v33 = vpop.f32.mrb[49].mxu1  ;;  %v10181_v41 = vld [vmem:[%s15612_s1 + $0x480] ss:$8 sps:$4 sm:$0xff]   ;;  %v3027_v36 = vld [vmem:[%s15610_s2 + $0x198] sm:$0xff] }
 0x160   :  { %9201 = vmatprep.mubr.msk.bf16.mxu0 %vm449_vm0, %v10179_v51  ;;  %v11974_v37 = vpop.f32.mrb[50].mxu1  ;;  %v10182_v33 = vld [vmem:[%s15612_s1 + $0x494] ss:$8 sps:$4 sm:$0xff]  }
 0x161   :  { %v9702_v43 = vpack.c.bf16 %v1779_v42, %v1779_v42  ;;  %v1780_v14 = vmax.f32 %v1715_v20, 0.0  ;;  %v11970_v17 = vpop.permute.xlu1 %1607  ;;  %v11972_v25 = vpop.permute.xlu0 %1602  ;;  %15657 = vst [vmem:[#allocation41_spill] sm:$0xff] %v11974_v37  ;;  %v3025_v20 = vld [vmem:[%s15610_s2 + $0x188] sm:$0xff] }
 0x162   :  { %3278 = vperm.xlu1 %9940, %v3023_v4   ;;  %3273 = vperm.xlu0 %9939, %v3022_v16   ;;  %v687_v28 = vpop.f32.mrb[52].mxu0  ;;  %v3024_v4 = vld [vmem:[%s15610_s2 + $0x180] sm:$0xff]  ;;  %v2815_v42 = vpop.f32.mrb[51].mxu1 }
 0x163   :  { %2106 = vst.msk [vmem:[%s15614_s4 + $0x60] sm:$0xf] %vm2081_vm1, %v9702_v43  ;;  %v9703_v54 = vpack.c.bf16 %v1780_v14, %v1780_v14  ;;  %v1261_v51 = vmul.f32 %v11095_v46, %v687_v28  ;;  %v689_v6 = vpop.f32.mrb[53].mxu0 }
 0x164   :  { %v690_v16 = vpop.f32.mrb[54].mxu0 }
 0x165   :  { %2107 = vst.msk [vmem:[%s15614_s4 + $0x64] sm:$0xf] %vm2081_vm1, %v9703_v54  ;;  %v1716_v46 = vadd.f32 %v11733_v39, %v1261_v51  ;;  %v1262_v43 = vmul.f32 %v11093_v45, %v690_v16  ;;  %v11999_v14 = vpop.permute.xlu1 %1617  ;;  %v12001_v28 = vpop.permute.xlu0 %1612  ;;  %v3026_v39 = vld [vmem:[%s15610_s2 + $0x190] sm:$0xff] }
 0x166   :  { %3288 = vperm.xlu1 %9940, %v3025_v20   ;;  %3283 = vperm.xlu0 %9939, %v3024_v4   ;;  %v692_v6 = vpop.f32.mrb[55].mxu0  ;;  %v12010_v45 = vpop.f32.mrb[52].mxu1 }
 0x167   :  { %v1781_v42 = vmax.f32 %v1716_v46, 0.0  ;;  %v1717_v37 = vadd.f32 %v11753_v55, %v1262_v43  ;;  %4899 = vmatmul.mubr.bf16.gmra.mrb[160].mxu0 %v10181_v41  ;;  %15658 = vst [vmem:[#allocation42_spill] sm:$0xff] %v12010_v45  ;;  %v2820_v54 = vpop.f32.mrb[53].mxu1  ;;  %v10184_v6 = vld [vmem:[%s15612_s1 + $0x490] ss:$8 sps:$4 sm:$0xff]  }
 0x168   :  { %9202 = vmatprep.mubr.msk.bf16.mxu0 %vm449_vm0, %v10182_v33  ;;  %v12017_v46 = vpop.f32.mrb[54].mxu1  ;;  %v10185_v54 = vld [vmem:[%s15612_s1 + $0x4a4] ss:$8 sps:$4 sm:$0xff]   ;;  %v3031_v45 = vld [vmem:[%s15610_s2 + $0x1b8] sm:$0xff] }
 0x169   :  { %v9704_v51 = vpack.c.bf16 %v1781_v42, %v1781_v42  ;;  %v1782_v20 = vmax.f32 %v1717_v37, 0.0  ;;  %v12013_v4 = vpop.permute.xlu1 %1627  ;;  %v12015_v16 = vpop.permute.xlu0 %1622  ;;  %15659 = vst [vmem:[#allocation43_spill] sm:$0xff] %v12017_v46  ;;  %v3029_v37 = vld [vmem:[%s15610_s2 + $0x1a8] sm:$0xff] }
 0x16a   :  { %3298 = vperm.xlu1 %9940, %v3027_v36   ;;  %3293 = vperm.xlu0 %9939, %v3026_v39   ;;  %v695_v55 = vpop.f32.mrb[56].mxu0  ;;  %v3028_v36 = vld [vmem:[%s15610_s2 + $0x1a0] sm:$0xff]  ;;  %v2823_v42 = vpop.f32.mrb[55].mxu1 }
 0x16b   :  { %2108 = vst.msk [vmem:[%s15614_s4 + $0x68] sm:$0xf] %vm2081_vm1, %v9704_v51  ;;  %v9705_v41 = vpack.c.bf16 %v1782_v20, %v1782_v20  ;;  %v1263_v33 = vmul.f32 %v11113_v56, %v695_v55  ;;  %v697_v43 = vpop.f32.mrb[57].mxu0 }
 0x16c   :  { %v698_v39 = vpop.f32.mrb[58].mxu0 }
 0x16d   :  { %2109 = vst.msk [vmem:[%s15614_s4 + $0x6c] sm:$0xf] %vm2081_vm1, %v9705_v41  ;;  %v1718_v56 = vadd.f32 %v11751_v2, %v1263_v33  ;;  %v1264_v51 = vmul.f32 %v11111_v53, %v698_v39  ;;  %v12042_v20 = vpop.permute.xlu1 %1637  ;;  %v12044_v55 = vpop.permute.xlu0 %1632  ;;  %v3030_v2 = vld [vmem:[%s15610_s2 + $0x1b0] sm:$0xff] }
 0x16e   :  { %3308 = vperm.xlu1 %9940, %v3029_v37   ;;  %3303 = vperm.xlu0 %9939, %v3028_v36   ;;  %v700_v43 = vpop.f32.mrb[59].mxu0  ;;  %v12053_v53 = vpop.f32.mrb[56].mxu1 }
 0x16f   :  { %v1783_v42 = vmax.f32 %v1718_v56, 0.0  ;;  %v1719_v46 = vadd.f32 %v11782_v0, %v1264_v51  ;;  %4907 = vmatmul.mubr.bf16.gmra.mrb[164].mxu0 %v10184_v6  ;;  %15660 = vst [vmem:[#allocation44_spill] sm:$0xff] %v12053_v53  ;;  %v2828_v41 = vpop.f32.mrb[57].mxu1  ;;  %v3033_v56 = vld [vmem:[%s15610_s2 + $0x1c8] sm:$0xff] }
 0x170   :  { %9203 = vmatprep.mubr.msk.bf16.mxu0 %vm449_vm0, %v10185_v54  ;;  %v12063_v51 = vpop.f32.mrb[58].mxu1  ;;  %v10187_v43 = vld [vmem:[%s15612_s1 + $0x4a0] ss:$8 sps:$4 sm:$0xff]  }
 0x171   :  { %v9706_v33 = vpack.c.bf16 %v1783_v42, %v1783_v42  ;;  %v1784_v37 = vmax.f32 %v1719_v46, 0.0  ;;  %v12056_v36 = vpop.permute.xlu1 %1647  ;;  %v12058_v39 = vpop.permute.xlu0 %1642  ;;  %15661 = vst [vmem:[#allocation45_spill] sm:$0xff] %v12063_v51 }
 0x172   :  { %3318 = vperm.xlu1 %9940, %v3031_v45   ;;  %3313 = vperm.xlu0 %9939, %v3030_v2   ;;  %v703_v0 = vpop.f32.mrb[60].mxu0  ;;  %v3032_v45 = vld [vmem:[%s15610_s2 + $0x1c0] sm:$0xff]  ;;  %v2831_v42 = vpop.f32.mrb[59].mxu1  ;;  %v10229_v2 = vld [vmem:[%s15611_s0 + $0xe8] sm:$0xff]  }
 0x173   :  { %2110 = vst.msk [vmem:[%s15614_s4 + $0x70] sm:$0xf] %vm2081_vm1, %v9706_v33  ;;  %v9707_v6 = vpack.c.bf16 %v1784_v37, %v1784_v37  ;;  %v1265_v46 = vmul.f32 %v11129_v1, %v703_v0  ;;  %v705_v54 = vpop.f32.mrb[61].mxu0  ;;  %v10188_v33 = vld [vmem:[%s15612_s1 + $0x4b4] ss:$8 sps:$4 sm:$0xff]   ;;  %6945 = vmatpush1.bf16.msra.mxu1 %v10229_v2 }
 0x174   :  { %v706_v41 = vpop.f32.mrb[62].mxu0  ;;  %6946 = vmatprep.subr.bf16.mxu1 %v15646_v9 }
 0x175   :  { %2111 = vst.msk [vmem:[%s15614_s4 + $0x74] sm:$0xf] %vm2081_vm1, %v9707_v6  ;;  %v1720_v1 = vadd.f32 %v11780_v8, %v1265_v46  ;;  %v1266_v37 = vmul.f32 %v11127_v63, %v706_v41  ;;  %v12088_v0 = vpop.permute.xlu1 %1657  ;;  %v12090_v54 = vpop.permute.xlu0 %1652  ;;  %v3034_v8 = vld [vmem:[%s15610_s2 + $0x1d0] sm:$0xff] }
 0x176   :  { %3328 = vperm.xlu1 %9940, %v3033_v56   ;;  %3323 = vperm.xlu0 %9939, %v3032_v45   ;;  %v708_v42 = vpop.f32.mrb[63].mxu0  ;;  %v12099_v63 = vpop.f32.mrb[60].mxu1 }
 0x177   :  { %v1785_v51 = vmax.f32 %v1720_v1, 0.0  ;;  %v1721_v53 = vadd.f32 %v11796_v48, %v1266_v37  ;;  %4915 = vmatmul.mubr.bf16.gmra.mrb[168].mxu0 %v10187_v43  ;;  %15662 = vst [vmem:[#allocation46_spill] sm:$0xff] %v12099_v63  ;;  %v2836_v56 = vpop.f32.mrb[61].mxu1  ;;  %v3437_v63 = vld [vmem:[%s15613_s3 + $0x30] sm:$0xff] }
 0x178   :  { %9204 = vmatprep.mubr.msk.bf16.mxu0 %vm449_vm0, %v10188_v33  ;;  %v12107_v41 = vpop.f32.mrb[62].mxu1 }
 0x179   :  { %v9708_v6 = vpack.c.bf16 %v1785_v51, %v1785_v51  ;;  %v1786_v46 = vmax.f32 %v1721_v53, 0.0  ;;  %v12103_v45 = vpop.permute.xlu1 %1667  ;;  %v12105_v48 = vpop.permute.xlu0 %1662  ;;  %15663 = vst [vmem:[#allocation47_spill] sm:$0xff] %v12107_v41  ;;  %v3037_v53 = vld [vmem:[%s15610_s2 + $0x1e8] sm:$0xff]  ;;  %v10190_v51 = vld [vmem:[%s15612_s1 + $0x4b0] ss:$8 sps:$4 sm:$0xff]  }
 0x17a   :  { %3338 = vperm.xlu1 %9940, %v3035_v19   ;;  %3333 = vperm.xlu0 %9939, %v3034_v8   ;;  %v711_v2 = vpop.f32.mrb[64].mxu0  ;;  %v3036_v19 = vld [vmem:[%s15610_s2 + $0x1e0] sm:$0xff]  ;;  %v2839_v37 = vpop.f32.mrb[63].mxu1  ;;  %v3039_v41 = vld [vmem:[%s15610_s2 + $0x1f8] sm:$0xff] }
 0x17b   :  { %2112 = vst.msk [vmem:[%s15614_s4 + $0x78] sm:$0xf] %vm2081_vm1, %v9708_v6  ;;  %v9709_v43 = vpack.c.bf16 %v1786_v46, %v1786_v46  ;;  %v1267_v33 = vmul.f32 %v11147_v11, %v711_v2  ;;  %v713_v1 = vpop.f32.mrb[65].mxu0  ;;  %v10191_v8 = vld [vmem:[%s15612_s1 + $0x4c4] ss:$8 sps:$4 sm:$0xff]  }
 0x17c   :  { %v714_v42 = vpop.f32.mrb[66].mxu0 }
 0x17d   :  { %2113 = vst.msk [vmem:[%s15614_s4 + $0x7c] sm:$0xf] %vm2081_vm1, %v9709_v43  ;;  %v1722_v11 = vadd.f32 %v11794_v18, %v1267_v33  ;;  %v1268_v56 = vmul.f32 %v11145_v10, %v714_v42  ;;  %v12132_v6 = vpop.permute.xlu1 %1677  ;;  %v12134_v46 = vpop.permute.xlu0 %1672  ;;  %v3038_v18 = vld [vmem:[%s15610_s2 + $0x1f0] sm:$0xff] }
 0x17e   :  { %3348 = vperm.xlu1 %9940, %v3037_v53   ;;  %3343 = vperm.xlu0 %9939, %v3036_v19   ;;  %v716_v2 = vpop.f32.mrb[67].mxu0  ;;  %v12143_v10 = vpop.f32.mrb[64].mxu1 }
 0x17f   :  { %v1787_v1 = vmax.f32 %v1722_v11, 0.0  ;;  %v1723_v37 = vadd.f32 %v11825_v60, %v1268_v56  ;;  %4923 = vmatmul.mubr.bf16.gmra.mrb[172].mxu0 %v10190_v51  ;;  %15664 = vst [vmem:[#allocation48_spill] sm:$0xff] %v12143_v10  ;;  %v2844_v43 = vpop.f32.mrb[65].mxu1  ;;  %v3431_v11 = vld [vmem:[%s15613_s3] sm:$0xff]  ;;  %v3433_v10 = vld [vmem:[%s15613_s3 + $0x10] sm:$0xff] }
 0x180   :  { %9205 = vmatprep.mubr.msk.bf16.mxu0 %vm449_vm0, %v10191_v8  ;;  %v12153_v56 = vpop.f32.mrb[66].mxu1  ;;  %v10194_v43 = vld [vmem:[%s15612_s1 + $0x4d4] ss:$8 sps:$4 sm:$0xff]  }
 0x181   :  { %v9710_v33 = vpack.c.bf16 %v1787_v1, %v1787_v1  ;;  %v1788_v53 = vmax.f32 %v1723_v37, 0.0  ;;  %v12146_v19 = vpop.permute.xlu1 %1687  ;;  %v12148_v42 = vpop.permute.xlu0 %1682  ;;  %15665 = vst [vmem:[#allocation49_spill] sm:$0xff] %v12153_v56  ;;  %v10193_v1 = vld [vmem:[%s15612_s1 + $0x4c0] ss:$8 sps:$4 sm:$0xff]  }
 0x182   :  { %3358 = vperm.xlu1 %9940, %v3039_v41   ;;  %3353 = vperm.xlu0 %9939, %v3038_v18   ;;  %v719_v60 = vpop.f32.mrb[68].mxu0  ;;  %v3040_v41 = vld [vmem:[%s15610_s2 + $0x200] sm:$0xf]  ;;  %v2847_v37 = vpop.f32.mrb[67].mxu1 }
 0x183   :  { %2114 = vst.msk [vmem:[%s15614_s4 + $0x80] sm:$0xf] %vm2081_vm1, %v9710_v33  ;;  %v9711_v51 = vpack.c.bf16 %v1788_v53, %v1788_v53  ;;  %v1269_v8 = vmul.f32 %v11163_v23, %v719_v60  ;;  %v721_v2 = vpop.f32.mrb[69].mxu0 }
 0x184   :  { %v722_v18 = vpop.f32.mrb[70].mxu0 }
 0x185   :  { %2115 = vst.msk [vmem:[%s15614_s4 + $0x84] sm:$0xf] %vm2081_vm1, %v9711_v51  ;;  %v1724_v23 = vadd.f32 %v11823_v47, %v1269_v8  ;;  %v1270_v33 = vmul.f32 %v11161_v22, %v722_v18  ;;  %v12175_v53 = vpop.permute.xlu1 %3048  ;;  %v12177_v60 = vpop.permute.xlu0 %3043  ;;  %v3432_v47 = vld [vmem:[%s15613_s3 + $0x8] sm:$0xff] }
 0x186   :  { %3498 = vperm.xlu1 %9940, %v3431_v11   ;;  %3363 = vperm.xlu0 %9939, %v3040_v41   ;;  %v724_v2 = vpop.f32.mrb[71].mxu0  ;;  %v12186_v22 = vpop.f32.mrb[68].mxu1 }
 0x187   :  { %v1789_v37 = vmax.f32 %v1724_v23, 0.0  ;;  %v1725_v56 = vadd.f32 %v11839_v52, %v1270_v33  ;;  %4931 = vmatmul.mubr.bf16.gmra.mrb[176].mxu0 %v10193_v1  ;;  %15666 = vst [vmem:[#allocation50_spill] sm:$0xff] %v12186_v22  ;;  %v2852_v51 = vpop.f32.mrb[69].mxu1  ;;  %v10196_v2 = vld [vmem:[%s15612_s1 + $0x4d0] ss:$8 sps:$4 sm:$0xff]  }
 0x188   :  { %9206 = vmatprep.mubr.msk.bf16.mxu0 %vm449_vm0, %v10194_v43  ;;  %v12193_v23 = vpop.f32.mrb[70].mxu1  ;;  %v10197_v51 = vld [vmem:[%s15612_s1 + $0x4e4] ss:$8 sps:$4 sm:$0xff]  }
 0x189   :  { %v9712_v11 = vpack.c.bf16 %v1789_v37, %v1789_v37  ;;  %v1790_v8 = vmax.f32 %v1725_v56, 0.0  ;;  %v12189_v41 = vpop.permute.xlu1 %3058  ;;  %v12191_v18 = vpop.permute.xlu0 %3053  ;;  %15667 = vst [vmem:[#allocation51_spill] sm:$0xff] %v12193_v23  ;;  %v3435_v56 = vld [vmem:[%s15613_s3 + $0x20] sm:$0xff] }
 0x18a   :  { %3508 = vperm.xlu1 %9940, %v3433_v10   ;;  %3503 = vperm.xlu0 %9939, %v3432_v47   ;;  %v727_v52 = vpop.f32.mrb[72].mxu0  ;;  %v3434_v10 = vld [vmem:[%s15613_s3 + $0x18] sm:$0xff]  ;;  %v2855_v37 = vpop.f32.mrb[71].mxu1 }
 0x18b   :  { %2116 = vst.msk [vmem:[%s15614_s4 + $0x88] sm:$0xf] %vm2081_vm1, %v9712_v11  ;;  %v9713_v1 = vpack.c.bf16 %v1790_v8, %v1790_v8  ;;  %v1271_v43 = vmul.f32 %v11181_v35, %v727_v52  ;;  %v729_v33 = vpop.f32.mrb[73].mxu0  ;;  %v10242_v35 = vld [vmem:[%s15611_s0 + $0xf0] sm:$0xff]  }
 0x18c   :  { %v730_v47 = vpop.f32.mrb[74].mxu0  ;;  %6947 = vmatpush1.bf16.msra.mxu1 %v10242_v35 }
 0x18d   :  { %2117 = vst.msk [vmem:[%s15614_s4 + $0x8c] sm:$0xf] %vm2081_vm1, %v9713_v1  ;;  %v1726_v11 = vadd.f32 %v11837_v15, %v1271_v43  ;;  %v1272_v8 = vmul.f32 %v11179_v32, %v730_v47  ;;  %v12221_v52 = vpop.permute.xlu1 %3068  ;;  %v12223_v33 = vpop.permute.xlu0 %3063  ;;  %v3436_v15 = vld [vmem:[%s15613_s3 + $0x28] sm:$0xff]  ;;  %6948 = vmatprep.subr.bf16.mxu1 %v15646_v9 }
 0x18e   :  { %3518 = vperm.xlu1 %9940, %v3435_v56   ;;  %3513 = vperm.xlu0 %9939, %v3434_v10   ;;  %v732_v37 = vpop.f32.mrb[75].mxu0  ;;  %v12232_v32 = vpop.f32.mrb[72].mxu1 }
 0x18f   :  { %v1791_v23 = vmax.f32 %v1726_v11, 0.0  ;;  %v1727_v22 = vadd.f32 %v11868_v27, %v1272_v8  ;;  %4939 = vmatmul.mubr.bf16.gmra.mrb[180].mxu0 %v10196_v2  ;;  %15668 = vst [vmem:[#allocation52_spill] sm:$0xff] %v12232_v32  ;;  %v2860_v1 = vpop.f32.mrb[73].mxu1 }
 0x190   :  { %9207 = vmatprep.mubr.msk.bf16.mxu0 %vm449_vm0, %v10197_v51  ;;  %v12240_v11 = vpop.f32.mrb[74].mxu1 }
 0x191   :  { %v9714_v43 = vpack.c.bf16 %v1791_v23, %v1791_v23  ;;  %v1792_v56 = vmax.f32 %v1727_v22, 0.0  ;;  %v12236_v27 = vpop.permute.xlu1 %3078  ;;  %v12238_v10 = vpop.permute.xlu0 %3073  ;;  %15669 = vst [vmem:[#allocation53_spill] sm:$0xff] %v12240_v11  ;;  %v3439_v22 = vld [vmem:[%s15613_s3 + $0x40] sm:$0xff]  ;;  %v3441_v11 = vld [vmem:[%s15613_s3 + $0x50] sm:$0xff] }
 0x192   :  { %3528 = vperm.xlu1 %9940, %v3437_v63   ;;  %3523 = vperm.xlu0 %9939, %v3436_v15   ;;  %v735_v47 = vpop.f32.mrb[76].mxu0  ;;  %v3438_v63 = vld [vmem:[%s15613_s3 + $0x38] sm:$0xff]  ;;  %v10199_v23 = vld [vmem:[%s15612_s1 + $0x4e0] ss:$8 sps:$4 sm:$0xff]   ;;  %v2863_v8 = vpop.f32.mrb[75].mxu1 }
 0x193   :  { %2118 = vst.msk [vmem:[%s15614_s4 + $0x90] sm:$0xf] %vm2081_vm1, %v9714_v43  ;;  %v9715_v2 = vpack.c.bf16 %v1792_v56, %v1792_v56  ;;  %v1273_v51 = vmul.f32 %v11197_v49, %v735_v47  ;;  %v737_v35 = vpop.f32.mrb[77].mxu0  ;;  %v10200_v15 = vld [vmem:[%s15612_s1 + $0x4f4] ss:$8 sps:$4 sm:$0xff]  }
 0x194   :  { %v738_v37 = vpop.f32.mrb[78].mxu0 }
 0x195   :  { %2119 = vst.msk [vmem:[%s15614_s4 + $0x94] sm:$0xf] %vm2081_vm1, %v9715_v2  ;;  %v1728_v49 = vadd.f32 %v11866_v31, %v1273_v51  ;;  %v1274_v1 = vmul.f32 %v11195_v44, %v738_v37  ;;  %v12265_v43 = vpop.permute.xlu1 %3088  ;;  %v12267_v56 = vpop.permute.xlu0 %3083  ;;  %v3440_v31 = vld [vmem:[%s15613_s3 + $0x48] sm:$0xff] }
 0x196   :  { %3538 = vperm.xlu1 %9940, %v3439_v22   ;;  %3533 = vperm.xlu0 %9939, %v3438_v63   ;;  %v740_v47 = vpop.f32.mrb[79].mxu0  ;;  %v12276_v44 = vpop.f32.mrb[76].mxu1 }
 0x197   :  { %v1793_v35 = vmax.f32 %v1728_v49, 0.0  ;;  %v1729_v8 = vadd.f32 %v11882_v34, %v1274_v1  ;;  %4947 = vmatmul.mubr.bf16.gmra.mrb[184].mxu0 %v10199_v23  ;;  %15670 = vst [vmem:[#allocation54_spill] sm:$0xff] %v12276_v44  ;;  %v2868_v2 = vpop.f32.mrb[77].mxu1  ;;  %v3443_v47 = vld [vmem:[%s15613_s3 + $0x60] sm:$0xff]  ;;  %v3445_v44 = vld [vmem:[%s15613_s3 + $0x70] sm:$0xff] }
 0x198   :  { %9208 = vmatprep.mubr.msk.bf16.mxu0 %vm449_vm0, %v10200_v15  ;;  %v12283_v49 = vpop.f32.mrb[78].mxu1  ;;  %v10203_v2 = vld [vmem:[%s15612_s1 + $0x504] ss:$8 sps:$4 sm:$0xff]  }
 0x199   :  { %v9716_v51 = vpack.c.bf16 %v1793_v35, %v1793_v35  ;;  %v1794_v22 = vmax.f32 %v1729_v8, 0.0  ;;  %v12279_v63 = vpop.permute.xlu1 %3098  ;;  %v12281_v37 = vpop.permute.xlu0 %3093  ;;  %15671 = vst [vmem:[#allocation55_spill] sm:$0xff] %v12283_v49  ;;  %v10202_v35 = vld [vmem:[%s15612_s1 + $0x4f0] ss:$8 sps:$4 sm:$0xff]  }
 0x19a   :  { %3548 = vperm.xlu1 %9940, %v3441_v11   ;;  %3543 = vperm.xlu0 %9939, %v3440_v31   ;;  %v743_v34 = vpop.f32.mrb[80].mxu0  ;;  %v3442_v11 = vld [vmem:[%s15613_s3 + $0x58] sm:$0xff]  ;;  %v2871_v8 = vpop.f32.mrb[79].mxu1 }
 0x19b   :  { %2120 = vst.msk [vmem:[%s15614_s4 + $0x98] sm:$0xf] %vm2081_vm1, %v9716_v51  ;;  %v9717_v23 = vpack.c.bf16 %v1794_v22, %v1794_v22  ;;  %v1275_v15 = vmul.f32 %v11215_v59, %v743_v34  ;;  %v745_v1 = vpop.f32.mrb[81].mxu0 }
 0x19c   :  { %v746_v31 = vpop.f32.mrb[82].mxu0 }
 0x19d   :  { %2121 = vst.msk [vmem:[%s15614_s4 + $0x9c] sm:$0xf] %vm2081_vm1, %v9717_v23  ;;  %v1730_v59 = vadd.f32 %v11880_v61, %v1275_v15  ;;  %v1276_v51 = vmul.f32 %v11213_v58, %v746_v31  ;;  %v12308_v22 = vpop.permute.xlu1 %3108  ;;  %v12310_v34 = vpop.permute.xlu0 %3103  ;;  %v3444_v61 = vld [vmem:[%s15613_s3 + $0x68] sm:$0xff] }
 0x19e   :  { %3558 = vperm.xlu1 %9940, %v3443_v47   ;;  %3553 = vperm.xlu0 %9939, %v3442_v11   ;;  %v748_v1 = vpop.f32.mrb[83].mxu0  ;;  %v12319_v58 = vpop.f32.mrb[80].mxu1 }
 0x19f   :  { %v1795_v8 = vmax.f32 %v1730_v59, 0.0  ;;  %v1731_v49 = vadd.f32 %v11911_v38, %v1276_v51  ;;  %4955 = vmatmul.mubr.bf16.gmra.mrb[188].mxu0 %v10202_v35  ;;  %15672 = vst [vmem:[#allocation56_spill] sm:$0xff] %v12319_v58  ;;  %v2876_v23 = vpop.f32.mrb[81].mxu1  ;;  %v10205_v1 = vld [vmem:[%s15612_s1 + $0x500] ss:$8 sps:$4 sm:$0xff]  }
 0x1a0   :  { %9209 = vmatprep.mubr.msk.bf16.mxu0 %vm449_vm0, %v10203_v2  ;;  %v12326_v59 = vpop.f32.mrb[82].mxu1  ;;  %v10207_v23 = vld [vmem:[%s15612_s1 + $0x514] ss:$8 sps:$4 sm:$0xff]  }
 0x1a1   :  { %v9718_v15 = vpack.c.bf16 %v1795_v8, %v1795_v8  ;;  %v1796_v47 = vmax.f32 %v1731_v49, 0.0  ;;  %v12322_v11 = vpop.permute.xlu1 %3118  ;;  %v12324_v31 = vpop.permute.xlu0 %3113  ;;  %15673 = vst [vmem:[#allocation57_spill] sm:$0xff] %v12326_v59  ;;  %v3447_v49 = vld [vmem:[%s15613_s3 + $0x80] sm:$0xff] }
 0x1a2   :  { %3568 = vperm.xlu1 %9940, %v3445_v44   ;;  %3563 = vperm.xlu0 %9939, %v3444_v61   ;;  %v751_v38 = vpop.f32.mrb[84].mxu0  ;;  %v3446_v44 = vld [vmem:[%s15613_s3 + $0x78] sm:$0xff]  ;;  %v2879_v8 = vpop.f32.mrb[83].mxu1 }
 0x1a3   :  { %2122 = vst.msk [vmem:[%s15614_s4 + $0xa0] sm:$0xf] %vm2081_vm1, %v9718_v15  ;;  %v9719_v35 = vpack.c.bf16 %v1796_v47, %v1796_v47  ;;  %v1277_v2 = vmul.f32 %v11231_v12, %v751_v38  ;;  %v753_v51 = vpop.f32.mrb[85].mxu0  ;;  %v10255_v8 = vld [vmem:[%s15611_s0 + $0xf8] sm:$0xff]  }
 0x1a4   :  { %v754_v61 = vpop.f32.mrb[86].mxu0  ;;  %6949 = vmatpush1.bf16.msra.mxu1 %v10255_v8  ;;  %v3450_v8 = vld [vmem:[%s15613_s3 + $0x98] sm:$0xff] }
 0x1a5   :  { %2123 = vst.msk [vmem:[%s15614_s4 + $0xa4] sm:$0xf] %vm2081_vm1, %v9719_v35  ;;  %v1732_v12 = vadd.f32 %v11909_v62, %v1277_v2  ;;  %v1278_v15 = vmul.f32 %v11229_v7, %v754_v61  ;;  %v12351_v47 = vpop.permute.xlu1 %3128  ;;  %v12353_v38 = vpop.permute.xlu0 %3123  ;;  %v3449_v62 = vld [vmem:[%s15613_s3 + $0x90] sm:$0xff]  ;;  %v3448_v7 = vld [vmem:[%s15613_s3 + $0x88] sm:$0xff]  ;;  %6950 = vmatprep.subr.bf16.mxu1 %v15646_v9 }
 0x1a6   :  { %3578 = vperm.xlu1 %9940, %v3447_v49   ;;  %3573 = vperm.xlu0 %9939, %v3446_v44   ;;  %v756_v51 = vpop.f32.mrb[87].mxu0  ;;  %v12365_v35 = vpop.f32.mrb[84].mxu1 }
 0x1a7   :  { %v1797_v59 = vmax.f32 %v1732_v12, 0.0  ;;  %v1733_v58 = vadd.f32 %v11929_v21, %v1278_v15  ;;  %4963 = vmatmul.mubr.bf16.gmra.mrb[192].mxu0 %v10205_v1  ;;  %15674 = vst [vmem:[#allocation58_spill] sm:$0xff] %v12365_v35  ;;  %v2884_v2 = vpop.f32.mrb[85].mxu1  ;;  %v10256_v1 = vld [vmem:[%s15611_s0 + $0x100] sm:$0xff]  }
 0x1a8   :  { %9210 = vmatprep.mubr.msk.bf16.mxu0 %vm449_vm0, %v10207_v23  ;;  %v12373_v15 = vpop.f32.mrb[86].mxu1  ;;  %v3451_v51 = vld [vmem:[%s15613_s3 + $0xa0] sm:$0xff]  ;;  %6951 = vmatpush1.bf16.msra.mxu1 %v10256_v1  ;;  %v10260_v1 = vld [vmem:[%s15611_s0 + $0x108] sm:$0xff]  }
 0x1a9   :  { %v9720_v49 = vpack.c.bf16 %v1797_v59, %v1797_v59  ;;  %v1798_v44 = vmax.f32 %v1733_v58, 0.0  ;;  %v12368_v61 = vpop.permute.xlu1 %3138  ;;  %v12370_v21 = vpop.permute.xlu0 %3133  ;;  %15675 = vst [vmem:[#allocation59_spill] sm:$0xff] %v12373_v15  ;;  %6952 = vmatprep.subr.bf16.mxu1 %v15646_v9 }
 0x1aa   :  { %3588 = vperm.xlu1 %9940, %v3449_v62   ;;  %3583 = vperm.xlu0 %9939, %v3448_v7   ;;  %v759_v12 = vpop.f32.mrb[88].mxu0  ;;  %v10209_v62 = vld [vmem:[%s15612_s1 + $0x510] ss:$8 sps:$4 sm:$0xff]   ;;  %v2887_v7 = vpop.f32.mrb[87].mxu1 }
 0x1ab   :  { %2124 = vst.msk [vmem:[%s15614_s4 + $0xa8] sm:$0xf] %vm2081_vm1, %v9720_v49  ;;  %v9721_v58 = vpack.c.bf16 %v1798_v44, %v1798_v44  ;;  %v1279_v59 = vmul.f32 %v11249_v30, %v759_v12  ;;  %v761_v23 = vpop.f32.mrb[89].mxu0  ;;  %v10210_v49 = vld [vmem:[%s15612_s1 + $0x524] ss:$8 sps:$4 sm:$0xff]  }
 0x1ac   :  { %v762_v2 = vpop.f32.mrb[90].mxu0  ;;  %6953 = vmatpush1.bf16.msra.mxu1 %v10260_v1 }
 0x1ad   :  { %2125 = vst.msk [vmem:[%s15614_s4 + $0xac] sm:$0xf] %vm2081_vm1, %v9721_v58  ;;  %v1734_v30 = vadd.f32 %v11927_v40, %v1279_v59  ;;  %v1280_v44 = vmul.f32 %v11247_v29, %v762_v2  ;;  %v12401_v12 = vpop.permute.xlu1 %3148  ;;  %v12403_v23 = vpop.permute.xlu0 %3143  ;;  %v3453_v29 = vld [vmem:[%s15613_s3 + $0xb0] sm:$0xff]  ;;  %v3452_v40 = vld [vmem:[%s15613_s3 + $0xa8] sm:$0xff]  ;;  %6954 = vmatprep.subr.bf16.mxu1 %v15646_v9 }
 0x1ae   :  { %3598 = vperm.xlu1 %9940, %v3451_v51   ;;  %3593 = vperm.xlu0 %9939, %v3450_v8   ;;  %v764_v7 = vpop.f32.mrb[91].mxu0  ;;  %v12416_v59 = vpop.f32.mrb[88].mxu1 }
 0x1af   :  { %v1799_v15 = vmax.f32 %v1734_v30, 0.0  ;;  %v1735_v58 = vadd.f32 %v11958_v26, %v1280_v44  ;;  %4971 = vmatmul.mubr.bf16.gmra.mrb[196].mxu0 %v10209_v62  ;;  %15676 = vst [vmem:[#allocation60_spill] sm:$0xff] %v12416_v59  ;;  %v2892_v51 = vpop.f32.mrb[89].mxu1  ;;  %v10261_v62 = vld [vmem:[%s15611_s0 + $0x110] sm:$0xff]  }
 0x1b0   :  { %9211 = vmatprep.mubr.msk.bf16.mxu0 %vm449_vm0, %v10210_v49  ;;  %v12424_v7 = vpop.f32.mrb[90].mxu1  ;;  %v15678_v49 = vld [vmem:[#allocation3_spill] sm:$0xff]  ;;  %6955 = vmatpush1.bf16.msra.mxu1 %v10261_v62  ;;  %v10264_v62 = vld [vmem:[%s15611_s0 + $0x118] sm:$0xff]  }
 0x1b1   :  { %v9722_v8 = vpack.c.bf16 %v1799_v15, %v1799_v15  ;;  %v1800_v2 = vmax.f32 %v1735_v58, 0.0  ;;  %v12419_v30 = vpop.permute.xlu1 %3158  ;;  %v12421_v26 = vpop.permute.xlu0 %3153  ;;  %15677 = vst [vmem:[#allocation61_spill] sm:$0xff] %v12424_v7  ;;  %v10212_v51 = vld [vmem:[%s15612_s1 + $0x520] ss:$8 sps:$4 sm:$0xff]   ;;  %6956 = vmatprep.subr.bf16.mxu1 %v15646_v9 }
 0x1b2   :  { %3608 = vperm.xlu1 %9940, %v3453_v29   ;;  %3603 = vperm.xlu0 %9939, %v3452_v40   ;;  %v767_v44 = vpop.f32.mrb[92].mxu0  ;;  %v3455_v29 = vld [vmem:[%s15613_s3 + $0xc0] sm:$0xff]  ;;  %v3454_v40 = vld [vmem:[%s15613_s3 + $0xb8] sm:$0xff]  ;;  %v2895_v7 = vpop.f32.mrb[91].mxu1 }
 0x1b3   :  { %2126 = vst.msk [vmem:[%s15614_s4 + $0xb0] sm:$0xf] %vm2081_vm1, %v9722_v8  ;;  %v9723_v15 = vpack.c.bf16 %v1800_v2, %v1800_v2  ;;  %v1281_v1 = vmul.f32 %v15678_v49, %v767_v44  ;;  %v769_v58 = vpop.f32.mrb[93].mxu0  ;;  %v10213_v8 = vld [vmem:[%s15612_s1 + $0x534] ss:$8 sps:$4 sm:$0xff]   ;;  %v15679_v44 = vld [vmem:[#allocation2_spill] sm:$0xff] }
 0x1b4   :  { %v770_v59 = vpop.f32.mrb[94].mxu0  ;;  %6957 = vmatpush1.bf16.msra.mxu1 %v10264_v62 }
 0x1b5   :  { %2127 = vst.msk [vmem:[%s15614_s4 + $0xb4] sm:$0xf] %vm2081_vm1, %v9723_v15  ;;  %v1736_v2 = vadd.f32 %v11956_v5, %v1281_v1  ;;  %v1282_v49 = vmul.f32 %v15679_v44, %v770_v59  ;;  %v12452_v58 = vpop.permute.xlu1 %3168  ;;  %v12454_v35 = vpop.permute.xlu0 %3163  ;;  %v3457_v5 = vld [vmem:[%s15613_s3 + $0xd0] sm:$0xff]  ;;  %v3456_v59 = vld [vmem:[%s15613_s3 + $0xc8] sm:$0xff] }
 0x1b6   :  { %3618 = vperm.xlu1 %9940, %v3455_v29   ;;  %3613 = vperm.xlu0 %9939, %v3454_v40   ;;  %v772_v7 = vpop.f32.mrb[95].mxu0  ;;  %v12467_v9 = vpop.f32.mrb[92].mxu1  ;;  %v10267_v29 = vld [vmem:[%s15612_s1 + $0x61c] ss:$8 sps:$4 sm:$0xff]  }
 0x1b7   :  { %v1801_v32 = vmax.f32 %v1736_v2, 0.0  ;;  %v1737_v15 = vadd.f32 %v11972_v25, %v1282_v49  ;;  %4979 = vmatmul.mubr.bf16.gmra.mrb[200].mxu0 %v10212_v51  ;;  %15680 = vst [vmem:[#allocation3_spill] sm:$0xff] %v12467_v9  ;;  %v2900_v1 = vpop.f32.mrb[93].mxu1  ;;  %v10265_v51 = vld [vmem:[%s15612_s1 + $0x618] ss:$8 sps:$4 sm:$0xff]   ;;  %9515 = vmatprep.mubr.msk.bf16.mxu1 %vm449_vm0, %v10267_v29 }
 0x1b8   :  { %9212 = vmatprep.mubr.msk.bf16.mxu0 %vm449_vm0, %v10213_v8  ;;  %v12480_v8 = vpop.f32.mrb[94].mxu1  ;;  %v15684_v7 = vld [vmem:[#allocation5_spill] sm:$0xff]  ;;  %v3459_v1 = vld [vmem:[%s15613_s3 + $0xe0] sm:$0xff]  ;;  %6973 = vmatmul.mubr.bf16.vlgmr.msra.gmra.mrb[132].mxu1 %v10265_v51  ;;  %v3461_v51 = vld [vmem:[%s15613_s3 + $0xf0] sm:$0xff] }
 0x1b9   :  { %v9724_v25 = vpack.c.bf16 %v1801_v32, %v1801_v32  ;;  %v1802_v40 = vmax.f32 %v1737_v15, 0.0  ;;  %v12473_v2 = vpop.permute.xlu1 %3178  ;;  %v12475_v44 = vpop.permute.xlu0 %3173  ;;  %15683 = vst [vmem:[#allocation63_spill] sm:$0xff] %v12480_v8 }
 0x1ba   :  { %15681 = vst [vmem:[#allocation2_spill] sm:$0xff] %v12473_v2  ;;  %15682 = vst [vmem:[#allocation62_spill] sm:$0xff] %v12475_v44  ;;  %3628 = vperm.xlu1 %9940, %v3457_v5   ;;  %3623 = vperm.xlu0 %9939, %v3456_v59   ;;  %v775_v49 = vpop.f32.mrb[96].mxu0  ;;  %v3458_v5 = vld [vmem:[%s15613_s3 + $0xd8] sm:$0xff]  ;;  %v2903_v8 = vpop.f32.mrb[95].mxu1 }
 0x1bb   :  { %2128 = vst.msk [vmem:[%s15614_s4 + $0xb8] sm:$0xf] %vm2081_vm1, %v9724_v25  ;;  %v9725_v32 = vpack.c.bf16 %v1802_v40, %v1802_v40  ;;  %v1283_v62 = vmul.f32 %v15684_v7, %v775_v49  ;;  %v777_v15 = vpop.f32.mrb[97].mxu0  ;;  %v10215_v59 = vld [vmem:[%s15612_s1 + $0x530] ss:$8 sps:$4 sm:$0xff]  }
 0x1bc   :  { %v778_v25 = vpop.f32.mrb[98].mxu0  ;;  %v10216_v40 = vld [vmem:[%s15612_s1 + $0x544] ss:$8 sps:$4 sm:$0xff]   ;;  %v15685_v7 = vld [vmem:[#allocation4_spill] sm:$0xff] }
 0x1bd   :  { %2129 = vst.msk [vmem:[%s15614_s4 + $0xbc] sm:$0xf] %vm2081_vm1, %v9725_v32  ;;  %v1738_v49 = vadd.f32 %v11970_v17, %v1283_v62  ;;  %v1284_v15 = vmul.f32 %v15685_v7, %v778_v25  ;;  %v12506_v9 = vpop.permute.xlu1 %3188  ;;  %v12508_v8 = vpop.permute.xlu0 %3183  ;;  %v3460_v17 = vld [vmem:[%s15613_s3 + $0xe8] sm:$0xff] }
 0x1be   :  { %3638 = vperm.xlu1 %9940, %v3459_v1   ;;  %3633 = vperm.xlu0 %9939, %v3458_v5   ;;  %v780_v29 = vpop.f32.mrb[99].mxu0  ;;  %v12517_v32 = vpop.f32.mrb[96].mxu1  ;;  %v10268_v1 = vld [vmem:[%s15612_s1 + $0x62c] ss:$8 sps:$4 sm:$0xff]   ;;  %v10270_v7 = vld [vmem:[%s15612_s1 + $0x628] ss:$8 sps:$4 sm:$0xff]  }
 0x1bf   :  { %v1803_v2 = vmax.f32 %v1738_v49, 0.0  ;;  %v1739_v44 = vadd.f32 %v12001_v28, %v1284_v15  ;;  %4987 = vmatmul.mubr.bf16.gmra.mrb[204].mxu0 %v10215_v59  ;;  %15686 = vst [vmem:[#allocation5_spill] sm:$0xff] %v12517_v32  ;;  %v2908_v62 = vpop.f32.mrb[97].mxu1  ;;  %9516 = vmatprep.mubr.msk.bf16.mxu1 %vm449_vm0, %v10268_v1 }
 0x1c0   :  { %9213 = vmatprep.mubr.msk.bf16.mxu0 %vm449_vm0, %v10216_v40  ;;  %v12530_v15 = vpop.f32.mrb[98].mxu1  ;;  %v3463_v62 = vld [vmem:[%s15613_s3 + $0x100] sm:$0xff]  ;;  %6981 = vmatmul.mubr.bf16.gmra.mrb[136].mxu1 %v10270_v7  ;;  %v3465_v7 = vld [vmem:[%s15613_s3 + $0x110] sm:$0xff] }
 0x1c1   :  { %v9726_v5 = vpack.c.bf16 %v1803_v2, %v1803_v2  ;;  %v1804_v28 = vmax.f32 %v1739_v44, 0.0  ;;  %v12523_v25 = vpop.permute.xlu1 %3198  ;;  %v12525_v49 = vpop.permute.xlu0 %3193  ;;  %15689 = vst [vmem:[#allocation65_spill] sm:$0xff] %v12530_v15  ;;  %v15690_v44 = vld [vmem:[#allocation7_spill] sm:$0xff] }
 0x1c2   :  { %15687 = vst [vmem:[#allocation4_spill] sm:$0xff] %v12523_v25  ;;  %15688 = vst [vmem:[#allocation64_spill] sm:$0xff] %v12525_v49  ;;  %3648 = vperm.xlu1 %9940, %v3461_v51   ;;  %3643 = vperm.xlu0 %9939, %v3460_v17   ;;  %v783_v59 = vpop.f32.mrb[100].mxu0  ;;  %v3462_v51 = vld [vmem:[%s15613_s3 + $0xf8] sm:$0xff]  ;;  %v10218_v17 = vld [vmem:[%s15612_s1 + $0x540] ss:$8 sps:$4 sm:$0xff]  }
 0x1c3   :  { %2130 = vst.msk [vmem:[%s15614_s4 + $0xc0] sm:$0xf] %vm2081_vm1, %v9726_v5  ;;  %v9727_v2 = vpack.c.bf16 %v1804_v28, %v1804_v28  ;;  %v1285_v40 = vmul.f32 %v15690_v44, %v783_v59  ;;  %v785_v29 = vpop.f32.mrb[101].mxu0  ;;  %v2911_v15 = vpop.f32.mrb[99].mxu1  ;;  %v10220_v28 = vld [vmem:[%s15612_s1 + $0x554] ss:$8 sps:$4 sm:$0xff]  }
 0x1c4   :  { %v786_v5 = vpop.f32.mrb[102].mxu0  ;;  %v15691_v44 = vld [vmem:[#allocation6_spill] sm:$0xff] }
 0x1c5   :  { %2131 = vst.msk [vmem:[%s15614_s4 + $0xc4] sm:$0xf] %vm2081_vm1, %v9727_v2  ;;  %v1740_v59 = vadd.f32 %v11999_v14, %v1285_v40  ;;  %v1286_v29 = vmul.f32 %v15691_v44, %v786_v5  ;;  %v12556_v32 = vpop.permute.xlu1 %3208  ;;  %v12558_v15 = vpop.permute.xlu0 %3203  ;;  %v3464_v14 = vld [vmem:[%s15613_s3 + $0x108] sm:$0xff]  ;;  %v10273_v44 = vld [vmem:[%s15612_s1 + $0x638] ss:$8 sps:$4 sm:$0xff]  }
 0x1c6   :  { %3658 = vperm.xlu1 %9940, %v3463_v62   ;;  %3653 = vperm.xlu0 %9939, %v3462_v51   ;;  %v788_v1 = vpop.f32.mrb[103].mxu0  ;;  %v12567_v2 = vpop.f32.mrb[100].mxu1  ;;  %v10271_v62 = vld [vmem:[%s15612_s1 + $0x63c] ss:$8 sps:$4 sm:$0xff]  }
 0x1c7   :  { %v1805_v25 = vmax.f32 %v1740_v59, 0.0  ;;  %v1741_v49 = vadd.f32 %v12015_v16, %v1286_v29  ;;  %4995 = vmatmul.mubr.bf16.gmra.mrb[208].mxu0 %v10218_v17  ;;  %15692 = vst [vmem:[#allocation7_spill] sm:$0xff] %v12567_v2  ;;  %v2916_v40 = vpop.f32.mrb[101].mxu1  ;;  %9517 = vmatprep.mubr.msk.bf16.mxu1 %vm449_vm0, %v10271_v62 }
 0x1c8   :  { %9214 = vmatprep.mubr.msk.bf16.mxu0 %vm449_vm0, %v10220_v28  ;;  %v12580_v29 = vpop.f32.mrb[102].mxu1  ;;  %v3467_v40 = vld [vmem:[%s15613_s3 + $0x120] sm:$0xff]  ;;  %6989 = vmatmul.mubr.bf16.gmra.mrb[140].mxu1 %v10273_v44  ;;  %v3469_v44 = vld [vmem:[%s15613_s3 + $0x130] sm:$0xff] }
 0x1c9   :  { %v9728_v51 = vpack.c.bf16 %v1805_v25, %v1805_v25  ;;  %v1806_v16 = vmax.f32 %v1741_v49, 0.0  ;;  %v12573_v5 = vpop.permute.xlu1 %3218  ;;  %v12575_v59 = vpop.permute.xlu0 %3213  ;;  %15695 = vst [vmem:[#allocation67_spill] sm:$0xff] %v12580_v29  ;;  %v15696_v49 = vld [vmem:[#allocation9_spill] sm:$0xff] }
 0x1ca   :  { %15693 = vst [vmem:[#allocation6_spill] sm:$0xff] %v12573_v5  ;;  %15694 = vst [vmem:[#allocation66_spill] sm:$0xff] %v12575_v59  ;;  %3668 = vperm.xlu1 %9940, %v3465_v7   ;;  %3663 = vperm.xlu0 %9939, %v3464_v14   ;;  %v791_v17 = vpop.f32.mrb[104].mxu0  ;;  %v3466_v7 = vld [vmem:[%s15613_s3 + $0x118] sm:$0xff]  ;;  %v2919_v29 = vpop.f32.mrb[103].mxu1 }
 0x1cb   :  { %2132 = vst.msk [vmem:[%s15614_s4 + $0xc8] sm:$0xf] %vm2081_vm1, %v9728_v51  ;;  %v9729_v25 = vpack.c.bf16 %v1806_v16, %v1806_v16  ;;  %v1287_v28 = vmul.f32 %v15696_v49, %v791_v17  ;;  %v793_v1 = vpop.f32.mrb[105].mxu0  ;;  %v10222_v14 = vld [vmem:[%s15612_s1 + $0x550] ss:$8 sps:$4 sm:$0xff]  }
 0x1cc   :  { %v794_v51 = vpop.f32.mrb[106].mxu0  ;;  %v10223_v16 = vld [vmem:[%s15612_s1 + $0x564] ss:$8 sps:$4 sm:$0xff]   ;;  %v15697_v49 = vld [vmem:[#allocation8_spill] sm:$0xff] }
 0x1cd   :  { %2133 = vst.msk [vmem:[%s15614_s4 + $0xcc] sm:$0xf] %vm2081_vm1, %v9729_v25  ;;  %v1742_v17 = vadd.f32 %v12013_v4, %v1287_v28  ;;  %v1288_v1 = vmul.f32 %v15697_v49, %v794_v51  ;;  %v12606_v2 = vpop.permute.xlu1 %3228  ;;  %v12608_v29 = vpop.permute.xlu0 %3223  ;;  %v3468_v4 = vld [vmem:[%s15613_s3 + $0x128] sm:$0xff] }
 0x1ce   :  { %3678 = vperm.xlu1 %9940, %v3467_v40   ;;  %3673 = vperm.xlu0 %9939, %v3466_v7   ;;  %v796_v62 = vpop.f32.mrb[107].mxu0  ;;  %v12617_v25 = vpop.f32.mrb[104].mxu1  ;;  %v10274_v40 = vld [vmem:[%s15612_s1 + $0x64c] ss:$8 sps:$4 sm:$0xff]   ;;  %v10276_v49 = vld [vmem:[%s15612_s1 + $0x648] ss:$8 sps:$4 sm:$0xff]  }
 0x1cf   :  { %v1807_v5 = vmax.f32 %v1742_v17, 0.0  ;;  %v1743_v59 = vadd.f32 %v12044_v55, %v1288_v1  ;;  %5003 = vmatmul.mubr.bf16.gmra.mrb[212].mxu0 %v10222_v14  ;;  %15698 = vst [vmem:[#allocation9_spill] sm:$0xff] %v12617_v25  ;;  %v2924_v28 = vpop.f32.mrb[105].mxu1  ;;  %9518 = vmatprep.mubr.msk.bf16.mxu1 %vm449_vm0, %v10274_v40 }
 0x1d0   :  { %9215 = vmatprep.mubr.msk.bf16.mxu0 %vm449_vm0, %v10223_v16  ;;  %v12630_v1 = vpop.f32.mrb[106].mxu1  ;;  %v3471_v28 = vld [vmem:[%s15613_s3 + $0x140] sm:$0xff]  ;;  %6997 = vmatmul.mubr.bf16.gmra.mrb[144].mxu1 %v10276_v49  ;;  %v3473_v49 = vld [vmem:[%s15613_s3 + $0x150] sm:$0xff] }
 0x1d1   :  { %v9730_v7 = vpack.c.bf16 %v1807_v5, %v1807_v5  ;;  %v1808_v55 = vmax.f32 %v1743_v59, 0.0  ;;  %v12623_v51 = vpop.permute.xlu1 %3238  ;;  %v12625_v17 = vpop.permute.xlu0 %3233  ;;  %15701 = vst [vmem:[#allocation69_spill] sm:$0xff] %v12630_v1  ;;  %v15702_v59 = vld [vmem:[#allocation11_spill] sm:$0xff] }
 0x1d2   :  { %15699 = vst [vmem:[#allocation8_spill] sm:$0xff] %v12623_v51  ;;  %15700 = vst [vmem:[#allocation68_spill] sm:$0xff] %v12625_v17  ;;  %3688 = vperm.xlu1 %9940, %v3469_v44   ;;  %3683 = vperm.xlu0 %9939, %v3468_v4   ;;  %v799_v14 = vpop.f32.mrb[108].mxu0  ;;  %v3470_v44 = vld [vmem:[%s15613_s3 + $0x138] sm:$0xff]  ;;  %v10225_v4 = vld [vmem:[%s15612_s1 + $0x560] ss:$8 sps:$4 sm:$0xff]  }
 0x1d3   :  { %2134 = vst.msk [vmem:[%s15614_s4 + $0xd0] sm:$0xf] %vm2081_vm1, %v9730_v7  ;;  %v9731_v5 = vpack.c.bf16 %v1808_v55, %v1808_v55  ;;  %v1289_v16 = vmul.f32 %v15702_v59, %v799_v14  ;;  %v801_v62 = vpop.f32.mrb[109].mxu0  ;;  %v2927_v1 = vpop.f32.mrb[107].mxu1  ;;  %v10226_v55 = vld [vmem:[%s15612_s1 + $0x574] ss:$8 sps:$4 sm:$0xff]  }
 0x1d4   :  { %v802_v7 = vpop.f32.mrb[110].mxu0  ;;  %v15703_v59 = vld [vmem:[#allocation10_spill] sm:$0xff] }
 0x1d5   :  { %2135 = vst.msk [vmem:[%s15614_s4 + $0xd4] sm:$0xf] %vm2081_vm1, %v9731_v5  ;;  %v1744_v14 = vadd.f32 %v12042_v20, %v1289_v16  ;;  %v1290_v62 = vmul.f32 %v15703_v59, %v802_v7  ;;  %v12656_v25 = vpop.permute.xlu1 %3248  ;;  %v12658_v1 = vpop.permute.xlu0 %3243  ;;  %v3472_v20 = vld [vmem:[%s15613_s3 + $0x148] sm:$0xff]  ;;  %v10279_v59 = vld [vmem:[%s15612_s1 + $0x658] ss:$8 sps:$4 sm:$0xff]  }
 0x1d6   :  { %3698 = vperm.xlu1 %9940, %v3471_v28   ;;  %3693 = vperm.xlu0 %9939, %v3470_v44   ;;  %v804_v40 = vpop.f32.mrb[111].mxu0  ;;  %v12667_v5 = vpop.f32.mrb[108].mxu1  ;;  %v10277_v28 = vld [vmem:[%s15612_s1 + $0x65c] ss:$8 sps:$4 sm:$0xff]  }
 0x1d7   :  { %v1809_v51 = vmax.f32 %v1744_v14, 0.0  ;;  %v1745_v17 = vadd.f32 %v12058_v39, %v1290_v62  ;;  %5011 = vmatmul.mubr.bf16.gmra.mrb[216].mxu0 %v10225_v4  ;;  %15704 = vst [vmem:[#allocation11_spill] sm:$0xff] %v12667_v5  ;;  %v2932_v16 = vpop.f32.mrb[109].mxu1  ;;  %9519 = vmatprep.mubr.msk.bf16.mxu1 %vm449_vm0, %v10277_v28 }
 0x1d8   :  { %9216 = vmatprep.mubr.msk.bf16.mxu0 %vm449_vm0, %v10226_v55  ;;  %v12680_v62 = vpop.f32.mrb[110].mxu1  ;;  %v3475_v16 = vld [vmem:[%s15613_s3 + $0x160] sm:$0xff]  ;;  %7005 = vmatmul.mubr.bf16.gmra.mrb[148].mxu1 %v10279_v59  ;;  %v3477_v59 = vld [vmem:[%s15613_s3 + $0x170] sm:$0xff] }
 0x1d9   :  { %v9732_v44 = vpack.c.bf16 %v1809_v51, %v1809_v51  ;;  %v1810_v39 = vmax.f32 %v1745_v17, 0.0  ;;  %v12673_v7 = vpop.permute.xlu1 %3258  ;;  %v12675_v14 = vpop.permute.xlu0 %3253  ;;  %15707 = vst [vmem:[#allocation71_spill] sm:$0xff] %v12680_v62  ;;  %v15708_v17 = vld [vmem:[#allocation13_spill] sm:$0xff] }
 0x1da   :  { %15705 = vst [vmem:[#allocation10_spill] sm:$0xff] %v12673_v7  ;;  %15706 = vst [vmem:[#allocation70_spill] sm:$0xff] %v12675_v14  ;;  %3708 = vperm.xlu1 %9940, %v3473_v49   ;;  %3703 = vperm.xlu0 %9939, %v3472_v20   ;;  %v807_v4 = vpop.f32.mrb[112].mxu0  ;;  %v3474_v49 = vld [vmem:[%s15613_s3 + $0x158] sm:$0xff]  ;;  %v2935_v62 = vpop.f32.mrb[111].mxu1 }
 0x1db   :  { %2136 = vst.msk [vmem:[%s15614_s4 + $0xd8] sm:$0xf] %vm2081_vm1, %v9732_v44  ;;  %v9733_v51 = vpack.c.bf16 %v1810_v39, %v1810_v39  ;;  %v1291_v55 = vmul.f32 %v15708_v17, %v807_v4  ;;  %v809_v40 = vpop.f32.mrb[113].mxu0  ;;  %v10228_v20 = vld [vmem:[%s15612_s1 + $0x570] ss:$8 sps:$4 sm:$0xff]  }
 0x1dc   :  { %v810_v44 = vpop.f32.mrb[114].mxu0  ;;  %v10230_v39 = vld [vmem:[%s15612_s1 + $0x584] ss:$8 sps:$4 sm:$0xff]   ;;  %v15709_v17 = vld [vmem:[#allocation12_spill] sm:$0xff] }
 0x1dd   :  { %2137 = vst.msk [vmem:[%s15614_s4 + $0xdc] sm:$0xf] %vm2081_vm1, %v9733_v51  ;;  %v1746_v4 = vadd.f32 %v12056_v36, %v1291_v55  ;;  %v1292_v40 = vmul.f32 %v15709_v17, %v810_v44  ;;  %v12706_v5 = vpop.permute.xlu1 %3268  ;;  %v12708_v62 = vpop.permute.xlu0 %3263  ;;  %v3476_v36 = vld [vmem:[%s15613_s3 + $0x168] sm:$0xff] }
 0x1de   :  { %3718 = vperm.xlu1 %9940, %v3475_v16   ;;  %3713 = vperm.xlu0 %9939, %v3474_v49   ;;  %v812_v28 = vpop.f32.mrb[115].mxu0  ;;  %v12717_v51 = vpop.f32.mrb[112].mxu1  ;;  %v10280_v16 = vld [vmem:[%s15612_s1 + $0x66c] ss:$8 sps:$4 sm:$0xff]   ;;  %v10282_v17 = vld [vmem:[%s15612_s1 + $0x668] ss:$8 sps:$4 sm:$0xff]  }
 0x1df   :  { %v1811_v7 = vmax.f32 %v1746_v4, 0.0  ;;  %v1747_v14 = vadd.f32 %v12090_v54, %v1292_v40  ;;  %5019 = vmatmul.mubr.bf16.gmra.mrb[220].mxu0 %v10228_v20  ;;  %15710 = vst [vmem:[#allocation13_spill] sm:$0xff] %v12717_v51  ;;  %v2940_v55 = vpop.f32.mrb[113].mxu1  ;;  %9520 = vmatprep.mubr.msk.bf16.mxu1 %vm449_vm0, %v10280_v16 }
 0x1e0   :  { %9217 = vmatprep.mubr.msk.bf16.mxu0 %vm449_vm0, %v10230_v39  ;;  %v12730_v40 = vpop.f32.mrb[114].mxu1  ;;  %v3479_v55 = vld [vmem:[%s15613_s3 + $0x180] sm:$0xff]  ;;  %7013 = vmatmul.mubr.bf16.gmra.mrb[152].mxu1 %v10282_v17  ;;  %v3481_v17 = vld [vmem:[%s15613_s3 + $0x190] sm:$0xff] }
 0x1e1   :  { %v9734_v49 = vpack.c.bf16 %v1811_v7, %v1811_v7  ;;  %v1812_v54 = vmax.f32 %v1747_v14, 0.0  ;;  %v12723_v44 = vpop.permute.xlu1 %3278  ;;  %v12725_v4 = vpop.permute.xlu0 %3273  ;;  %15713 = vst [vmem:[#allocation73_spill] sm:$0xff] %v12730_v40  ;;  %v15714_v14 = vld [vmem:[#allocation15_spill] sm:$0xff] }
 0x1e2   :  { %15711 = vst [vmem:[#allocation12_spill] sm:$0xff] %v12723_v44  ;;  %15712 = vst [vmem:[#allocation72_spill] sm:$0xff] %v12725_v4  ;;  %3728 = vperm.xlu1 %9940, %v3477_v59   ;;  %3723 = vperm.xlu0 %9939, %v3476_v36   ;;  %v815_v20 = vpop.f32.mrb[116].mxu0  ;;  %v3478_v59 = vld [vmem:[%s15613_s3 + $0x178] sm:$0xff]  ;;  %v10232_v36 = vld [vmem:[%s15612_s1 + $0x580] ss:$8 sps:$4 sm:$0xff]  }
 0x1e3   :  { %2138 = vst.msk [vmem:[%s15614_s4 + $0xe0] sm:$0xf] %vm2081_vm1, %v9734_v49  ;;  %v9735_v7 = vpack.c.bf16 %v1812_v54, %v1812_v54  ;;  %v1293_v39 = vmul.f32 %v15714_v14, %v815_v20  ;;  %v817_v28 = vpop.f32.mrb[117].mxu0  ;;  %v2943_v40 = vpop.f32.mrb[115].mxu1  ;;  %v10233_v54 = vld [vmem:[%s15612_s1 + $0x594] ss:$8 sps:$4 sm:$0xff]  }
 0x1e4   :  { %v818_v49 = vpop.f32.mrb[118].mxu0  ;;  %v15715_v14 = vld [vmem:[#allocation14_spill] sm:$0xff] }
 0x1e5   :  { %2139 = vst.msk [vmem:[%s15614_s4 + $0xe4] sm:$0xf] %vm2081_vm1, %v9735_v7  ;;  %v1748_v20 = vadd.f32 %v12088_v0, %v1293_v39  ;;  %v1294_v28 = vmul.f32 %v15715_v14, %v818_v49  ;;  %v12756_v51 = vpop.permute.xlu1 %3288  ;;  %v12758_v40 = vpop.permute.xlu0 %3283  ;;  %v3480_v0 = vld [vmem:[%s15613_s3 + $0x188] sm:$0xff]  ;;  %v10285_v14 = vld [vmem:[%s15612_s1 + $0x678] ss:$8 sps:$4 sm:$0xff]  }
 0x1e6   :  { %3738 = vperm.xlu1 %9940, %v3479_v55   ;;  %3733 = vperm.xlu0 %9939, %v3478_v59   ;;  %v820_v16 = vpop.f32.mrb[119].mxu0  ;;  %v12767_v7 = vpop.f32.mrb[116].mxu1  ;;  %v10283_v55 = vld [vmem:[%s15612_s1 + $0x67c] ss:$8 sps:$4 sm:$0xff]  }
 0x1e7   :  { %v1813_v44 = vmax.f32 %v1748_v20, 0.0  ;;  %v1749_v4 = vadd.f32 %v12105_v48, %v1294_v28  ;;  %5027 = vmatmul.mubr.bf16.gmra.mrb[224].mxu0 %v10232_v36  ;;  %15716 = vst [vmem:[#allocation15_spill] sm:$0xff] %v12767_v7  ;;  %v2948_v39 = vpop.f32.mrb[117].mxu1  ;;  %9521 = vmatprep.mubr.msk.bf16.mxu1 %vm449_vm0, %v10283_v55 }
 0x1e8   :  { %9218 = vmatprep.mubr.msk.bf16.mxu0 %vm449_vm0, %v10233_v54  ;;  %v12780_v28 = vpop.f32.mrb[118].mxu1  ;;  %v3483_v39 = vld [vmem:[%s15613_s3 + $0x1a0] sm:$0xff]  ;;  %7021 = vmatmul.mubr.bf16.gmra.mrb[156].mxu1 %v10285_v14  ;;  %v3485_v14 = vld [vmem:[%s15613_s3 + $0x1b0] sm:$0xff] }
 0x1e9   :  { %v9736_v59 = vpack.c.bf16 %v1813_v44, %v1813_v44  ;;  %v1814_v48 = vmax.f32 %v1749_v4, 0.0  ;;  %v12773_v49 = vpop.permute.xlu1 %3298  ;;  %v12775_v20 = vpop.permute.xlu0 %3293  ;;  %15719 = vst [vmem:[#allocation75_spill] sm:$0xff] %v12780_v28  ;;  %v15720_v4 = vld [vmem:[#allocation17_spill] sm:$0xff] }
 0x1ea   :  { %15717 = vst [vmem:[#allocation14_spill] sm:$0xff] %v12773_v49  ;;  %15718 = vst [vmem:[#allocation74_spill] sm:$0xff] %v12775_v20  ;;  %3748 = vperm.xlu1 %9940, %v3481_v17   ;;  %3743 = vperm.xlu0 %9939, %v3480_v0   ;;  %v823_v36 = vpop.f32.mrb[120].mxu0  ;;  %v3482_v17 = vld [vmem:[%s15613_s3 + $0x198] sm:$0xff]  ;;  %v2951_v28 = vpop.f32.mrb[119].mxu1 }
 0x1eb   :  { %2140 = vst.msk [vmem:[%s15614_s4 + $0xe8] sm:$0xf] %vm2081_vm1, %v9736_v59  ;;  %v9737_v44 = vpack.c.bf16 %v1814_v48, %v1814_v48  ;;  %v1295_v54 = vmul.f32 %v15720_v4, %v823_v36  ;;  %v825_v16 = vpop.f32.mrb[121].mxu0  ;;  %v10235_v0 = vld [vmem:[%s15612_s1 + $0x590] ss:$8 sps:$4 sm:$0xff]  }
 0x1ec   :  { %v826_v59 = vpop.f32.mrb[122].mxu0  ;;  %v10236_v48 = vld [vmem:[%s15612_s1 + $0x5a4] ss:$8 sps:$4 sm:$0xff]   ;;  %v15721_v4 = vld [vmem:[#allocation16_spill] sm:$0xff] }
 0x1ed   :  { %2141 = vst.msk [vmem:[%s15614_s4 + $0xec] sm:$0xf] %vm2081_vm1, %v9737_v44  ;;  %v1750_v36 = vadd.f32 %v12103_v45, %v1295_v54  ;;  %v1296_v16 = vmul.f32 %v15721_v4, %v826_v59  ;;  %v12806_v7 = vpop.permute.xlu1 %3308  ;;  %v12808_v28 = vpop.permute.xlu0 %3303  ;;  %v3484_v45 = vld [vmem:[%s15613_s3 + $0x1a8] sm:$0xff] }
 0x1ee   :  { %3758 = vperm.xlu1 %9940, %v3483_v39   ;;  %3753 = vperm.xlu0 %9939, %v3482_v17   ;;  %v828_v55 = vpop.f32.mrb[123].mxu0  ;;  %v12817_v44 = vpop.f32.mrb[120].mxu1  ;;  %v10286_v39 = vld [vmem:[%s15612_s1 + $0x68c] ss:$8 sps:$4 sm:$0xff]   ;;  %v10288_v4 = vld [vmem:[%s15612_s1 + $0x688] ss:$8 sps:$4 sm:$0xff]  }
 0x1ef   :  { %v1815_v49 = vmax.f32 %v1750_v36, 0.0  ;;  %v1751_v20 = vadd.f32 %v12134_v46, %v1296_v16  ;;  %5035 = vmatmul.mubr.bf16.gmra.mrb[228].mxu0 %v10235_v0  ;;  %15722 = vst [vmem:[#allocation17_spill] sm:$0xff] %v12817_v44  ;;  %v2956_v54 = vpop.f32.mrb[121].mxu1  ;;  %9522 = vmatprep.mubr.msk.bf16.mxu1 %vm449_vm0, %v10286_v39 }
 0x1f0   :  { %9219 = vmatprep.mubr.msk.bf16.mxu0 %vm449_vm0, %v10236_v48  ;;  %v12830_v16 = vpop.f32.mrb[122].mxu1  ;;  %v3487_v54 = vld [vmem:[%s15613_s3 + $0x1c0] sm:$0xff]  ;;  %7029 = vmatmul.mubr.bf16.gmra.mrb[160].mxu1 %v10288_v4  ;;  %v3489_v4 = vld [vmem:[%s15613_s3 + $0x1d0] sm:$0xff] }
 0x1f1   :  { %v9738_v17 = vpack.c.bf16 %v1815_v49, %v1815_v49  ;;  %v1816_v46 = vmax.f32 %v1751_v20, 0.0  ;;  %v12823_v59 = vpop.permute.xlu1 %3318  ;;  %v12825_v36 = vpop.permute.xlu0 %3313  ;;  %15725 = vst [vmem:[#allocation77_spill] sm:$0xff] %v12830_v16  ;;  %v15726_v20 = vld [vmem:[#allocation19_spill] sm:$0xff] }
 0x1f2   :  { %15723 = vst [vmem:[#allocation16_spill] sm:$0xff] %v12823_v59  ;;  %15724 = vst [vmem:[#allocation76_spill] sm:$0xff] %v12825_v36  ;;  %3768 = vperm.xlu1 %9940, %v3485_v14   ;;  %3763 = vperm.xlu0 %9939, %v3484_v45   ;;  %v831_v0 = vpop.f32.mrb[124].mxu0  ;;  %v3486_v14 = vld [vmem:[%s15613_s3 + $0x1b8] sm:$0xff]  ;;  %v2959_v45 = vpop.f32.mrb[123].mxu1 }
 0x1f3   :  { %2142 = vst.msk [vmem:[%s15614_s4 + $0xf0] sm:$0xf] %vm2081_vm1, %v9738_v17  ;;  %v9739_v49 = vpack.c.bf16 %v1816_v46, %v1816_v46  ;;  %v1297_v48 = vmul.f32 %v15726_v20, %v831_v0  ;;  %v833_v55 = vpop.f32.mrb[125].mxu0  ;;  %v10238_v16 = vld [vmem:[%s15612_s1 + $0x5a0] ss:$8 sps:$4 sm:$0xff]  }
 0x1f4   :  { %v834_v17 = vpop.f32.mrb[126].mxu0  ;;  %v10239_v46 = vld [vmem:[%s15612_s1 + $0x5b4] ss:$8 sps:$4 sm:$0xff]   ;;  %v15727_v20 = vld [vmem:[#allocation18_spill] sm:$0xff] }
 0x1f5   :  { %2143 = vst.msk [vmem:[%s15614_s4 + $0xf4] sm:$0xf] %vm2081_vm1, %v9739_v49  ;;  %v1752_v0 = vadd.f32 %v12132_v6, %v1297_v48  ;;  %v1298_v55 = vmul.f32 %v15727_v20, %v834_v17  ;;  %v12856_v45 = vpop.permute.xlu1 %3328  ;;  %v12858_v44 = vpop.permute.xlu0 %3323  ;;  %v3488_v6 = vld [vmem:[%s15613_s3 + $0x1c8] sm:$0xff]  ;;  %v10291_v20 = vld [vmem:[%s15612_s1 + $0x698] ss:$8 sps:$4 sm:$0xff]  }
 0x1f6   :  { %3778 = vperm.xlu1 %9940, %v3487_v54   ;;  %3773 = vperm.xlu0 %9939, %v3486_v14   ;;  %v836_v39 = vpop.f32.mrb[127].mxu0  ;;  %v12867_v49 = vpop.f32.mrb[124].mxu1  ;;  %v10289_v54 = vld [vmem:[%s15612_s1 + $0x69c] ss:$8 sps:$4 sm:$0xff]  }
 0x1f7   :  { %v1817_v59 = vmax.f32 %v1752_v0, 0.0  ;;  %v1753_v36 = vadd.f32 %v12148_v42, %v1298_v55  ;;  %5043 = vmatmul.mubr.bf16.gmra.mrb[232].mxu0 %v10238_v16  ;;  %15728 = vst [vmem:[#allocation19_spill] sm:$0xff] %v12867_v49  ;;  %v2964_v48 = vpop.f32.mrb[125].mxu1  ;;  %v3491_v39 = vld [vmem:[%s15613_s3 + $0x1e0] sm:$0xff]  ;;  %9523 = vmatprep.mubr.msk.bf16.mxu1 %vm449_vm0, %v10289_v54 }
 0x1f8   :  { %9220 = vmatprep.mubr.msk.bf16.mxu0 %vm449_vm0, %v10239_v46  ;;  %v12880_v55 = vpop.f32.mrb[126].mxu1  ;;  %v10241_v48 = vld [vmem:[%s15612_s1 + $0x5b0] ss:$8 sps:$4 sm:$0xff]   ;;  %7037 = vmatmul.mubr.bf16.gmra.mrb[164].mxu1 %v10291_v20 }
 0x1f9   :  { %v9740_v14 = vpack.c.bf16 %v1817_v59, %v1817_v59  ;;  %v1818_v42 = vmax.f32 %v1753_v36, 0.0  ;;  %v12873_v17 = vpop.permute.xlu1 %3338  ;;  %v12875_v0 = vpop.permute.xlu0 %3333  ;;  %15729 = vst [vmem:[#allocation18_spill] sm:$0xff] %v12880_v55  ;;  %v15730_v36 = vld [vmem:[#allocation20_spill] sm:$0xff] }
 0x1fa   :  { %3788 = vperm.xlu1 %9940, %v3489_v4   ;;  %3783 = vperm.xlu0 %9939, %v3488_v6   ;;  %v839_v16 = vpop.f32.mrb[128].mxu0  ;;  %v3490_v4 = vld [vmem:[%s15613_s3 + $0x1d8] sm:$0xff]  ;;  %v2967_v6 = vpop.f32.mrb[127].mxu1  ;;  %v3493_v20 = vld [vmem:[%s15613_s3 + $0x1f0] sm:$0xff] }
 0x1fb   :  { %2144 = vst.msk [vmem:[%s15614_s4 + $0xf8] sm:$0xf] %vm2081_vm1, %v9740_v14  ;;  %v9741_v59 = vpack.c.bf16 %v1818_v42, %v1818_v42  ;;  %v1299_v46 = vmul.f32 %v15730_v36, %v839_v16  ;;  %v841_v55 = vpop.f32.mrb[129].mxu0  ;;  %v10243_v14 = vld [vmem:[%s15612_s1 + $0x5c4] ss:$8 sps:$4 sm:$0xff]  }
 0x1fc   :  { %v842_v42 = vpop.f32.mrb[130].mxu0 }
 0x1fd   :  { %2145 = vst.msk [vmem:[%s15614_s4 + $0xfc] sm:$0xf] %vm2081_vm1, %v9741_v59  ;;  %v1754_v16 = vadd.f32 %v12146_v19, %v1299_v46  ;;  %v12905_v36 = vpop.permute.xlu1 %3348  ;;  %v12907_v6 = vpop.permute.xlu0 %3343  ;;  %v3492_v42 = vld [vmem:[%s15613_s3 + $0x1e8] sm:$0xff] }
 0x1fe   :  { %3798 = vperm.xlu1 %9940, %v3491_v39   ;;  %3793 = vperm.xlu0 %9939, %v3490_v4   ;;  %v843_v54 = vpop.f32.mrb[131].mxu0  ;;  %v12915_v49 = vpop.f32.mrb[128].mxu1  ;;  %v10292_v19 = vld [vmem:[%s15612_s1 + $0x6ac] ss:$8 sps:$4 sm:$0xff]  }
 0x1ff   :  { %v1819_v55 = vmax.f32 %v1754_v16, 0.0  ;;  %15731 = vst [vmem:[#allocation20_spill] sm:$0xff] %v12915_v49  ;;  %5051 = vmatmul.mubr.bf16.gmra.mrb[236].mxu0 %v10241_v48  ;;  %v2972_v59 = vpop.f32.mrb[129].mxu1  ;;  %v10294_v16 = vld [vmem:[%s15612_s1 + $0x6a8] ss:$8 sps:$4 sm:$0xff]   ;;  %v3494_v54 = vld [vmem:[%s15613_s3 + $0x1f8] sm:$0xff]  ;;  %9524 = vmatprep.mubr.msk.bf16.mxu1 %vm449_vm0, %v10292_v19 }
 0x200   :  { %9221 = vmatprep.mubr.msk.bf16.mxu0 %vm449_vm0, %v10243_v14  ;;  %v2973_v48 = vpop.f32.mrb[130].mxu1  ;;  %v3495_v14 = vld [vmem:[%s15613_s3 + $0x200] sm:$0xf]  ;;  %7045 = vmatmul.mubr.bf16.gmra.mrb[168].mxu1 %v10294_v16  ;;  %v3368_v16 = vmul.f32 %v12191_v18, %v11463_v50  ;;  %v5109_v18 = vld [vmem:[%s15610_s2 + $0x18] sm:$0xff] }
 0x201   :  { %v9742_v46 = vpack.c.bf16 %v1819_v55, %v1819_v55  ;;  %v12921_v39 = vpop.permute.xlu1 %3358  ;;  %v12923_v4 = vpop.permute.xlu0 %3353  ;;  %v10245_v55 = vld [vmem:[%s15612_s1 + $0x5c0] ss:$8 sps:$4 sm:$0xff]  }
 0x202   :  { %15732 = vst [vmem:[#allocation78_spill] sm:$0xff] %v12921_v39  ;;  %15733 = vst [vmem:[#allocation79_spill] sm:$0xff] %v12923_v4  ;;  %3808 = vperm.xlu1 %9940, %v3493_v20   ;;  %3803 = vperm.xlu0 %9939, %v3492_v42   ;;  %v2974_v20 = vpop.f32.mrb[131].mxu1  ;;  %v15734_v42 = vld [vmem:[#allocation21_spill] sm:$0xff]  ;;  %v5107_v4 = vld [vmem:[%s15610_s2 + $0x8] sm:$0xff] }
 0x203   :  { %2147 = vst.msk [vmem:[%s15614_s4 + $0x100] sm:$0x3] %vm2146_vm2, %v9742_v46  ;;  %v3366_v59 = vmul.f32 %v12177_v60, %v15734_v42  ;;  %v10246_v46 = vld [vmem:[%s15612_s1 + $0x5d4] ss:$8 sps:$4 sm:$0xff]   ;;  %v5106_v19 = vld [vmem:[%s15610_s2] sm:$0xff] }
 0x204   :  { %v15736_v60 = vld [vmem:[#allocation22_spill] sm:$0xff] }
 0x205   :  { %v3499_v48 = vpop.permute.xlu1 %3498  ;;  %v12947_v49 = vpop.permute.xlu0 %3363  ;;  %v3367_v20 = vmul.f32 %v12175_v53, %v15736_v60 }
 0x206   :  { %15735 = vst [vmem:[#allocation21_spill] sm:$0xff] %v12947_v49  ;;  %v3821_v39 = vadd.f32 %v3499_v48, %v3366_v59  ;;  %3818 = vperm.xlu1 %9940, %v3495_v14   ;;  %3813 = vperm.xlu0 %9939, %v3494_v54   ;;  %v12960_v14 = vpop.f32.mrb[132].mxu0  ;;  %v10295_v54 = vld [vmem:[%s15612_s1 + $0x6bc] ss:$8 sps:$4 sm:$0xff]  }
 0x207   :  { %5059 = vmatmul.mubr.bf16.gmra.mrb[240].mxu0 %v10245_v55  ;;  %v10297_v55 = vld [vmem:[%s15612_s1 + $0x6b8] ss:$8 sps:$4 sm:$0xff]   ;;  %v4846_v50 = vpop.f32.mrb[133].mxu0  ;;  %9525 = vmatprep.mubr.msk.bf16.mxu1 %vm449_vm0, %v10295_v54  ;;  %v10249_v54 = vld [vmem:[%s15612_s1 + $0x5e4] ss:$8 sps:$4 sm:$0xff]  }
 0x208   :  { %v3886_v42 = vmax.f32 %v3821_v39, 0.0  ;;  %9222 = vmatprep.mubr.msk.bf16.mxu0 %vm449_vm0, %v10246_v46  ;;  %v10248_v39 = vld [vmem:[%s15612_s1 + $0x5d0] ss:$8 sps:$4 sm:$0xff]   ;;  %v12974_v46 = vpop.f32.mrb[134].mxu0  ;;  %7053 = vmatmul.mubr.bf16.gmra.mrb[172].mxu1 %v10297_v55  ;;  %v15738_v55 = vld [vmem:[#allocation23_spill] sm:$0xff] }
 0x209   :  { %v3509_v59 = vpop.permute.xlu1 %3508  ;;  %v3504_v48 = vpop.permute.xlu0 %3503  ;;  %15737 = vst [vmem:[#allocation22_spill] sm:$0xff] %v12974_v46  ;;  %v3372_v46 = vmul.f32 %v12238_v10, %v15738_v55  ;;  %v5112_v55 = vld [vmem:[%s15610_s2 + $0x30] sm:$0xff] }
 0x20a   :  { %v9743_v49 = vpack.c.bf16 %v3886_v42, %v3886_v42  ;;  %v3823_v53 = vadd.f32 %v3509_v59, %v3368_v16  ;;  %v3822_v60 = vadd.f32 %v3504_v48, %v3367_v20  ;;  %5178 = vperm.xlu1 %9940, %v5107_v4   ;;  %5173 = vperm.xlu0 %9939, %v5106_v19   ;;  %v5108_v16 = vld [vmem:[%s15610_s2 + $0x10] sm:$0xff]  ;;  %v4849_v59 = vpop.f32.mrb[135].mxu0 }
 0x20b   :  { %v3369_v42 = vmul.f32 %v12189_v41, %v11486_v3  ;;  %v3370_v4 = vmul.f32 %v12223_v33, %v11502_v24  ;;  %v3371_v59 = vmul.f32 %v12221_v52, %v11512_v57  ;;  %v10298_v52 = vld [vmem:[%s15612_s1 + $0x6cc] ss:$8 sps:$4 sm:$0xff]  }
 0x20c   :  { %8971 = vst.msk [vmem:[%s15614_s4 + $0x104] sm:$0xf] %vm2081_vm1, %v9743_v49  ;;  %v3888_v19 = vmax.f32 %v3823_v53, 0.0  ;;  %v3887_v20 = vmax.f32 %v3822_v60, 0.0  ;;  %v12991_v49 = vpop.f32.mrb[136].mxu0  ;;  %v5111_v53 = vld [vmem:[%s15610_s2 + $0x28] sm:$0xff]  ;;  %9526 = vmatprep.mubr.msk.bf16.mxu1 %vm449_vm0, %v10298_v52 }
 0x20d   :  { %v3519_v3 = vpop.permute.xlu1 %3518  ;;  %v3514_v41 = vpop.permute.xlu0 %3513 }
 0x20e   :  { %v9745_v24 = vpack.c.bf16 %v3888_v19, %v3888_v19  ;;  %v9744_v33 = vpack.c.bf16 %v3887_v20, %v3887_v20  ;;  %v3825_v48 = vadd.f32 %v3519_v3, %v3370_v4  ;;  %v3824_v50 = vadd.f32 %v3514_v41, %v3369_v42  ;;  %5188 = vperm.xlu1 %9940, %v5109_v18   ;;  %v4854_v60 = vpop.f32.mrb[137].mxu0  ;;  %v10300_v19 = vld [vmem:[%s15612_s1 + $0x6c8] ss:$8 sps:$4 sm:$0xff]  }
 0x20f   :  { %5183 = vperm.xlu0 %9939, %v5108_v16   ;;  %5067 = vmatmul.mubr.bf16.gmra.mrb[244].mxu0 %v10248_v39  ;;  %v5110_v39 = vld [vmem:[%s15610_s2 + $0x20] sm:$0xff]  ;;  %v13012_v57 = vpop.f32.mrb[138].mxu0 }
 0x210   :  { %8973 = vst.msk [vmem:[%s15614_s4 + $0x10c] sm:$0xf] %vm2081_vm1, %v9745_v24  ;;  %8972 = vst.msk [vmem:[%s15614_s4 + $0x108] sm:$0xf] %vm2081_vm1, %v9744_v33  ;;  %v3890_v18 = vmax.f32 %v3825_v48, 0.0  ;;  %v3889_v42 = vmax.f32 %v3824_v50, 0.0  ;;  %9223 = vmatprep.mubr.msk.bf16.mxu0 %vm449_vm0, %v10249_v54  ;;  %7061 = vmatmul.mubr.bf16.gmra.mrb[176].mxu1 %v10300_v19 }
 0x211   :  { %v3529_v10 = vpop.permute.xlu1 %3528  ;;  %v3524_v4 = vpop.permute.xlu0 %3523  ;;  %v5113_v54 = vld [vmem:[%s15610_s2 + $0x38] sm:$0xff]  ;;  %v10251_v33 = vld [vmem:[%s15612_s1 + $0x5e0] ss:$8 sps:$4 sm:$0xff]   ;;  %v15739_v50 = vld [vmem:[#allocation24_spill] sm:$0xff] }
 0x212   :  { %v9747_v20 = vpack.c.bf16 %v3890_v18, %v3890_v18  ;;  %v9746_v16 = vpack.c.bf16 %v3889_v42, %v3889_v42  ;;  %v3827_v3 = vadd.f32 %v3529_v10, %v3372_v46  ;;  %v3826_v41 = vadd.f32 %v3524_v4, %v3371_v59  ;;  %5198 = vperm.xlu1 %9940, %v5111_v53   ;;  %v4857_v24 = vpop.f32.mrb[139].mxu0  ;;  %v15741_v19 = vld [vmem:[#allocation26_spill] sm:$0xff] }
 0x213   :  { %5193 = vperm.xlu0 %9939, %v5110_v39   ;;  %v13026_v48 = vpop.f32.mrb[140].mxu0  ;;  %v3373_v60 = vmul.f32 %v12236_v27, %v15739_v50  ;;  %v3374_v46 = vmul.f32 %v12267_v56, %v11611_v13  ;;  %v10252_v13 = vld [vmem:[%s15612_s1 + $0x5f4] ss:$8 sps:$4 sm:$0xff]   ;;  %v3376_v24 = vmul.f32 %v12281_v37, %v15741_v19 }
 0x214   :  { %8975 = vst.msk [vmem:[%s15614_s4 + $0x114] sm:$0xf] %vm2081_vm1, %v9747_v20  ;;  %8974 = vst.msk [vmem:[%s15614_s4 + $0x110] sm:$0xf] %vm2081_vm1, %v9746_v16  ;;  %v3892_v53 = vmax.f32 %v3827_v3, 0.0  ;;  %v3891_v59 = vmax.f32 %v3826_v41, 0.0 }
 0x215   :  { %v4862_v27 = vpop.f32.mrb[141].mxu0  ;;  %v3539_v56 = vpop.permute.xlu1 %3538  ;;  %v5115_v20 = vld [vmem:[%s15610_s2 + $0x48] sm:$0xff]  ;;  %v15740_v3 = vld [vmem:[#allocation25_spill] sm:$0xff] }
 0x216   :  { %v3534_v18 = vpop.permute.xlu0 %3533  ;;  %v9749_v42 = vpack.c.bf16 %v3892_v53, %v3892_v53  ;;  %v9748_v39 = vpack.c.bf16 %v3891_v59, %v3891_v59  ;;  %v3829_v52 = vadd.f32 %v3539_v56, %v3374_v46  ;;  %5208 = vperm.xlu1 %9940, %v5113_v54   ;;  %v13047_v4 = vpop.f32.mrb[142].mxu0  ;;  %v3375_v41 = vmul.f32 %v12265_v43, %v15740_v3  ;;  %v10301_v43 = vld [vmem:[%s15612_s1 + $0x6dc] ss:$8 sps:$4 sm:$0xff]   ;;  %v10303_v46 = vld [vmem:[%s15612_s1 + $0x6d8] ss:$8 sps:$4 sm:$0xff]  }
 0x217   :  { %v3828_v10 = vadd.f32 %v3534_v18, %v3373_v60  ;;  %5203 = vperm.xlu0 %9939, %v5112_v55   ;;  %5075 = vmatmul.mubr.bf16.gmra.mrb[248].mxu0 %v10251_v33  ;;  %v4865_v16 = vpop.f32.mrb[143].mxu0  ;;  %v5114_v33 = vld [vmem:[%s15610_s2 + $0x40] sm:$0xff]  ;;  %v10254_v18 = vld [vmem:[%s15612_s1 + $0x5f0] ss:$8 sps:$4 sm:$0xff]  }
 0x218   :  { %8977 = vst.msk [vmem:[%s15614_s4 + $0x11c] sm:$0xf] %vm2081_vm1, %v9749_v42  ;;  %8976 = vst.msk [vmem:[%s15614_s4 + $0x118] sm:$0xf] %vm2081_vm1, %v9748_v39  ;;  %v3894_v54 = vmax.f32 %v3829_v52, 0.0  ;;  %9224 = vmatprep.mubr.msk.bf16.mxu0 %vm449_vm0, %v10252_v13  ;;  %v5117_v13 = vld [vmem:[%s15610_s2 + $0x58] sm:$0xff]  ;;  %9527 = vmatprep.mubr.msk.bf16.mxu1 %vm449_vm0, %v10301_v43 }
 0x219   :  { %v3893_v50 = vmax.f32 %v3828_v10, 0.0  ;;  %v3549_v37 = vpop.permute.xlu1 %3548  ;;  %v15742_v39 = vld [vmem:[#allocation27_spill] sm:$0xff]  ;;  %v15743_v10 = vld [vmem:[#allocation28_spill] sm:$0xff]  ;;  %7069 = vmatmul.mubr.bf16.gmra.mrb[180].mxu1 %v10303_v46 }
 0x21a   :  { %v3544_v60 = vpop.permute.xlu0 %3543  ;;  %v9751_v53 = vpack.c.bf16 %v3894_v54, %v3894_v54  ;;  %v3831_v55 = vadd.f32 %v3549_v37, %v3376_v24  ;;  %5218 = vperm.xlu1 %9940, %v5115_v20   ;;  %v13074_v56 = vpop.f32.mrb[144].mxu0  ;;  %v3377_v52 = vmul.f32 %v12279_v63, %v15742_v39  ;;  %v3378_v20 = vmul.f32 %v12310_v34, %v15743_v10  ;;  %v10259_v63 = vld [vmem:[%s15612_s1 + $0x604] ss:$8 sps:$4 sm:$0xff]   ;;  %v13128_v39 = vld [vmem:[%s15612_s1 + $0x610] sm:$0x33] }
 0x21b   :  { %v9750_v59 = vpack.c.bf16 %v3893_v50, %v3893_v50  ;;  %v3830_v27 = vadd.f32 %v3544_v60, %v3375_v41  ;;  %5213 = vperm.xlu0 %9939, %v5114_v33   ;;  %v4870_v42 = vpop.f32.mrb[145].mxu0  ;;  %v5116_v41 = vld [vmem:[%s15610_s2 + $0x50] sm:$0xff]  ;;  %v5119_v60 = vld [vmem:[%s15610_s2 + $0x68] sm:$0xff] }
 0x21c   :  { %8979 = vst.msk [vmem:[%s15614_s4 + $0x124] sm:$0xf] %vm2081_vm1, %v9751_v53  ;;  %v3896_v16 = vmax.f32 %v3831_v55, 0.0  ;;  %v13101_v34 = vpop.f32.mrb[146].mxu0  ;;  %v15744_v53 = vld [vmem:[#allocation29_spill] sm:$0xff]  ;;  %v15745_v55 = vld [vmem:[#allocation30_spill] sm:$0xff] }
 0x21d   :  { %8978 = vst.msk [vmem:[%s15614_s4 + $0x120] sm:$0xf] %vm2081_vm1, %v9750_v59  ;;  %v3895_v3 = vmax.f32 %v3830_v27, 0.0  ;;  %v3559_v19 = vpop.permute.xlu1 %3558  ;;  %v4873_v37 = vpop.f32.mrb[147].mxu0  ;;  %v3379_v59 = vmul.f32 %v12308_v22, %v15744_v53  ;;  %v3380_v46 = vmul.f32 %v12324_v31, %v15745_v55  ;;  %v10304_v22 = vld [vmem:[%s15612_s1 + $0x6ec] ss:$8 sps:$4 sm:$0xff]   ;;  %v9184_v53 = vcombine.high %v13128_v39, %v13128_v39 }
 0x21e   :  { %v3554_v24 = vpop.permute.xlu0 %3553  ;;  %v9753_v54 = vpack.c.bf16 %v3896_v16, %v3896_v16  ;;  %v3833_v33 = vadd.f32 %v3559_v19, %v3378_v20  ;;  %5228 = vperm.xlu1 %9940, %v5117_v13   ;;  %9528 = vmatprep.mubr.msk.bf16.mxu1 %vm449_vm0, %v10304_v22 }
 0x21f   :  { %v9752_v50 = vpack.c.bf16 %v3895_v3, %v3895_v3  ;;  %v3832_v43 = vadd.f32 %v3554_v24, %v3377_v52  ;;  %5223 = vperm.xlu0 %9939, %v5116_v41   ;;  %5083 = vmatmul.mubr.bf16.gmra.mrb[252].mxu0 %v10254_v18  ;;  %v5118_v18 = vld [vmem:[%s15610_s2 + $0x60] sm:$0xff]  ;;  %v10306_v52 = vld [vmem:[%s15612_s1 + $0x6e8] ss:$8 sps:$4 sm:$0xff]   ;;  %v5121_v24 = vld [vmem:[%s15610_s2 + $0x78] sm:$0xff] }
 0x220   :  { %8981 = vst.msk [vmem:[%s15614_s4 + $0x12c] sm:$0xf] %vm2081_vm1, %v9753_v54  ;;  %v3898_v27 = vmax.f32 %v3833_v33, 0.0  ;;  %9225 = vmatprep.mubr.msk.bf16.mxu0 %vm449_vm0, %v10259_v63  ;;  %v15746_v63 = vld [vmem:[#allocation31_spill] sm:$0xff]  ;;  %v15747_v33 = vld [vmem:[#allocation32_spill] sm:$0xff] }
 0x221   :  { %8980 = vst.msk [vmem:[%s15614_s4 + $0x128] sm:$0xf] %vm2081_vm1, %v9752_v50  ;;  %v3897_v13 = vmax.f32 %v3832_v43, 0.0  ;;  %v3569_v31 = vpop.permute.xlu1 %3568  ;;  %v3381_v19 = vmul.f32 %v12322_v11, %v15746_v63  ;;  %v10257_v54 = vld [vmem:[%s15612_s1 + $0x600] ss:$8 sps:$4 sm:$0xff]   ;;  %v3382_v43 = vmul.f32 %v12353_v38, %v15747_v33  ;;  %7077 = vmatmul.mubr.bf16.gmra.mrb[184].mxu1 %v10306_v52 }
 0x222   :  { %v3564_v42 = vpop.permute.xlu0 %3563  ;;  %v9755_v10 = vpack.c.bf16 %v3898_v27, %v3898_v27  ;;  %v3835_v16 = vadd.f32 %v3569_v31, %v3380_v46  ;;  %5238 = vperm.xlu1 %9940, %v5119_v60   ;;  %v13133_v41 = vpop.f32.mrb[148].mxu0  ;;  %v5120_v60 = vld [vmem:[%s15610_s2 + $0x70] sm:$0xff]  ;;  %v5123_v31 = vld [vmem:[%s15610_s2 + $0x88] sm:$0xff]  ;;  %v5122_v63 = vld [vmem:[%s15610_s2 + $0x80] sm:$0xff] }
 0x223   :  { %v9754_v20 = vpack.c.bf16 %v3897_v13, %v3897_v13  ;;  %v3834_v3 = vadd.f32 %v3564_v42, %v3379_v59  ;;  %5233 = vperm.xlu0 %9939, %v5118_v18   ;;  %v4878_v50 = vpop.f32.mrb[149].mxu0  ;;  %v15748_v42 = vld [vmem:[#allocation33_spill] sm:$0xff] }
 0x224   :  { %8983 = vst.msk [vmem:[%s15614_s4 + $0x134] sm:$0xf] %vm2081_vm1, %v9755_v10  ;;  %v3900_v11 = vmax.f32 %v3835_v16, 0.0  ;;  %v13159_v38 = vpop.f32.mrb[150].mxu0  ;;  %v3383_v10 = vmul.f32 %v12351_v47, %v15748_v42  ;;  %v10307_v47 = vld [vmem:[%s15612_s1 + $0x6fc] ss:$8 sps:$4 sm:$0xff]  }
 0x225   :  { %8982 = vst.msk [vmem:[%s15614_s4 + $0x130] sm:$0xf] %vm2081_vm1, %v9754_v20  ;;  %v3899_v37 = vmax.f32 %v3834_v3, 0.0  ;;  %v3579_v59 = vpop.permute.xlu1 %3578  ;;  %v4881_v22 = vpop.f32.mrb[151].mxu0  ;;  %v15749_v20 = vld [vmem:[#allocation34_spill] sm:$0xff]  ;;  %9529 = vmatprep.mubr.msk.bf16.mxu1 %vm449_vm0, %v10307_v47 }
 0x226   :  { %v3574_v55 = vpop.permute.xlu0 %3573  ;;  %v9757_v46 = vpack.c.bf16 %v3900_v11, %v3900_v11  ;;  %v3837_v13 = vadd.f32 %v3579_v59, %v3382_v43  ;;  %5248 = vperm.xlu1 %9940, %v5121_v24   ;;  %v3384_v52 = vmul.f32 %v12370_v21, %v15749_v20  ;;  %v10309_v24 = vld [vmem:[%s15612_s1 + $0x6f8] ss:$8 sps:$4 sm:$0xff]   ;;  %v15750_v59 = vld [vmem:[#allocation35_spill] sm:$0xff] }
 0x227   :  { %v9756_v27 = vpack.c.bf16 %v3899_v37, %v3899_v37  ;;  %v3836_v18 = vadd.f32 %v3574_v55, %v3381_v19  ;;  %5243 = vperm.xlu0 %9939, %v5120_v60   ;;  %5091 = vmatmul.mubr.bf16.gmra.mrb[0].mxu0 %v10257_v54  ;;  %v5125_v37 = vld [vmem:[%s15610_s2 + $0x98] sm:$0xff]  ;;  %v9183_v60 = vcombine.low %v13128_v39, %v13128_v39  ;;  %v15753_v47 = vld [vmem:[#allocation38_spill] sm:$0xff] }
 0x228   :  { %8985 = vst.msk [vmem:[%s15614_s4 + $0x13c] sm:$0xf] %vm2081_vm1, %v9757_v46  ;;  %v3902_v16 = vmax.f32 %v3837_v13, 0.0  ;;  %9226 = vmatprep.mubr.msk.bf16.mxu0 %vm449_vm0, %v9184_v53  ;;  %v3385_v55 = vmul.f32 %v12368_v61, %v15750_v59  ;;  %v15751_v46 = vld [vmem:[#allocation36_spill] sm:$0xff] }
 0x229   :  { %8984 = vst.msk [vmem:[%s15614_s4 + $0x138] sm:$0xf] %vm2081_vm1, %v9756_v27  ;;  %v3901_v3 = vmax.f32 %v3836_v18, 0.0  ;;  %v3589_v21 = vpop.permute.xlu1 %3588  ;;  %v3386_v27 = vmul.f32 %v12403_v23, %v15751_v46  ;;  %v5124_v18 = vld [vmem:[%s15610_s2 + $0x90] sm:$0xff]  ;;  %7085 = vmatmul.mubr.bf16.gmra.mrb[188].mxu1 %v10309_v24 }
 0x22a   :  { %v3584_v19 = vpop.permute.xlu0 %3583  ;;  %v9759_v54 = vpack.c.bf16 %v3902_v16, %v3902_v16  ;;  %v3839_v33 = vadd.f32 %v3589_v21, %v3384_v52  ;;  %5258 = vperm.xlu1 %9940, %v5123_v31   ;;  %v13186_v11 = vpop.f32.mrb[152].mxu0  ;;  %v5127_v16 = vld [vmem:[%s15610_s2 + $0xa8] sm:$0xff]  ;;  %v3388_v21 = vmul.f32 %v12421_v26, %v15753_v47  ;;  %v15756_v47 = vld [vmem:[#allocation41_spill] sm:$0xff] }
 0x22b   :  { %v9758_v50 = vpack.c.bf16 %v3901_v3, %v3901_v3  ;;  %v3838_v43 = vadd.f32 %v3584_v19, %v3383_v10  ;;  %5253 = vperm.xlu0 %9939, %v5122_v63   ;;  %v4886_v53 = vpop.f32.mrb[153].mxu0  ;;  %v15752_v3 = vld [vmem:[#allocation37_spill] sm:$0xff] }
 0x22c   :  { %8987 = vst.msk [vmem:[%s15614_s4 + $0x144] sm:$0xf] %vm2081_vm1, %v9759_v54  ;;  %v3904_v39 = vmax.f32 %v3839_v33, 0.0  ;;  %v13209_v61 = vpop.f32.mrb[154].mxu0  ;;  %v3387_v63 = vmul.f32 %v12401_v12, %v15752_v3  ;;  %v5126_v54 = vld [vmem:[%s15610_s2 + $0xa0] sm:$0xff] }
 0x22d   :  { %8986 = vst.msk [vmem:[%s15614_s4 + $0x140] sm:$0xf] %vm2081_vm1, %v9758_v50  ;;  %v3903_v13 = vmax.f32 %v3838_v43, 0.0  ;;  %v3599_v23 = vpop.permute.xlu1 %3598  ;;  %v4889_v52 = vpop.f32.mrb[155].mxu0  ;;  %v10310_v12 = vld [vmem:[%s15612_s1 + $0x70c] ss:$8 sps:$4 sm:$0xff]  }
 0x22e   :  { %v3594_v22 = vpop.permute.xlu0 %3593  ;;  %v9761_v31 = vpack.c.bf16 %v3904_v39, %v3904_v39  ;;  %v3841_v10 = vadd.f32 %v3599_v23, %v3386_v27  ;;  %5268 = vperm.xlu1 %9940, %v5125_v37   ;;  %v10312_v33 = vld [vmem:[%s15612_s1 + $0x708] ss:$8 sps:$4 sm:$0xff]   ;;  %9530 = vmatprep.mubr.msk.bf16.mxu1 %vm449_vm0, %v10310_v12 }
 0x22f   :  { %v9760_v42 = vpack.c.bf16 %v3903_v13, %v3903_v13  ;;  %v3840_v20 = vadd.f32 %v3594_v22, %v3385_v55  ;;  %5263 = vperm.xlu0 %9939, %v5124_v18   ;;  %5099 = vmatmul.mubr.bf16.gmra.mrb[4].mxu0 %v9183_v60  ;;  %v5129_v55 = vld [vmem:[%s15610_s2 + $0xb8] sm:$0xff]  ;;  %v15754_v27 = vld [vmem:[#allocation39_spill] sm:$0xff]  ;;  %v15755_v13 = vld [vmem:[#allocation40_spill] sm:$0xff] }
 0x230   :  { %8989 = vst.msk [vmem:[%s15614_s4 + $0x14c] sm:$0xf] %vm2081_vm1, %v9761_v31  ;;  %v3906_v19 = vmax.f32 %v3841_v10, 0.0  ;;  %v3389_v39 = vmul.f32 %v12419_v30, %v15754_v27  ;;  %v3390_v18 = vmul.f32 %v12454_v35, %v15755_v13  ;;  %v5128_v31 = vld [vmem:[%s15610_s2 + $0xb0] sm:$0xff] }
 0x231   :  { %8988 = vst.msk [vmem:[%s15614_s4 + $0x148] sm:$0xf] %vm2081_vm1, %v9760_v42  ;;  %v3905_v24 = vmax.f32 %v3840_v20, 0.0  ;;  %v3609_v26 = vpop.permute.xlu1 %3608  ;;  %7093 = vmatmul.mubr.bf16.gmra.mrb[192].mxu1 %v10312_v33 }
 0x232   :  { %v3604_v50 = vpop.permute.xlu0 %3603  ;;  %v9763_v43 = vpack.c.bf16 %v3906_v19, %v3906_v19  ;;  %v3843_v60 = vadd.f32 %v3609_v26, %v3388_v21  ;;  %5278 = vperm.xlu1 %9940, %v5127_v16   ;;  %v13235_v59 = vpop.f32.mrb[156].mxu0  ;;  %v3391_v21 = vmul.f32 %v12452_v58, %v15756_v47  ;;  %v15757_v19 = vld [vmem:[#allocation42_spill] sm:$0xff] }
 0x233   :  { %v9762_v37 = vpack.c.bf16 %v3905_v24, %v3905_v24  ;;  %v3842_v53 = vadd.f32 %v3604_v50, %v3387_v63  ;;  %5273 = vperm.xlu0 %9939, %v5126_v54   ;;  %v4894_v46 = vpop.f32.mrb[157].mxu0  ;;  %v5131_v63 = vld [vmem:[%s15610_s2 + $0xc8] sm:$0xff]  ;;  %v15758_v24 = vld [vmem:[#allocation62_spill] sm:$0xff] }
 0x234   :  { %8991 = vst.msk [vmem:[%s15614_s4 + $0x154] sm:$0xf] %vm2081_vm1, %v9763_v43  ;;  %v3908_v23 = vmax.f32 %v3843_v60, 0.0  ;;  %v13256_v30 = vpop.f32.mrb[158].mxu0  ;;  %v3392_v54 = vmul.f32 %v15758_v24, %v15757_v19  ;;  %v5130_v50 = vld [vmem:[%s15610_s2 + $0xc0] sm:$0xff]  ;;  %v5135_v24 = vld [vmem:[%s15610_s2 + $0xe8] sm:$0xff] }
 0x235   :  { %8990 = vst.msk [vmem:[%s15614_s4 + $0x150] sm:$0xf] %vm2081_vm1, %v9762_v37  ;;  %v3907_v22 = vmax.f32 %v3842_v53, 0.0  ;;  %v3619_v35 = vpop.permute.xlu1 %3618  ;;  %v4897_v3 = vpop.f32.mrb[159].mxu0  ;;  %v10313_v58 = vld [vmem:[%s15612_s1 + $0x71c] ss:$8 sps:$4 sm:$0xff]  }
 0x236   :  { %v3614_v42 = vpop.permute.xlu0 %3613  ;;  %v9765_v10 = vpack.c.bf16 %v3908_v23, %v3908_v23  ;;  %v3845_v52 = vadd.f32 %v3619_v35, %v3390_v18  ;;  %5288 = vperm.xlu1 %9940, %v5129_v55   ;;  %v10315_v37 = vld [vmem:[%s15612_s1 + $0x718] ss:$8 sps:$4 sm:$0xff]   ;;  %9531 = vmatprep.mubr.msk.bf16.mxu1 %vm449_vm0, %v10313_v58  ;;  %v15759_v18 = vld [vmem:[#allocation43_spill] sm:$0xff] }
 0x237   :  { %v9764_v20 = vpack.c.bf16 %v3907_v22, %v3907_v22  ;;  %v3844_v16 = vadd.f32 %v3614_v42, %v3389_v39  ;;  %5283 = vperm.xlu0 %9939, %v5128_v31   ;;  %v5133_v39 = vld [vmem:[%s15610_s2 + $0xd8] sm:$0xff]  ;;  %v15760_v23 = vld [vmem:[#allocation2_spill] sm:$0xff]  ;;  %v15761_v31 = vld [vmem:[#allocation44_spill] sm:$0xff] }
 0x238   :  { %8993 = vst.msk [vmem:[%s15614_s4 + $0x15c] sm:$0xf] %vm2081_vm1, %v9765_v10  ;;  %v3910_v12 = vmax.f32 %v3845_v52, 0.0  ;;  %v3393_v22 = vmul.f32 %v15760_v23, %v15759_v18  ;;  %v3394_v35 = vmul.f32 %v12508_v8, %v15761_v31 }
 0x239   :  { %8992 = vst.msk [vmem:[%s15614_s4 + $0x158] sm:$0xf] %vm2081_vm1, %v9764_v20  ;;  %v3909_v26 = vmax.f32 %v3844_v16, 0.0  ;;  %v3629_v33 = vpop.permute.xlu1 %3628  ;;  %v5132_v20 = vld [vmem:[%s15610_s2 + $0xd0] sm:$0xff]  ;;  %7101 = vmatmul.mubr.bf16.gmra.mrb[196].mxu1 %v10315_v37  ;;  %v5134_v37 = vld [vmem:[%s15610_s2 + $0xe0] sm:$0xff] }
 0x23a   :  { %v3624_v43 = vpop.permute.xlu0 %3623  ;;  %v9767_v60 = vpack.c.bf16 %v3910_v12, %v3910_v12  ;;  %v3847_v55 = vadd.f32 %v3629_v33, %v3392_v54  ;;  %5298 = vperm.xlu1 %9940, %v5131_v63   ;;  %v13282_v27 = vpop.f32.mrb[160].mxu0  ;;  %v15762_v54 = vld [vmem:[#allocation45_spill] sm:$0xff] }
 0x23b   :  { %v9766_v53 = vpack.c.bf16 %v3909_v26, %v3909_v26  ;;  %v3846_v46 = vadd.f32 %v3624_v43, %v3391_v21  ;;  %5293 = vperm.xlu0 %9939, %v5130_v50   ;;  %v4902_v13 = vpop.f32.mrb[161].mxu0  ;;  %v3395_v12 = vmul.f32 %v12506_v9, %v15762_v54  ;;  %v15763_v26 = vld [vmem:[#allocation46_spill] sm:$0xff]  ;;  %v15764_v50 = vld [vmem:[#allocation64_spill] sm:$0xff] }
 0x23c   :  { %8995 = vst.msk [vmem:[%s15614_s4 + $0x164] sm:$0xf] %vm2081_vm1, %v9767_v60  ;;  %v3912_v42 = vmax.f32 %v3847_v55, 0.0  ;;  %v13303_v52 = vpop.f32.mrb[162].mxu0  ;;  %v3396_v58 = vmul.f32 %v15764_v50, %v15763_v26  ;;  %v10316_v9 = vld [vmem:[%s15612_s1 + $0x72c] ss:$8 sps:$4 sm:$0xff]  }
 0x23d   :  { %8994 = vst.msk [vmem:[%s15614_s4 + $0x160] sm:$0xf] %vm2081_vm1, %v9766_v53  ;;  %v3911_v10 = vmax.f32 %v3846_v46, 0.0  ;;  %v3639_v8 = vpop.permute.xlu1 %3638  ;;  %v4905_v19 = vpop.f32.mrb[163].mxu0  ;;  %v10318_v55 = vld [vmem:[%s15612_s1 + $0x728] ss:$8 sps:$4 sm:$0xff]   ;;  %9532 = vmatprep.mubr.msk.bf16.mxu1 %vm449_vm0, %v10316_v9 }
 0x23e   :  { %v3634_v16 = vpop.permute.xlu0 %3633  ;;  %v9769_v3 = vpack.c.bf16 %v3912_v42, %v3912_v42  ;;  %v3849_v47 = vadd.f32 %v3639_v8, %v3394_v35  ;;  %5308 = vperm.xlu1 %9940, %v5133_v39   ;;  %v15765_v35 = vld [vmem:[#allocation47_spill] sm:$0xff]  ;;  %v15766_v42 = vld [vmem:[#allocation4_spill] sm:$0xff] }
 0x23f   :  { %v9768_v63 = vpack.c.bf16 %v3911_v10, %v3911_v10  ;;  %v3848_v21 = vadd.f32 %v3634_v16, %v3393_v22  ;;  %5303 = vperm.xlu0 %9939, %v5132_v20   ;;  %v5137_v22 = vld [vmem:[%s15610_s2 + $0xf8] sm:$0xff]  ;;  %v3397_v10 = vmul.f32 %v15766_v42, %v15765_v35  ;;  %v15767_v20 = vld [vmem:[#allocation48_spill] sm:$0xff]  ;;  %v5139_v50 = vld [vmem:[%s15610_s2 + $0x108] sm:$0xff] }
 0x240   :  { %8997 = vst.msk [vmem:[%s15614_s4 + $0x16c] sm:$0xf] %vm2081_vm1, %v9769_v3  ;;  %v3914_v33 = vmax.f32 %v3849_v47, 0.0  ;;  %v3398_v8 = vmul.f32 %v12558_v15, %v15767_v20 }
 0x241   :  { %8996 = vst.msk [vmem:[%s15614_s4 + $0x168] sm:$0xf] %vm2081_vm1, %v9768_v63  ;;  %v3913_v43 = vmax.f32 %v3848_v21, 0.0  ;;  %v3649_v60 = vpop.permute.xlu1 %3648  ;;  %v5136_v63 = vld [vmem:[%s15610_s2 + $0xf0] sm:$0xff]  ;;  %7109 = vmatmul.mubr.bf16.gmra.mrb[200].mxu1 %v10318_v55  ;;  %v5138_v55 = vld [vmem:[%s15610_s2 + $0x100] sm:$0xff] }
 0x242   :  { %v3644_v53 = vpop.permute.xlu0 %3643  ;;  %v9771_v46 = vpack.c.bf16 %v3914_v33, %v3914_v33  ;;  %v3851_v13 = vadd.f32 %v3649_v60, %v3396_v58  ;;  %5318 = vperm.xlu1 %9940, %v5135_v24   ;;  %v13329_v23 = vpop.f32.mrb[164].mxu0  ;;  %v15768_v58 = vld [vmem:[#allocation49_spill] sm:$0xff] }
 0x243   :  { %v9770_v39 = vpack.c.bf16 %v3913_v43, %v3913_v43  ;;  %v3850_v18 = vadd.f32 %v3644_v53, %v3395_v12  ;;  %5313 = vperm.xlu0 %9939, %v5134_v37   ;;  %v4910_v31 = vpop.f32.mrb[165].mxu0  ;;  %v3399_v33 = vmul.f32 %v12556_v32, %v15768_v58  ;;  %v15769_v43 = vld [vmem:[#allocation50_spill] sm:$0xff] }
 0x244   :  { %8999 = vst.msk [vmem:[%s15614_s4 + $0x174] sm:$0xf] %vm2081_vm1, %v9771_v46  ;;  %v3916_v16 = vmax.f32 %v3851_v13, 0.0  ;;  %v13350_v47 = vpop.f32.mrb[166].mxu0  ;;  %v15770_v37 = vld [vmem:[#allocation66_spill] sm:$0xff] }
 0x245   :  { %8998 = vst.msk [vmem:[%s15614_s4 + $0x170] sm:$0xf] %vm2081_vm1, %v9770_v39  ;;  %v3915_v3 = vmax.f32 %v3850_v18, 0.0  ;;  %v3659_v15 = vpop.permute.xlu1 %3658  ;;  %v4913_v26 = vpop.f32.mrb[167].mxu0  ;;  %v3400_v9 = vmul.f32 %v15770_v37, %v15769_v43  ;;  %v10319_v32 = vld [vmem:[%s15612_s1 + $0x73c] ss:$8 sps:$4 sm:$0xff]  }
 0x246   :  { %v3654_v21 = vpop.permute.xlu0 %3653  ;;  %v9773_v19 = vpack.c.bf16 %v3916_v16, %v3916_v16  ;;  %v3853_v54 = vadd.f32 %v3659_v15, %v3398_v8  ;;  %5328 = vperm.xlu1 %9940, %v5137_v22   ;;  %v10321_v13 = vld [vmem:[%s15612_s1 + $0x738] ss:$8 sps:$4 sm:$0xff]   ;;  %9533 = vmatprep.mubr.msk.bf16.mxu1 %vm449_vm0, %v10319_v32  ;;  %v15771_v8 = vld [vmem:[#allocation51_spill] sm:$0xff] }
 0x247   :  { %v9772_v24 = vpack.c.bf16 %v3915_v3, %v3915_v3  ;;  %v3852_v12 = vadd.f32 %v3654_v21, %v3397_v10  ;;  %5323 = vperm.xlu0 %9939, %v5136_v63   ;;  %v5141_v10 = vld [vmem:[%s15610_s2 + $0x118] sm:$0xff]  ;;  %v15772_v16 = vld [vmem:[#allocation6_spill] sm:$0xff]  ;;  %v15773_v63 = vld [vmem:[#allocation52_spill] sm:$0xff] }
 0x248   :  { %9001 = vst.msk [vmem:[%s15614_s4 + $0x17c] sm:$0xf] %vm2081_vm1, %v9773_v19  ;;  %v3918_v60 = vmax.f32 %v3853_v54, 0.0  ;;  %v3401_v3 = vmul.f32 %v15772_v16, %v15771_v8  ;;  %v3402_v15 = vmul.f32 %v12608_v29, %v15773_v63  ;;  %v5143_v37 = vld [vmem:[%s15610_s2 + $0x128] sm:$0xff] }
 0x249   :  { %9000 = vst.msk [vmem:[%s15614_s4 + $0x178] sm:$0xf] %vm2081_vm1, %v9772_v24  ;;  %v3917_v53 = vmax.f32 %v3852_v12, 0.0  ;;  %v3669_v46 = vpop.permute.xlu1 %3668  ;;  %v5140_v24 = vld [vmem:[%s15610_s2 + $0x110] sm:$0xff]  ;;  %7117 = vmatmul.mubr.bf16.gmra.mrb[204].mxu1 %v10321_v13  ;;  %v5142_v13 = vld [vmem:[%s15610_s2 + $0x120] sm:$0xff] }
 0x24a   :  { %v3664_v39 = vpop.permute.xlu0 %3663  ;;  %v9775_v18 = vpack.c.bf16 %v3918_v60, %v3918_v60  ;;  %v3855_v31 = vadd.f32 %v3669_v46, %v3400_v9  ;;  %5338 = vperm.xlu1 %9940, %v5139_v50   ;;  %v13376_v42 = vpop.f32.mrb[168].mxu0  ;;  %v15774_v9 = vld [vmem:[#allocation53_spill] sm:$0xff] }
 0x24b   :  { %v9774_v22 = vpack.c.bf16 %v3917_v53, %v3917_v53  ;;  %v3854_v35 = vadd.f32 %v3664_v39, %v3399_v33  ;;  %5333 = vperm.xlu0 %9939, %v5138_v55   ;;  %v4918_v20 = vpop.f32.mrb[169].mxu0  ;;  %v3403_v60 = vmul.f32 %v12606_v2, %v15774_v9  ;;  %v15775_v53 = vld [vmem:[#allocation54_spill] sm:$0xff]  ;;  %v15776_v55 = vld [vmem:[#allocation68_spill] sm:$0xff] }
 0x24c   :  { %9003 = vst.msk [vmem:[%s15614_s4 + $0x184] sm:$0xf] %vm2081_vm1, %v9775_v18  ;;  %v3920_v21 = vmax.f32 %v3855_v31, 0.0  ;;  %v13397_v54 = vpop.f32.mrb[170].mxu0  ;;  %v3404_v32 = vmul.f32 %v15776_v55, %v15775_v53  ;;  %v10322_v2 = vld [vmem:[%s15612_s1 + $0x74c] ss:$8 sps:$4 sm:$0xff]  }
 0x24d   :  { %9002 = vst.msk [vmem:[%s15614_s4 + $0x180] sm:$0xf] %vm2081_vm1, %v9774_v22  ;;  %v3919_v19 = vmax.f32 %v3854_v35, 0.0  ;;  %v3679_v29 = vpop.permute.xlu1 %3678  ;;  %v4921_v43 = vpop.f32.mrb[171].mxu0  ;;  %v10324_v31 = vld [vmem:[%s15612_s1 + $0x748] ss:$8 sps:$4 sm:$0xff]   ;;  %9534 = vmatprep.mubr.msk.bf16.mxu1 %vm449_vm0, %v10322_v2 }
 0x24e   :  { %v3674_v12 = vpop.permute.xlu0 %3673  ;;  %v9777_v26 = vpack.c.bf16 %v3920_v21, %v3920_v21  ;;  %v3857_v58 = vadd.f32 %v3679_v29, %v3402_v15  ;;  %5348 = vperm.xlu1 %9940, %v5141_v10   ;;  %v15777_v15 = vld [vmem:[#allocation55_spill] sm:$0xff]  ;;  %v15778_v21 = vld [vmem:[#allocation8_spill] sm:$0xff] }
 0x24f   :  { %v9776_v50 = vpack.c.bf16 %v3919_v19, %v3919_v19  ;;  %v3856_v33 = vadd.f32 %v3674_v12, %v3401_v3  ;;  %5343 = vperm.xlu0 %9939, %v5140_v24   ;;  %v5145_v3 = vld [vmem:[%s15610_s2 + $0x138] sm:$0xff]  ;;  %v3405_v19 = vmul.f32 %v15778_v21, %v15777_v15  ;;  %v15779_v24 = vld [vmem:[#allocation56_spill] sm:$0xff]  ;;  %v5147_v55 = vld [vmem:[%s15610_s2 + $0x148] sm:$0xff] }
 0x250   :  { %9005 = vst.msk [vmem:[%s15614_s4 + $0x18c] sm:$0xf] %vm2081_vm1, %v9777_v26  ;;  %v3922_v46 = vmax.f32 %v3857_v58, 0.0  ;;  %v3406_v29 = vmul.f32 %v12658_v1, %v15779_v24 }
 0x251   :  { %9004 = vst.msk [vmem:[%s15614_s4 + $0x188] sm:$0xf] %vm2081_vm1, %v9776_v50  ;;  %v3921_v39 = vmax.f32 %v3856_v33, 0.0  ;;  %v3689_v18 = vpop.permute.xlu1 %3688  ;;  %v5144_v50 = vld [vmem:[%s15610_s2 + $0x130] sm:$0xff]  ;;  %7125 = vmatmul.mubr.bf16.gmra.mrb[208].mxu1 %v10324_v31  ;;  %v5146_v31 = vld [vmem:[%s15610_s2 + $0x140] sm:$0xff] }
 0x252   :  { %v3684_v22 = vpop.permute.xlu0 %3683  ;;  %v9779_v35 = vpack.c.bf16 %v3922_v46, %v3922_v46  ;;  %v3859_v20 = vadd.f32 %v3689_v18, %v3404_v32  ;;  %5358 = vperm.xlu1 %9940, %v5143_v37   ;;  %v13423_v16 = vpop.f32.mrb[172].mxu0  ;;  %v15780_v32 = vld [vmem:[#allocation57_spill] sm:$0xff] }
 0x253   :  { %v9778_v10 = vpack.c.bf16 %v3921_v39, %v3921_v39  ;;  %v3858_v8 = vadd.f32 %v3684_v22, %v3403_v60  ;;  %5353 = vperm.xlu0 %9939, %v5142_v13   ;;  %v4926_v63 = vpop.f32.mrb[173].mxu0  ;;  %v3407_v46 = vmul.f32 %v12656_v25, %v15780_v32  ;;  %v15781_v39 = vld [vmem:[#allocation58_spill] sm:$0xff] }
 0x254   :  { %9007 = vst.msk [vmem:[%s15614_s4 + $0x194] sm:$0xf] %vm2081_vm1, %v9779_v35  ;;  %v3924_v12 = vmax.f32 %v3859_v20, 0.0  ;;  %v13444_v58 = vpop.f32.mrb[174].mxu0  ;;  %v15782_v13 = vld [vmem:[#allocation70_spill] sm:$0xff] }
 0x255   :  { %9006 = vst.msk [vmem:[%s15614_s4 + $0x190] sm:$0xf] %vm2081_vm1, %v9778_v10  ;;  %v3923_v26 = vmax.f32 %v3858_v8, 0.0  ;;  %v3699_v1 = vpop.permute.xlu1 %3698  ;;  %v4929_v53 = vpop.f32.mrb[175].mxu0  ;;  %v3408_v2 = vmul.f32 %v15782_v13, %v15781_v39  ;;  %v10325_v25 = vld [vmem:[%s15612_s1 + $0x75c] ss:$8 sps:$4 sm:$0xff]  }
 0x256   :  { %v3694_v33 = vpop.permute.xlu0 %3693  ;;  %v9781_v43 = vpack.c.bf16 %v3924_v12, %v3924_v12  ;;  %v3861_v9 = vadd.f32 %v3699_v1, %v3406_v29  ;;  %5368 = vperm.xlu1 %9940, %v5145_v3   ;;  %v10327_v20 = vld [vmem:[%s15612_s1 + $0x758] ss:$8 sps:$4 sm:$0xff]   ;;  %9535 = vmatprep.mubr.msk.bf16.mxu1 %vm449_vm0, %v10325_v25  ;;  %v15783_v29 = vld [vmem:[#allocation59_spill] sm:$0xff] }
 0x257   :  { %v9780_v37 = vpack.c.bf16 %v3923_v26, %v3923_v26  ;;  %v3860_v60 = vadd.f32 %v3694_v33, %v3405_v19  ;;  %5363 = vperm.xlu0 %9939, %v5144_v50   ;;  %v5149_v19 = vld [vmem:[%s15610_s2 + $0x158] sm:$0xff]  ;;  %v15784_v12 = vld [vmem:[#allocation10_spill] sm:$0xff]  ;;  %v15785_v50 = vld [vmem:[#allocation60_spill] sm:$0xff] }
 0x258   :  { %9009 = vst.msk [vmem:[%s15614_s4 + $0x19c] sm:$0xf] %vm2081_vm1, %v9781_v43  ;;  %v3926_v18 = vmax.f32 %v3861_v9, 0.0  ;;  %v3409_v26 = vmul.f32 %v15784_v12, %v15783_v29  ;;  %v3410_v1 = vmul.f32 %v12708_v62, %v15785_v50  ;;  %v5151_v13 = vld [vmem:[%s15610_s2 + $0x168] sm:$0xff] }
 0x259   :  { %9008 = vst.msk [vmem:[%s15614_s4 + $0x198] sm:$0xf] %vm2081_vm1, %v9780_v37  ;;  %v3925_v22 = vmax.f32 %v3860_v60, 0.0  ;;  %v3709_v35 = vpop.permute.xlu1 %3708  ;;  %v5148_v37 = vld [vmem:[%s15610_s2 + $0x150] sm:$0xff]  ;;  %7133 = vmatmul.mubr.bf16.gmra.mrb[212].mxu1 %v10327_v20  ;;  %v5150_v20 = vld [vmem:[%s15610_s2 + $0x160] sm:$0xff] }
 0x25a   :  { %v3704_v10 = vpop.permute.xlu0 %3703  ;;  %v9783_v8 = vpack.c.bf16 %v3926_v18, %v3926_v18  ;;  %v3863_v63 = vadd.f32 %v3709_v35, %v3408_v2  ;;  %5378 = vperm.xlu1 %9940, %v5147_v55   ;;  %v13470_v21 = vpop.f32.mrb[176].mxu0  ;;  %v15786_v2 = vld [vmem:[#allocation61_spill] sm:$0xff] }
 0x25b   :  { %v9782_v3 = vpack.c.bf16 %v3925_v22, %v3925_v22  ;;  %v3862_v15 = vadd.f32 %v3704_v10, %v3407_v46  ;;  %5373 = vperm.xlu0 %9939, %v5146_v31   ;;  %v4934_v24 = vpop.f32.mrb[177].mxu0  ;;  %v3411_v18 = vmul.f32 %v12706_v5, %v15786_v2  ;;  %v15787_v22 = vld [vmem:[#allocation3_spill] sm:$0xff]  ;;  %v15788_v31 = vld [vmem:[#allocation72_spill] sm:$0xff] }
 0x25c   :  { %9011 = vst.msk [vmem:[%s15614_s4 + $0x1a4] sm:$0xf] %vm2081_vm1, %v9783_v8  ;;  %v3928_v33 = vmax.f32 %v3863_v63, 0.0  ;;  %v13491_v9 = vpop.f32.mrb[178].mxu0  ;;  %v3412_v25 = vmul.f32 %v15788_v31, %v15787_v22  ;;  %v10328_v5 = vld [vmem:[%s15612_s1 + $0x76c] ss:$8 sps:$4 sm:$0xff]  }
 0x25d   :  { %9010 = vst.msk [vmem:[%s15614_s4 + $0x1a0] sm:$0xf] %vm2081_vm1, %v9782_v3  ;;  %v3927_v43 = vmax.f32 %v3862_v15, 0.0  ;;  %v3719_v62 = vpop.permute.xlu1 %3718  ;;  %v4937_v39 = vpop.f32.mrb[179].mxu0  ;;  %v10330_v63 = vld [vmem:[%s15612_s1 + $0x768] ss:$8 sps:$4 sm:$0xff]   ;;  %9536 = vmatprep.mubr.msk.bf16.mxu1 %vm449_vm0, %v10328_v5 }
 0x25e   :  { %v3714_v60 = vpop.permute.xlu0 %3713  ;;  %v9785_v53 = vpack.c.bf16 %v3928_v33, %v3928_v33  ;;  %v3865_v32 = vadd.f32 %v3719_v62, %v3410_v1  ;;  %5388 = vperm.xlu1 %9940, %v5149_v19   ;;  %v15789_v1 = vld [vmem:[#allocation63_spill] sm:$0xff]  ;;  %v15790_v33 = vld [vmem:[#allocation12_spill] sm:$0xff] }
 0x25f   :  { %v9784_v55 = vpack.c.bf16 %v3927_v43, %v3927_v43  ;;  %v3864_v46 = vadd.f32 %v3714_v60, %v3409_v26  ;;  %5383 = vperm.xlu0 %9939, %v5148_v37   ;;  %v5153_v26 = vld [vmem:[%s15610_s2 + $0x178] sm:$0xff]  ;;  %v3413_v43 = vmul.f32 %v15790_v33, %v15789_v1  ;;  %v5155_v31 = vld [vmem:[%s15610_s2 + $0x188] sm:$0xff] }
 0x260   :  { %9013 = vst.msk [vmem:[%s15614_s4 + $0x1ac] sm:$0xf] %vm2081_vm1, %v9785_v53  ;;  %v3930_v35 = vmax.f32 %v3865_v32, 0.0  ;;  %v15791_v37 = vld [vmem:[#allocation5_spill] sm:$0xff] }
 0x261   :  { %9012 = vst.msk [vmem:[%s15614_s4 + $0x1a8] sm:$0xf] %vm2081_vm1, %v9784_v55  ;;  %v3929_v10 = vmax.f32 %v3864_v46, 0.0  ;;  %v3729_v8 = vpop.permute.xlu1 %3728  ;;  %v3414_v62 = vmul.f32 %v12758_v40, %v15791_v37  ;;  %v5152_v55 = vld [vmem:[%s15610_s2 + $0x170] sm:$0xff]  ;;  %7141 = vmatmul.mubr.bf16.gmra.mrb[216].mxu1 %v10330_v63  ;;  %v5154_v63 = vld [vmem:[%s15610_s2 + $0x180] sm:$0xff] }
 0x262   :  { %v3724_v3 = vpop.permute.xlu0 %3723  ;;  %v9787_v15 = vpack.c.bf16 %v3930_v35, %v3930_v35  ;;  %v3867_v24 = vadd.f32 %v3729_v8, %v3412_v25  ;;  %5398 = vperm.xlu1 %9940, %v5151_v13   ;;  %v13517_v12 = vpop.f32.mrb[180].mxu0  ;;  %v15792_v25 = vld [vmem:[#allocation65_spill] sm:$0xff] }
 0x263   :  { %v9786_v19 = vpack.c.bf16 %v3929_v10, %v3929_v10  ;;  %v3866_v29 = vadd.f32 %v3724_v3, %v3411_v18  ;;  %5393 = vperm.xlu0 %9939, %v5150_v20   ;;  %v4942_v50 = vpop.f32.mrb[181].mxu0  ;;  %v3415_v35 = vmul.f32 %v12756_v51, %v15792_v25  ;;  %v15793_v10 = vld [vmem:[#allocation7_spill] sm:$0xff]  ;;  %v15794_v20 = vld [vmem:[#allocation74_spill] sm:$0xff] }
 0x264   :  { %9015 = vst.msk [vmem:[%s15614_s4 + $0x1b4] sm:$0xf] %vm2081_vm1, %v9787_v15  ;;  %v3932_v60 = vmax.f32 %v3867_v24, 0.0  ;;  %v13538_v32 = vpop.f32.mrb[182].mxu0  ;;  %v3416_v5 = vmul.f32 %v15794_v20, %v15793_v10  ;;  %v10331_v51 = vld [vmem:[%s15612_s1 + $0x77c] ss:$8 sps:$4 sm:$0xff]  }
 0x265   :  { %9014 = vst.msk [vmem:[%s15614_s4 + $0x1b0] sm:$0xf] %vm2081_vm1, %v9786_v19  ;;  %v3931_v53 = vmax.f32 %v3866_v29, 0.0  ;;  %v3739_v40 = vpop.permute.xlu1 %3738  ;;  %v4945_v22 = vpop.f32.mrb[183].mxu0  ;;  %v10333_v24 = vld [vmem:[%s15612_s1 + $0x778] ss:$8 sps:$4 sm:$0xff]   ;;  %9537 = vmatprep.mubr.msk.bf16.mxu1 %vm449_vm0, %v10331_v51 }
 0x266   :  { %v3734_v46 = vpop.permute.xlu0 %3733  ;;  %v9789_v39 = vpack.c.bf16 %v3932_v60, %v3932_v60  ;;  %v3869_v2 = vadd.f32 %v3739_v40, %v3414_v62  ;;  %5408 = vperm.xlu1 %9940, %v5153_v26   ;;  %v15795_v62 = vld [vmem:[#allocation67_spill] sm:$0xff]  ;;  %v15796_v60 = vld [vmem:[#allocation14_spill] sm:$0xff] }
 0x267   :  { %v9788_v13 = vpack.c.bf16 %v3931_v53, %v3931_v53  ;;  %v3868_v18 = vadd.f32 %v3734_v46, %v3413_v43  ;;  %5403 = vperm.xlu0 %9939, %v5152_v55   ;;  %v5157_v43 = vld [vmem:[%s15610_s2 + $0x198] sm:$0xff]  ;;  %v3417_v53 = vmul.f32 %v15796_v60, %v15795_v62  ;;  %v5159_v20 = vld [vmem:[%s15610_s2 + $0x1a8] sm:$0xff] }
 0x268   :  { %9017 = vst.msk [vmem:[%s15614_s4 + $0x1bc] sm:$0xf] %vm2081_vm1, %v9789_v39  ;;  %v3934_v8 = vmax.f32 %v3869_v2, 0.0  ;;  %v15797_v55 = vld [vmem:[#allocation9_spill] sm:$0xff] }
 0x269   :  { %9016 = vst.msk [vmem:[%s15614_s4 + $0x1b8] sm:$0xf] %vm2081_vm1, %v9788_v13  ;;  %v3933_v3 = vmax.f32 %v3868_v18, 0.0  ;;  %v3749_v15 = vpop.permute.xlu1 %3748  ;;  %v3418_v40 = vmul.f32 %v12808_v28, %v15797_v55  ;;  %v5156_v13 = vld [vmem:[%s15610_s2 + $0x190] sm:$0xff]  ;;  %7149 = vmatmul.mubr.bf16.gmra.mrb[220].mxu1 %v10333_v24  ;;  %v5158_v24 = vld [vmem:[%s15610_s2 + $0x1a0] sm:$0xff] }
 0x26a   :  { %v3744_v19 = vpop.permute.xlu0 %3743  ;;  %v9791_v29 = vpack.c.bf16 %v3934_v8, %v3934_v8  ;;  %v3871_v50 = vadd.f32 %v3749_v15, %v3416_v5  ;;  %5418 = vperm.xlu1 %9940, %v5155_v31   ;;  %v13564_v33 = vpop.f32.mrb[184].mxu0  ;;  %v15799_v5 = vld [vmem:[#allocation69_spill] sm:$0xff] }
 0x26b   :  { %v9790_v26 = vpack.c.bf16 %v3933_v3, %v3933_v3  ;;  %v3870_v1 = vadd.f32 %v3744_v19, %v3415_v35  ;;  %5413 = vperm.xlu0 %9939, %v5154_v63   ;;  %v4950_v37 = vpop.f32.mrb[185].mxu0  ;;  %v3419_v8 = vmul.f32 %v12806_v7, %v15799_v5  ;;  %v15800_v3 = vld [vmem:[#allocation11_spill] sm:$0xff]  ;;  %v15801_v63 = vld [vmem:[#allocation76_spill] sm:$0xff] }
 0x26c   :  { %9019 = vst.msk [vmem:[%s15614_s4 + $0x1c4] sm:$0xf] %vm2081_vm1, %v9791_v29  ;;  %v3936_v46 = vmax.f32 %v3871_v50, 0.0  ;;  %v13585_v2 = vpop.f32.mrb[186].mxu0  ;;  %v3420_v51 = vmul.f32 %v15801_v63, %v15800_v3  ;;  %v10334_v7 = vld [vmem:[%s15612_s1 + $0x78c] ss:$8 sps:$4 sm:$0xff]  }
 0x26d   :  { %9018 = vst.msk [vmem:[%s15614_s4 + $0x1c0] sm:$0xf] %vm2081_vm1, %v9790_v26  ;;  %v3935_v39 = vmax.f32 %v3870_v1, 0.0  ;;  %15798 = vst [vmem:[#allocation23_spill] sm:$0xff] %v13585_v2  ;;  %v3759_v28 = vpop.permute.xlu1 %3758  ;;  %v4953_v10 = vpop.f32.mrb[187].mxu0  ;;  %9538 = vmatprep.mubr.msk.bf16.mxu1 %vm449_vm0, %v10334_v7  ;;  %v5163_v63 = vld [vmem:[%s15610_s2 + $0x1c8] sm:$0xff] }
 0x26e   :  { %v3754_v18 = vpop.permute.xlu0 %3753  ;;  %v9793_v22 = vpack.c.bf16 %v3936_v46, %v3936_v46  ;;  %v3873_v25 = vadd.f32 %v3759_v28, %v3418_v40  ;;  %5428 = vperm.xlu1 %9940, %v5157_v43   ;;  %v10336_v50 = vld [vmem:[%s15612_s1 + $0x788] ss:$8 sps:$4 sm:$0xff]  }
 0x26f   :  { %v9792_v31 = vpack.c.bf16 %v3935_v39, %v3935_v39  ;;  %v3872_v35 = vadd.f32 %v3754_v18, %v3417_v53  ;;  %5423 = vperm.xlu0 %9939, %v5156_v13   ;;  %v5161_v53 = vld [vmem:[%s15610_s2 + $0x1b8] sm:$0xff]  ;;  %v15803_v40 = vld [vmem:[#allocation71_spill] sm:$0xff]  ;;  %v15804_v46 = vld [vmem:[#allocation16_spill] sm:$0xff] }
 0x270   :  { %9021 = vst.msk [vmem:[%s15614_s4 + $0x1cc] sm:$0xf] %vm2081_vm1, %v9793_v22  ;;  %v3938_v15 = vmax.f32 %v3873_v25, 0.0  ;;  %v3421_v39 = vmul.f32 %v15804_v46, %v15803_v40  ;;  %v15805_v13 = vld [vmem:[#allocation13_spill] sm:$0xff] }
 0x271   :  { %9020 = vst.msk [vmem:[%s15614_s4 + $0x1c8] sm:$0xf] %vm2081_vm1, %v9792_v31  ;;  %v3937_v19 = vmax.f32 %v3872_v35, 0.0  ;;  %v3769_v29 = vpop.permute.xlu1 %3768  ;;  %v3422_v28 = vmul.f32 %v12858_v44, %v15805_v13  ;;  %v5160_v31 = vld [vmem:[%s15610_s2 + $0x1b0] sm:$0xff]  ;;  %7157 = vmatmul.mubr.bf16.gmra.mrb[224].mxu1 %v10336_v50  ;;  %v5165_v40 = vld [vmem:[%s15610_s2 + $0x1d8] sm:$0xff] }
 0x272   :  { %v3764_v26 = vpop.permute.xlu0 %3763  ;;  %v9795_v1 = vpack.c.bf16 %v3938_v15, %v3938_v15  ;;  %v3875_v37 = vadd.f32 %v3769_v29, %v3420_v51  ;;  %5438 = vperm.xlu1 %9940, %v5159_v20   ;;  %v13611_v60 = vpop.f32.mrb[188].mxu0  ;;  %v15807_v51 = vld [vmem:[#allocation73_spill] sm:$0xff] }
 0x273   :  { %v9794_v43 = vpack.c.bf16 %v3937_v19, %v3937_v19  ;;  %v3874_v62 = vadd.f32 %v3764_v26, %v3419_v8  ;;  %15802 = vst [vmem:[#allocation24_spill] sm:$0xff] %v13611_v60  ;;  %5433 = vperm.xlu0 %9939, %v5158_v24   ;;  %v4958_v55 = vpop.f32.mrb[189].mxu0  ;;  %v3423_v15 = vmul.f32 %v12856_v45, %v15807_v51  ;;  %v15808_v19 = vld [vmem:[#allocation15_spill] sm:$0xff]  ;;  %v5162_v26 = vld [vmem:[%s15610_s2 + $0x1c0] sm:$0xff]  ;;  %v15813_v51 = vld [vmem:[#allocation77_spill] sm:$0xff] }
 0x274   :  { %9023 = vst.msk [vmem:[%s15614_s4 + $0x1d4] sm:$0xf] %vm2081_vm1, %v9795_v1  ;;  %v3940_v18 = vmax.f32 %v3875_v37, 0.0  ;;  %v13632_v25 = vpop.f32.mrb[190].mxu0  ;;  %v3424_v24 = vmul.f32 %v12875_v0, %v15808_v19  ;;  %v10337_v45 = vld [vmem:[%s15612_s1 + $0x79c] ss:$8 sps:$4 sm:$0xff]  }
 0x275   :  { %9022 = vst.msk [vmem:[%s15614_s4 + $0x1d0] sm:$0xf] %vm2081_vm1, %v9794_v43  ;;  %v3939_v22 = vmax.f32 %v3874_v62, 0.0  ;;  %15806 = vst [vmem:[#allocation25_spill] sm:$0xff] %v13632_v25  ;;  %v3779_v44 = vpop.permute.xlu1 %3778  ;;  %v4961_v3 = vpop.f32.mrb[191].mxu0  ;;  %9539 = vmatprep.mubr.msk.bf16.mxu1 %vm449_vm0, %v10337_v45  ;;  %v15814_v19 = vld [vmem:[#allocation19_spill] sm:$0xff] }
 0x276   :  { %v3774_v35 = vpop.permute.xlu0 %3773  ;;  %v9797_v10 = vpack.c.bf16 %v3940_v18, %v3940_v18  ;;  %v3877_v5 = vadd.f32 %v3779_v44, %v3422_v28  ;;  %5448 = vperm.xlu1 %9940, %v5161_v53   ;;  %v10339_v1 = vld [vmem:[%s15612_s1 + $0x798] ss:$8 sps:$4 sm:$0xff]   ;;  %v5164_v44 = vld [vmem:[%s15610_s2 + $0x1d0] sm:$0xff]  ;;  %v5586_v25 = vld [vmem:[%s15613_s3 + $0xc8] sm:$0xff] }
 0x277   :  { %v9796_v20 = vpack.c.bf16 %v3939_v22, %v3939_v22  ;;  %v3876_v8 = vadd.f32 %v3774_v35, %v3421_v39  ;;  %5443 = vperm.xlu0 %9939, %v5160_v31   ;;  %v15810_v39 = vld [vmem:[#allocation75_spill] sm:$0xff]  ;;  %v15811_v28 = vld [vmem:[#allocation17_spill] sm:$0xff]  ;;  %v5166_v45 = vld [vmem:[%s15610_s2 + $0x1e0] sm:$0xff] }
 0x278   :  { %9025 = vst.msk [vmem:[%s15614_s4 + $0x1dc] sm:$0xf] %vm2081_vm1, %v9797_v10  ;;  %v3942_v7 = vmax.f32 %v3877_v5, 0.0  ;;  %v3425_v13 = vmul.f32 %v12873_v17, %v15810_v39  ;;  %v3426_v18 = vmul.f32 %v12907_v6, %v15811_v28  ;;  %v15818_v28 = vld [vmem:[#allocation78_spill] sm:$0xff] }
 0x279   :  { %9024 = vst.msk [vmem:[%s15614_s4 + $0x1d8] sm:$0xf] %vm2081_vm1, %v9796_v20  ;;  %v3941_v29 = vmax.f32 %v3876_v8, 0.0  ;;  %v3789_v0 = vpop.permute.xlu1 %3788  ;;  %7165 = vmatmul.mubr.bf16.gmra.mrb[228].mxu1 %v10339_v1  ;;  %v10342_v1 = vld [vmem:[%s15612_s1 + $0x7a8] ss:$8 sps:$4 sm:$0xff]  }
 0x27a   :  { %v3784_v50 = vpop.permute.xlu0 %3783  ;;  %v9799_v43 = vpack.c.bf16 %v3942_v7, %v3942_v7  ;;  %v3879_v62 = vadd.f32 %v3789_v0, %v3424_v24  ;;  %5458 = vperm.xlu1 %9940, %v5163_v63   ;;  %v13658_v55 = vpop.f32.mrb[192].mxu0  ;;  %v5167_v63 = vld [vmem:[%s15610_s2 + $0x1e8] sm:$0xff] }
 0x27b   :  { %v9798_v37 = vpack.c.bf16 %v3941_v29, %v3941_v29  ;;  %v3878_v53 = vadd.f32 %v3784_v50, %v3423_v15  ;;  %15809 = vst [vmem:[#allocation26_spill] sm:$0xff] %v13658_v55  ;;  %5453 = vperm.xlu0 %9939, %v5162_v26   ;;  %v4966_v46 = vpop.f32.mrb[193].mxu0  ;;  %v3427_v15 = vmul.f32 %v12905_v36, %v15813_v51  ;;  %v15815_v24 = vld [vmem:[#allocation79_spill] sm:$0xff] }
 0x27c   :  { %9027 = vst.msk [vmem:[%s15614_s4 + $0x1e4] sm:$0xf] %vm2081_vm1, %v9799_v43  ;;  %v3944_v22 = vmax.f32 %v3879_v62, 0.0  ;;  %v13679_v17 = vpop.f32.mrb[194].mxu0  ;;  %v3428_v7 = vmul.f32 %v15815_v24, %v15814_v19  ;;  %v10340_v36 = vld [vmem:[%s15612_s1 + $0x7ac] ss:$8 sps:$4 sm:$0xff]  }
 0x27d   :  { %9026 = vst.msk [vmem:[%s15614_s4 + $0x1e0] sm:$0xf] %vm2081_vm1, %v9798_v37  ;;  %v3943_v31 = vmax.f32 %v3878_v53, 0.0  ;;  %15812 = vst [vmem:[#allocation27_spill] sm:$0xff] %v13679_v17  ;;  %v3799_v6 = vpop.permute.xlu1 %3798  ;;  %v4969_v3 = vpop.f32.mrb[195].mxu0  ;;  %v5169_v46 = vld [vmem:[%s15610_s2 + $0x1f8] sm:$0xff]  ;;  %9540 = vmatprep.mubr.msk.bf16.mxu1 %vm449_vm0, %v10340_v36 }
 0x27e   :  { %v3794_v35 = vpop.permute.xlu0 %3793  ;;  %v9801_v10 = vpack.c.bf16 %v3944_v22, %v3944_v22  ;;  %v3881_v5 = vadd.f32 %v3799_v6, %v3426_v18  ;;  %5468 = vperm.xlu1 %9940, %v5165_v40   ;;  %v15819_v22 = vld [vmem:[#allocation20_spill] sm:$0xff]  ;;  %v5561_v24 = vld [vmem:[%s15613_s3] sm:$0xff] }
 0x27f   :  { %v9800_v20 = vpack.c.bf16 %v3943_v31, %v3943_v31  ;;  %v3880_v8 = vadd.f32 %v3794_v35, %v3425_v13  ;;  %5463 = vperm.xlu0 %9939, %v5164_v44   ;;  %v15817_v13 = vld [vmem:[#allocation18_spill] sm:$0xff]  ;;  %v15820_v31 = vld [vmem:[#allocation21_spill] sm:$0xff] }
 0x280   :  { %9029 = vst.msk [vmem:[%s15614_s4 + $0x1ec] sm:$0xf] %vm2081_vm1, %v9801_v10  ;;  %v3946_v29 = vmax.f32 %v3881_v5, 0.0  ;;  %v3429_v18 = vmul.f32 %v15818_v28, %v15817_v13  ;;  %v3430_v44 = vmul.f32 %v15820_v31, %v15819_v22  ;;  %v5168_v10 = vld [vmem:[%s15610_s2 + $0x1f0] sm:$0xff]  ;;  %v5565_v22 = vld [vmem:[%s15613_s3 + $0x20] sm:$0xff]  ;;  %v5564_v31 = vld [vmem:[%s15613_s3 + $0x18] sm:$0xff] }
 0x281   :  { %9028 = vst.msk [vmem:[%s15614_s4 + $0x1e8] sm:$0xf] %vm2081_vm1, %v9800_v20  ;;  %v3945_v26 = vmax.f32 %v3880_v8, 0.0  ;;  %v3809_v0 = vpop.permute.xlu1 %3808  ;;  %7173 = vmatmul.mubr.bf16.gmra.mrb[232].mxu1 %v10342_v1 }
 0x282   :  { %v3804_v50 = vpop.permute.xlu0 %3803  ;;  %v9803_v43 = vpack.c.bf16 %v3946_v29, %v3946_v29  ;;  %v3883_v62 = vadd.f32 %v3809_v0, %v3428_v7  ;;  %5478 = vperm.xlu1 %9940, %v5167_v63   ;;  %v13705_v40 = vpop.f32.mrb[196].mxu0 }
 0x283   :  { %v9802_v37 = vpack.c.bf16 %v3945_v26, %v3945_v26  ;;  %v3882_v53 = vadd.f32 %v3804_v50, %v3427_v15  ;;  %15816 = vst [vmem:[#allocation28_spill] sm:$0xff] %v13705_v40  ;;  %5473 = vperm.xlu0 %9939, %v5166_v45   ;;  %v4974_v39 = vpop.f32.mrb[197].mxu0  ;;  %v5170_v26 = vld [vmem:[%s15610_s2 + $0x200] sm:$0xf]  ;;  %v10343_v45 = vld [vmem:[%s15612_s1 + $0x7bc] ss:$8 sps:$4 sm:$0xff]  }
 0x284   :  { %9031 = vst.msk [vmem:[%s15614_s4 + $0x1f4] sm:$0xf] %vm2081_vm1, %v9803_v43  ;;  %v3948_v6 = vmax.f32 %v3883_v62, 0.0  ;;  %v13726_v20 = vpop.f32.mrb[198].mxu0  ;;  %v10345_v50 = vld [vmem:[%s15612_s1 + $0x7b8] ss:$8 sps:$4 sm:$0xff]   ;;  %9541 = vmatprep.mubr.msk.bf16.mxu1 %vm449_vm0, %v10343_v45 }
 0x285   :  { %9030 = vst.msk [vmem:[%s15614_s4 + $0x1f0] sm:$0xf] %vm2081_vm1, %v9802_v37  ;;  %v3947_v35 = vmax.f32 %v3882_v53, 0.0  ;;  %15821 = vst [vmem:[#allocation29_spill] sm:$0xff] %v13726_v20  ;;  %v3819_v5 = vpop.permute.xlu1 %3818  ;;  %v4977_v19 = vpop.f32.mrb[199].mxu0  ;;  %v5563_v62 = vld [vmem:[%s15613_s3 + $0x10] sm:$0xff] }
 0x286   :  { %v3814_v8 = vpop.permute.xlu0 %3813  ;;  %v9805_v3 = vpack.c.bf16 %v3948_v6, %v3948_v6  ;;  %v3885_v51 = vadd.f32 %v3819_v5, %v3430_v44  ;;  %5488 = vperm.xlu1 %9940, %v5169_v46   ;;  %v5562_v46 = vld [vmem:[%s15613_s3 + $0x8] sm:$0xff] }
 0x287   :  { %v9804_v63 = vpack.c.bf16 %v3947_v35, %v3947_v35  ;;  %v3884_v15 = vadd.f32 %v3814_v8, %v3429_v18  ;;  %5483 = vperm.xlu0 %9939, %v5168_v10   ;;  %v10346_v44 = vld [vmem:[%s15612_s1 + $0x7cc] ss:$8 sps:$4 sm:$0xff]   ;;  %v10348_v35 = vld [vmem:[%s15612_s1 + $0x7c8] ss:$8 sps:$4 sm:$0xff]  }
 0x288   :  { %9033 = vst.msk [vmem:[%s15614_s4 + $0x1fc] sm:$0xf] %vm2081_vm1, %v9805_v3  ;;  %v3950_v7 = vmax.f32 %v3885_v51, 0.0  ;;  %v5567_v8 = vld [vmem:[%s15613_s3 + $0x30] sm:$0xff] }
 0x289   :  { %9032 = vst.msk [vmem:[%s15614_s4 + $0x1f8] sm:$0xf] %vm2081_vm1, %v9804_v63  ;;  %v3949_v29 = vmax.f32 %v3884_v15, 0.0  ;;  %v13745_v36 = vpop.permute.xlu1 %5178  ;;  %7181 = vmatmul.mubr.bf16.gmra.mrb[236].mxu1 %v10345_v50  ;;  %v5566_v63 = vld [vmem:[%s15613_s3 + $0x28] sm:$0xff]  ;;  %v10351_v50 = vld [vmem:[%s15612_s1 + $0x7d8] ss:$8 sps:$4 sm:$0xff]  }
 0x28a   :  { %v13747_v0 = vpop.permute.xlu0 %5173  ;;  %v9807_v1 = vpack.c.bf16 %v3950_v7, %v3950_v7  ;;  %5628 = vperm.xlu1 %9940, %v5561_v24   ;;  %v13752_v37 = vpop.f32.mrb[200].mxu0  ;;  %9542 = vmatprep.mubr.msk.bf16.mxu1 %vm449_vm0, %v10346_v44  ;;  %v5569_v7 = vld [vmem:[%s15613_s3 + $0x40] sm:$0xff] }
 0x28b   :  { %v9806_v43 = vpack.c.bf16 %v3949_v29, %v3949_v29  ;;  %15822 = vst [vmem:[#allocation30_spill] sm:$0xff] %v13752_v37  ;;  %5493 = vperm.xlu0 %9939, %v5170_v26   ;;  %v4982_v53 = vpop.f32.mrb[201].mxu0  ;;  %v5568_v29 = vld [vmem:[%s15613_s3 + $0x38] sm:$0xff] }
 0x28c   :  { %9035 = vst.msk [vmem:[%s15614_s4 + $0x204] sm:$0x3] %vm2146_vm2, %v9807_v1  ;;  %v13769_v39 = vpop.f32.mrb[202].mxu0  ;;  %v10349_v26 = vld [vmem:[%s15612_s1 + $0x7dc] ss:$8 sps:$4 sm:$0xff]  }
 0x28d   :  { %9034 = vst.msk [vmem:[%s15614_s4 + $0x200] sm:$0xf] %vm2081_vm1, %v9806_v43  ;;  %15823 = vst [vmem:[#allocation31_spill] sm:$0xff] %v13769_v39  ;;  %v13771_v13 = vpop.permute.xlu1 %5188  ;;  %v4985_v28 = vpop.f32.mrb[203].mxu0 }
 0x28e   :  { %v13773_v18 = vpop.permute.xlu0 %5183  ;;  %5638 = vperm.xlu1 %9940, %v5563_v62   ;;  %v5571_v62 = vld [vmem:[%s15613_s3 + $0x50] sm:$0xff] }
 0x28f   :  { %5633 = vperm.xlu0 %9939, %v5562_v46   ;;  %v5570_v46 = vld [vmem:[%s15613_s3 + $0x48] sm:$0xff] }
 0x291   :  { %v13784_v6 = vpop.permute.xlu1 %5198  ;;  %7189 = vmatmul.mubr.bf16.gmra.mrb[240].mxu1 %v10348_v35  ;;  %v5573_v35 = vld [vmem:[%s15613_s3 + $0x60] sm:$0xff] }
 0x292   :  { %v13789_v10 = vpop.permute.xlu0 %5193  ;;  %5648 = vperm.xlu1 %9940, %v5565_v22   ;;  %v13791_v5 = vpop.f32.mrb[204].mxu0  ;;  %9543 = vmatprep.mubr.msk.bf16.mxu1 %vm449_vm0, %v10349_v26  ;;  %v5575_v26 = vld [vmem:[%s15613_s3 + $0x70] sm:$0xff] }
 0x293   :  { %15824 = vst [vmem:[#allocation32_spill] sm:$0xff] %v13791_v5  ;;  %5643 = vperm.xlu0 %9939, %v5564_v31   ;;  %v4990_v3 = vpop.f32.mrb[205].mxu0  ;;  %v5582_v5 = vld [vmem:[%s15613_s3 + $0xa8] sm:$0xff] }
 0x294   :  { %v13800_v51 = vpop.f32.mrb[206].mxu0  ;;  %v10352_v3 = vld [vmem:[%s15612_s1 + $0x7ec] ss:$8 sps:$4 sm:$0xff]  }
 0x295   :  { %15825 = vst [vmem:[#allocation33_spill] sm:$0xff] %v13800_v51  ;;  %v13802_v15 = vpop.permute.xlu1 %5208  ;;  %v4993_v19 = vpop.f32.mrb[207].mxu0 }
 0x296   :  { %v13804_v24 = vpop.permute.xlu0 %5203  ;;  %5658 = vperm.xlu1 %9940, %v5567_v8   ;;  %v5572_v8 = vld [vmem:[%s15613_s3 + $0x58] sm:$0xff]  ;;  %v10354_v19 = vld [vmem:[%s15612_s1 + $0x7e8] ss:$8 sps:$4 sm:$0xff]  }
 0x297   :  { %5653 = vperm.xlu0 %9939, %v5566_v63  }
 0x299   :  { %v13815_v45 = vpop.permute.xlu1 %5218  ;;  %7197 = vmatmul.mubr.bf16.gmra.mrb[244].mxu1 %v10351_v50 }
 0x29a   :  { %v13820_v1 = vpop.permute.xlu0 %5213  ;;  %5668 = vperm.xlu1 %9940, %v5569_v7   ;;  %v13822_v43 = vpop.f32.mrb[208].mxu0  ;;  %9544 = vmatprep.mubr.msk.bf16.mxu1 %vm449_vm0, %v10352_v3  ;;  %v5576_v3 = vld [vmem:[%s15613_s3 + $0x78] sm:$0xff] }
 0x29b   :  { %15826 = vst [vmem:[#allocation34_spill] sm:$0xff] %v13822_v43  ;;  %5663 = vperm.xlu0 %9939, %v5568_v29   ;;  %v4998_v53 = vpop.f32.mrb[209].mxu0 }
 0x29c   :  { %v13831_v28 = vpop.f32.mrb[210].mxu0 }
 0x29d   :  { %15827 = vst [vmem:[#allocation35_spill] sm:$0xff] %v13831_v28  ;;  %v13833_v22 = vpop.permute.xlu1 %5228  ;;  %v5001_v31 = vpop.f32.mrb[211].mxu0 }
 0x29e   :  { %v13835_v44 = vpop.permute.xlu0 %5223  ;;  %5678 = vperm.xlu1 %9940, %v5571_v62   ;;  %v5574_v62 = vld [vmem:[%s15613_s3 + $0x68] sm:$0xff] }
 0x29f   :  { %5673 = vperm.xlu0 %9939, %v5570_v46  }
 0x2a1   :  { %v13846_v63 = vpop.permute.xlu1 %5238  ;;  %7205 = vmatmul.mubr.bf16.gmra.mrb[248].mxu1 %v10354_v19 }
 0x2a2   :  { %v13851_v7 = vpop.permute.xlu0 %5233  ;;  %5688 = vperm.xlu1 %9940, %v5573_v35   ;;  %v13853_v29 = vpop.f32.mrb[212].mxu0 }
 0x2a3   :  { %15828 = vst [vmem:[#allocation36_spill] sm:$0xff] %v13853_v29  ;;  %5683 = vperm.xlu0 %9939, %v5572_v8   ;;  %v5006_v50 = vpop.f32.mrb[213].mxu0  ;;  %v5577_v8 = vld [vmem:[%s15613_s3 + $0x80] sm:$0xff]  ;;  %v5578_v29 = vld [vmem:[%s15613_s3 + $0x88] sm:$0xff] }
 0x2a4   :  { %v13862_v53 = vpop.f32.mrb[214].mxu0  ;;  %v10355_v50 = vld [vmem:[%s15612_s1 + $0x7fc] ss:$8 sps:$4 sm:$0xff]  }
 0x2a5   :  { %15829 = vst [vmem:[#allocation37_spill] sm:$0xff] %v13862_v53  ;;  %v13864_v46 = vpop.permute.xlu1 %5248  ;;  %v5009_v31 = vpop.f32.mrb[215].mxu0  ;;  %9545 = vmatprep.mubr.msk.bf16.mxu1 %vm449_vm0, %v10355_v50  ;;  %v5579_v53 = vld [vmem:[%s15613_s3 + $0x90] sm:$0xff] }
 0x2a6   :  { %v13866_v35 = vpop.permute.xlu0 %5243  ;;  %5698 = vperm.xlu1 %9940, %v5575_v26   ;;  %v10357_v31 = vld [vmem:[%s15612_s1 + $0x7f8] ss:$8 sps:$4 sm:$0xff]   ;;  %v10360_v50 = vld [vmem:[%s15612_s1 + $0x80c] ss:$8 sps:$4 sm:$0xff]  }
 0x2a7   :  { %5693 = vperm.xlu0 %9939, %v5574_v62  }
 0x2a9   :  { %v13877_v19 = vpop.permute.xlu1 %5258  ;;  %7213 = vmatmul.mubr.bf16.gmra.mrb[252].mxu1 %v10357_v31 }
 0x2aa   :  { %v13882_v26 = vpop.permute.xlu0 %5253  ;;  %5708 = vperm.xlu1 %9940, %v5577_v8   ;;  %v13884_v62 = vpop.f32.mrb[216].mxu0  ;;  %9546 = vmatprep.mubr.msk.bf16.mxu1 %vm449_vm0, %v10360_v50  ;;  %v5584_v50 = vld [vmem:[%s15613_s3 + $0xb8] sm:$0xff] }
 0x2ab   :  { %15830 = vst [vmem:[#allocation38_spill] sm:$0xff] %v13884_v62  ;;  %5703 = vperm.xlu0 %9939, %v5576_v3   ;;  %v5014_v28 = vpop.f32.mrb[217].mxu0  ;;  %v5581_v3 = vld [vmem:[%s15613_s3 + $0xa0] sm:$0xff] }
 0x2ac   :  { %v13893_v51 = vpop.f32.mrb[218].mxu0  ;;  %v5580_v28 = vld [vmem:[%s15613_s3 + $0x98] sm:$0xff] }
 0x2ad   :  { %15831 = vst [vmem:[#allocation39_spill] sm:$0xff] %v13893_v51  ;;  %v13895_v43 = vpop.permute.xlu1 %5268  ;;  %v5017_v8 = vpop.f32.mrb[219].mxu0  ;;  %v5583_v51 = vld [vmem:[%s15613_s3 + $0xb0] sm:$0xff] }
 0x2ae   :  { %v13897_v39 = vpop.permute.xlu0 %5263  ;;  %5718 = vperm.xlu1 %9940, %v5579_v53   ;;  %v10358_v8 = vld [vmem:[%s15612_s1 + $0x808] ss:$8 sps:$4 sm:$0xff]  }
 0x2af   :  { %5713 = vperm.xlu0 %9939, %v5578_v29  }
 0x2b1   :  { %v13908_v31 = vpop.permute.xlu1 %5278  ;;  %7221 = vmatmul.mubr.bf16.gmra.mrb[0].mxu1 %v10358_v8 }
 0x2b2   :  { %v13913_v53 = vpop.permute.xlu0 %5273  ;;  %5728 = vperm.xlu1 %9940, %v5581_v3   ;;  %v13915_v29 = vpop.f32.mrb[220].mxu0 }
 0x2b3   :  { %15832 = vst [vmem:[#allocation40_spill] sm:$0xff] %v13915_v29  ;;  %5723 = vperm.xlu0 %9939, %v5580_v28   ;;  %v5022_v62 = vpop.f32.mrb[221].mxu0  ;;  %v5585_v28 = vld [vmem:[%s15613_s3 + $0xc0] sm:$0xff] }
 0x2b4   :  { %v13924_v20 = vpop.f32.mrb[222].mxu0  ;;  %v9421_v62 = vld [vmem:[%s15612_s1 + $0x818] sm:$0x33] }
 0x2b5   :  { %15833 = vst [vmem:[#allocation41_spill] sm:$0xff] %v13924_v20  ;;  %v13926_v37 = vpop.permute.xlu1 %5288  ;;  %v5025_v3 = vpop.f32.mrb[223].mxu0  ;;  %v9505_v8 = vcombine.high %v9421_v62, %v9421_v62 }
 0x2b6   :  { %v13928_v17 = vpop.permute.xlu0 %5283  ;;  %5738 = vperm.xlu1 %9940, %v5583_v51   ;;  %v9504_v3 = vcombine.low %v9421_v62, %v9421_v62  ;;  %v5587_v51 = vld [vmem:[%s15613_s3 + $0xd0] sm:$0xff] }
 0x2b7   :  { %5733 = vperm.xlu0 %9939, %v5582_v5   ;;  %9547 = vmatprep.mubr.msk.bf16.mxu1 %vm449_vm0, %v9505_v8 }
 0x2b9   :  { %v13939_v20 = vpop.permute.xlu1 %5298  ;;  %7229 = vmatmul.mubr.bf16.gmra.mrb[4].mxu1 %v9504_v3 }
 0x2ba   :  { %15834 = vst [vmem:[#allocation42_spill] sm:$0xff] %v13939_v20  ;;  %v13941_v29 = vpop.permute.xlu0 %5293  ;;  %5748 = vperm.xlu1 %9940, %v5585_v28   ;;  %v13943_v5 = vpop.f32.mrb[224].mxu0 }
 0x2bb   :  { %15835 = vst [vmem:[#allocation62_spill] sm:$0xff] %v13943_v5  ;;  %5743 = vperm.xlu0 %9939, %v5584_v50   ;;  %v5030_v40 = vpop.f32.mrb[225].mxu0  ;;  %v5589_v50 = vld [vmem:[%s15613_s3 + $0xe0] sm:$0xff] }
 0x2bc   :  { %v13952_v55 = vpop.f32.mrb[226].mxu0  ;;  %v5588_v40 = vld [vmem:[%s15613_s3 + $0xd8] sm:$0xff] }
 0x2bd   :  { %15836 = vst [vmem:[#allocation43_spill] sm:$0xff] %v13952_v55  ;;  %v13954_v62 = vpop.permute.xlu1 %5308  ;;  %v5033_v28 = vpop.f32.mrb[227].mxu0 }
 0x2be   :  { %15837 = vst [vmem:[#allocation2_spill] sm:$0xff] %v13954_v62  ;;  %v13956_v2 = vpop.permute.xlu0 %5303  ;;  %5758 = vperm.xlu1 %9940, %v5587_v51   ;;  %v5590_v28 = vld [vmem:[%s15613_s3 + $0xe8] sm:$0xff] }
 0x2bf   :  { %5753 = vperm.xlu0 %9939, %v5586_v25   ;;  %v5591_v25 = vld [vmem:[%s15613_s3 + $0xf0] sm:$0xff] }
 0x2c1   :  { %v13964_v8 = vpop.permute.xlu1 %5318 }
 0x2c2   :  { %15838 = vst [vmem:[#allocation44_spill] sm:$0xff] %v13964_v8  ;;  %v13966_v5 = vpop.permute.xlu0 %5313  ;;  %5768 = vperm.xlu1 %9940, %v5589_v50   ;;  %v13968_v3 = vpop.f32.mrb[228].mxu0  ;;  %v5593_v50 = vld [vmem:[%s15613_s3 + $0x100] sm:$0xff] }
 0x2c3   :  { %15839 = vst [vmem:[#allocation45_spill] sm:$0xff] %v13966_v5  ;;  %15840 = vst [vmem:[#allocation46_spill] sm:$0xff] %v13968_v3  ;;  %5763 = vperm.xlu0 %9939, %v5588_v40   ;;  %v5038_v51 = vpop.f32.mrb[229].mxu0  ;;  %v5592_v40 = vld [vmem:[%s15613_s3 + $0xf8] sm:$0xff] }
 0x2c4   :  { %v13976_v55 = vpop.f32.mrb[230].mxu0 }
 0x2c5   :  { %15841 = vst [vmem:[#allocation64_spill] sm:$0xff] %v13976_v55  ;;  %v13978_v62 = vpop.permute.xlu1 %5328  ;;  %v5041_v8 = vpop.f32.mrb[231].mxu0 }
 0x2c6   :  { %15842 = vst [vmem:[#allocation47_spill] sm:$0xff] %v13978_v62  ;;  %v13980_v60 = vpop.permute.xlu0 %5323  ;;  %5778 = vperm.xlu1 %9940, %v5591_v25   ;;  %v5595_v8 = vld [vmem:[%s15613_s3 + $0x110] sm:$0xff] }
 0x2c7   :  { %15843 = vst [vmem:[#allocation4_spill] sm:$0xff] %v13980_v60  ;;  %5773 = vperm.xlu0 %9939, %v5590_v28   ;;  %v5594_v28 = vld [vmem:[%s15613_s3 + $0x108] sm:$0xff] }
 0x2c9   :  { %v13988_v51 = vpop.permute.xlu1 %5338 }
 0x2ca   :  { %15844 = vst [vmem:[#allocation48_spill] sm:$0xff] %v13988_v51  ;;  %v13990_v3 = vpop.permute.xlu0 %5333  ;;  %5788 = vperm.xlu1 %9940, %v5593_v50   ;;  %v13992_v55 = vpop.f32.mrb[232].mxu0  ;;  %v5597_v50 = vld [vmem:[%s15613_s3 + $0x120] sm:$0xff] }
 0x2cb   :  { %15845 = vst [vmem:[#allocation49_spill] sm:$0xff] %v13990_v3  ;;  %15846 = vst [vmem:[#allocation50_spill] sm:$0xff] %v13992_v55  ;;  %5783 = vperm.xlu0 %9939, %v5592_v40   ;;  %v5046_v25 = vpop.f32.mrb[233].mxu0  ;;  %v5596_v40 = vld [vmem:[%s15613_s3 + $0x118] sm:$0xff] }
 0x2cc   :  { %v14000_v62 = vpop.f32.mrb[234].mxu0 }
 0x2cd   :  { %15847 = vst [vmem:[#allocation66_spill] sm:$0xff] %v14000_v62  ;;  %v14002_v60 = vpop.permute.xlu1 %5348  ;;  %v5049_v51 = vpop.f32.mrb[235].mxu0 }
 0x2ce   :  { %15848 = vst [vmem:[#allocation51_spill] sm:$0xff] %v14002_v60  ;;  %v14004_v5 = vpop.permute.xlu0 %5343  ;;  %5798 = vperm.xlu1 %9940, %v5595_v8   ;;  %v5599_v51 = vld [vmem:[%s15613_s3 + $0x130] sm:$0xff] }
 0x2cf   :  { %15849 = vst [vmem:[#allocation6_spill] sm:$0xff] %v14004_v5  ;;  %5793 = vperm.xlu0 %9939, %v5594_v28   ;;  %v5598_v28 = vld [vmem:[%s15613_s3 + $0x128] sm:$0xff] }
 0x2d1   :  { %v14012_v25 = vpop.permute.xlu1 %5358 }
 0x2d2   :  { %15850 = vst [vmem:[#allocation52_spill] sm:$0xff] %v14012_v25  ;;  %v14014_v55 = vpop.permute.xlu0 %5353  ;;  %5808 = vperm.xlu1 %9940, %v5597_v50   ;;  %v14016_v62 = vpop.f32.mrb[236].mxu0  ;;  %v5601_v50 = vld [vmem:[%s15613_s3 + $0x140] sm:$0xff] }
 0x2d3   :  { %15851 = vst [vmem:[#allocation53_spill] sm:$0xff] %v14014_v55  ;;  %15852 = vst [vmem:[#allocation54_spill] sm:$0xff] %v14016_v62  ;;  %5803 = vperm.xlu0 %9939, %v5596_v40   ;;  %v5054_v8 = vpop.f32.mrb[237].mxu0  ;;  %v5600_v40 = vld [vmem:[%s15613_s3 + $0x138] sm:$0xff] }
 0x2d4   :  { %v14024_v60 = vpop.f32.mrb[238].mxu0 }
 0x2d5   :  { %15853 = vst [vmem:[#allocation68_spill] sm:$0xff] %v14024_v60  ;;  %v14026_v5 = vpop.permute.xlu1 %5368  ;;  %v5057_v25 = vpop.f32.mrb[239].mxu0 }
 0x2d6   :  { %15854 = vst [vmem:[#allocation55_spill] sm:$0xff] %v14026_v5  ;;  %v14028_v3 = vpop.permute.xlu0 %5363  ;;  %5818 = vperm.xlu1 %9940, %v5599_v51   ;;  %v5603_v25 = vld [vmem:[%s15613_s3 + $0x150] sm:$0xff] }
 0x2d7   :  { %15855 = vst [vmem:[#allocation8_spill] sm:$0xff] %v14028_v3  ;;  %5813 = vperm.xlu0 %9939, %v5598_v28   ;;  %v5602_v28 = vld [vmem:[%s15613_s3 + $0x148] sm:$0xff] }
 0x2d9   :  { %v14036_v8 = vpop.permute.xlu1 %5378 }
 0x2da   :  { %15856 = vst [vmem:[#allocation56_spill] sm:$0xff] %v14036_v8  ;;  %v14038_v62 = vpop.permute.xlu0 %5373  ;;  %5828 = vperm.xlu1 %9940, %v5601_v50   ;;  %v14040_v60 = vpop.f32.mrb[240].mxu0  ;;  %v5605_v50 = vld [vmem:[%s15613_s3 + $0x160] sm:$0xff] }
 0x2db   :  { %15857 = vst [vmem:[#allocation57_spill] sm:$0xff] %v14038_v62  ;;  %15858 = vst [vmem:[#allocation58_spill] sm:$0xff] %v14040_v60  ;;  %5823 = vperm.xlu0 %9939, %v5600_v40   ;;  %v5062_v51 = vpop.f32.mrb[241].mxu0  ;;  %v5604_v40 = vld [vmem:[%s15613_s3 + $0x158] sm:$0xff] }
 0x2dc   :  { %v14048_v5 = vpop.f32.mrb[242].mxu0 }
 0x2dd   :  { %15859 = vst [vmem:[#allocation70_spill] sm:$0xff] %v14048_v5  ;;  %v14050_v3 = vpop.permute.xlu1 %5388  ;;  %v5065_v8 = vpop.f32.mrb[243].mxu0 }
 0x2de   :  { %15860 = vst [vmem:[#allocation59_spill] sm:$0xff] %v14050_v3  ;;  %v14052_v55 = vpop.permute.xlu0 %5383  ;;  %5838 = vperm.xlu1 %9940, %v5603_v25   ;;  %v5607_v8 = vld [vmem:[%s15613_s3 + $0x170] sm:$0xff] }
 0x2df   :  { %15861 = vst [vmem:[#allocation10_spill] sm:$0xff] %v14052_v55  ;;  %5833 = vperm.xlu0 %9939, %v5602_v28   ;;  %v5606_v28 = vld [vmem:[%s15613_s3 + $0x168] sm:$0xff] }
 0x2e1   :  { %v14060_v51 = vpop.permute.xlu1 %5398 }
 0x2e2   :  { %15862 = vst [vmem:[#allocation60_spill] sm:$0xff] %v14060_v51  ;;  %v14062_v60 = vpop.permute.xlu0 %5393  ;;  %5848 = vperm.xlu1 %9940, %v5605_v50   ;;  %v14064_v5 = vpop.f32.mrb[244].mxu0  ;;  %v5609_v50 = vld [vmem:[%s15613_s3 + $0x180] sm:$0xff] }
 0x2e3   :  { %15863 = vst [vmem:[#allocation61_spill] sm:$0xff] %v14062_v60  ;;  %15864 = vst [vmem:[#allocation3_spill] sm:$0xff] %v14064_v5  ;;  %5843 = vperm.xlu0 %9939, %v5604_v40   ;;  %v5070_v25 = vpop.f32.mrb[245].mxu0  ;;  %v5608_v40 = vld [vmem:[%s15613_s3 + $0x178] sm:$0xff] }
 0x2e4   :  { %v14072_v3 = vpop.f32.mrb[246].mxu0 }
 0x2e5   :  { %15865 = vst [vmem:[#allocation72_spill] sm:$0xff] %v14072_v3  ;;  %v14074_v55 = vpop.permute.xlu1 %5408  ;;  %v5073_v51 = vpop.f32.mrb[247].mxu0 }
 0x2e6   :  { %15866 = vst [vmem:[#allocation63_spill] sm:$0xff] %v14074_v55  ;;  %v14076_v62 = vpop.permute.xlu0 %5403  ;;  %5858 = vperm.xlu1 %9940, %v5607_v8   ;;  %v5611_v51 = vld [vmem:[%s15613_s3 + $0x190] sm:$0xff] }
 0x2e7   :  { %15867 = vst [vmem:[#allocation12_spill] sm:$0xff] %v14076_v62  ;;  %5853 = vperm.xlu0 %9939, %v5606_v28   ;;  %v5610_v28 = vld [vmem:[%s15613_s3 + $0x188] sm:$0xff] }
 0x2e9   :  { %v14084_v25 = vpop.permute.xlu1 %5418 }
 0x2ea   :  { %15868 = vst [vmem:[#allocation5_spill] sm:$0xff] %v14084_v25  ;;  %v14086_v5 = vpop.permute.xlu0 %5413  ;;  %5868 = vperm.xlu1 %9940, %v5609_v50   ;;  %v14088_v3 = vpop.f32.mrb[248].mxu0  ;;  %v5613_v50 = vld [vmem:[%s15613_s3 + $0x1a0] sm:$0xff] }
 0x2eb   :  { %15869 = vst [vmem:[#allocation65_spill] sm:$0xff] %v14086_v5  ;;  %15870 = vst [vmem:[#allocation7_spill] sm:$0xff] %v14088_v3  ;;  %5863 = vperm.xlu0 %9939, %v5608_v40   ;;  %v5078_v8 = vpop.f32.mrb[249].mxu0  ;;  %v5612_v40 = vld [vmem:[%s15613_s3 + $0x198] sm:$0xff] }
 0x2ec   :  { %v14096_v55 = vpop.f32.mrb[250].mxu0 }
 0x2ed   :  { %15871 = vst [vmem:[#allocation74_spill] sm:$0xff] %v14096_v55  ;;  %v14098_v62 = vpop.permute.xlu1 %5428  ;;  %v5081_v25 = vpop.f32.mrb[251].mxu0 }
 0x2ee   :  { %15872 = vst [vmem:[#allocation67_spill] sm:$0xff] %v14098_v62  ;;  %v14100_v60 = vpop.permute.xlu0 %5423  ;;  %5878 = vperm.xlu1 %9940, %v5611_v51   ;;  %v5615_v25 = vld [vmem:[%s15613_s3 + $0x1b0] sm:$0xff] }
 0x2ef   :  { %15873 = vst [vmem:[#allocation14_spill] sm:$0xff] %v14100_v60  ;;  %5873 = vperm.xlu0 %9939, %v5610_v28   ;;  %v5614_v28 = vld [vmem:[%s15613_s3 + $0x1a8] sm:$0xff] }
 0x2f1   :  { %v14108_v8 = vpop.permute.xlu1 %5438 }
 0x2f2   :  { %15874 = vst [vmem:[#allocation9_spill] sm:$0xff] %v14108_v8  ;;  %v14110_v3 = vpop.permute.xlu0 %5433  ;;  %5888 = vperm.xlu1 %9940, %v5613_v50   ;;  %v14112_v55 = vpop.f32.mrb[252].mxu0  ;;  %v5617_v50 = vld [vmem:[%s15613_s3 + $0x1c0] sm:$0xff] }
 0x2f3   :  { %15875 = vst [vmem:[#allocation69_spill] sm:$0xff] %v14110_v3  ;;  %15876 = vst [vmem:[#allocation11_spill] sm:$0xff] %v14112_v55  ;;  %5883 = vperm.xlu0 %9939, %v5612_v40   ;;  %v5086_v51 = vpop.f32.mrb[253].mxu0  ;;  %v5616_v40 = vld [vmem:[%s15613_s3 + $0x1b8] sm:$0xff] }
 0x2f4   :  { %v14120_v62 = vpop.f32.mrb[254].mxu0 }
 0x2f5   :  { %15877 = vst [vmem:[#allocation76_spill] sm:$0xff] %v14120_v62  ;;  %v14122_v60 = vpop.permute.xlu1 %5448  ;;  %v5089_v8 = vpop.f32.mrb[255].mxu0 }
 0x2f6   :  { %15878 = vst [vmem:[#allocation71_spill] sm:$0xff] %v14122_v60  ;;  %v14124_v5 = vpop.permute.xlu0 %5443  ;;  %5898 = vperm.xlu1 %9940, %v5615_v25   ;;  %v5619_v8 = vld [vmem:[%s15613_s3 + $0x1d0] sm:$0xff] }
 0x2f7   :  { %15879 = vst [vmem:[#allocation16_spill] sm:$0xff] %v14124_v5  ;;  %5893 = vperm.xlu0 %9939, %v5614_v28   ;;  %v5618_v28 = vld [vmem:[%s15613_s3 + $0x1c8] sm:$0xff] }
 0x2f9   :  { %v14132_v51 = vpop.permute.xlu1 %5458 }
 0x2fa   :  { %15880 = vst [vmem:[#allocation13_spill] sm:$0xff] %v14132_v51  ;;  %v14134_v55 = vpop.permute.xlu0 %5453  ;;  %5908 = vperm.xlu1 %9940, %v5617_v50   ;;  %v14136_v62 = vpop.f32.mrb[0].mxu0  ;;  %v5621_v50 = vld [vmem:[%s15613_s3 + $0x1e0] sm:$0xff] }
 0x2fb   :  { %15881 = vst [vmem:[#allocation73_spill] sm:$0xff] %v14134_v55  ;;  %15882 = vst [vmem:[#allocation15_spill] sm:$0xff] %v14136_v62  ;;  %5903 = vperm.xlu0 %9939, %v5616_v40   ;;  %v5094_v25 = vpop.f32.mrb[1].mxu0  ;;  %v5620_v40 = vld [vmem:[%s15613_s3 + $0x1d8] sm:$0xff] }
 0x2fc   :  { %v14144_v60 = vpop.f32.mrb[2].mxu0 }
 0x2fd   :  { %15883 = vst [vmem:[#allocation75_spill] sm:$0xff] %v14144_v60  ;;  %v14146_v5 = vpop.permute.xlu1 %5468  ;;  %v5097_v51 = vpop.f32.mrb[3].mxu0 }
 0x2fe   :  { %15884 = vst [vmem:[#allocation17_spill] sm:$0xff] %v14146_v5  ;;  %v14148_v3 = vpop.permute.xlu0 %5463  ;;  %5918 = vperm.xlu1 %9940, %v5619_v8   ;;  %v5623_v51 = vld [vmem:[%s15613_s3 + $0x1f0] sm:$0xff] }
 0x2ff   :  { %15885 = vst [vmem:[#allocation77_spill] sm:$0xff] %v14148_v3  ;;  %5913 = vperm.xlu0 %9939, %v5618_v28   ;;  %v5622_v28 = vld [vmem:[%s15613_s3 + $0x1e8] sm:$0xff] }
 0x301   :  { %v14156_v25 = vpop.permute.xlu1 %5478 }
 0x302   :  { %15886 = vst [vmem:[#allocation19_spill] sm:$0xff] %v14156_v25  ;;  %v14158_v62 = vpop.permute.xlu0 %5473  ;;  %5928 = vperm.xlu1 %9940, %v5621_v50   ;;  %v14160_v60 = vpop.f32.mrb[4].mxu0  ;;  %v5625_v50 = vld [vmem:[%s15613_s3 + $0x200] sm:$0xf] }
 0x303   :  { %15887 = vst [vmem:[#allocation79_spill] sm:$0xff] %v14158_v62  ;;  %15888 = vst [vmem:[#allocation18_spill] sm:$0xff] %v14160_v60  ;;  %5923 = vperm.xlu0 %9939, %v5620_v40   ;;  %v5102_v8 = vpop.f32.mrb[5].mxu0  ;;  %v5496_v40 = vmul.f32 %v13747_v0, %v12960_v14  ;;  %v5498_v14 = vmul.f32 %v13773_v18, %v12991_v49  ;;  %v7239_v49 = vld [vmem:[%s15610_s2 + $0x18] sm:$0xff]  ;;  %v5500_v18 = vmul.f32 %v13789_v10, %v13026_v48 }
 0x304   :  { %v5103_v5 = vpop.f32.mrb[6].mxu0  ;;  %v5624_v8 = vld [vmem:[%s15613_s3 + $0x1f8] sm:$0xff] }
 0x305   :  { %v14168_v3 = vpop.permute.xlu1 %5488  ;;  %v5104_v55 = vpop.f32.mrb[7].mxu0 }
 0x306   :  { %15889 = vst [vmem:[#allocation78_spill] sm:$0xff] %v14168_v3  ;;  %v14170_v25 = vpop.permute.xlu0 %5483  ;;  %5938 = vperm.xlu1 %9940, %v5623_v51   ;;  %v14180_v5 = vpop.f32.mrb[132].mxu1 }
 0x307   :  { %15890 = vst [vmem:[#allocation20_spill] sm:$0xff] %v14170_v25  ;;  %5933 = vperm.xlu0 %9939, %v5622_v28   ;;  %15891 = vst [vmem:[#allocation21_spill] sm:$0xff] %v14180_v5  ;;  %v6976_v51 = vpop.f32.mrb[133].mxu1  ;;  %v7237_v28 = vld [vmem:[%s15610_s2 + $0x8] sm:$0xff]  ;;  %v7236_v5 = vld [vmem:[%s15610_s2] sm:$0xff] }
 0x308   :  { %v14187_v25 = vpop.f32.mrb[134].mxu1 }
 0x309   :  { %v5629_v60 = vpop.permute.xlu1 %5628 }
 0x30a   :  { %v5951_v3 = vadd.f32 %v5629_v60, %v5496_v40  ;;  %v14182_v55 = vpop.permute.xlu0 %5493  ;;  %5948 = vperm.xlu1 %9940, %v5625_v50   ;;  %v6979_v60 = vpop.f32.mrb[135].mxu1  ;;  %v15893_v40 = vld [vmem:[#allocation22_spill] sm:$0xff] }
 0x30b   :  { %15892 = vst [vmem:[#allocation80_spill] sm:$0xff] %v14182_v55  ;;  %5943 = vperm.xlu0 %9939, %v5624_v8   ;;  %v5497_v50 = vmul.f32 %v13745_v36, %v15893_v40 }
 0x30c   :  { %v6016_v0 = vmax.f32 %v5951_v3, 0.0  ;;  %v7238_v3 = vld [vmem:[%s15610_s2 + $0x10] sm:$0xff] }
 0x30d   :  { %v5639_v51 = vpop.permute.xlu1 %5638 }
 0x30e   :  { %v9808_v8 = vpack.c.bf16 %v6016_v0, %v6016_v0  ;;  %v5953_v55 = vadd.f32 %v5639_v51, %v5498_v14  ;;  %v5634_v62 = vpop.permute.xlu0 %5633  ;;  %7308 = vperm.xlu1 %9940, %v7237_v28   ;;  %v14208_v28 = vpop.f32.mrb[136].mxu1  ;;  %v7241_v51 = vld [vmem:[%s15610_s2 + $0x28] sm:$0xff] }
 0x30f   :  { %v5952_v20 = vadd.f32 %v5634_v62, %v5497_v50  ;;  %7303 = vperm.xlu0 %9939, %v7236_v5   ;;  %v5499_v62 = vmul.f32 %v13771_v13, %v13012_v57  ;;  %v6984_v0 = vpop.f32.mrb[137].mxu1  ;;  %v5502_v57 = vmul.f32 %v13804_v24, %v13074_v56  ;;  %v7240_v13 = vld [vmem:[%s15610_s2 + $0x20] sm:$0xff] }
 0x310   :  { %9292 = vst.msk [vmem:[%s15614_s4 + $0x208] sm:$0xf] %vm2081_vm1, %v9808_v8  ;;  %v6018_v36 = vmax.f32 %v5953_v55, 0.0  ;;  %v14212_v40 = vpop.f32.mrb[138].mxu1 }
 0x311   :  { %v6017_v5 = vmax.f32 %v5952_v20, 0.0  ;;  %v5649_v14 = vpop.permute.xlu1 %5648  ;;  %v6987_v8 = vpop.f32.mrb[139].mxu1 }
 0x312   :  { %v9810_v60 = vpack.c.bf16 %v6018_v36, %v6018_v36  ;;  %v5955_v48 = vadd.f32 %v5649_v14, %v5500_v18  ;;  %v5644_v10 = vpop.permute.xlu0 %5643  ;;  %7318 = vperm.xlu1 %9940, %v7239_v49   ;;  %v14226_v49 = vpop.f32.mrb[140].mxu1  ;;  %v5501_v18 = vmul.f32 %v13784_v6, %v13047_v4  ;;  %v7243_v4 = vld [vmem:[%s15610_s2 + $0x38] sm:$0xff] }
 0x313   :  { %v9809_v50 = vpack.c.bf16 %v6017_v5, %v6017_v5  ;;  %v5954_v55 = vadd.f32 %v5644_v10, %v5499_v62  ;;  %7313 = vperm.xlu0 %9939, %v7238_v3   ;;  %v6992_v36 = vpop.f32.mrb[141].mxu1 }
 0x314   :  { %9294 = vst.msk [vmem:[%s15614_s4 + $0x210] sm:$0xf] %vm2081_vm1, %v9810_v60  ;;  %v6020_v20 = vmax.f32 %v5955_v48, 0.0  ;;  %v14234_v14 = vpop.f32.mrb[142].mxu1  ;;  %v5504_v48 = vmul.f32 %v13820_v1, %v13133_v41  ;;  %v5506_v36 = vmul.f32 %v13835_v44, %v13186_v11 }
 0x315   :  { %9293 = vst.msk [vmem:[%s15614_s4 + $0x20c] sm:$0xf] %vm2081_vm1, %v9809_v50  ;;  %v6019_v56 = vmax.f32 %v5954_v55, 0.0  ;;  %v5659_v24 = vpop.permute.xlu1 %5658  ;;  %v6995_v6 = vpop.f32.mrb[143].mxu1  ;;  %v7242_v50 = vld [vmem:[%s15610_s2 + $0x30] sm:$0xff] }
 0x316   :  { %v9812_v3 = vpack.c.bf16 %v6020_v20, %v6020_v20  ;;  %v5957_v62 = vadd.f32 %v5659_v24, %v5502_v57  ;;  %v5654_v5 = vpop.permute.xlu0 %5653  ;;  %7328 = vperm.xlu1 %9940, %v7241_v51   ;;  %v14248_v55 = vpop.f32.mrb[144].mxu1  ;;  %v5503_v51 = vmul.f32 %v13802_v15, %v13101_v34  ;;  %v7245_v34 = vld [vmem:[%s15610_s2 + $0x48] sm:$0xff] }
 0x317   :  { %v9811_v0 = vpack.c.bf16 %v6019_v56, %v6019_v56  ;;  %v5956_v60 = vadd.f32 %v5654_v5, %v5501_v18  ;;  %7323 = vperm.xlu0 %9939, %v7240_v13   ;;  %v7000_v8 = vpop.f32.mrb[145].mxu1 }
 0x318   :  { %9296 = vst.msk [vmem:[%s15614_s4 + $0x218] sm:$0xf] %vm2081_vm1, %v9812_v3  ;;  %v6022_v10 = vmax.f32 %v5957_v62, 0.0  ;;  %v14256_v18 = vpop.f32.mrb[146].mxu1  ;;  %v7244_v62 = vld [vmem:[%s15610_s2 + $0x40] sm:$0xff]  ;;  %v7246_v8 = vld [vmem:[%s15610_s2 + $0x50] sm:$0xff] }
 0x319   :  { %9295 = vst.msk [vmem:[%s15614_s4 + $0x214] sm:$0xf] %vm2081_vm1, %v9811_v0  ;;  %v6021_v41 = vmax.f32 %v5956_v60, 0.0  ;;  %v5669_v1 = vpop.permute.xlu1 %5668  ;;  %v7003_v15 = vpop.f32.mrb[147].mxu1  ;;  %v5505_v0 = vmul.f32 %v13815_v45, %v13159_v38  ;;  %v7247_v38 = vld [vmem:[%s15610_s2 + $0x58] sm:$0xff] }
 0x31a   :  { %v9814_v57 = vpack.c.bf16 %v6022_v10, %v6022_v10  ;;  %v5959_v20 = vadd.f32 %v5669_v1, %v5504_v48  ;;  %v5664_v13 = vpop.permute.xlu0 %5663  ;;  %7338 = vperm.xlu1 %9940, %v7243_v4   ;;  %v14270_v5 = vpop.f32.mrb[148].mxu1 }
 0x31b   :  { %v9813_v56 = vpack.c.bf16 %v6021_v41, %v6021_v41  ;;  %v5958_v24 = vadd.f32 %v5664_v13, %v5503_v51  ;;  %7333 = vperm.xlu0 %9939, %v7242_v50   ;;  %v7008_v60 = vpop.f32.mrb[149].mxu1  ;;  %v5508_v41 = vmul.f32 %v13851_v7, %v13235_v59 }
 0x31c   :  { %9298 = vst.msk [vmem:[%s15614_s4 + $0x220] sm:$0xf] %vm2081_vm1, %v9814_v57  ;;  %v6024_v3 = vmax.f32 %v5959_v20, 0.0  ;;  %v14278_v10 = vpop.f32.mrb[150].mxu1  ;;  %v5507_v20 = vmul.f32 %v13833_v22, %v13209_v61  ;;  %v7249_v61 = vld [vmem:[%s15610_s2 + $0x68] sm:$0xff]  ;;  %v5509_v60 = vmul.f32 %v13846_v63, %v13256_v30  ;;  %v7251_v30 = vld [vmem:[%s15610_s2 + $0x78] sm:$0xff] }
 0x31d   :  { %9297 = vst.msk [vmem:[%s15614_s4 + $0x21c] sm:$0xf] %vm2081_vm1, %v9813_v56  ;;  %v6023_v11 = vmax.f32 %v5958_v24, 0.0  ;;  %v5679_v44 = vpop.permute.xlu1 %5678  ;;  %v7011_v45 = vpop.f32.mrb[151].mxu1 }
 0x31e   :  { %v9816_v4 = vpack.c.bf16 %v6024_v3, %v6024_v3  ;;  %v5961_v6 = vadd.f32 %v5679_v44, %v5506_v36  ;;  %v5674_v48 = vpop.permute.xlu0 %5673  ;;  %7348 = vperm.xlu1 %9940, %v7245_v34   ;;  %v14292_v57 = vpop.f32.mrb[152].mxu1 }
 0x31f   :  { %v9815_v50 = vpack.c.bf16 %v6023_v11, %v6023_v11  ;;  %v5960_v51 = vadd.f32 %v5674_v48, %v5505_v0  ;;  %7343 = vperm.xlu0 %9939, %v7244_v62   ;;  %v7016_v13 = vpop.f32.mrb[153].mxu1  ;;  %v5510_v62 = vmul.f32 %v13866_v35, %v13282_v27  ;;  %v7248_v11 = vld [vmem:[%s15610_s2 + $0x60] sm:$0xff] }
 0x320   :  { %9300 = vst.msk [vmem:[%s15614_s4 + $0x228] sm:$0xf] %vm2081_vm1, %v9816_v4  ;;  %v6026_v1 = vmax.f32 %v5961_v6, 0.0  ;;  %v14300_v15 = vpop.f32.mrb[154].mxu1 }
 0x321   :  { %9299 = vst.msk [vmem:[%s15614_s4 + $0x224] sm:$0xf] %vm2081_vm1, %v9815_v50  ;;  %v6025_v59 = vmax.f32 %v5960_v51, 0.0  ;;  %v5689_v7 = vpop.permute.xlu1 %5688  ;;  %15894 = vst [vmem:[#allocation22_spill] sm:$0xff] %v14300_v15  ;;  %v7019_v22 = vpop.f32.mrb[155].mxu1 }
 0x322   :  { %v9818_v56 = vpack.c.bf16 %v6026_v1, %v6026_v1  ;;  %v5963_v24 = vadd.f32 %v5689_v7, %v5508_v41  ;;  %v5684_v34 = vpop.permute.xlu0 %5683  ;;  %7358 = vperm.xlu1 %9940, %v7247_v38   ;;  %v14314_v44 = vpop.f32.mrb[156].mxu1  ;;  %v5512_v41 = vmul.f32 %v13882_v26, %v13329_v23 }
 0x323   :  { %v9817_v36 = vpack.c.bf16 %v6025_v59, %v6025_v59  ;;  %v5962_v3 = vadd.f32 %v5684_v34, %v5507_v20  ;;  %7353 = vperm.xlu0 %9939, %v7246_v8   ;;  %15895 = vst [vmem:[#allocation81_spill] sm:$0xff] %v14314_v44  ;;  %v7024_v4 = vpop.f32.mrb[157].mxu1  ;;  %v7250_v8 = vld [vmem:[%s15610_s2 + $0x70] sm:$0xff]  ;;  %v5511_v59 = vmul.f32 %v13864_v46, %v13303_v52  ;;  %v7253_v52 = vld [vmem:[%s15610_s2 + $0x88] sm:$0xff] }
 0x324   :  { %9302 = vst.msk [vmem:[%s15614_s4 + $0x230] sm:$0xf] %vm2081_vm1, %v9818_v56  ;;  %v6028_v0 = vmax.f32 %v5963_v24, 0.0  ;;  %v14322_v51 = vpop.f32.mrb[158].mxu1 }
 0x325   :  { %9301 = vst.msk [vmem:[%s15614_s4 + $0x22c] sm:$0xf] %vm2081_vm1, %v9817_v36  ;;  %v6027_v27 = vmax.f32 %v5962_v3, 0.0  ;;  %v5699_v35 = vpop.permute.xlu1 %5698  ;;  %15896 = vst [vmem:[#allocation82_spill] sm:$0xff] %v14322_v51  ;;  %v7027_v63 = vpop.f32.mrb[159].mxu1 }
 0x326   :  { %v9820_v6 = vpack.c.bf16 %v6028_v0, %v6028_v0  ;;  %v5965_v48 = vadd.f32 %v5699_v35, %v5510_v62  ;;  %v5694_v50 = vpop.permute.xlu0 %5693  ;;  %7368 = vperm.xlu1 %9940, %v7249_v61   ;;  %v14336_v20 = vpop.f32.mrb[160].mxu1  ;;  %v5514_v61 = vmul.f32 %v13897_v39, %v13376_v42  ;;  %v7252_v62 = vld [vmem:[%s15610_s2 + $0x80] sm:$0xff] }
 0x327   :  { %v9819_v38 = vpack.c.bf16 %v6027_v27, %v6027_v27  ;;  %v5964_v45 = vadd.f32 %v5694_v50, %v5509_v60  ;;  %7363 = vperm.xlu0 %9939, %v7248_v11   ;;  %15897 = vst [vmem:[#allocation83_spill] sm:$0xff] %v14336_v20  ;;  %v7032_v7 = vpop.f32.mrb[161].mxu1  ;;  %v5513_v11 = vmul.f32 %v13877_v19, %v13350_v47  ;;  %v7255_v47 = vld [vmem:[%s15610_s2 + $0x98] sm:$0xff]  ;;  %v7705_v20 = vld [vmem:[%s15613_s3 + $0x70] sm:$0xff] }
 0x328   :  { %9304 = vst.msk [vmem:[%s15614_s4 + $0x238] sm:$0xf] %vm2081_vm1, %v9820_v6  ;;  %v6030_v1 = vmax.f32 %v5965_v48, 0.0  ;;  %v14344_v34 = vpop.f32.mrb[162].mxu1 }
 0x329   :  { %9303 = vst.msk [vmem:[%s15614_s4 + $0x234] sm:$0xf] %vm2081_vm1, %v9819_v38  ;;  %v6029_v23 = vmax.f32 %v5964_v45, 0.0  ;;  %v5709_v26 = vpop.permute.xlu1 %5708  ;;  %15898 = vst [vmem:[#allocation84_spill] sm:$0xff] %v14344_v34  ;;  %v7035_v46 = vpop.f32.mrb[163].mxu1  ;;  %v5516_v38 = vmul.f32 %v13913_v53, %v13423_v16  ;;  %v15989_v34 = vld [vmem:[#allocation80_spill] sm:$0xff] }
 0x32a   :  { %v9822_v13 = vpack.c.bf16 %v6030_v1, %v6030_v1  ;;  %v5967_v56 = vadd.f32 %v5709_v26, %v5512_v41  ;;  %v5704_v24 = vpop.permute.xlu0 %5703  ;;  %7378 = vperm.xlu1 %9940, %v7251_v30   ;;  %v14358_v0 = vpop.f32.mrb[164].mxu1  ;;  %v7254_v30 = vld [vmem:[%s15610_s2 + $0x90] sm:$0xff]  ;;  %v5515_v41 = vmul.f32 %v13895_v43, %v13397_v54  ;;  %v7257_v54 = vld [vmem:[%s15610_s2 + $0xa8] sm:$0xff] }
 0x32b   :  { %v9821_v36 = vpack.c.bf16 %v6029_v23, %v6029_v23  ;;  %v5966_v3 = vadd.f32 %v5704_v24, %v5511_v59  ;;  %7373 = vperm.xlu0 %9939, %v7250_v8   ;;  %15899 = vst [vmem:[#allocation85_spill] sm:$0xff] %v14358_v0  ;;  %v7040_v60 = vpop.f32.mrb[165].mxu1  ;;  %v7703_v0 = vld [vmem:[%s15613_s3 + $0x60] sm:$0xff] }
 0x32c   :  { %9306 = vst.msk [vmem:[%s15614_s4 + $0x240] sm:$0xf] %vm2081_vm1, %v9822_v13  ;;  %v6032_v22 = vmax.f32 %v5967_v56, 0.0  ;;  %v14366_v6 = vpop.f32.mrb[166].mxu1  ;;  %v5518_v56 = vmul.f32 %v13928_v17, %v13470_v21  ;;  %v5520_v60 = vmul.f32 %v13941_v29, %v13517_v12 }
 0x32d   :  { %9305 = vst.msk [vmem:[%s15614_s4 + $0x23c] sm:$0xf] %vm2081_vm1, %v9821_v36  ;;  %v6031_v42 = vmax.f32 %v5966_v3, 0.0  ;;  %v5719_v39 = vpop.permute.xlu1 %5718  ;;  %15900 = vst [vmem:[#allocation86_spill] sm:$0xff] %v14366_v6  ;;  %v7043_v19 = vpop.f32.mrb[167].mxu1  ;;  %v7256_v36 = vld [vmem:[%s15610_s2 + $0xa0] sm:$0xff] }
 0x32e   :  { %v9824_v27 = vpack.c.bf16 %v6032_v22, %v6032_v22  ;;  %v5969_v35 = vadd.f32 %v5719_v39, %v5514_v61  ;;  %v5714_v4 = vpop.permute.xlu0 %5713  ;;  %7388 = vperm.xlu1 %9940, %v7253_v52   ;;  %v14380_v63 = vpop.f32.mrb[168].mxu1  ;;  %v5517_v52 = vmul.f32 %v13908_v31, %v13444_v58  ;;  %v7259_v58 = vld [vmem:[%s15610_s2 + $0xb8] sm:$0xff]  ;;  %v15985_v6 = vld [vmem:[#allocation20_spill] sm:$0xff] }
 0x32f   :  { %v9823_v48 = vpack.c.bf16 %v6031_v42, %v6031_v42  ;;  %v5968_v50 = vadd.f32 %v5714_v4, %v5513_v11  ;;  %7383 = vperm.xlu0 %9939, %v7252_v62   ;;  %15901 = vst [vmem:[#allocation87_spill] sm:$0xff] %v14380_v63  ;;  %v7048_v1 = vpop.f32.mrb[169].mxu1  ;;  %v15988_v63 = vld [vmem:[#allocation18_spill] sm:$0xff] }
 0x330   :  { %9308 = vst.msk [vmem:[%s15614_s4 + $0x248] sm:$0xf] %vm2081_vm1, %v9824_v27  ;;  %v6034_v45 = vmax.f32 %v5969_v35, 0.0  ;;  %v14388_v26 = vpop.f32.mrb[170].mxu1  ;;  %v7258_v35 = vld [vmem:[%s15610_s2 + $0xb0] sm:$0xff]  ;;  %v7260_v1 = vld [vmem:[%s15610_s2 + $0xc0] sm:$0xff] }
 0x331   :  { %9307 = vst.msk [vmem:[%s15614_s4 + $0x244] sm:$0xf] %vm2081_vm1, %v9823_v48  ;;  %v6033_v16 = vmax.f32 %v5968_v50, 0.0  ;;  %v5729_v53 = vpop.permute.xlu1 %5728  ;;  %15902 = vst [vmem:[#allocation88_spill] sm:$0xff] %v14388_v26  ;;  %v7051_v43 = vpop.f32.mrb[171].mxu1  ;;  %v5519_v48 = vmul.f32 %v13926_v37, %v13491_v9  ;;  %v7261_v9 = vld [vmem:[%s15610_s2 + $0xc8] sm:$0xff] }
 0x332   :  { %v9826_v8 = vpack.c.bf16 %v6034_v45, %v6034_v45  ;;  %v5971_v59 = vadd.f32 %v5729_v53, %v5516_v38  ;;  %v5724_v23 = vpop.permute.xlu0 %5723  ;;  %7398 = vperm.xlu1 %9940, %v7255_v47   ;;  %v14402_v3 = vpop.f32.mrb[172].mxu1  ;;  %v15981_v26 = vld [vmem:[#allocation79_spill] sm:$0xff] }
 0x333   :  { %v9825_v7 = vpack.c.bf16 %v6033_v16, %v6033_v16  ;;  %v5970_v13 = vadd.f32 %v5724_v23, %v5515_v41  ;;  %7393 = vperm.xlu0 %9939, %v7254_v30   ;;  %15903 = vst [vmem:[#allocation89_spill] sm:$0xff] %v14402_v3  ;;  %v7056_v46 = vpop.f32.mrb[173].mxu1  ;;  %v5522_v16 = vmul.f32 %v13956_v2, %v13564_v33  ;;  %v15984_v3 = vld [vmem:[#allocation15_spill] sm:$0xff] }
 0x334   :  { %9310 = vst.msk [vmem:[%s15614_s4 + $0x250] sm:$0xf] %vm2081_vm1, %v9826_v8  ;;  %v6036_v24 = vmax.f32 %v5971_v59, 0.0  ;;  %v14410_v11 = vpop.f32.mrb[174].mxu1  ;;  %v15908_v59 = vld [vmem:[#allocation42_spill] sm:$0xff] }
 0x335   :  { %9309 = vst.msk [vmem:[%s15614_s4 + $0x24c] sm:$0xf] %vm2081_vm1, %v9825_v7  ;;  %v6035_v21 = vmax.f32 %v5970_v13, 0.0  ;;  %v5739_v17 = vpop.permute.xlu1 %5738  ;;  %15904 = vst [vmem:[#allocation90_spill] sm:$0xff] %v14410_v11  ;;  %v7059_v31 = vpop.f32.mrb[175].mxu1  ;;  %v5521_v23 = vmul.f32 %v15908_v59, %v13538_v32  ;;  %v7263_v32 = vld [vmem:[%s15610_s2 + $0xd8] sm:$0xff] }
 0x336   :  { %v9828_v61 = vpack.c.bf16 %v6036_v24, %v6036_v24  ;;  %v5973_v22 = vadd.f32 %v5739_v17, %v5518_v56  ;;  %v5734_v62 = vpop.permute.xlu0 %5733  ;;  %7408 = vperm.xlu1 %9940, %v7257_v54   ;;  %v14424_v4 = vpop.f32.mrb[176].mxu1  ;;  %v15911_v17 = vld [vmem:[#allocation45_spill] sm:$0xff]  ;;  %v15920_v59 = vld [vmem:[#allocation44_spill] sm:$0xff] }
 0x337   :  { %v9827_v42 = vpack.c.bf16 %v6035_v21, %v6035_v21  ;;  %v5972_v39 = vadd.f32 %v5734_v62, %v5517_v52  ;;  %7403 = vperm.xlu0 %9939, %v7256_v36   ;;  %15905 = vst [vmem:[#allocation91_spill] sm:$0xff] %v14424_v4  ;;  %v7064_v50 = vpop.f32.mrb[177].mxu1  ;;  %v15910_v21 = vld [vmem:[#allocation24_spill] sm:$0xff]  ;;  %v15977_v11 = vld [vmem:[#allocation77_spill] sm:$0xff]  ;;  %v15980_v4 = vld [vmem:[#allocation11_spill] sm:$0xff] }
 0x338   :  { %9312 = vst.msk [vmem:[%s15614_s4 + $0x258] sm:$0xf] %vm2081_vm1, %v9828_v61  ;;  %v6038_v27 = vmax.f32 %v5973_v22, 0.0  ;;  %v14432_v45 = vpop.f32.mrb[178].mxu1  ;;  %v5524_v46 = vmul.f32 %v15911_v17, %v15910_v21  ;;  %v7262_v22 = vld [vmem:[%s15610_s2 + $0xd0] sm:$0xff] }
 0x339   :  { %9311 = vst.msk [vmem:[%s15614_s4 + $0x254] sm:$0xf] %vm2081_vm1, %v9827_v42  ;;  %v6037_v12 = vmax.f32 %v5972_v39, 0.0  ;;  %v5749_v29 = vpop.permute.xlu1 %5748  ;;  %15906 = vst [vmem:[#allocation92_spill] sm:$0xff] %v14432_v45  ;;  %v7067_v37 = vpop.f32.mrb[179].mxu1  ;;  %v15913_v42 = vld [vmem:[#allocation23_spill] sm:$0xff] }
 0x33a   :  { %v9830_v47 = vpack.c.bf16 %v6038_v27, %v6038_v27  ;;  %v5975_v19 = vadd.f32 %v5749_v29, %v5520_v60  ;;  %v5744_v38 = vpop.permute.xlu0 %5743  ;;  %7418 = vperm.xlu1 %9940, %v7259_v58   ;;  %v14446_v8 = vpop.f32.mrb[180].mxu1  ;;  %v15914_v39 = vld [vmem:[#allocation2_spill] sm:$0xff]  ;;  %v15922_v17 = vld [vmem:[#allocation28_spill] sm:$0xff]  ;;  %v15973_v45 = vld [vmem:[#allocation73_spill] sm:$0xff] }
 0x33b   :  { %v9829_v30 = vpack.c.bf16 %v6037_v12, %v6037_v12  ;;  %v5974_v41 = vadd.f32 %v5744_v38, %v5519_v48  ;;  %7413 = vperm.xlu0 %9939, %v7258_v35   ;;  %15907 = vst [vmem:[#allocation93_spill] sm:$0xff] %v14446_v8  ;;  %v7072_v7 = vpop.f32.mrb[181].mxu1  ;;  %v5523_v58 = vmul.f32 %v15914_v39, %v15913_v42  ;;  %v7266_v42 = vld [vmem:[%s15610_s2 + $0xf0] sm:$0xff]  ;;  %v15976_v8 = vld [vmem:[#allocation7_spill] sm:$0xff] }
 0x33c   :  { %9314 = vst.msk [vmem:[%s15614_s4 + $0x260] sm:$0xf] %vm2081_vm1, %v9830_v47  ;;  %v6040_v53 = vmax.f32 %v5975_v19, 0.0  ;;  %v14454_v56 = vpop.f32.mrb[182].mxu1  ;;  %v7265_v19 = vld [vmem:[%s15610_s2 + $0xe8] sm:$0xff] }
 0x33d   :  { %9313 = vst.msk [vmem:[%s15614_s4 + $0x25c] sm:$0xf] %vm2081_vm1, %v9829_v30  ;;  %v6039_v33 = vmax.f32 %v5974_v41, 0.0  ;;  %v5759_v2 = vpop.permute.xlu1 %5758  ;;  %15909 = vst [vmem:[#allocation42_spill] sm:$0xff] %v14454_v56  ;;  %v7075_v52 = vpop.f32.mrb[183].mxu1  ;;  %v15916_v30 = vld [vmem:[#allocation26_spill] sm:$0xff] }
 0x33e   :  { %v9832_v13 = vpack.c.bf16 %v6040_v53, %v6040_v53  ;;  %v5977_v54 = vadd.f32 %v5759_v2, %v5522_v16  ;;  %v5754_v43 = vpop.permute.xlu0 %5753  ;;  %7428 = vperm.xlu1 %9940, %v7261_v9   ;;  %v14468_v62 = vpop.f32.mrb[184].mxu1  ;;  %v15917_v41 = vld [vmem:[#allocation4_spill] sm:$0xff]  ;;  %v7264_v16 = vld [vmem:[%s15610_s2 + $0xe0] sm:$0xff]  ;;  %v7267_v52 = vld [vmem:[%s15610_s2 + $0xf8] sm:$0xff] }
 0x33f   :  { %v9831_v24 = vpack.c.bf16 %v6039_v33, %v6039_v33  ;;  %v5976_v36 = vadd.f32 %v5754_v43, %v5521_v23  ;;  %7423 = vperm.xlu0 %9939, %v7260_v1   ;;  %15912 = vst [vmem:[#allocation24_spill] sm:$0xff] %v14468_v62  ;;  %v7080_v27 = vpop.f32.mrb[185].mxu1  ;;  %v5526_v9 = vmul.f32 %v15917_v41, %v15916_v30  ;;  %v15919_v1 = vld [vmem:[#allocation25_spill] sm:$0xff]  ;;  %v7269_v41 = vld [vmem:[%s15610_s2 + $0x108] sm:$0xff]  ;;  %v15969_v56 = vld [vmem:[#allocation16_spill] sm:$0xff] }
 0x340   :  { %9316 = vst.msk [vmem:[%s15614_s4 + $0x268] sm:$0xf] %vm2081_vm1, %v9832_v13  ;;  %v6042_v61 = vmax.f32 %v5977_v54, 0.0  ;;  %v14476_v29 = vpop.f32.mrb[186].mxu1  ;;  %v5525_v23 = vmul.f32 %v15920_v59, %v15919_v1  ;;  %v15972_v62 = vld [vmem:[#allocation3_spill] sm:$0xff] }
 0x341   :  { %9315 = vst.msk [vmem:[%s15614_s4 + $0x264] sm:$0xf] %vm2081_vm1, %v9831_v24  ;;  %v6041_v31 = vmax.f32 %v5976_v36, 0.0  ;;  %v5769_v60 = vpop.permute.xlu1 %5768  ;;  %15915 = vst [vmem:[#allocation45_spill] sm:$0xff] %v14476_v29  ;;  %v7083_v38 = vpop.f32.mrb[187].mxu1  ;;  %v15965_v29 = vld [vmem:[#allocation69_spill] sm:$0xff] }
 0x342   :  { %v9834_v35 = vpack.c.bf16 %v6042_v61, %v6042_v61  ;;  %v5979_v48 = vadd.f32 %v5769_v60, %v5524_v46  ;;  %v5764_v12 = vpop.permute.xlu0 %5763  ;;  %7438 = vperm.xlu1 %9940, %v7263_v32   ;;  %v14490_v53 = vpop.f32.mrb[188].mxu1  ;;  %v15923_v46 = vld [vmem:[#allocation49_spill] sm:$0xff] }
 0x343   :  { %v9833_v50 = vpack.c.bf16 %v6041_v31, %v6041_v31  ;;  %v5978_v47 = vadd.f32 %v5764_v12, %v5523_v58  ;;  %7433 = vperm.xlu0 %9939, %v7262_v22   ;;  %15918 = vst [vmem:[#allocation23_spill] sm:$0xff] %v14490_v53  ;;  %v7088_v7 = vpop.f32.mrb[189].mxu1  ;;  %v5528_v61 = vmul.f32 %v15923_v46, %v15922_v17  ;;  %v15925_v58 = vld [vmem:[#allocation27_spill] sm:$0xff]  ;;  %v15968_v53 = vld [vmem:[#allocation58_spill] sm:$0xff] }
 0x344   :  { %9318 = vst.msk [vmem:[%s15614_s4 + $0x270] sm:$0xf] %vm2081_vm1, %v9834_v35  ;;  %v6044_v37 = vmax.f32 %v5979_v48, 0.0  ;;  %v14498_v24 = vpop.f32.mrb[190].mxu1  ;;  %v15926_v31 = vld [vmem:[#allocation47_spill] sm:$0xff]  ;;  %v15931_v7 = vld [vmem:[#allocation48_spill] sm:$0xff] }
 0x345   :  { %9317 = vst.msk [vmem:[%s15614_s4 + $0x26c] sm:$0xf] %vm2081_vm1, %v9833_v50  ;;  %v6043_v33 = vmax.f32 %v5978_v47, 0.0  ;;  %v5779_v2 = vpop.permute.xlu1 %5778  ;;  %15921 = vst [vmem:[#allocation2_spill] sm:$0xff] %v14498_v24  ;;  %v7091_v21 = vpop.f32.mrb[191].mxu1  ;;  %v5527_v60 = vmul.f32 %v15926_v31, %v15925_v58  ;;  %v15932_v58 = vld [vmem:[#allocation32_spill] sm:$0xff] }
 0x346   :  { %v9836_v13 = vpack.c.bf16 %v6044_v37, %v6044_v37  ;;  %v5981_v54 = vadd.f32 %v5779_v2, %v5526_v9  ;;  %v5774_v43 = vpop.permute.xlu0 %5773  ;;  %7448 = vperm.xlu1 %9940, %v7265_v19   ;;  %v14512_v39 = vpop.f32.mrb[192].mxu1  ;;  %v15928_v37 = vld [vmem:[#allocation30_spill] sm:$0xff]  ;;  %v15930_v2 = vld [vmem:[#allocation29_spill] sm:$0xff] }
 0x347   :  { %v9835_v36 = vpack.c.bf16 %v6043_v33, %v6043_v33  ;;  %v5980_v32 = vadd.f32 %v5774_v43, %v5525_v23  ;;  %7443 = vperm.xlu0 %9939, %v7264_v16   ;;  %15924 = vst [vmem:[#allocation26_spill] sm:$0xff] %v14512_v39  ;;  %v7096_v48 = vpop.f32.mrb[193].mxu1  ;;  %v15929_v16 = vld [vmem:[#allocation6_spill] sm:$0xff]  ;;  %v15933_v31 = vld [vmem:[#allocation53_spill] sm:$0xff] }
 0x348   :  { %9320 = vst.msk [vmem:[%s15614_s4 + $0x278] sm:$0xf] %vm2081_vm1, %v9836_v13  ;;  %v6046_v22 = vmax.f32 %v5981_v54, 0.0  ;;  %v14520_v19 = vpop.f32.mrb[194].mxu1  ;;  %v5530_v1 = vmul.f32 %v15929_v16, %v15928_v37  ;;  %v7268_v23 = vld [vmem:[%s15610_s2 + $0x100] sm:$0xff]  ;;  %v5529_v13 = vmul.f32 %v15931_v7, %v15930_v2  ;;  %v7273_v2 = vld [vmem:[%s15610_s2 + $0x128] sm:$0xff] }
 0x349   :  { %9319 = vst.msk [vmem:[%s15614_s4 + $0x274] sm:$0xf] %vm2081_vm1, %v9835_v36  ;;  %v6045_v27 = vmax.f32 %v5980_v32, 0.0  ;;  %v5789_v35 = vpop.permute.xlu1 %5788  ;;  %15927 = vst [vmem:[#allocation4_spill] sm:$0xff] %v14520_v19  ;;  %v7099_v9 = vpop.f32.mrb[195].mxu1  ;;  %v15960_v19 = vld [vmem:[#allocation50_spill] sm:$0xff] }
 0x34a   :  { %v9838_v12 = vpack.c.bf16 %v6046_v22, %v6046_v22  ;;  %v5983_v50 = vadd.f32 %v5789_v35, %v5528_v61  ;;  %v5784_v47 = vpop.permute.xlu0 %5783  ;;  %7458 = vperm.xlu1 %9940, %v7267_v52   ;;  %v14534_v33 = vpop.f32.mrb[196].mxu1  ;;  %v7271_v22 = vld [vmem:[%s15610_s2 + $0x118] sm:$0xff]  ;;  %v7270_v35 = vld [vmem:[%s15610_s2 + $0x110] sm:$0xff]  ;;  %v15961_v24 = vld [vmem:[#allocation14_spill] sm:$0xff] }
 0x34b   :  { %v9837_v38 = vpack.c.bf16 %v6045_v27, %v6045_v27  ;;  %v5982_v30 = vadd.f32 %v5784_v47, %v5527_v60  ;;  %7453 = vperm.xlu0 %9939, %v7266_v42   ;;  %v7104_v36 = vpop.f32.mrb[197].mxu1  ;;  %v5532_v60 = vmul.f32 %v15933_v31, %v15932_v58  ;;  %v15964_v39 = vld [vmem:[#allocation54_spill] sm:$0xff] }
 0x34c   :  { %9322 = vst.msk [vmem:[%s15614_s4 + $0x280] sm:$0xf] %vm2081_vm1, %v9838_v12  ;;  %v6048_v59 = vmax.f32 %v5983_v50, 0.0  ;;  %v14542_v17 = vpop.f32.mrb[198].mxu1  ;;  %v15934_v12 = vld [vmem:[#allocation31_spill] sm:$0xff] }
 0x34d   :  { %9321 = vst.msk [vmem:[%s15614_s4 + $0x27c] sm:$0xf] %vm2081_vm1, %v9837_v38  ;;  %v6047_v54 = vmax.f32 %v5982_v30, 0.0  ;;  %v5799_v43 = vpop.permute.xlu1 %5798  ;;  %v7107_v42 = vpop.f32.mrb[199].mxu1  ;;  %v15935_v50 = vld [vmem:[#allocation51_spill] sm:$0xff] }
 0x34e   :  { %v9840_v32 = vpack.c.bf16 %v6048_v59, %v6048_v59  ;;  %v5985_v52 = vadd.f32 %v5799_v43, %v5530_v1  ;;  %v5794_v21 = vpop.permute.xlu0 %5793  ;;  %7468 = vperm.xlu1 %9940, %v7269_v41   ;;  %v14556_v48 = vpop.f32.mrb[200].mxu1  ;;  %v5531_v47 = vmul.f32 %v15935_v50, %v15934_v12 }
 0x34f   :  { %v9839_v46 = vpack.c.bf16 %v6047_v54, %v6047_v54  ;;  %v5984_v61 = vadd.f32 %v5794_v21, %v5529_v13  ;;  %7463 = vperm.xlu0 %9939, %v7268_v23   ;;  %v7112_v41 = vpop.f32.mrb[201].mxu1  ;;  %v15936_v13 = vld [vmem:[#allocation34_spill] sm:$0xff]  ;;  %v15937_v54 = vld [vmem:[#allocation8_spill] sm:$0xff]  ;;  %v15938_v21 = vld [vmem:[#allocation33_spill] sm:$0xff] }
 0x350   :  { %9324 = vst.msk [vmem:[%s15614_s4 + $0x288] sm:$0xf] %vm2081_vm1, %v9840_v32  ;;  %v6050_v27 = vmax.f32 %v5985_v52, 0.0  ;;  %v14564_v1 = vpop.f32.mrb[202].mxu1  ;;  %v5534_v43 = vmul.f32 %v15937_v54, %v15936_v13  ;;  %v7272_v32 = vld [vmem:[%s15610_s2 + $0x120] sm:$0xff]  ;;  %v15941_v41 = vld [vmem:[#allocation57_spill] sm:$0xff] }
 0x351   :  { %9323 = vst.msk [vmem:[%s15614_s4 + $0x284] sm:$0xf] %vm2081_vm1, %v9839_v46  ;;  %v6049_v38 = vmax.f32 %v5984_v61, 0.0  ;;  %v5809_v30 = vpop.permute.xlu1 %5808  ;;  %v7115_v7 = vpop.f32.mrb[203].mxu1  ;;  %v15939_v46 = vld [vmem:[#allocation52_spill] sm:$0xff] }
 0x352   :  { %v9842_v9 = vpack.c.bf16 %v6050_v27, %v6050_v27  ;;  %v5987_v37 = vadd.f32 %v5809_v30, %v5532_v60  ;;  %v5804_v16 = vpop.permute.xlu0 %5803  ;;  %7478 = vperm.xlu1 %9940, %v7271_v22   ;;  %v14578_v52 = vpop.f32.mrb[204].mxu1  ;;  %v5533_v61 = vmul.f32 %v15939_v46, %v15938_v21  ;;  %v15940_v30 = vld [vmem:[#allocation36_spill] sm:$0xff] }
 0x353   :  { %v9841_v59 = vpack.c.bf16 %v6049_v38, %v6049_v38  ;;  %v5986_v23 = vadd.f32 %v5804_v16, %v5531_v47  ;;  %7473 = vperm.xlu0 %9939, %v7270_v35   ;;  %v7120_v58 = vpop.f32.mrb[205].mxu1  ;;  %v7275_v47 = vld [vmem:[%s15610_s2 + $0x138] sm:$0xff]  ;;  %v7274_v16 = vld [vmem:[%s15610_s2 + $0x130] sm:$0xff] }
 0x354   :  { %9326 = vst.msk [vmem:[%s15614_s4 + $0x290] sm:$0xf] %vm2081_vm1, %v9842_v9  ;;  %v6052_v36 = vmax.f32 %v5987_v37, 0.0  ;;  %v14586_v35 = vpop.f32.mrb[206].mxu1  ;;  %v5536_v9 = vmul.f32 %v15941_v41, %v15940_v30  ;;  %v15947_v30 = vld [vmem:[#allocation56_spill] sm:$0xff] }
 0x355   :  { %9325 = vst.msk [vmem:[%s15614_s4 + $0x28c] sm:$0xf] %vm2081_vm1, %v9841_v59  ;;  %v6051_v22 = vmax.f32 %v5986_v23, 0.0  ;;  %v5819_v42 = vpop.permute.xlu1 %5818  ;;  %v7123_v38 = vpop.f32.mrb[207].mxu1  ;;  %v15942_v23 = vld [vmem:[#allocation35_spill] sm:$0xff] }
 0x356   :  { %v9844_v31 = vpack.c.bf16 %v6052_v36, %v6052_v36  ;;  %v5989_v60 = vadd.f32 %v5819_v42, %v5534_v43  ;;  %v5814_v27 = vpop.permute.xlu0 %5813  ;;  %7488 = vperm.xlu1 %9940, %v7273_v2   ;;  %v14600_v59 = vpop.f32.mrb[208].mxu1  ;;  %v15943_v2 = vld [vmem:[#allocation55_spill] sm:$0xff]  ;;  %v15946_v38 = vld [vmem:[#allocation37_spill] sm:$0xff] }
 0x357   :  { %v9843_v12 = vpack.c.bf16 %v6051_v22, %v6051_v22  ;;  %v5988_v50 = vadd.f32 %v5814_v27, %v5533_v61  ;;  %7483 = vperm.xlu0 %9939, %v7272_v32   ;;  %v5535_v7 = vmul.f32 %v15943_v2, %v15942_v23  ;;  %v7128_v43 = vpop.f32.mrb[209].mxu1  ;;  %v7277_v42 = vld [vmem:[%s15610_s2 + $0x148] sm:$0xff]  ;;  %v5537_v41 = vmul.f32 %v15947_v30, %v15946_v38 }
 0x358   :  { %9328 = vst.msk [vmem:[%s15614_s4 + $0x298] sm:$0xf] %vm2081_vm1, %v9844_v31  ;;  %v6054_v37 = vmax.f32 %v5989_v60, 0.0  ;;  %v14608_v46 = vpop.f32.mrb[210].mxu1  ;;  %v15944_v31 = vld [vmem:[#allocation38_spill] sm:$0xff] }
 0x359   :  { %9327 = vst.msk [vmem:[%s15614_s4 + $0x294] sm:$0xf] %vm2081_vm1, %v9843_v12  ;;  %v6053_v13 = vmax.f32 %v5988_v50, 0.0  ;;  %v5829_v54 = vpop.permute.xlu1 %5828  ;;  %v7131_v58 = vpop.f32.mrb[211].mxu1  ;;  %v15945_v60 = vld [vmem:[#allocation10_spill] sm:$0xff] }
 0x35a   :  { %v9846_v36 = vpack.c.bf16 %v6054_v37, %v6054_v37  ;;  %v5991_v32 = vadd.f32 %v5829_v54, %v5536_v9  ;;  %v5824_v21 = vpop.permute.xlu0 %5823  ;;  %7498 = vperm.xlu1 %9940, %v7275_v47   ;;  %v5538_v27 = vmul.f32 %v15945_v60, %v15944_v31  ;;  %v7276_v50 = vld [vmem:[%s15610_s2 + $0x140] sm:$0xff]  ;;  %v14622_v47 = vpop.f32.mrb[212].mxu1  ;;  %v15949_v58 = vld [vmem:[#allocation61_spill] sm:$0xff]  ;;  %v15950_v60 = vld [vmem:[#allocation39_spill] sm:$0xff] }
 0x35b   :  { %v9845_v61 = vpack.c.bf16 %v6053_v13, %v6053_v13  ;;  %v5990_v22 = vadd.f32 %v5824_v21, %v5535_v7  ;;  %7493 = vperm.xlu0 %9939, %v7274_v16   ;;  %v7136_v16 = vpop.f32.mrb[213].mxu1  ;;  %v15948_v21 = vld [vmem:[#allocation40_spill] sm:$0xff] }
 0x35c   :  { %9330 = vst.msk [vmem:[%s15614_s4 + $0x2a0] sm:$0xf] %vm2081_vm1, %v9846_v36  ;;  %v6056_v12 = vmax.f32 %v5991_v32, 0.0  ;;  %v14630_v13 = vpop.f32.mrb[214].mxu1  ;;  %v7279_v36 = vld [vmem:[%s15610_s2 + $0x158] sm:$0xff] }
 0x35d   :  { %9329 = vst.msk [vmem:[%s15614_s4 + $0x29c] sm:$0xf] %vm2081_vm1, %v9845_v61  ;;  %v6055_v9 = vmax.f32 %v5990_v22, 0.0  ;;  %v5839_v37 = vpop.permute.xlu1 %5838  ;;  %v7139_v32 = vpop.f32.mrb[215].mxu1  ;;  %v5540_v61 = vmul.f32 %v15949_v58, %v15948_v21  ;;  %v15952_v21 = vld [vmem:[#allocation62_spill] sm:$0xff]  ;;  %v15953_v58 = vld [vmem:[#allocation12_spill] sm:$0xff] }
 0x35e   :  { %v9848_v23 = vpack.c.bf16 %v6056_v12, %v6056_v12  ;;  %v5993_v2 = vadd.f32 %v5839_v37, %v5538_v27  ;;  %v5834_v7 = vpop.permute.xlu0 %5833  ;;  %7508 = vperm.xlu1 %9940, %v7277_v42   ;;  %v7278_v42 = vld [vmem:[%s15610_s2 + $0x150] sm:$0xff]  ;;  %v14644_v31 = vpop.f32.mrb[216].mxu1  ;;  %v15951_v27 = vld [vmem:[#allocation59_spill] sm:$0xff] }
 0x35f   :  { %v9847_v54 = vpack.c.bf16 %v6055_v9, %v6055_v9  ;;  %v5992_v43 = vadd.f32 %v5834_v7, %v5537_v41  ;;  %7503 = vperm.xlu0 %9939, %v7276_v50   ;;  %v5539_v12 = vmul.f32 %v15951_v27, %v15950_v60  ;;  %v7144_v30 = vpop.f32.mrb[217].mxu1  ;;  %v7281_v7 = vld [vmem:[%s15610_s2 + $0x168] sm:$0xff] }
 0x360   :  { %9332 = vst.msk [vmem:[%s15614_s4 + $0x2a8] sm:$0xf] %vm2081_vm1, %v9848_v23  ;;  %v6058_v22 = vmax.f32 %v5993_v2, 0.0  ;;  %v14652_v16 = vpop.f32.mrb[218].mxu1 }
 0x361   :  { %9331 = vst.msk [vmem:[%s15614_s4 + $0x2a4] sm:$0xf] %vm2081_vm1, %v9847_v54  ;;  %v6057_v50 = vmax.f32 %v5992_v43, 0.0  ;;  %v5849_v38 = vpop.permute.xlu1 %5848  ;;  %v7147_v32 = vpop.f32.mrb[219].mxu1  ;;  %v5542_v54 = vmul.f32 %v15953_v58, %v15952_v21  ;;  %v7283_v21 = vld [vmem:[%s15610_s2 + $0x178] sm:$0xff] }
 0x362   :  { %v9850_v41 = vpack.c.bf16 %v6058_v22, %v6058_v22  ;;  %v5995_v9 = vadd.f32 %v5849_v38, %v5540_v61  ;;  %v5844_v37 = vpop.permute.xlu0 %5843  ;;  %7518 = vperm.xlu1 %9940, %v7279_v36   ;;  %v7280_v36 = vld [vmem:[%s15610_s2 + $0x160] sm:$0xff]  ;;  %v14666_v61 = vpop.f32.mrb[220].mxu1  ;;  %v15954_v22 = vld [vmem:[#allocation41_spill] sm:$0xff] }
 0x363   :  { %v9849_v23 = vpack.c.bf16 %v6057_v50, %v6057_v50  ;;  %v5994_v2 = vadd.f32 %v5844_v37, %v5539_v12  ;;  %7513 = vperm.xlu0 %9939, %v7278_v42   ;;  %v15955_v42 = vld [vmem:[#allocation60_spill] sm:$0xff]  ;;  %v7152_v50 = vpop.f32.mrb[221].mxu1 }
 0x364   :  { %9334 = vst.msk [vmem:[%s15614_s4 + $0x2b0] sm:$0xf] %vm2081_vm1, %v9850_v41  ;;  %v6060_v43 = vmax.f32 %v5995_v9, 0.0  ;;  %v5541_v60 = vmul.f32 %v15955_v42, %v15954_v22  ;;  %v14674_v9 = vpop.f32.mrb[222].mxu1  ;;  %v15956_v22 = vld [vmem:[#allocation46_spill] sm:$0xff]  ;;  %v15957_v42 = vld [vmem:[#allocation65_spill] sm:$0xff] }
 0x365   :  { %9333 = vst.msk [vmem:[%s15614_s4 + $0x2ac] sm:$0xf] %vm2081_vm1, %v9849_v23  ;;  %v6059_v27 = vmax.f32 %v5994_v2, 0.0  ;;  %v5859_v12 = vpop.permute.xlu1 %5858  ;;  %v7155_v58 = vpop.f32.mrb[223].mxu1  ;;  %v5544_v23 = vmul.f32 %v15957_v42, %v15956_v22 }
 0x366   :  { %v9852_v38 = vpack.c.bf16 %v6060_v43, %v6060_v43  ;;  %v5997_v30 = vadd.f32 %v5859_v12, %v5542_v54  ;;  %v5854_v41 = vpop.permute.xlu0 %5853  ;;  %7528 = vperm.xlu1 %9940, %v7281_v7   ;;  %v7282_v7 = vld [vmem:[%s15610_s2 + $0x170] sm:$0xff]  ;;  %v14688_v54 = vpop.f32.mrb[224].mxu1  ;;  %v15958_v43 = vld [vmem:[#allocation43_spill] sm:$0xff] }
 0x367   :  { %v9851_v37 = vpack.c.bf16 %v6059_v27, %v6059_v27  ;;  %v5996_v32 = vadd.f32 %v5854_v41, %v5541_v60  ;;  %7523 = vperm.xlu0 %9939, %v7280_v36   ;;  %v15959_v36 = vld [vmem:[#allocation63_spill] sm:$0xff]  ;;  %v7160_v50 = vpop.f32.mrb[225].mxu1 }
 0x368   :  { %9336 = vst.msk [vmem:[%s15614_s4 + $0x2b8] sm:$0xf] %vm2081_vm1, %v9852_v38  ;;  %v6062_v2 = vmax.f32 %v5997_v30, 0.0  ;;  %v5543_v60 = vmul.f32 %v15959_v36, %v15958_v43  ;;  %v14696_v58 = vpop.f32.mrb[226].mxu1  ;;  %v7285_v43 = vld [vmem:[%s15610_s2 + $0x188] sm:$0xff] }
 0x369   :  { %9335 = vst.msk [vmem:[%s15614_s4 + $0x2b4] sm:$0xf] %vm2081_vm1, %v9851_v37  ;;  %v6061_v27 = vmax.f32 %v5996_v32, 0.0  ;;  %v5869_v12 = vpop.permute.xlu1 %5868  ;;  %v7163_v36 = vpop.f32.mrb[227].mxu1  ;;  %v5546_v37 = vmul.f32 %v15961_v24, %v15960_v19 }
 0x36a   :  { %v9854_v41 = vpack.c.bf16 %v6062_v2, %v6062_v2  ;;  %v5999_v38 = vadd.f32 %v5869_v12, %v5544_v23  ;;  %v5864_v30 = vpop.permute.xlu0 %5863  ;;  %7538 = vperm.xlu1 %9940, %v7283_v21   ;;  %v7284_v21 = vld [vmem:[%s15610_s2 + $0x180] sm:$0xff]  ;;  %v14710_v23 = vpop.f32.mrb[228].mxu1  ;;  %v15962_v2 = vld [vmem:[#allocation64_spill] sm:$0xff] }
 0x36b   :  { %v9853_v22 = vpack.c.bf16 %v6061_v27, %v6061_v27  ;;  %v5998_v42 = vadd.f32 %v5864_v30, %v5543_v60  ;;  %7533 = vperm.xlu0 %9939, %v7282_v7   ;;  %v15963_v7 = vld [vmem:[#allocation5_spill] sm:$0xff]  ;;  %v7168_v27 = vpop.f32.mrb[229].mxu1 }
 0x36c   :  { %9338 = vst.msk [vmem:[%s15614_s4 + $0x2c0] sm:$0xf] %vm2081_vm1, %v9854_v41  ;;  %v6064_v32 = vmax.f32 %v5999_v38, 0.0  ;;  %v5545_v60 = vmul.f32 %v15963_v7, %v15962_v2  ;;  %v14718_v38 = vpop.f32.mrb[230].mxu1  ;;  %v7287_v2 = vld [vmem:[%s15610_s2 + $0x198] sm:$0xff] }
 0x36d   :  { %9337 = vst.msk [vmem:[%s15614_s4 + $0x2bc] sm:$0xf] %vm2081_vm1, %v9853_v22  ;;  %v6063_v24 = vmax.f32 %v5998_v42, 0.0  ;;  %v5879_v19 = vpop.permute.xlu1 %5878  ;;  %v7171_v7 = vpop.f32.mrb[231].mxu1  ;;  %v5548_v22 = vmul.f32 %v15965_v29, %v15964_v39 }
 0x36e   :  { %v9856_v12 = vpack.c.bf16 %v6064_v32, %v6064_v32  ;;  %v6001_v50 = vadd.f32 %v5879_v19, %v5546_v37  ;;  %v5874_v41 = vpop.permute.xlu0 %5873  ;;  %7548 = vperm.xlu1 %9940, %v7285_v43   ;;  %v7286_v43 = vld [vmem:[%s15610_s2 + $0x190] sm:$0xff]  ;;  %v14732_v37 = vpop.f32.mrb[232].mxu1  ;;  %v15966_v32 = vld [vmem:[#allocation66_spill] sm:$0xff] }
 0x36f   :  { %v9855_v30 = vpack.c.bf16 %v6063_v24, %v6063_v24  ;;  %v6000_v36 = vadd.f32 %v5874_v41, %v5545_v60  ;;  %7543 = vperm.xlu0 %9939, %v7284_v21   ;;  %v15967_v21 = vld [vmem:[#allocation67_spill] sm:$0xff]  ;;  %v7176_v24 = vpop.f32.mrb[233].mxu1 }
 0x370   :  { %9340 = vst.msk [vmem:[%s15614_s4 + $0x2c8] sm:$0xf] %vm2081_vm1, %v9856_v12  ;;  %v6066_v42 = vmax.f32 %v6001_v50, 0.0  ;;  %v5547_v60 = vmul.f32 %v15967_v21, %v15966_v32  ;;  %v14740_v50 = vpop.f32.mrb[234].mxu1  ;;  %v7289_v32 = vld [vmem:[%s15610_s2 + $0x1a8] sm:$0xff] }
 0x371   :  { %9339 = vst.msk [vmem:[%s15614_s4 + $0x2c4] sm:$0xf] %vm2081_vm1, %v9855_v30  ;;  %v6065_v29 = vmax.f32 %v6000_v36, 0.0  ;;  %v5889_v39 = vpop.permute.xlu1 %5888  ;;  %v7179_v21 = vpop.f32.mrb[235].mxu1  ;;  %v5550_v30 = vmul.f32 %v15969_v56, %v15968_v53 }
 0x372   :  { %v9858_v19 = vpack.c.bf16 %v6066_v42, %v6066_v42  ;;  %v6003_v27 = vadd.f32 %v5889_v39, %v5548_v22  ;;  %v5884_v12 = vpop.permute.xlu0 %5883  ;;  %7558 = vperm.xlu1 %9940, %v7287_v2   ;;  %v7288_v2 = vld [vmem:[%s15610_s2 + $0x1a0] sm:$0xff]  ;;  %v14754_v22 = vpop.f32.mrb[236].mxu1  ;;  %v15970_v42 = vld [vmem:[#allocation68_spill] sm:$0xff] }
 0x373   :  { %v9857_v41 = vpack.c.bf16 %v6065_v29, %v6065_v29  ;;  %v6002_v7 = vadd.f32 %v5884_v12, %v5547_v60  ;;  %7553 = vperm.xlu0 %9939, %v7286_v43   ;;  %v15971_v43 = vld [vmem:[#allocation9_spill] sm:$0xff]  ;;  %v7184_v29 = vpop.f32.mrb[237].mxu1 }
 0x374   :  { %9342 = vst.msk [vmem:[%s15614_s4 + $0x2d0] sm:$0xf] %vm2081_vm1, %v9858_v19  ;;  %v6068_v36 = vmax.f32 %v6003_v27, 0.0  ;;  %v5549_v60 = vmul.f32 %v15971_v43, %v15970_v42  ;;  %v14762_v27 = vpop.f32.mrb[238].mxu1  ;;  %v7291_v42 = vld [vmem:[%s15610_s2 + $0x1b8] sm:$0xff] }
 0x375   :  { %9341 = vst.msk [vmem:[%s15614_s4 + $0x2cc] sm:$0xf] %vm2081_vm1, %v9857_v41  ;;  %v6067_v56 = vmax.f32 %v6002_v7, 0.0  ;;  %v5899_v53 = vpop.permute.xlu1 %5898  ;;  %v7187_v43 = vpop.f32.mrb[239].mxu1  ;;  %v5552_v41 = vmul.f32 %v15973_v45, %v15972_v62 }
 0x376   :  { %v9860_v39 = vpack.c.bf16 %v6068_v36, %v6068_v36  ;;  %v6005_v24 = vadd.f32 %v5899_v53, %v5550_v30  ;;  %v5894_v19 = vpop.permute.xlu0 %5893  ;;  %7568 = vperm.xlu1 %9940, %v7289_v32   ;;  %v7290_v32 = vld [vmem:[%s15610_s2 + $0x1b0] sm:$0xff]  ;;  %v14776_v30 = vpop.f32.mrb[240].mxu1  ;;  %v15974_v36 = vld [vmem:[#allocation70_spill] sm:$0xff] }
 0x377   :  { %v9859_v12 = vpack.c.bf16 %v6067_v56, %v6067_v56  ;;  %v6004_v21 = vadd.f32 %v5894_v19, %v5549_v60  ;;  %7563 = vperm.xlu0 %9939, %v7288_v2   ;;  %v15975_v2 = vld [vmem:[#allocation71_spill] sm:$0xff]  ;;  %v7192_v56 = vpop.f32.mrb[241].mxu1 }
 0x378   :  { %9344 = vst.msk [vmem:[%s15614_s4 + $0x2d8] sm:$0xf] %vm2081_vm1, %v9860_v39  ;;  %v6070_v7 = vmax.f32 %v6005_v24, 0.0  ;;  %v5551_v60 = vmul.f32 %v15975_v2, %v15974_v36  ;;  %v14784_v24 = vpop.f32.mrb[242].mxu1  ;;  %v7293_v36 = vld [vmem:[%s15610_s2 + $0x1c8] sm:$0xff] }
 0x379   :  { %9343 = vst.msk [vmem:[%s15614_s4 + $0x2d4] sm:$0xf] %vm2081_vm1, %v9859_v12  ;;  %v6069_v45 = vmax.f32 %v6004_v21, 0.0  ;;  %v5909_v62 = vpop.permute.xlu1 %5908  ;;  %v7195_v2 = vpop.f32.mrb[243].mxu1  ;;  %v5554_v12 = vmul.f32 %v15977_v11, %v15976_v8 }
 0x37a   :  { %v9862_v53 = vpack.c.bf16 %v6070_v7, %v6070_v7  ;;  %v6007_v29 = vadd.f32 %v5909_v62, %v5552_v41  ;;  %v5904_v39 = vpop.permute.xlu0 %5903  ;;  %7578 = vperm.xlu1 %9940, %v7291_v42   ;;  %v7292_v42 = vld [vmem:[%s15610_s2 + $0x1c0] sm:$0xff]  ;;  %v14798_v41 = vpop.f32.mrb[244].mxu1  ;;  %v15978_v7 = vld [vmem:[#allocation72_spill] sm:$0xff] }
 0x37b   :  { %v9861_v19 = vpack.c.bf16 %v6069_v45, %v6069_v45  ;;  %v6006_v43 = vadd.f32 %v5904_v39, %v5551_v60  ;;  %7573 = vperm.xlu0 %9939, %v7290_v32   ;;  %v15979_v32 = vld [vmem:[#allocation13_spill] sm:$0xff]  ;;  %v7200_v45 = vpop.f32.mrb[245].mxu1 }
 0x37c   :  { %9346 = vst.msk [vmem:[%s15614_s4 + $0x2e0] sm:$0xf] %vm2081_vm1, %v9862_v53  ;;  %v6072_v21 = vmax.f32 %v6007_v29, 0.0  ;;  %v5553_v60 = vmul.f32 %v15979_v32, %v15978_v7  ;;  %v14806_v29 = vpop.f32.mrb[246].mxu1  ;;  %v7295_v7 = vld [vmem:[%s15610_s2 + $0x1d8] sm:$0xff] }
 0x37d   :  { %9345 = vst.msk [vmem:[%s15614_s4 + $0x2dc] sm:$0xf] %vm2081_vm1, %v9861_v19  ;;  %v6071_v11 = vmax.f32 %v6006_v43, 0.0  ;;  %v5919_v8 = vpop.permute.xlu1 %5918  ;;  %v7203_v32 = vpop.f32.mrb[247].mxu1  ;;  %v5556_v19 = vmul.f32 %v15981_v26, %v15980_v4 }
 0x37e   :  { %v9864_v62 = vpack.c.bf16 %v6072_v21, %v6072_v21  ;;  %v6009_v56 = vadd.f32 %v5919_v8, %v5554_v12  ;;  %v5914_v53 = vpop.permute.xlu0 %5913  ;;  %7588 = vperm.xlu1 %9940, %v7293_v36   ;;  %v7294_v36 = vld [vmem:[%s15610_s2 + $0x1d0] sm:$0xff]  ;;  %v14820_v12 = vpop.f32.mrb[248].mxu1  ;;  %v15982_v21 = vld [vmem:[#allocation74_spill] sm:$0xff] }
 0x37f   :  { %v9863_v39 = vpack.c.bf16 %v6071_v11, %v6071_v11  ;;  %v6008_v2 = vadd.f32 %v5914_v53, %v5553_v60  ;;  %7583 = vperm.xlu0 %9939, %v7292_v42   ;;  %v15983_v42 = vld [vmem:[#allocation17_spill] sm:$0xff]  ;;  %v7208_v11 = vpop.f32.mrb[249].mxu1 }
 0x380   :  { %9348 = vst.msk [vmem:[%s15614_s4 + $0x2e8] sm:$0xf] %vm2081_vm1, %v9864_v62  ;;  %v6074_v43 = vmax.f32 %v6009_v56, 0.0  ;;  %v5555_v60 = vmul.f32 %v15983_v42, %v15982_v21  ;;  %v14828_v56 = vpop.f32.mrb[250].mxu1  ;;  %v7297_v21 = vld [vmem:[%s15610_s2 + $0x1e8] sm:$0xff] }
 0x381   :  { %9347 = vst.msk [vmem:[%s15614_s4 + $0x2e4] sm:$0xf] %vm2081_vm1, %v9863_v39  ;;  %v6073_v26 = vmax.f32 %v6008_v2, 0.0  ;;  %v5929_v4 = vpop.permute.xlu1 %5928  ;;  %v7211_v42 = vpop.f32.mrb[251].mxu1  ;;  %v5558_v39 = vmul.f32 %v15985_v6, %v15984_v3 }
 0x382   :  { %v9866_v8 = vpack.c.bf16 %v6074_v43, %v6074_v43  ;;  %v6011_v45 = vadd.f32 %v5929_v4, %v5556_v19  ;;  %v5924_v62 = vpop.permute.xlu0 %5923  ;;  %7598 = vperm.xlu1 %9940, %v7295_v7   ;;  %v7296_v7 = vld [vmem:[%s15610_s2 + $0x1e0] sm:$0xff]  ;;  %v14842_v19 = vpop.f32.mrb[252].mxu1  ;;  %v15986_v43 = vld [vmem:[#allocation76_spill] sm:$0xff] }
 0x383   :  { %v9865_v53 = vpack.c.bf16 %v6073_v26, %v6073_v26  ;;  %v6010_v32 = vadd.f32 %v5924_v62, %v5555_v60  ;;  %7593 = vperm.xlu0 %9939, %v7294_v36   ;;  %v15987_v36 = vld [vmem:[#allocation19_spill] sm:$0xff]  ;;  %v7216_v26 = vpop.f32.mrb[253].mxu1 }
 0x384   :  { %9350 = vst.msk [vmem:[%s15614_s4 + $0x2f0] sm:$0xf] %vm2081_vm1, %v9866_v8  ;;  %v6076_v2 = vmax.f32 %v6011_v45, 0.0  ;;  %v5557_v60 = vmul.f32 %v15987_v36, %v15986_v43  ;;  %v14850_v45 = vpop.f32.mrb[254].mxu1  ;;  %v7299_v43 = vld [vmem:[%s15610_s2 + $0x1f8] sm:$0xff] }
 0x385   :  { %9349 = vst.msk [vmem:[%s15614_s4 + $0x2ec] sm:$0xf] %vm2081_vm1, %v9865_v53  ;;  %v6075_v6 = vmax.f32 %v6010_v32, 0.0  ;;  %v5939_v3 = vpop.permute.xlu1 %5938  ;;  %v7219_v36 = vpop.f32.mrb[255].mxu1  ;;  %v5560_v53 = vmul.f32 %v15989_v34, %v15988_v63 }
 0x386   :  { %v9868_v4 = vpack.c.bf16 %v6076_v2, %v6076_v2  ;;  %v6013_v11 = vadd.f32 %v5939_v3, %v5558_v39  ;;  %v5934_v8 = vpop.permute.xlu0 %5933  ;;  %7608 = vperm.xlu1 %9940, %v7297_v21   ;;  %v7298_v21 = vld [vmem:[%s15610_s2 + $0x1f0] sm:$0xff]  ;;  %v14864_v39 = vpop.f32.mrb[0].mxu1  ;;  %v15990_v2 = vld [vmem:[#allocation75_spill] sm:$0xff] }
 0x387   :  { %v9867_v62 = vpack.c.bf16 %v6075_v6, %v6075_v6  ;;  %v6012_v42 = vadd.f32 %v5934_v8, %v5557_v60  ;;  %7603 = vperm.xlu0 %9939, %v7296_v7   ;;  %v15991_v7 = vld [vmem:[#allocation78_spill] sm:$0xff]  ;;  %v7224_v6 = vpop.f32.mrb[1].mxu1 }
 0x388   :  { %9352 = vst.msk [vmem:[%s15614_s4 + $0x2f8] sm:$0xf] %vm2081_vm1, %v9868_v4  ;;  %v6078_v32 = vmax.f32 %v6013_v11, 0.0  ;;  %v5559_v60 = vmul.f32 %v15991_v7, %v15990_v2  ;;  %v14872_v11 = vpop.f32.mrb[2].mxu1  ;;  %v7691_v2 = vld [vmem:[%s15613_s3] sm:$0xff]  ;;  %v7692_v6 = vld [vmem:[%s15613_s3 + $0x8] sm:$0xff] }
 0x389   :  { %9351 = vst.msk [vmem:[%s15614_s4 + $0x2f4] sm:$0xf] %vm2081_vm1, %v9867_v62  ;;  %v6077_v34 = vmax.f32 %v6012_v42, 0.0  ;;  %v5949_v63 = vpop.permute.xlu1 %5948  ;;  %v7227_v7 = vpop.f32.mrb[3].mxu1  ;;  %v7300_v42 = vld [vmem:[%s15610_s2 + $0x200] sm:$0xf] }
 0x38a   :  { %v9870_v3 = vpack.c.bf16 %v6078_v32, %v6078_v32  ;;  %v6015_v26 = vadd.f32 %v5949_v63, %v5560_v53  ;;  %v5944_v4 = vpop.permute.xlu0 %5943  ;;  %7618 = vperm.xlu1 %9940, %v7299_v43   ;;  %v7694_v7 = vld [vmem:[%s15613_s3 + $0x18] sm:$0xff] }
 0x38b   :  { %v9869_v8 = vpack.c.bf16 %v6077_v34, %v6077_v34  ;;  %v6014_v36 = vadd.f32 %v5944_v4, %v5559_v60  ;;  %7613 = vperm.xlu0 %9939, %v7298_v21   ;;  %v7693_v34 = vld [vmem:[%s15613_s3 + $0x10] sm:$0xff] }
 0x38c   :  { %9354 = vst.msk [vmem:[%s15614_s4 + $0x300] sm:$0xf] %vm2081_vm1, %v9870_v3  ;;  %v6080_v62 = vmax.f32 %v6015_v26, 0.0  ;;  %v14895_v63 = vpop.f32.mrb[4].mxu1 }
 0x38d   :  { %9353 = vst.msk [vmem:[%s15614_s4 + $0x2fc] sm:$0xf] %vm2081_vm1, %v9869_v8  ;;  %v6079_v43 = vmax.f32 %v6014_v36, 0.0  ;;  %v14888_v53 = vpop.permute.xlu1 %7308  ;;  %v7232_v3 = vpop.f32.mrb[5].mxu1 }
 0x38e   :  { %v9872_v32 = vpack.c.bf16 %v6080_v62, %v6080_v62  ;;  %v14890_v21 = vpop.permute.xlu0 %7303  ;;  %7758 = vperm.xlu1 %9940, %v7691_v2   ;;  %v7233_v4 = vpop.f32.mrb[6].mxu1  ;;  %v7695_v2 = vld [vmem:[%s15613_s3 + $0x20] sm:$0xff]  ;;  %v7698_v3 = vld [vmem:[%s15613_s3 + $0x38] sm:$0xff] }
 0x38f   :  { %v9871_v60 = vpack.c.bf16 %v6079_v43, %v6079_v43  ;;  %7623 = vperm.xlu0 %9939, %v7300_v42   ;;  %v7234_v36 = vpop.f32.mrb[7].mxu1  ;;  %v7697_v43 = vld [vmem:[%s15613_s3 + $0x30] sm:$0xff] }
 0x390   :  { %9356 = vst.msk [vmem:[%s15614_s4 + $0x308] sm:$0x3] %vm2146_vm2, %v9872_v32  ;;  %v7696_v32 = vld [vmem:[%s15613_s3 + $0x28] sm:$0xff] }
 0x391   :  { %9355 = vst.msk [vmem:[%s15614_s4 + $0x304] sm:$0xf] %vm2081_vm1, %v9871_v60  ;;  %v14908_v26 = vpop.permute.xlu1 %7318 }
 0x392   :  { %v14910_v8 = vpop.permute.xlu0 %7313  ;;  %7768 = vperm.xlu1 %9940, %v7693_v34  }
 0x393   :  { %7763 = vperm.xlu0 %9939, %v7692_v6   ;;  %v7699_v6 = vld [vmem:[%s15613_s3 + $0x40] sm:$0xff] }
 0x395   :  { %v14918_v62 = vpop.permute.xlu1 %7328 }
 0x396   :  { %v14920_v42 = vpop.permute.xlu0 %7323  ;;  %7778 = vperm.xlu1 %9940, %v7695_v2   ;;  %v7701_v2 = vld [vmem:[%s15613_s3 + $0x50] sm:$0xff] }
 0x397   :  { %7773 = vperm.xlu0 %9939, %v7694_v7   ;;  %v7700_v7 = vld [vmem:[%s15613_s3 + $0x48] sm:$0xff] }
 0x399   :  { %v14928_v60 = vpop.permute.xlu1 %7338 }
 0x39a   :  { %v14930_v34 = vpop.permute.xlu0 %7333  ;;  %7788 = vperm.xlu1 %9940, %v7697_v43  }
 0x39b   :  { %7783 = vperm.xlu0 %9939, %v7696_v32  }
 0x39d   :  { %v14938_v4 = vpop.permute.xlu1 %7348 }
 0x39e   :  { %15992 = vst [vmem:[#allocation25_spill] sm:$0xff] %v14938_v4  ;;  %v14940_v36 = vpop.permute.xlu0 %7343  ;;  %7798 = vperm.xlu1 %9940, %v7699_v6   ;;  %v7702_v6 = vld [vmem:[%s15613_s3 + $0x58] sm:$0xff] }
 0x39f   :  { %7793 = vperm.xlu0 %9939, %v7698_v3  }
 0x3a1   :  { %v14948_v43 = vpop.permute.xlu1 %7358 }
 0x3a2   :  { %15993 = vst [vmem:[#allocation44_spill] sm:$0xff] %v14948_v43  ;;  %v14950_v32 = vpop.permute.xlu0 %7353  ;;  %7808 = vperm.xlu1 %9940, %v7701_v2   ;;  %v7704_v2 = vld [vmem:[%s15613_s3 + $0x68] sm:$0xff] }
 0x3a3   :  { %7803 = vperm.xlu0 %9939, %v7700_v7  }
 0x3a5   :  { %v14958_v3 = vpop.permute.xlu1 %7368 }
 0x3a6   :  { %15994 = vst [vmem:[#allocation28_spill] sm:$0xff] %v14958_v3  ;;  %v14960_v51 = vpop.permute.xlu0 %7363  ;;  %7818 = vperm.xlu1 %9940, %v7703_v0   ;;  %v7707_v3 = vld [vmem:[%s15613_s3 + $0x80] sm:$0xff]  ;;  %v7706_v0 = vld [vmem:[%s15613_s3 + $0x78] sm:$0xff] }
 0x3a7   :  { %15995 = vst [vmem:[#allocation49_spill] sm:$0xff] %v14960_v51  ;;  %7813 = vperm.xlu0 %9939, %v7702_v6  }
 0x3a9   :  { %v14968_v7 = vpop.permute.xlu1 %7378 }
 0x3aa   :  { %15996 = vst [vmem:[#allocation27_spill] sm:$0xff] %v14968_v7  ;;  %v14970_v43 = vpop.permute.xlu0 %7373  ;;  %7828 = vperm.xlu1 %9940, %v7705_v20   ;;  %v7709_v7 = vld [vmem:[%s15613_s3 + $0x90] sm:$0xff]  ;;  %v7708_v20 = vld [vmem:[%s15613_s3 + $0x88] sm:$0xff] }
 0x3ab   :  { %15997 = vst [vmem:[#allocation47_spill] sm:$0xff] %v14970_v43  ;;  %7823 = vperm.xlu0 %9939, %v7704_v2  }
 0x3ad   :  { %v14978_v6 = vpop.permute.xlu1 %7388 }
 0x3ae   :  { %15998 = vst [vmem:[#allocation30_spill] sm:$0xff] %v14978_v6  ;;  %v14980_v15 = vpop.permute.xlu0 %7383  ;;  %7838 = vperm.xlu1 %9940, %v7707_v3   ;;  %v7711_v6 = vld [vmem:[%s15613_s3 + $0xa0] sm:$0xff]  ;;  %v7710_v3 = vld [vmem:[%s15613_s3 + $0x98] sm:$0xff] }
 0x3af   :  { %15999 = vst [vmem:[#allocation6_spill] sm:$0xff] %v14980_v15  ;;  %7833 = vperm.xlu0 %9939, %v7706_v0  }
 0x3b1   :  { %v14988_v2 = vpop.permute.xlu1 %7398 }
 0x3b2   :  { %16000 = vst [vmem:[#allocation29_spill] sm:$0xff] %v14988_v2  ;;  %v14990_v43 = vpop.permute.xlu0 %7393  ;;  %7848 = vperm.xlu1 %9940, %v7709_v7   ;;  %v7713_v2 = vld [vmem:[%s15613_s3 + $0xb0] sm:$0xff]  ;;  %v7712_v7 = vld [vmem:[%s15613_s3 + $0xa8] sm:$0xff] }
 0x3b3   :  { %16001 = vst [vmem:[#allocation48_spill] sm:$0xff] %v14990_v43  ;;  %7843 = vperm.xlu0 %9939, %v7708_v20  }
 0x3b5   :  { %v14998_v0 = vpop.permute.xlu1 %7408 }
 0x3b6   :  { %16002 = vst [vmem:[#allocation32_spill] sm:$0xff] %v14998_v0  ;;  %v15000_v15 = vpop.permute.xlu0 %7403  ;;  %7858 = vperm.xlu1 %9940, %v7711_v6   ;;  %v7715_v0 = vld [vmem:[%s15613_s3 + $0xc0] sm:$0xff]  ;;  %v7714_v6 = vld [vmem:[%s15613_s3 + $0xb8] sm:$0xff] }
 0x3b7   :  { %16003 = vst [vmem:[#allocation53_spill] sm:$0xff] %v15000_v15  ;;  %7853 = vperm.xlu0 %9939, %v7710_v3  }
 0x3b9   :  { %v15008_v20 = vpop.permute.xlu1 %7418 }
 0x3ba   :  { %16004 = vst [vmem:[#allocation31_spill] sm:$0xff] %v15008_v20  ;;  %v15010_v43 = vpop.permute.xlu0 %7413  ;;  %7868 = vperm.xlu1 %9940, %v7713_v2   ;;  %v7717_v20 = vld [vmem:[%s15613_s3 + $0xd0] sm:$0xff]  ;;  %v7716_v2 = vld [vmem:[%s15613_s3 + $0xc8] sm:$0xff] }
 0x3bb   :  { %16005 = vst [vmem:[#allocation51_spill] sm:$0xff] %v15010_v43  ;;  %7863 = vperm.xlu0 %9939, %v7712_v7  }
 0x3bd   :  { %v15018_v3 = vpop.permute.xlu1 %7428 }
 0x3be   :  { %16006 = vst [vmem:[#allocation34_spill] sm:$0xff] %v15018_v3  ;;  %v15020_v15 = vpop.permute.xlu0 %7423  ;;  %7878 = vperm.xlu1 %9940, %v7715_v0   ;;  %v7719_v3 = vld [vmem:[%s15613_s3 + $0xe0] sm:$0xff]  ;;  %v7718_v0 = vld [vmem:[%s15613_s3 + $0xd8] sm:$0xff] }
 0x3bf   :  { %16007 = vst [vmem:[#allocation8_spill] sm:$0xff] %v15020_v15  ;;  %7873 = vperm.xlu0 %9939, %v7714_v6  }
 0x3c1   :  { %v15028_v7 = vpop.permute.xlu1 %7438 }
 0x3c2   :  { %16008 = vst [vmem:[#allocation33_spill] sm:$0xff] %v15028_v7  ;;  %v15030_v43 = vpop.permute.xlu0 %7433  ;;  %7888 = vperm.xlu1 %9940, %v7717_v20   ;;  %v7721_v7 = vld [vmem:[%s15613_s3 + $0xf0] sm:$0xff]  ;;  %v7720_v20 = vld [vmem:[%s15613_s3 + $0xe8] sm:$0xff] }
 0x3c3   :  { %16009 = vst [vmem:[#allocation52_spill] sm:$0xff] %v15030_v43  ;;  %7883 = vperm.xlu0 %9939, %v7716_v2  }
 0x3c5   :  { %v15038_v6 = vpop.permute.xlu1 %7448 }
 0x3c6   :  { %16010 = vst [vmem:[#allocation36_spill] sm:$0xff] %v15038_v6  ;;  %v15040_v15 = vpop.permute.xlu0 %7443  ;;  %7898 = vperm.xlu1 %9940, %v7719_v3   ;;  %v7723_v6 = vld [vmem:[%s15613_s3 + $0x100] sm:$0xff]  ;;  %v7722_v3 = vld [vmem:[%s15613_s3 + $0xf8] sm:$0xff] }
 0x3c7   :  { %16011 = vst [vmem:[#allocation57_spill] sm:$0xff] %v15040_v15  ;;  %7893 = vperm.xlu0 %9939, %v7718_v0  }
 0x3c9   :  { %v15048_v2 = vpop.permute.xlu1 %7458 }
 0x3ca   :  { %16012 = vst [vmem:[#allocation35_spill] sm:$0xff] %v15048_v2  ;;  %v15050_v43 = vpop.permute.xlu0 %7453  ;;  %7908 = vperm.xlu1 %9940, %v7721_v7   ;;  %v7725_v7 = vld [vmem:[%s15613_s3 + $0x110] sm:$0xff] }
 0x3cb   :  { %16013 = vst [vmem:[#allocation55_spill] sm:$0xff] %v15050_v43  ;;  %7903 = vperm.xlu0 %9939, %v7720_v20   ;;  %v7724_v20 = vld [vmem:[%s15613_s3 + $0x108] sm:$0xff] }
 0x3cd   :  { %v7469_v0 = vpop.permute.xlu1 %7468 }
 0x3ce   :  { %v7464_v15 = vpop.permute.xlu0 %7463  ;;  %v15059_v51 = vmul.f32 %v7469_v0, %v14542_v17  ;;  %7918 = vperm.xlu1 %9940, %v7723_v6  }
 0x3cf   :  { %v15062_v2 = vmul.f32 %v7464_v15, %v14534_v33  ;;  %7913 = vperm.xlu0 %9939, %v7722_v3   ;;  %v7727_v15 = vld [vmem:[%s15613_s3 + $0x120] sm:$0xff]  ;;  %v7726_v33 = vld [vmem:[%s15613_s3 + $0x118] sm:$0xff] }
 0x3d1   :  { %v7479_v43 = vpop.permute.xlu1 %7478 }
 0x3d2   :  { %v7474_v44 = vpop.permute.xlu0 %7473  ;;  %v15071_v4 = vmul.f32 %v7479_v43, %v14564_v1  ;;  %7928 = vperm.xlu1 %9940, %v7725_v7  }
 0x3d3   :  { %v15074_v17 = vmul.f32 %v7474_v44, %v14556_v48  ;;  %7923 = vperm.xlu0 %9939, %v7724_v20   ;;  %v7729_v44 = vld [vmem:[%s15613_s3 + $0x130] sm:$0xff]  ;;  %v7728_v48 = vld [vmem:[%s15613_s3 + $0x128] sm:$0xff] }
 0x3d5   :  { %v7489_v6 = vpop.permute.xlu1 %7488 }
 0x3d6   :  { %v7484_v3 = vpop.permute.xlu0 %7483  ;;  %v15083_v0 = vmul.f32 %v7489_v6, %v14586_v35  ;;  %7938 = vperm.xlu1 %9940, %v7727_v15   ;;  %v7730_v15 = vld [vmem:[%s15613_s3 + $0x138] sm:$0xff] }
 0x3d7   :  { %v15086_v1 = vmul.f32 %v7484_v3, %v14578_v52  ;;  %7933 = vperm.xlu0 %9939, %v7726_v33   ;;  %v7731_v52 = vld [vmem:[%s15613_s3 + $0x140] sm:$0xff] }
 0x3d9   :  { %v7499_v43 = vpop.permute.xlu1 %7498 }
 0x3da   :  { %v7494_v7 = vpop.permute.xlu0 %7493  ;;  %v15095_v20 = vmul.f32 %v7499_v43, %v14608_v46  ;;  %7948 = vperm.xlu1 %9940, %v7729_v44   ;;  %v7732_v44 = vld [vmem:[%s15613_s3 + $0x148] sm:$0xff] }
 0x3db   :  { %v15098_v35 = vmul.f32 %v7494_v7, %v14600_v59  ;;  %7943 = vperm.xlu0 %9939, %v7728_v48   ;;  %v7733_v59 = vld [vmem:[%s15613_s3 + $0x150] sm:$0xff] }
 0x3dd   :  { %v7509_v33 = vpop.permute.xlu1 %7508 }
 0x3de   :  { %v7504_v6 = vpop.permute.xlu0 %7503  ;;  %v15107_v3 = vmul.f32 %v7509_v33, %v14630_v13  ;;  %7958 = vperm.xlu1 %9940, %v7731_v52   ;;  %v7734_v52 = vld [vmem:[%s15613_s3 + $0x158] sm:$0xff] }
 0x3df   :  { %v15110_v46 = vmul.f32 %v7504_v6, %v14622_v47  ;;  %7953 = vperm.xlu0 %9939, %v7730_v15   ;;  %v7735_v47 = vld [vmem:[%s15613_s3 + $0x160] sm:$0xff] }
 0x3e1   :  { %v7519_v48 = vpop.permute.xlu1 %7518 }
 0x3e2   :  { %v7514_v43 = vpop.permute.xlu0 %7513  ;;  %v15119_v7 = vmul.f32 %v7519_v48, %v14652_v16  ;;  %7968 = vperm.xlu1 %9940, %v7733_v59   ;;  %v7736_v59 = vld [vmem:[%s15613_s3 + $0x168] sm:$0xff] }
 0x3e3   :  { %v15122_v13 = vmul.f32 %v7514_v43, %v14644_v31  ;;  %7963 = vperm.xlu0 %9939, %v7732_v44   ;;  %v7737_v31 = vld [vmem:[%s15613_s3 + $0x170] sm:$0xff] }
 0x3e5   :  { %v7529_v15 = vpop.permute.xlu1 %7528 }
 0x3e6   :  { %v7524_v33 = vpop.permute.xlu0 %7523  ;;  %v15131_v6 = vmul.f32 %v7529_v15, %v14674_v9  ;;  %7978 = vperm.xlu1 %9940, %v7735_v47   ;;  %v7738_v47 = vld [vmem:[%s15613_s3 + $0x178] sm:$0xff] }
 0x3e7   :  { %v15134_v16 = vmul.f32 %v7524_v33, %v14666_v61  ;;  %7973 = vperm.xlu0 %9939, %v7734_v52   ;;  %v7739_v61 = vld [vmem:[%s15613_s3 + $0x180] sm:$0xff] }
 0x3e9   :  { %v7539_v44 = vpop.permute.xlu1 %7538 }
 0x3ea   :  { %v7534_v48 = vpop.permute.xlu0 %7533  ;;  %v15143_v43 = vmul.f32 %v7539_v44, %v14696_v58  ;;  %7988 = vperm.xlu1 %9940, %v7737_v31   ;;  %v7740_v31 = vld [vmem:[%s15613_s3 + $0x188] sm:$0xff] }
 0x3eb   :  { %v15146_v9 = vmul.f32 %v7534_v48, %v14688_v54  ;;  %7983 = vperm.xlu0 %9939, %v7736_v59   ;;  %v7741_v54 = vld [vmem:[%s15613_s3 + $0x190] sm:$0xff] }
 0x3ed   :  { %v7549_v52 = vpop.permute.xlu1 %7548 }
 0x3ee   :  { %v7544_v15 = vpop.permute.xlu0 %7543  ;;  %v15155_v33 = vmul.f32 %v7549_v52, %v14718_v38  ;;  %7998 = vperm.xlu1 %9940, %v7739_v61   ;;  %v7742_v61 = vld [vmem:[%s15613_s3 + $0x198] sm:$0xff] }
 0x3ef   :  { %v15158_v58 = vmul.f32 %v7544_v15, %v14710_v23  ;;  %7993 = vperm.xlu0 %9939, %v7738_v47   ;;  %v7743_v23 = vld [vmem:[%s15613_s3 + $0x1a0] sm:$0xff] }
 0x3f1   :  { %v7559_v59 = vpop.permute.xlu1 %7558 }
 0x3f2   :  { %v7554_v44 = vpop.permute.xlu0 %7553  ;;  %v15167_v48 = vmul.f32 %v7559_v59, %v14740_v50  ;;  %8008 = vperm.xlu1 %9940, %v7741_v54   ;;  %v7744_v54 = vld [vmem:[%s15613_s3 + $0x1a8] sm:$0xff] }
 0x3f3   :  { %v15170_v38 = vmul.f32 %v7554_v44, %v14732_v37  ;;  %8003 = vperm.xlu0 %9939, %v7740_v31   ;;  %v7745_v37 = vld [vmem:[%s15613_s3 + $0x1b0] sm:$0xff] }
 0x3f5   :  { %v7569_v47 = vpop.permute.xlu1 %7568 }
 0x3f6   :  { %v7564_v52 = vpop.permute.xlu0 %7563  ;;  %v15179_v15 = vmul.f32 %v7569_v47, %v14762_v27  ;;  %8018 = vperm.xlu1 %9940, %v7743_v23   ;;  %v7746_v23 = vld [vmem:[%s15613_s3 + $0x1b8] sm:$0xff] }
 0x3f7   :  { %v15182_v50 = vmul.f32 %v7564_v52, %v14754_v22  ;;  %8013 = vperm.xlu0 %9939, %v7742_v61   ;;  %v7747_v22 = vld [vmem:[%s15613_s3 + $0x1c0] sm:$0xff] }
 0x3f9   :  { %v7579_v31 = vpop.permute.xlu1 %7578 }
 0x3fa   :  { %v7574_v59 = vpop.permute.xlu0 %7573  ;;  %v15191_v44 = vmul.f32 %v7579_v31, %v14784_v24  ;;  %8028 = vperm.xlu1 %9940, %v7745_v37   ;;  %v7748_v37 = vld [vmem:[%s15613_s3 + $0x1c8] sm:$0xff] }
 0x3fb   :  { %v15194_v27 = vmul.f32 %v7574_v59, %v14776_v30  ;;  %8023 = vperm.xlu0 %9939, %v7744_v54   ;;  %v7749_v30 = vld [vmem:[%s15613_s3 + $0x1d0] sm:$0xff] }
 0x3fd   :  { %v7589_v61 = vpop.permute.xlu1 %7588 }
 0x3fe   :  { %v7584_v47 = vpop.permute.xlu0 %7583  ;;  %v15203_v52 = vmul.f32 %v7589_v61, %v14806_v29  ;;  %8038 = vperm.xlu1 %9940, %v7747_v22   ;;  %v7750_v22 = vld [vmem:[%s15613_s3 + $0x1d8] sm:$0xff] }
 0x3ff   :  { %v15206_v24 = vmul.f32 %v7584_v47, %v14798_v41  ;;  %8033 = vperm.xlu0 %9939, %v7746_v23   ;;  %v7751_v41 = vld [vmem:[%s15613_s3 + $0x1e0] sm:$0xff] }
 0x401   :  { %v7599_v54 = vpop.permute.xlu1 %7598 }
 0x402   :  { %v7594_v31 = vpop.permute.xlu0 %7593  ;;  %v15215_v59 = vmul.f32 %v7599_v54, %v14828_v56  ;;  %8048 = vperm.xlu1 %9940, %v7749_v30   ;;  %v7752_v30 = vld [vmem:[%s15613_s3 + $0x1e8] sm:$0xff] }
 0x403   :  { %v15218_v29 = vmul.f32 %v7594_v31, %v14820_v12  ;;  %8043 = vperm.xlu0 %9939, %v7748_v37   ;;  %v7753_v12 = vld [vmem:[%s15613_s3 + $0x1f0] sm:$0xff] }
 0x405   :  { %v7609_v23 = vpop.permute.xlu1 %7608 }
 0x406   :  { %v7604_v61 = vpop.permute.xlu0 %7603  ;;  %v15227_v47 = vmul.f32 %v7609_v23, %v14850_v45  ;;  %8058 = vperm.xlu1 %9940, %v7751_v41   ;;  %v16017_v41 = vld [vmem:[#allocation21_spill] sm:$0xff] }
 0x407   :  { %v15230_v56 = vmul.f32 %v7604_v61, %v14842_v19  ;;  %8053 = vperm.xlu0 %9939, %v7750_v22   ;;  %v7755_v19 = vld [vmem:[%s15613_s3 + $0x200] sm:$0xf]  ;;  %v7626_v22 = vmul.f32 %v14890_v21, %v16017_v41  ;;  %v7754_v23 = vld [vmem:[%s15613_s3 + $0x1f8] sm:$0xff] }
 0x408   :  { %16014 = vst [vmem:[#allocation38_spill] sm:$0xff] %v15227_v47 }
 0x409   :  { %v7619_v37 = vpop.permute.xlu1 %7618 }
 0x40a   :  { %v7614_v54 = vpop.permute.xlu0 %7613  ;;  %v15239_v31 = vmul.f32 %v7619_v37, %v14872_v11  ;;  %8068 = vperm.xlu1 %9940, %v7753_v12   ;;  %v7627_v37 = vmul.f32 %v14888_v53, %v14187_v25 }
 0x40b   :  { %v15242_v45 = vmul.f32 %v7614_v54, %v14864_v39  ;;  %8063 = vperm.xlu0 %9939, %v7752_v30   ;;  %v7628_v39 = vmul.f32 %v14910_v8, %v14208_v28  ;;  %v7629_v28 = vmul.f32 %v14908_v26, %v14212_v40 }
 0x40c   :  { %16015 = vst [vmem:[#allocation10_spill] sm:$0xff] %v15239_v31 }
 0x40d   :  { %16016 = vst [vmem:[#allocation37_spill] sm:$0xff] %v15242_v45  ;;  %v7759_v61 = vpop.permute.xlu1 %7758 }
 0x40e   :  { %v8081_v47 = vadd.f32 %v7759_v61, %v7626_v22  ;;  %v7624_v11 = vpop.permute.xlu0 %7623  ;;  %8078 = vperm.xlu1 %9940, %v7755_v19   ;;  %v7630_v22 = vmul.f32 %v14920_v42, %v14226_v49  ;;  %v7631_v42 = vmul.f32 %v14918_v62, %v14234_v14  ;;  %v7633_v62 = vmul.f32 %v14928_v60, %v14256_v18  ;;  %v16018_v60 = vld [vmem:[#allocation25_spill] sm:$0xff] }
 0x40f   :  { %v15253_v12 = vmul.f32 %v7624_v11, %v14895_v63  ;;  %8073 = vperm.xlu0 %9939, %v7754_v23  }
 0x410   :  { %v8146_v30 = vmax.f32 %v8081_v47, 0.0 }
 0x411   :  { %v7769_v21 = vpop.permute.xlu1 %7768 }
 0x412   :  { %v9873_v54 = vpack.c.bf16 %v8146_v30, %v8146_v30  ;;  %v8083_v41 = vadd.f32 %v7769_v21, %v7628_v39  ;;  %v7764_v31 = vpop.permute.xlu0 %7763  ;;  %v7634_v30 = vmul.f32 %v14940_v36, %v14270_v5 }
 0x413   :  { %v8082_v45 = vadd.f32 %v7764_v31, %v7627_v37  ;;  %v7632_v31 = vmul.f32 %v14930_v34, %v14248_v55 }
 0x414   :  { %9613 = vst.msk [vmem:[%s15614_s4 + $0x30c] sm:$0xf] %vm2081_vm1, %v9873_v54  ;;  %v8148_v63 = vmax.f32 %v8083_v41, 0.0 }
 0x415   :  { %v8147_v8 = vmax.f32 %v8082_v45, 0.0  ;;  %v7779_v47 = vpop.permute.xlu1 %7778 }
 0x416   :  { %v9875_v25 = vpack.c.bf16 %v8148_v63, %v8148_v63  ;;  %v8085_v53 = vadd.f32 %v7779_v47, %v7630_v22  ;;  %v7774_v19 = vpop.permute.xlu0 %7773  ;;  %v7636_v63 = vmul.f32 %v14950_v32, %v14292_v57 }
 0x417   :  { %v9874_v23 = vpack.c.bf16 %v8147_v8, %v8147_v8  ;;  %v8084_v61 = vadd.f32 %v7774_v19, %v7629_v28  ;;  %v7635_v28 = vmul.f32 %v16018_v60, %v14278_v10 }
 0x418   :  { %9615 = vst.msk [vmem:[%s15614_s4 + $0x314] sm:$0xf] %vm2081_vm1, %v9875_v25  ;;  %v8150_v49 = vmax.f32 %v8085_v53, 0.0 }
 0x419   :  { %9614 = vst.msk [vmem:[%s15614_s4 + $0x310] sm:$0xf] %vm2081_vm1, %v9874_v23  ;;  %v8149_v40 = vmax.f32 %v8084_v61, 0.0  ;;  %v7789_v26 = vpop.permute.xlu1 %7788  ;;  %v16019_v23 = vld [vmem:[#allocation81_spill] sm:$0xff] }
 0x41a   :  { %v9877_v45 = vpack.c.bf16 %v8150_v49, %v8150_v49  ;;  %v8087_v11 = vadd.f32 %v7789_v26, %v7632_v31  ;;  %v7784_v39 = vpop.permute.xlu0 %7783  ;;  %v16020_v61 = vld [vmem:[#allocation49_spill] sm:$0xff]  ;;  %v16021_v49 = vld [vmem:[#allocation22_spill] sm:$0xff] }
 0x41b   :  { %v9876_v55 = vpack.c.bf16 %v8149_v40, %v8149_v40  ;;  %v8086_v34 = vadd.f32 %v7784_v39, %v7631_v42  ;;  %v7638_v31 = vmul.f32 %v16020_v61, %v16019_v23  ;;  %v16022_v42 = vld [vmem:[#allocation44_spill] sm:$0xff] }
 0x41c   :  { %9617 = vst.msk [vmem:[%s15614_s4 + $0x31c] sm:$0xf] %vm2081_vm1, %v9877_v45  ;;  %v8152_v14 = vmax.f32 %v8087_v11, 0.0  ;;  %v7637_v40 = vmul.f32 %v16022_v42, %v16021_v49 }
 0x41d   :  { %9616 = vst.msk [vmem:[%s15614_s4 + $0x318] sm:$0xf] %vm2081_vm1, %v9876_v55  ;;  %v8151_v37 = vmax.f32 %v8086_v34, 0.0  ;;  %v7799_v21 = vpop.permute.xlu1 %7798 }
 0x41e   :  { %v9879_v54 = vpack.c.bf16 %v8152_v14, %v8152_v14  ;;  %v8089_v41 = vadd.f32 %v7799_v21, %v7634_v30  ;;  %v7794_v22 = vpop.permute.xlu0 %7793  ;;  %v16023_v14 = vld [vmem:[#allocation83_spill] sm:$0xff] }
 0x41f   :  { %v9878_v5 = vpack.c.bf16 %v8151_v37, %v8151_v37  ;;  %v8088_v36 = vadd.f32 %v7794_v22, %v7633_v62  ;;  %v16024_v62 = vld [vmem:[#allocation47_spill] sm:$0xff] }
 0x420   :  { %9619 = vst.msk [vmem:[%s15614_s4 + $0x324] sm:$0xf] %vm2081_vm1, %v9879_v54  ;;  %v8154_v18 = vmax.f32 %v8089_v41, 0.0  ;;  %v7640_v37 = vmul.f32 %v16024_v62, %v16023_v14  ;;  %v16025_v54 = vld [vmem:[#allocation82_spill] sm:$0xff]  ;;  %v16026_v41 = vld [vmem:[#allocation28_spill] sm:$0xff] }
 0x421   :  { %9618 = vst.msk [vmem:[%s15614_s4 + $0x320] sm:$0xf] %vm2081_vm1, %v9878_v5  ;;  %v8153_v8 = vmax.f32 %v8088_v36, 0.0  ;;  %v7809_v47 = vpop.permute.xlu1 %7808  ;;  %v7639_v22 = vmul.f32 %v16026_v41, %v16025_v54 }
 0x422   :  { %v9881_v25 = vpack.c.bf16 %v8154_v18, %v8154_v18  ;;  %v8091_v53 = vadd.f32 %v7809_v47, %v7636_v63  ;;  %v7804_v19 = vpop.permute.xlu0 %7803  ;;  %v16027_v47 = vld [vmem:[#allocation85_spill] sm:$0xff] }
 0x423   :  { %v9880_v57 = vpack.c.bf16 %v8153_v8, %v8153_v8  ;;  %v8090_v32 = vadd.f32 %v7804_v19, %v7635_v28 }
 0x424   :  { %9621 = vst.msk [vmem:[%s15614_s4 + $0x32c] sm:$0xf] %vm2081_vm1, %v9881_v25  ;;  %v8156_v10 = vmax.f32 %v8091_v53, 0.0  ;;  %v16028_v25 = vld [vmem:[#allocation6_spill] sm:$0xff] }
 0x425   :  { %9620 = vst.msk [vmem:[%s15614_s4 + $0x328] sm:$0xf] %vm2081_vm1, %v9880_v57  ;;  %v8155_v26 = vmax.f32 %v8090_v32, 0.0  ;;  %v7819_v45 = vpop.permute.xlu1 %7818  ;;  %v7642_v53 = vmul.f32 %v16028_v25, %v16027_v47  ;;  %v16029_v57 = vld [vmem:[#allocation84_spill] sm:$0xff]  ;;  %v16030_v32 = vld [vmem:[#allocation27_spill] sm:$0xff] }
 0x426   :  { %v9883_v11 = vpack.c.bf16 %v8156_v10, %v8156_v10  ;;  %v8093_v39 = vadd.f32 %v7819_v45, %v7638_v31  ;;  %v7814_v55 = vpop.permute.xlu0 %7813  ;;  %v7641_v23 = vmul.f32 %v16030_v32, %v16029_v57  ;;  %v16031_v45 = vld [vmem:[#allocation87_spill] sm:$0xff] }
 0x427   :  { %v9882_v34 = vpack.c.bf16 %v8155_v26, %v8155_v26  ;;  %v8092_v30 = vadd.f32 %v7814_v55, %v7637_v40 }
 0x428   :  { %9623 = vst.msk [vmem:[%s15614_s4 + $0x334] sm:$0xf] %vm2081_vm1, %v9883_v11  ;;  %v8158_v21 = vmax.f32 %v8093_v39, 0.0  ;;  %v16032_v11 = vld [vmem:[#allocation48_spill] sm:$0xff] }
 0x429   :  { %9622 = vst.msk [vmem:[%s15614_s4 + $0x330] sm:$0xf] %vm2081_vm1, %v9882_v34  ;;  %v8157_v5 = vmax.f32 %v8092_v30, 0.0  ;;  %v7829_v36 = vpop.permute.xlu1 %7828  ;;  %v7644_v39 = vmul.f32 %v16032_v11, %v16031_v45  ;;  %v16033_v34 = vld [vmem:[#allocation86_spill] sm:$0xff] }
 0x42a   :  { %v9885_v63 = vpack.c.bf16 %v8158_v21, %v8158_v21  ;;  %v8095_v18 = vadd.f32 %v7829_v36, %v7640_v37  ;;  %v7824_v60 = vpop.permute.xlu0 %7823  ;;  %v16034_v30 = vld [vmem:[#allocation30_spill] sm:$0xff]  ;;  %v16035_v36 = vld [vmem:[#allocation89_spill] sm:$0xff] }
 0x42b   :  { %v9884_v28 = vpack.c.bf16 %v8157_v5, %v8157_v5  ;;  %v8094_v8 = vadd.f32 %v7824_v60, %v7639_v22  ;;  %v7643_v14 = vmul.f32 %v16034_v30, %v16033_v34 }
 0x42c   :  { %9625 = vst.msk [vmem:[%s15614_s4 + $0x33c] sm:$0xf] %vm2081_vm1, %v9885_v63  ;;  %v8160_v19 = vmax.f32 %v8095_v18, 0.0  ;;  %v16036_v63 = vld [vmem:[#allocation53_spill] sm:$0xff] }
 0x42d   :  { %9624 = vst.msk [vmem:[%s15614_s4 + $0x338] sm:$0xf] %vm2081_vm1, %v9884_v28  ;;  %v8159_v61 = vmax.f32 %v8094_v8, 0.0  ;;  %v7839_v31 = vpop.permute.xlu1 %7838  ;;  %v7646_v18 = vmul.f32 %v16036_v63, %v16035_v36  ;;  %v16037_v28 = vld [vmem:[#allocation88_spill] sm:$0xff]  ;;  %v16038_v8 = vld [vmem:[#allocation29_spill] sm:$0xff] }
 0x42e   :  { %v9887_v10 = vpack.c.bf16 %v8160_v19, %v8160_v19  ;;  %v8097_v49 = vadd.f32 %v7839_v31, %v7642_v53  ;;  %v7834_v42 = vpop.permute.xlu0 %7833  ;;  %v7645_v47 = vmul.f32 %v16038_v8, %v16037_v28  ;;  %v16039_v31 = vld [vmem:[#allocation91_spill] sm:$0xff] }
 0x42f   :  { %v9886_v40 = vpack.c.bf16 %v8159_v61, %v8159_v61  ;;  %v8096_v26 = vadd.f32 %v7834_v42, %v7641_v23 }
 0x430   :  { %9627 = vst.msk [vmem:[%s15614_s4 + $0x344] sm:$0xf] %vm2081_vm1, %v9887_v10  ;;  %v8162_v55 = vmax.f32 %v8097_v49, 0.0  ;;  %v16040_v10 = vld [vmem:[#allocation51_spill] sm:$0xff] }
 0x431   :  { %9626 = vst.msk [vmem:[%s15614_s4 + $0x340] sm:$0xf] %vm2081_vm1, %v9886_v40  ;;  %v8161_v62 = vmax.f32 %v8096_v26, 0.0  ;;  %v7849_v37 = vpop.permute.xlu1 %7848  ;;  %v7648_v49 = vmul.f32 %v16040_v10, %v16039_v31  ;;  %v16041_v40 = vld [vmem:[#allocation90_spill] sm:$0xff]  ;;  %v16042_v26 = vld [vmem:[#allocation32_spill] sm:$0xff] }
 0x432   :  { %v9889_v21 = vpack.c.bf16 %v8162_v55, %v8162_v55  ;;  %v8099_v54 = vadd.f32 %v7849_v37, %v7644_v39  ;;  %v7844_v41 = vpop.permute.xlu0 %7843  ;;  %v7647_v45 = vmul.f32 %v16042_v26, %v16041_v40  ;;  %v16043_v37 = vld [vmem:[#allocation93_spill] sm:$0xff] }
 0x433   :  { %v9888_v22 = vpack.c.bf16 %v8161_v62, %v8161_v62  ;;  %v8098_v5 = vadd.f32 %v7844_v41, %v7643_v14 }
 0x434   :  { %9629 = vst.msk [vmem:[%s15614_s4 + $0x34c] sm:$0xf] %vm2081_vm1, %v9889_v21  ;;  %v8164_v60 = vmax.f32 %v8099_v54, 0.0  ;;  %v16044_v21 = vld [vmem:[#allocation8_spill] sm:$0xff] }
 0x435   :  { %9628 = vst.msk [vmem:[%s15614_s4 + $0x348] sm:$0xf] %vm2081_vm1, %v9888_v22  ;;  %v8163_v25 = vmax.f32 %v8098_v5, 0.0  ;;  %v7859_v53 = vpop.permute.xlu1 %7858  ;;  %v7650_v54 = vmul.f32 %v16044_v21, %v16043_v37  ;;  %v16045_v22 = vld [vmem:[#allocation92_spill] sm:$0xff]  ;;  %v16046_v5 = vld [vmem:[#allocation31_spill] sm:$0xff] }
 0x436   :  { %v9891_v19 = vpack.c.bf16 %v8164_v60, %v8164_v60  ;;  %v8101_v57 = vadd.f32 %v7859_v53, %v7646_v18  ;;  %v7854_v32 = vpop.permute.xlu0 %7853  ;;  %v7649_v36 = vmul.f32 %v16046_v5, %v16045_v22  ;;  %v16047_v53 = vld [vmem:[#allocation24_spill] sm:$0xff] }
 0x437   :  { %v9890_v23 = vpack.c.bf16 %v8163_v25, %v8163_v25  ;;  %v8100_v61 = vadd.f32 %v7854_v32, %v7645_v47 }
 0x438   :  { %9631 = vst.msk [vmem:[%s15614_s4 + $0x354] sm:$0xf] %vm2081_vm1, %v9891_v19  ;;  %v8166_v42 = vmax.f32 %v8101_v57, 0.0  ;;  %v16048_v19 = vld [vmem:[#allocation52_spill] sm:$0xff] }
 0x439   :  { %9630 = vst.msk [vmem:[%s15614_s4 + $0x350] sm:$0xf] %vm2081_vm1, %v9890_v23  ;;  %v8165_v11 = vmax.f32 %v8100_v61, 0.0  ;;  %v7869_v39 = vpop.permute.xlu1 %7868  ;;  %v7652_v57 = vmul.f32 %v16048_v19, %v16047_v53  ;;  %v16049_v23 = vld [vmem:[#allocation42_spill] sm:$0xff] }
 0x43a   :  { %v9893_v55 = vpack.c.bf16 %v8166_v42, %v8166_v42  ;;  %v8103_v34 = vadd.f32 %v7869_v39, %v7648_v49  ;;  %v7864_v30 = vpop.permute.xlu0 %7863  ;;  %v16050_v61 = vld [vmem:[#allocation34_spill] sm:$0xff]  ;;  %v16051_v39 = vld [vmem:[#allocation23_spill] sm:$0xff] }
 0x43b   :  { %v9892_v14 = vpack.c.bf16 %v8165_v11, %v8165_v11  ;;  %v8102_v62 = vadd.f32 %v7864_v30, %v7647_v45  ;;  %v7651_v31 = vmul.f32 %v16050_v61, %v16049_v23 }
 0x43c   :  { %9633 = vst.msk [vmem:[%s15614_s4 + $0x35c] sm:$0xf] %vm2081_vm1, %v9893_v55  ;;  %v8168_v41 = vmax.f32 %v8103_v34, 0.0  ;;  %v16052_v55 = vld [vmem:[#allocation57_spill] sm:$0xff] }
 0x43d   :  { %9632 = vst.msk [vmem:[%s15614_s4 + $0x358] sm:$0xf] %vm2081_vm1, %v9892_v14  ;;  %v8167_v63 = vmax.f32 %v8102_v62, 0.0  ;;  %v7879_v18 = vpop.permute.xlu1 %7878  ;;  %v7654_v34 = vmul.f32 %v16052_v55, %v16051_v39  ;;  %v16053_v14 = vld [vmem:[#allocation45_spill] sm:$0xff] }
 0x43e   :  { %v9895_v60 = vpack.c.bf16 %v8168_v41, %v8168_v41  ;;  %v8105_v28 = vadd.f32 %v7879_v18, %v7650_v54  ;;  %v7874_v8 = vpop.permute.xlu0 %7873  ;;  %v16054_v62 = vld [vmem:[#allocation33_spill] sm:$0xff]  ;;  %v16055_v18 = vld [vmem:[#allocation26_spill] sm:$0xff] }
 0x43f   :  { %v9894_v47 = vpack.c.bf16 %v8167_v63, %v8167_v63  ;;  %v8104_v25 = vadd.f32 %v7874_v8, %v7649_v36  ;;  %v7653_v37 = vmul.f32 %v16054_v62, %v16053_v14 }
 0x440   :  { %9635 = vst.msk [vmem:[%s15614_s4 + $0x364] sm:$0xf] %vm2081_vm1, %v9895_v60  ;;  %v8170_v32 = vmax.f32 %v8105_v28, 0.0  ;;  %v16056_v60 = vld [vmem:[#allocation55_spill] sm:$0xff] }
 0x441   :  { %9634 = vst.msk [vmem:[%s15614_s4 + $0x360] sm:$0xf] %vm2081_vm1, %v9894_v47  ;;  %v8169_v10 = vmax.f32 %v8104_v25, 0.0  ;;  %v7889_v49 = vpop.permute.xlu1 %7888  ;;  %v7656_v28 = vmul.f32 %v16056_v60, %v16055_v18  ;;  %v16057_v47 = vld [vmem:[#allocation2_spill] sm:$0xff]  ;;  %v16058_v25 = vld [vmem:[#allocation36_spill] sm:$0xff] }
 0x442   :  { %v9897_v42 = vpack.c.bf16 %v8170_v32, %v8170_v32  ;;  %v8107_v40 = vadd.f32 %v7889_v49, %v7652_v57  ;;  %v7884_v26 = vpop.permute.xlu0 %7883  ;;  %v7655_v53 = vmul.f32 %v16058_v25, %v16057_v47 }
 0x443   :  { %v9896_v45 = vpack.c.bf16 %v8169_v10, %v8169_v10  ;;  %v8106_v11 = vadd.f32 %v7884_v26, %v7651_v31 }
 0x444   :  { %9637 = vst.msk [vmem:[%s15614_s4 + $0x36c] sm:$0xf] %vm2081_vm1, %v9897_v42  ;;  %v8172_v30 = vmax.f32 %v8107_v40, 0.0  ;;  %v16059_v42 = vld [vmem:[#allocation4_spill] sm:$0xff]  ;;  %v16060_v40 = vld [vmem:[#allocation35_spill] sm:$0xff] }
 0x445   :  { %9636 = vst.msk [vmem:[%s15614_s4 + $0x368] sm:$0xf] %vm2081_vm1, %v9896_v45  ;;  %v8171_v21 = vmax.f32 %v8106_v11, 0.0  ;;  %v7899_v54 = vpop.permute.xlu1 %7898  ;;  %v7657_v26 = vmul.f32 %v16060_v40, %v16059_v42 }
 0x446   :  { %v9899_v41 = vpack.c.bf16 %v8172_v30, %v8172_v30  ;;  %v8109_v22 = vadd.f32 %v7899_v54, %v7654_v34  ;;  %v7894_v5 = vpop.permute.xlu0 %7893 }
 0x447   :  { %v9898_v36 = vpack.c.bf16 %v8171_v21, %v8171_v21  ;;  %v8108_v63 = vadd.f32 %v7894_v5, %v7653_v37 }
 0x448   :  { %9639 = vst.msk [vmem:[%s15614_s4 + $0x374] sm:$0xf] %vm2081_vm1, %v9899_v41  ;;  %v8174_v8 = vmax.f32 %v8109_v22, 0.0 }
 0x449   :  { %9638 = vst.msk [vmem:[%s15614_s4 + $0x370] sm:$0xf] %vm2081_vm1, %v9898_v36  ;;  %v8173_v19 = vmax.f32 %v8108_v63, 0.0  ;;  %v7909_v57 = vpop.permute.xlu1 %7908 }
 0x44a   :  { %v9901_v32 = vpack.c.bf16 %v8174_v8, %v8174_v8  ;;  %v8111_v23 = vadd.f32 %v7909_v57, %v7656_v28  ;;  %v7904_v61 = vpop.permute.xlu0 %7903 }
 0x44b   :  { %v9900_v31 = vpack.c.bf16 %v8173_v19, %v8173_v19  ;;  %v8110_v10 = vadd.f32 %v7904_v61, %v7655_v53 }
 0x44c   :  { %9641 = vst.msk [vmem:[%s15614_s4 + $0x37c] sm:$0xf] %vm2081_vm1, %v9901_v32  ;;  %v8176_v49 = vmax.f32 %v8111_v23, 0.0 }
 0x44d   :  { %9640 = vst.msk [vmem:[%s15614_s4 + $0x378] sm:$0xf] %vm2081_vm1, %v9900_v31  ;;  %v8175_v45 = vmax.f32 %v8110_v10, 0.0  ;;  %v7919_v11 = vpop.permute.xlu1 %7918 }
 0x44e   :  { %v9903_v39 = vpack.c.bf16 %v8176_v49, %v8176_v49  ;;  %v8113_v55 = vadd.f32 %v7919_v11, %v15062_v2  ;;  %v7914_v34 = vpop.permute.xlu0 %7913 }
 0x44f   :  { %v9902_v30 = vpack.c.bf16 %v8175_v45, %v8175_v45  ;;  %v8112_v14 = vadd.f32 %v7914_v34, %v7657_v26 }
 0x450   :  { %9643 = vst.msk [vmem:[%s15614_s4 + $0x384] sm:$0xf] %vm2081_vm1, %v9903_v39  ;;  %v8178_v62 = vmax.f32 %v8113_v55, 0.0 }
 0x451   :  { %9642 = vst.msk [vmem:[%s15614_s4 + $0x380] sm:$0xf] %vm2081_vm1, %v9902_v30  ;;  %v8177_v37 = vmax.f32 %v8112_v14, 0.0  ;;  %v7929_v21 = vpop.permute.xlu1 %7928 }
 0x452   :  { %v9905_v54 = vpack.c.bf16 %v8178_v62, %v8178_v62  ;;  %v8115_v41 = vadd.f32 %v7929_v21, %v15074_v17  ;;  %v7924_v2 = vpop.permute.xlu0 %7923 }
 0x453   :  { %v9904_v22 = vpack.c.bf16 %v8177_v37, %v8177_v37  ;;  %v8114_v5 = vadd.f32 %v7924_v2, %v15059_v51 }
 0x454   :  { %9645 = vst.msk [vmem:[%s15614_s4 + $0x38c] sm:$0xf] %vm2081_vm1, %v9905_v54  ;;  %v8180_v36 = vmax.f32 %v8115_v41, 0.0 }
 0x455   :  { %9644 = vst.msk [vmem:[%s15614_s4 + $0x388] sm:$0xf] %vm2081_vm1, %v9904_v22  ;;  %v8179_v63 = vmax.f32 %v8114_v5, 0.0  ;;  %v7939_v18 = vpop.permute.xlu1 %7938 }
 0x456   :  { %v9907_v60 = vpack.c.bf16 %v8180_v36, %v8180_v36  ;;  %v8117_v17 = vadd.f32 %v7939_v18, %v15086_v1  ;;  %v7934_v28 = vpop.permute.xlu0 %7933 }
 0x457   :  { %v9906_v8 = vpack.c.bf16 %v8179_v63, %v8179_v63  ;;  %v8116_v51 = vadd.f32 %v7934_v28, %v15071_v4 }
 0x458   :  { %9647 = vst.msk [vmem:[%s15614_s4 + $0x394] sm:$0xf] %vm2081_vm1, %v9907_v60  ;;  %v8182_v47 = vmax.f32 %v8117_v17, 0.0 }
 0x459   :  { %9646 = vst.msk [vmem:[%s15614_s4 + $0x390] sm:$0xf] %vm2081_vm1, %v9906_v8  ;;  %v8181_v25 = vmax.f32 %v8116_v51, 0.0  ;;  %v7949_v53 = vpop.permute.xlu1 %7948 }
 0x45a   :  { %v9909_v19 = vpack.c.bf16 %v8182_v47, %v8182_v47  ;;  %v8119_v1 = vadd.f32 %v7949_v53, %v15098_v35  ;;  %v7944_v57 = vpop.permute.xlu0 %7943 }
 0x45b   :  { %v9908_v32 = vpack.c.bf16 %v8181_v25, %v8181_v25  ;;  %v8118_v4 = vadd.f32 %v7944_v57, %v15083_v0 }
 0x45c   :  { %9649 = vst.msk [vmem:[%s15614_s4 + $0x39c] sm:$0xf] %vm2081_vm1, %v9909_v19  ;;  %v8184_v23 = vmax.f32 %v8119_v1, 0.0 }
 0x45d   :  { %9648 = vst.msk [vmem:[%s15614_s4 + $0x398] sm:$0xf] %vm2081_vm1, %v9908_v32  ;;  %v8183_v61 = vmax.f32 %v8118_v4, 0.0  ;;  %v7959_v31 = vpop.permute.xlu1 %7958 }
 0x45e   :  { %v9911_v10 = vpack.c.bf16 %v8184_v23, %v8184_v23  ;;  %v8121_v35 = vadd.f32 %v7959_v31, %v15110_v46  ;;  %v7954_v49 = vpop.permute.xlu0 %7953 }
 0x45f   :  { %v9910_v42 = vpack.c.bf16 %v8183_v61, %v8183_v61  ;;  %v8120_v0 = vadd.f32 %v7954_v49, %v15095_v20 }
 0x460   :  { %9651 = vst.msk [vmem:[%s15614_s4 + $0x3a4] sm:$0xf] %vm2081_vm1, %v9911_v10  ;;  %v8186_v40 = vmax.f32 %v8121_v35, 0.0 }
 0x461   :  { %9650 = vst.msk [vmem:[%s15614_s4 + $0x3a0] sm:$0xf] %vm2081_vm1, %v9910_v42  ;;  %v8185_v26 = vmax.f32 %v8120_v0, 0.0  ;;  %v7969_v45 = vpop.permute.xlu1 %7968 }
 0x462   :  { %v9913_v11 = vpack.c.bf16 %v8186_v40, %v8186_v40  ;;  %v8123_v46 = vadd.f32 %v7969_v45, %v15122_v13  ;;  %v7964_v39 = vpop.permute.xlu0 %7963 }
 0x463   :  { %v9912_v55 = vpack.c.bf16 %v8185_v26, %v8185_v26  ;;  %v8122_v20 = vadd.f32 %v7964_v39, %v15107_v3 }
 0x464   :  { %9653 = vst.msk [vmem:[%s15614_s4 + $0x3ac] sm:$0xf] %vm2081_vm1, %v9913_v11  ;;  %v8188_v34 = vmax.f32 %v8123_v46, 0.0 }
 0x465   :  { %9652 = vst.msk [vmem:[%s15614_s4 + $0x3a8] sm:$0xf] %vm2081_vm1, %v9912_v55  ;;  %v8187_v30 = vmax.f32 %v8122_v20, 0.0  ;;  %v7979_v14 = vpop.permute.xlu1 %7978 }
 0x466   :  { %v9915_v62 = vpack.c.bf16 %v8188_v34, %v8188_v34  ;;  %v8125_v13 = vadd.f32 %v7979_v14, %v15134_v16  ;;  %v7974_v37 = vpop.permute.xlu0 %7973 }
 0x467   :  { %v9914_v21 = vpack.c.bf16 %v8187_v30, %v8187_v30  ;;  %v8124_v3 = vadd.f32 %v7974_v37, %v15119_v7 }
 0x468   :  { %9655 = vst.msk [vmem:[%s15614_s4 + $0x3b4] sm:$0xf] %vm2081_vm1, %v9915_v62  ;;  %v8190_v54 = vmax.f32 %v8125_v13, 0.0 }
 0x469   :  { %9654 = vst.msk [vmem:[%s15614_s4 + $0x3b0] sm:$0xf] %vm2081_vm1, %v9914_v21  ;;  %v8189_v41 = vmax.f32 %v8124_v3, 0.0  ;;  %v7989_v2 = vpop.permute.xlu1 %7988 }
 0x46a   :  { %v9917_v22 = vpack.c.bf16 %v8190_v54, %v8190_v54  ;;  %v8127_v16 = vadd.f32 %v7989_v2, %v15146_v9  ;;  %v7984_v5 = vpop.permute.xlu0 %7983 }
 0x46b   :  { %v9916_v36 = vpack.c.bf16 %v8189_v41, %v8189_v41  ;;  %v8126_v7 = vadd.f32 %v7984_v5, %v15131_v6 }
 0x46c   :  { %9657 = vst.msk [vmem:[%s15614_s4 + $0x3bc] sm:$0xf] %vm2081_vm1, %v9917_v22  ;;  %v8192_v63 = vmax.f32 %v8127_v16, 0.0 }
 0x46d   :  { %9656 = vst.msk [vmem:[%s15614_s4 + $0x3b8] sm:$0xf] %vm2081_vm1, %v9916_v36  ;;  %v8191_v18 = vmax.f32 %v8126_v7, 0.0  ;;  %v7999_v60 = vpop.permute.xlu1 %7998  ;;  %v16061_v7 = vld [vmem:[#allocation37_spill] sm:$0xff] }
 0x46e   :  { %v9919_v17 = vpack.c.bf16 %v8192_v63, %v8192_v63  ;;  %v8129_v9 = vadd.f32 %v7999_v60, %v15158_v58  ;;  %v7994_v28 = vpop.permute.xlu0 %7993  ;;  %v16062_v60 = vld [vmem:[#allocation38_spill] sm:$0xff] }
 0x46f   :  { %v9918_v8 = vpack.c.bf16 %v8191_v18, %v8191_v18  ;;  %v8128_v6 = vadd.f32 %v7994_v28, %v15143_v43 }
 0x470   :  { %9659 = vst.msk [vmem:[%s15614_s4 + $0x3c4] sm:$0xf] %vm2081_vm1, %v9919_v17  ;;  %v8194_v51 = vmax.f32 %v8129_v9, 0.0 }
 0x471   :  { %9658 = vst.msk [vmem:[%s15614_s4 + $0x3c0] sm:$0xf] %vm2081_vm1, %v9918_v8  ;;  %v8193_v47 = vmax.f32 %v8128_v6, 0.0  ;;  %v8009_v25 = vpop.permute.xlu1 %8008 }
 0x472   :  { %v9921_v53 = vpack.c.bf16 %v8194_v51, %v8194_v51  ;;  %v8131_v58 = vadd.f32 %v8009_v25, %v15170_v38  ;;  %v8004_v19 = vpop.permute.xlu0 %8003  ;;  %v16063_v25 = vld [vmem:[#allocation10_spill] sm:$0xff] }
 0x473   :  { %v9920_v1 = vpack.c.bf16 %v8193_v47, %v8193_v47  ;;  %v8130_v43 = vadd.f32 %v8004_v19, %v15155_v33 }
 0x474   :  { %9661 = vst.msk [vmem:[%s15614_s4 + $0x3cc] sm:$0xf] %vm2081_vm1, %v9921_v53  ;;  %v8196_v57 = vmax.f32 %v8131_v58, 0.0 }
 0x475   :  { %9660 = vst.msk [vmem:[%s15614_s4 + $0x3c8] sm:$0xf] %vm2081_vm1, %v9920_v1  ;;  %v8195_v32 = vmax.f32 %v8130_v43, 0.0  ;;  %v8019_v4 = vpop.permute.xlu1 %8018 }
 0x476   :  { %v9923_v23 = vpack.c.bf16 %v8196_v57, %v8196_v57  ;;  %v8133_v38 = vadd.f32 %v8019_v4, %v15182_v50  ;;  %v8014_v61 = vpop.permute.xlu0 %8013 }
 0x477   :  { %v9922_v31 = vpack.c.bf16 %v8195_v32, %v8195_v32  ;;  %v8132_v33 = vadd.f32 %v8014_v61, %v15167_v48 }
 0x478   :  { %9663 = vst.msk [vmem:[%s15614_s4 + $0x3d4] sm:$0xf] %vm2081_vm1, %v9923_v23  ;;  %v8198_v10 = vmax.f32 %v8133_v38, 0.0 }
 0x479   :  { %9662 = vst.msk [vmem:[%s15614_s4 + $0x3d0] sm:$0xf] %vm2081_vm1, %v9922_v31  ;;  %v8197_v35 = vmax.f32 %v8132_v33, 0.0  ;;  %v8029_v49 = vpop.permute.xlu1 %8028 }
 0x47a   :  { %v9925_v42 = vpack.c.bf16 %v8198_v10, %v8198_v10  ;;  %v8135_v50 = vadd.f32 %v8029_v49, %v15194_v27  ;;  %v8024_v0 = vpop.permute.xlu0 %8023 }
 0x47b   :  { %v9924_v40 = vpack.c.bf16 %v8197_v35, %v8197_v35  ;;  %v8134_v48 = vadd.f32 %v8024_v0, %v15179_v15 }
 0x47c   :  { %9665 = vst.msk [vmem:[%s15614_s4 + $0x3dc] sm:$0xf] %vm2081_vm1, %v9925_v42  ;;  %v8200_v26 = vmax.f32 %v8135_v50, 0.0 }
 0x47d   :  { %9664 = vst.msk [vmem:[%s15614_s4 + $0x3d8] sm:$0xf] %vm2081_vm1, %v9924_v40  ;;  %v8199_v45 = vmax.f32 %v8134_v48, 0.0  ;;  %v8039_v11 = vpop.permute.xlu1 %8038 }
 0x47e   :  { %v9927_v46 = vpack.c.bf16 %v8200_v26, %v8200_v26  ;;  %v8137_v27 = vadd.f32 %v8039_v11, %v15206_v24  ;;  %v8034_v39 = vpop.permute.xlu0 %8033 }
 0x47f   :  { %v9926_v55 = vpack.c.bf16 %v8199_v45, %v8199_v45  ;;  %v8136_v15 = vadd.f32 %v8034_v39, %v15191_v44 }
 0x480   :  { %9667 = vst.msk [vmem:[%s15614_s4 + $0x3e4] sm:$0xf] %vm2081_vm1, %v9927_v46  ;;  %v8202_v20 = vmax.f32 %v8137_v27, 0.0 }
 0x481   :  { %9666 = vst.msk [vmem:[%s15614_s4 + $0x3e0] sm:$0xf] %vm2081_vm1, %v9926_v55  ;;  %v8201_v34 = vmax.f32 %v8136_v15, 0.0  ;;  %v8049_v30 = vpop.permute.xlu1 %8048 }
 0x482   :  { %v9929_v14 = vpack.c.bf16 %v8202_v20, %v8202_v20  ;;  %v8139_v24 = vadd.f32 %v8049_v30, %v15218_v29  ;;  %v8044_v62 = vpop.permute.xlu0 %8043 }
 0x483   :  { %v9928_v13 = vpack.c.bf16 %v8201_v34, %v8201_v34  ;;  %v8138_v44 = vadd.f32 %v8044_v62, %v15203_v52 }
 0x484   :  { %9669 = vst.msk [vmem:[%s15614_s4 + $0x3ec] sm:$0xf] %vm2081_vm1, %v9929_v14  ;;  %v8204_v37 = vmax.f32 %v8139_v24, 0.0 }
 0x485   :  { %9668 = vst.msk [vmem:[%s15614_s4 + $0x3e8] sm:$0xf] %vm2081_vm1, %v9928_v13  ;;  %v8203_v21 = vmax.f32 %v8138_v44, 0.0  ;;  %v8059_v3 = vpop.permute.xlu1 %8058 }
 0x486   :  { %v9931_v54 = vpack.c.bf16 %v8204_v37, %v8204_v37  ;;  %v8141_v29 = vadd.f32 %v8059_v3, %v15230_v56  ;;  %v8054_v41 = vpop.permute.xlu0 %8053 }
 0x487   :  { %v9930_v2 = vpack.c.bf16 %v8203_v21, %v8203_v21  ;;  %v8140_v52 = vadd.f32 %v8054_v41, %v15215_v59 }
 0x488   :  { %9671 = vst.msk [vmem:[%s15614_s4 + $0x3f4] sm:$0xf] %vm2081_vm1, %v9931_v54  ;;  %v8206_v22 = vmax.f32 %v8141_v29, 0.0 }
 0x489   :  { %9670 = vst.msk [vmem:[%s15614_s4 + $0x3f0] sm:$0xf] %vm2081_vm1, %v9930_v2  ;;  %v8205_v16 = vmax.f32 %v8140_v52, 0.0  ;;  %v8069_v5 = vpop.permute.xlu1 %8068 }
 0x48a   :  { %v9933_v36 = vpack.c.bf16 %v8206_v22, %v8206_v22  ;;  %v8143_v56 = vadd.f32 %v8069_v5, %v16061_v7  ;;  %v8064_v63 = vpop.permute.xlu0 %8063 }
 0x48b   :  { %v9932_v18 = vpack.c.bf16 %v8205_v16, %v8205_v16  ;;  %v8142_v59 = vadd.f32 %v8064_v63, %v16062_v60 }
 0x48c   :  { %9673 = vst.msk [vmem:[%s15614_s4 + $0x3fc] sm:$0xf] %vm2081_vm1, %v9933_v36  ;;  %v8208_v17 = vmax.f32 %v8143_v56, 0.0 }
 0x48d   :  { %9672 = vst.msk [vmem:[%s15614_s4 + $0x3f8] sm:$0xf] %vm2081_vm1, %v9932_v18  ;;  %v8207_v9 = vmax.f32 %v8142_v59, 0.0  ;;  %v8079_v28 = vpop.permute.xlu1 %8078 }
 0x48e   :  { %v9935_v8 = vpack.c.bf16 %v8208_v17, %v8208_v17  ;;  %v8145_v6 = vadd.f32 %v8079_v28, %v15253_v12  ;;  %v8074_v51 = vpop.permute.xlu0 %8073 }
 0x48f   :  { %v9934_v47 = vpack.c.bf16 %v8207_v9, %v8207_v9  ;;  %v8144_v53 = vadd.f32 %v8074_v51, %v16063_v25 }
 0x490   :  { %9675 = vst.msk [vmem:[%s15614_s4 + $0x404] sm:$0xf] %vm2081_vm1, %v9935_v8  ;;  %v8210_v58 = vmax.f32 %v8145_v6, 0.0 }
 0x491   :  { %9674 = vst.msk [vmem:[%s15614_s4 + $0x400] sm:$0xf] %vm2081_vm1, %v9934_v47  ;;  %v8209_v19 = vmax.f32 %v8144_v53, 0.0 }
 0x492   :  { %v9937_v1 = vpack.c.bf16 %v8210_v58, %v8210_v58 }
 0x493   :  { %v9936_v43 = vpack.c.bf16 %v8209_v19, %v8209_v19 }
 0x494   :  { %9677 = vst.msk [vmem:[%s15614_s4 + $0x40c] sm:$0x3] %vm2146_vm2, %v9937_v1 }
 0x495   :  { %9676 = vst.msk [vmem:[%s15614_s4 + $0x408] sm:$0xf] %vm2081_vm1, %v9936_v43 }

</bundles_post_ra>
